<compile_context>
chip_gen: v7x
topology: tpu7x:2x2x1
jax: 0.10.0
libtpu: 0.0.40
codegen_flags: <defaults>
</compile_context>

<pallas_src>
import functools
import math

import jax
import jax.numpy as jnp
from jax import lax
from jax.experimental import pallas as pl
from jax.experimental.pallas import tpu as pltpu

# ----------------------------- model hyper-params -----------------------------
D = 128            # vision width ("768" in the original module, scaled down)
HEADS = 4
HEAD_DIM = D // HEADS
LAYERS = 2         # transformer / generator depth
MLP = 4 * D
PATCH = 8
IMG = 32
CHANNELS = 3
N_PATCHES = (IMG // PATCH) ** 2          # 16
PATCH_DIM = CHANNELS * PATCH * PATCH     # 192
OUT_DIM = 64       # feature_proj output dim
OUT_PAD = 128      # feature_proj output padded to a full lane tile (lane-dense store)
N_DOMS = 3         # len(dict_doms)
N_CLSS = 5         # len(dict_clss)
P_PAD = 8          # prompt rows padded to a full sublane tile
TEMP_DOM = 2.0     # cfg.ratio_soft_dom
TEMP_CLS = 2.0     # cfg.ratio_soft_cls
RATIO_PROMPT = 4.0 # cfg.ratio_prompt
LN_EPS = 1e-5
ATTN_SCALE = 1.0 / math.sqrt(HEAD_DIM)

S_GEN = N_PATCHES                        # 16, already sublane-aligned
S_VALID = 3 + N_PATCHES                  # 19 valid tokens in the stage-4 sequence
S_PAD = 24                               # padded to a multiple of 8 sublanes
NEG_INF = -1e30

STACK_KEYS = ("ln1_g", "ln1_b", "w_qkv", "b_qkv", "w_o", "b_o",
              "ln2_g", "ln2_b", "w_fc", "b_fc", "w_proj", "b_proj")
N_STACK = len(STACK_KEYS)


# ------------------------------ in-kernel helpers ------------------------------
def _ln(x, g, b, eps=LN_EPS):
    """LayerNorm over the last dim. x: (M, D); g, b: (1, D)."""
    mu = jnp.mean(x, axis=-1, keepdims=True)
    var = jnp.mean(jnp.square(x - mu), axis=-1, keepdims=True)
    return (x - mu) * lax.rsqrt(var + eps) * g + b


def _residual_blocks(x, r, *, b_tile, seq, s_valid):
    """CLIP ResidualAttentionBlock stack on a batch-folded (b_tile*seq, D) slab.

    All dense matmuls (QKV, W_o, MLP) run on the stacked rows of the whole batch tile;
    attention scores / softmax / PV are batched over samples per head.
    """
    M = b_tile * seq
    neg_bias = None
    if s_valid < seq:   # padded keys must not receive attention weight (computed ONCE)
        neg_bias = jnp.where(
            lax.broadcasted_iota(jnp.int32, (1, 1, seq), 2) >= s_valid, NEG_INF, 0.0)

    for l in range(LAYERS):
        # ---- attention sub-block: LN1 + fused QKV + per-head softmax + single W_o + residual
        h = _ln(x, r["ln1_g"][l], r["ln1_b"][l])
        qkv = jnp.dot(h, r["w_qkv"][l], preferred_element_type=jnp.float32) + r["b_qkv"][l]

        heads_out = []
        for hd_i in range(HEADS):                       # static unroll; heads live in the lane dim
            lo = hd_i * HEAD_DIM
            q = qkv[:, lo:lo + HEAD_DIM].reshape(b_tile, seq, HEAD_DIM)
            k = qkv[:, D + lo:D + lo + HEAD_DIM].reshape(b_tile, seq, HEAD_DIM)
            v = qkv[:, 2 * D + lo:2 * D + lo + HEAD_DIM].reshape(b_tile, seq, HEAD_DIM)
            s = jnp.einsum('bqd,bkd->bqk', q, k,
                           preferred_element_type=jnp.float32) * ATTN_SCALE
            if neg_bias is not None:
                s = s + neg_bias
            m = jnp.max(s, axis=-1, keepdims=True)
            p = jnp.exp(s - m)
            o = jnp.einsum('bqk,bkd->bqd', p, v, preferred_element_type=jnp.float32)
            o = o / jnp.sum(p, axis=-1, keepdims=True)  # exact softmax normalization
            heads_out.append(o)

        # concat(heads) along lanes -> ONE full-depth (M,128)x(128,128) output projection
        attn = jnp.concatenate(heads_out, axis=-1).reshape(M, D)
        attn = jnp.dot(attn, r["w_o"][l], preferred_element_type=jnp.float32) + r["b_o"][l]
        x = x + attn

        # ---- MLP sub-block: LN2 + FC + QuickGELU + proj + residual (batch-folded rows)
        h = _ln(x, r["ln2_g"][l], r["ln2_b"][l])
        h = jnp.dot(h, r["w_fc"][l], preferred_element_type=jnp.float32) + r["b_fc"][l]
        h = h * jax.nn.sigmoid(1.702 * h)               # CLIP QuickGELU
        h = jnp.dot(h, r["w_proj"][l], preferred_element_type=jnp.float32) + r["b_proj"][l]
        x = x + h
    return x


# ------------------------------- fused Pallas kernel ----------------------------
def _stage4_kernel(*refs, b_tile):
    """Entire stage-4 forward for one batch tile of b_tile samples."""
    (x_ref, conv_w, pos_patch, cls_row,
     ln_pre_g, ln_pre_b, ln_post_g, ln_post_b) = refs[0:8]
    gen = dict(zip(STACK_KEYS, refs[8:8 + N_STACK]))
    trf = dict(zip(STACK_KEYS, refs[8 + N_STACK:8 + 2 * N_STACK]))
    (wi_w, wi_b, wp_w, wp_b, pj_w, pj_b, ln2p_g, ln2p_b,
     domp, clsp, feat_proj) = refs[8 + 2 * N_STACK:8 + 2 * N_STACK + 11]
    o_ref, seq_ref = refs[8 + 2 * N_STACK + 11:]

    # ---- conv1 patch embedding (stride == kernel, bias=False) as one stacked matmul + pos[1:]
    xp = x_ref[...].reshape(b_tile * N_PATCHES, PATCH_DIM)
    patches = jnp.dot(xp, conv_w[...], preferred_element_type=jnp.float32)
    patches = patches.reshape(b_tile, N_PATCHES, D) + pos_patch[...][None]       # (bt, 16, D)

    # ---- stage-2 pass: generator stack, ln_post on token 0 -> (bt, D)
    g_in = _ln(patches.reshape(b_tile * N_PATCHES, D), ln_pre_g[...], ln_pre_b[...])
    g_out = _residual_blocks(g_in, gen, b_tile=b_tile, seq=S_GEN, s_valid=S_GEN)
    tok0 = g_out.reshape(b_tile, S_GEN, D)[:, 0:1, :].reshape(b_tile, D)
    img_tok = _ln(tok0, ln_post_g[...], ln_post_b[...])

    # ---- fused ImagePromptAttention_dom / _cls (num_heads == 1), batch-folded; already / ratio
    img_p = jnp.dot(img_tok, wi_w[...], preferred_element_type=jnp.float32) + wi_b[...]

    def prompt_pool(prompts_pad_ref, n_valid, inv_t):
        pr = (jnp.dot(prompts_pad_ref[...], wp_w[...], preferred_element_type=jnp.float32)
              + wp_b[...])                                                        # (P_PAD, D)
        s = lax.dot_general(img_p, pr, (((1,), (1,)), ((), ())),
                            preferred_element_type=jnp.float32) * inv_t          # (bt, P_PAD)
        valid = lax.broadcasted_iota(jnp.int32, (1, P_PAD), 1) < n_valid
        s = jnp.where(valid, s, NEG_INF)                                          # mask pad rows
        m = jnp.max(s, axis=-1, keepdims=True)
        w = jnp.exp(s - m)
        w = w / jnp.sum(w, axis=-1, keepdims=True)                                # exact softmax
        combined = jnp.dot(w, pr, preferred_element_type=jnp.float32)             # (bt, D)
        proj = jnp.dot(combined, pj_w[...], preferred_element_type=jnp.float32) + pj_b[...]
        return (combined + _ln(proj, ln2p_g[...], ln2p_b[...])) * (1.0 / RATIO_PROMPT)

    dom_p = prompt_pool(domp, N_DOMS, 1.0 / TEMP_DOM)
    cls_p = prompt_pool(clsp, N_CLSS, 1.0 / TEMP_CLS)

    # ---- assemble the stage-4 sequence in a VMEM scratch: [cls, dom, cls, patches, zero-pad]
    seq_ref[:, 0:1, :] = jnp.broadcast_to(cls_row[...].reshape(1, 1, D), (b_tile, 1, D))
    seq_ref[:, 1:2, :] = dom_p.reshape(b_tile, 1, D)
    seq_ref[:, 2:3, :] = cls_p.reshape(b_tile, 1, D)
    seq_ref[:, 3:3 + N_PATCHES, :] = patches
    seq_ref[:, S_VALID:, :] = jnp.zeros((b_tile, S_PAD - S_VALID, D), jnp.float32)

    # ---- transformer stack (padded keys masked), ln_post on token 1, feature_proj (padded)
    t_in = _ln(seq_ref[...].reshape(b_tile * S_PAD, D), ln_pre_g[...], ln_pre_b[...])
    t_out = _residual_blocks(t_in, trf, b_tile=b_tile, seq=S_PAD, s_valid=S_VALID)
    tok1 = t_out.reshape(b_tile, S_PAD, D)[:, 1:2, :].reshape(b_tile, D)
    feat = _ln(tok1, ln_post_g[...], ln_post_b[...])
    out = jnp.dot(feat, feat_proj[...], preferred_element_type=jnp.float32)       # (bt, 128)
    o_ref[...] = out.reshape(b_tile, 1, OUT_PAD)


# ------------------------------- kernel wrapper ----------------------------------
def _const_spec(a):
    """Full-array block, block index pinned to 0 -> fetched once, stays VMEM-resident.

    Total weights are ~3.6 MB f32, so the default double-buffering costs ~3.6 MB more —
    negligible vs 64/128 MiB VMEM.  If the model is scaled to real CLIP size (D=768, L=12),
    switch to per-layer weight streaming (pltpu.emit_pipeline), bf16 weight storage (v5e
    bandwidth), and `pipeline_mode=pl.Buffered(1)` on these constant specs.
    """
    zeros = (0,) * a.ndim
    return pl.BlockSpec(a.shape, lambda b, _z=zeros: _z)


def _pick_b_tile(B):
    """Batch-fold up to 8 samples per grid step, but keep >= 2 grid steps (v7x: 2 TensorCores)."""
    if B <= 1:
        return 1
    return max(1, min(8, B // 2))


def forward(params, image, dom_id, cls_id, stage=4):
    """Reproduces image_encoder.forward for stage == 4 (no dropout on this path)."""
    assert stage == 4
    del dom_id, cls_id   # unused on the stage-4 path, exactly as in the torch module
    B = image.shape[0]
    b_tile = _pick_b_tile(B)
    n_tiles = -(-B // b_tile)
    B_pad = n_tiles * b_tile

    # NCHW -> (B, Np, C*p*p): the single tiny XLA rearrangement feeding the fused kernel.
    x = image.reshape(B, CHANNELS, IMG // PATCH, PATCH, IMG // PATCH, PATCH)
    x = x.transpose(0, 2, 4, 1, 3, 5).reshape(B, N_PATCHES, PATCH_DIM)
    if B_pad != B:
        x = jnp.concatenate(
            [x, jnp.zeros((B_pad - B, N_PATCHES, PATCH_DIM), x.dtype)], axis=0)

    # class token row = feature_template + positional_embedding[0]  (one (128,) add)
    cls_row = (params["feature_template"] + params["pos_cls"]).reshape(1, D)

    inputs = [x, params["conv1_w_flat"], params["pos_patch"], cls_row,
              params["ln_pre_g"], params["ln_pre_b"],
              params["ln_post_g"], params["ln_post_b"]]
    inputs += [params["generator"][k] for k in STACK_KEYS]
    inputs += [params["transformer"][k] for k in STACK_KEYS]
    inputs += [params["W_image_w"], params["W_image_b"],
               params["W_prompt_w"], params["W_prompt_b"],
               params["prompt_proj_w"], params["prompt_proj_b"],
               params["ln2_g"], params["ln2_b"],
               params["spec_dom_prompts_pad"], params["spec_cls_prompts_pad"],
               params["feature_proj_pad"]]

    in_specs = ([pl.BlockSpec((b_tile, N_PATCHES, PATCH_DIM), lambda b: (b, 0, 0))]
                + [_const_spec(a) for a in inputs[1:]])

    out = pl.pallas_call(
        functools.partial(_stage4_kernel, b_tile=b_tile),
        grid=(n_tiles,),
        out_shape=jax.ShapeDtypeStruct((B_pad, 1, OUT_PAD), jnp.float32),
        in_specs=in_specs,
        out_specs=pl.BlockSpec((b_tile, 1, OUT_PAD), lambda b: (b, 0, 0)),
        scratch_shapes=[pltpu.VMEM((b_tile, S_PAD, D), jnp.float32)],
        compiler_params=pltpu.CompilerParams(dimension_semantics=("parallel",)),
    )(*inputs)

    # slice away batch padding and the lane padding of feature_proj
    return out[:B, 0, :OUT_DIM]

    # TODO(synk): stage-1 per-sample prompt gather and stage-3 masked_fill path are not
    # exercised by the stage-4 forward and are not implemented here.


# ------------------------------ deterministic init ------------------------------
def init_params(key):
    keys = iter(jax.random.split(key, 64))

    def nrm(shape, scale=0.02):
        return (scale * jax.random.normal(next(keys), shape)).astype(jnp.float32)

    def stacked_blocks():
        # per-layer weights stacked along a leading L axis so the fused kernel owns the stack
        return dict(
            ln1_g=jnp.ones((LAYERS, 1, D), jnp.float32),
            ln1_b=jnp.zeros((LAYERS, 1, D), jnp.float32),
            w_qkv=nrm((LAYERS, D, 3 * D)),
            b_qkv=jnp.zeros((LAYERS, 1, 3 * D), jnp.float32),
            w_o=nrm((LAYERS, D, D)),
            b_o=jnp.zeros((LAYERS, 1, D), jnp.float32),
            ln2_g=jnp.ones((LAYERS, 1, D), jnp.float32),
            ln2_b=jnp.zeros((LAYERS, 1, D), jnp.float32),
            w_fc=nrm((LAYERS, D, MLP)),
            b_fc=jnp.zeros((LAYERS, 1, MLP), jnp.float32),
            w_proj=nrm((LAYERS, MLP, D)),
            b_proj=jnp.zeros((LAYERS, 1, D), jnp.float32),
        )

    transformer = stacked_blocks()
    # generator = copy.deepcopy(transformer): identical values at init
    generator = jax.tree_util.tree_map(lambda a: a, transformer)

    conv_w = nrm((D, CHANNELS, PATCH, PATCH))
    pos = nrm((1 + N_PATCHES, D))
    dom_prompts = nrm((N_DOMS, D), 0.1)
    cls_prompts = nrm((N_CLSS, D), 0.1)
    feature_proj = nrm((D, OUT_DIM))

    return dict(
        conv1_w_flat=conv_w.reshape(D, -1).T,          # (C*p*p, D); CLIP conv1 has bias=False
        feature_template=nrm((D,)),
        pos_cls=pos[0],
        pos_patch=pos[1:],
        # feature_proj columns padded 64 -> 128 so the final store is a lane-dense vst
        # (the wrapper slices the output back to OUT_DIM).
        feature_proj_pad=jnp.zeros((D, OUT_PAD), jnp.float32).at[:, :OUT_DIM].set(feature_proj),
        ln_pre_g=jnp.ones((1, D), jnp.float32), ln_pre_b=jnp.zeros((1, D), jnp.float32),
        ln_post_g=jnp.ones((1, D), jnp.float32), ln_post_b=jnp.zeros((1, D), jnp.float32),
        transformer=transformer,
        generator=generator,
        W_image_w=nrm((D, D)), W_image_b=jnp.zeros((1, D), jnp.float32),
        W_prompt_w=nrm((D, D)), W_prompt_b=jnp.zeros((1, D), jnp.float32),
        prompt_proj_w=nrm((D, D)), prompt_proj_b=jnp.zeros((1, D), jnp.float32),
        ln2_g=jnp.ones((1, D), jnp.float32), ln2_b=jnp.zeros((1, D), jnp.float32),
        # sp_{dom,cls}_prompt_proj are nn.Identity (DOM_PROJECT = CLS_PROJECT = -1).
        # Prompts are pre-padded to a full 8-row sublane tile; pad rows masked in-kernel.
        spec_dom_prompts_pad=jnp.zeros((P_PAD, D), jnp.float32).at[:N_DOMS].set(dom_prompts),
        spec_cls_prompts_pad=jnp.zeros((P_PAD, D), jnp.float32).at[:N_CLSS].set(cls_prompts),
    )


if __name__ == "__main__":
    key = jax.random.PRNGKey(0)
    params = init_params(key)

    # NCHW image input, matching the PyTorch conv1 convention.
    image = jax.random.normal(jax.random.fold_in(key, 123),
                              (2, CHANNELS, IMG, IMG), jnp.float32)
    dom_id = jnp.array([0, 1], jnp.int32)   # unused in the stage-4 path (as in torch)
    cls_id = jnp.array([2, 4], jnp.int32)

    fwd = jax.jit(functools.partial(forward, stage=4))
    out = fwd(params, image, dom_id, cls_id)
    out = jax.block_until_ready(out)
    assert out.shape == (2, OUT_DIM), out.shape
    assert bool(jnp.all(jnp.isfinite(out)))
    print("KERNEL_OK")
</pallas_src>

<mosaic_0001>
module attributes {stable_mosaic.version = 11 : i64} {
  func.func @_stage4_kernel(%arg0: i32, %arg1: memref<1x16x192xf32, #tpu.memory_space<vmem>>, %arg2: memref<192x128xf32, #tpu.memory_space<vmem>>, %arg3: memref<16x128xf32, #tpu.memory_space<vmem>>, %arg4: memref<1x128xf32, #tpu.memory_space<vmem>>, %arg5: memref<1x128xf32, #tpu.memory_space<vmem>>, %arg6: memref<1x128xf32, #tpu.memory_space<vmem>>, %arg7: memref<1x128xf32, #tpu.memory_space<vmem>>, %arg8: memref<1x128xf32, #tpu.memory_space<vmem>>, %arg9: memref<2x1x128xf32, #tpu.memory_space<vmem>>, %arg10: memref<2x1x128xf32, #tpu.memory_space<vmem>>, %arg11: memref<2x128x384xf32, #tpu.memory_space<vmem>>, %arg12: memref<2x1x384xf32, #tpu.memory_space<vmem>>, %arg13: memref<2x128x128xf32, #tpu.memory_space<vmem>>, %arg14: memref<2x1x128xf32, #tpu.memory_space<vmem>>, %arg15: memref<2x1x128xf32, #tpu.memory_space<vmem>>, %arg16: memref<2x1x128xf32, #tpu.memory_space<vmem>>, %arg17: memref<2x128x512xf32, #tpu.memory_space<vmem>>, %arg18: memref<2x1x512xf32, #tpu.memory_space<vmem>>, %arg19: memref<2x512x128xf32, #tpu.memory_space<vmem>>, %arg20: memref<2x1x128xf32, #tpu.memory_space<vmem>>, %arg21: memref<2x1x128xf32, #tpu.memory_space<vmem>>, %arg22: memref<2x1x128xf32, #tpu.memory_space<vmem>>, %arg23: memref<2x128x384xf32, #tpu.memory_space<vmem>>, %arg24: memref<2x1x384xf32, #tpu.memory_space<vmem>>, %arg25: memref<2x128x128xf32, #tpu.memory_space<vmem>>, %arg26: memref<2x1x128xf32, #tpu.memory_space<vmem>>, %arg27: memref<2x1x128xf32, #tpu.memory_space<vmem>>, %arg28: memref<2x1x128xf32, #tpu.memory_space<vmem>>, %arg29: memref<2x128x512xf32, #tpu.memory_space<vmem>>, %arg30: memref<2x1x512xf32, #tpu.memory_space<vmem>>, %arg31: memref<2x512x128xf32, #tpu.memory_space<vmem>>, %arg32: memref<2x1x128xf32, #tpu.memory_space<vmem>>, %arg33: memref<128x128xf32, #tpu.memory_space<vmem>>, %arg34: memref<1x128xf32, #tpu.memory_space<vmem>>, %arg35: memref<128x128xf32, #tpu.memory_space<vmem>>, %arg36: memref<1x128xf32, #tpu.memory_space<vmem>>, %arg37: memref<128x128xf32, #tpu.memory_space<vmem>>, %arg38: memref<1x128xf32, #tpu.memory_space<vmem>>, %arg39: memref<1x128xf32, #tpu.memory_space<vmem>>, %arg40: memref<1x128xf32, #tpu.memory_space<vmem>>, %arg41: memref<8x128xf32, #tpu.memory_space<vmem>>, %arg42: memref<8x128xf32, #tpu.memory_space<vmem>>, %arg43: memref<128x128xf32, #tpu.memory_space<vmem>>, %arg44: memref<1x1x128xf32, #tpu.memory_space<vmem>>, %arg45: memref<1x24x128xf32, #tpu.memory_space<vmem>>) attributes {dimension_semantics = [#tpu.dimension_semantics<parallel>], iteration_bounds = array<i64: 2>, scalar_prefetch = 0 : i64, scratch_operands = 1 : i64, tpu.core_type = #tpu.core_type<tc>, window_params = [{transform_indices = @transform_0, window_bounds = array<i64: 1, 16, 192>}, {pipeline_mode = #tpu.pipeline_mode<synchronous>, transform_indices = @transform_1, window_bounds = array<i64: 192, 128>}, {pipeline_mode = #tpu.pipeline_mode<synchronous>, transform_indices = @transform_2, window_bounds = array<i64: 16, 128>}, {pipeline_mode = #tpu.pipeline_mode<synchronous>, transform_indices = @transform_3, window_bounds = array<i64: 1, 128>}, {pipeline_mode = #tpu.pipeline_mode<synchronous>, transform_indices = @transform_4, window_bounds = array<i64: 1, 128>}, {pipeline_mode = #tpu.pipeline_mode<synchronous>, transform_indices = @transform_5, window_bounds = array<i64: 1, 128>}, {pipeline_mode = #tpu.pipeline_mode<synchronous>, transform_indices = @transform_6, window_bounds = array<i64: 1, 128>}, {pipeline_mode = #tpu.pipeline_mode<synchronous>, transform_indices = @transform_7, window_bounds = array<i64: 1, 128>}, {pipeline_mode = #tpu.pipeline_mode<synchronous>, transform_indices = @transform_8, window_bounds = array<i64: 2, 1, 128>}, {pipeline_mode = #tpu.pipeline_mode<synchronous>, transform_indices = @transform_9, window_bounds = array<i64: 2, 1, 128>}, {pipeline_mode = #tpu.pipeline_mode<synchronous>, transform_indices = @transform_10, window_bounds = array<i64: 2, 128, 384>}, {pipeline_mode = #tpu.pipeline_mode<synchronous>, transform_indices = @transform_11, window_bounds = array<i64: 2, 1, 384>}, {pipeline_mode = #tpu.pipeline_mode<synchronous>, transform_indices = @transform_12, window_bounds = array<i64: 2, 128, 128>}, {pipeline_mode = #tpu.pipeline_mode<synchronous>, transform_indices = @transform_13, window_bounds = array<i64: 2, 1, 128>}, {pipeline_mode = #tpu.pipeline_mode<synchronous>, transform_indices = @transform_14, window_bounds = array<i64: 2, 1, 128>}, {pipeline_mode = #tpu.pipeline_mode<synchronous>, transform_indices = @transform_15, window_bounds = array<i64: 2, 1, 128>}, {pipeline_mode = #tpu.pipeline_mode<synchronous>, transform_indices = @transform_16, window_bounds = array<i64: 2, 128, 512>}, {pipeline_mode = #tpu.pipeline_mode<synchronous>, transform_indices = @transform_17, window_bounds = array<i64: 2, 1, 512>}, {pipeline_mode = #tpu.pipeline_mode<synchronous>, transform_indices = @transform_18, window_bounds = array<i64: 2, 512, 128>}, {pipeline_mode = #tpu.pipeline_mode<synchronous>, transform_indices = @transform_19, window_bounds = array<i64: 2, 1, 128>}, {pipeline_mode = #tpu.pipeline_mode<synchronous>, transform_indices = @transform_20, window_bounds = array<i64: 2, 1, 128>}, {pipeline_mode = #tpu.pipeline_mode<synchronous>, transform_indices = @transform_21, window_bounds = array<i64: 2, 1, 128>}, {pipeline_mode = #tpu.pipeline_mode<synchronous>, transform_indices = @transform_22, window_bounds = array<i64: 2, 128, 384>}, {pipeline_mode = #tpu.pipeline_mode<synchronous>, transform_indices = @transform_23, window_bounds = array<i64: 2, 1, 384>}, {pipeline_mode = #tpu.pipeline_mode<synchronous>, transform_indices = @transform_24, window_bounds = array<i64: 2, 128, 128>}, {pipeline_mode = #tpu.pipeline_mode<synchronous>, transform_indices = @transform_25, window_bounds = array<i64: 2, 1, 128>}, {pipeline_mode = #tpu.pipeline_mode<synchronous>, transform_indices = @transform_26, window_bounds = array<i64: 2, 1, 128>}, {pipeline_mode = #tpu.pipeline_mode<synchronous>, transform_indices = @transform_27, window_bounds = array<i64: 2, 1, 128>}, {pipeline_mode = #tpu.pipeline_mode<synchronous>, transform_indices = @transform_28, window_bounds = array<i64: 2, 128, 512>}, {pipeline_mode = #tpu.pipeline_mode<synchronous>, transform_indices = @transform_29, window_bounds = array<i64: 2, 1, 512>}, {pipeline_mode = #tpu.pipeline_mode<synchronous>, transform_indices = @transform_30, window_bounds = array<i64: 2, 512, 128>}, {pipeline_mode = #tpu.pipeline_mode<synchronous>, transform_indices = @transform_31, window_bounds = array<i64: 2, 1, 128>}, {pipeline_mode = #tpu.pipeline_mode<synchronous>, transform_indices = @transform_32, window_bounds = array<i64: 128, 128>}, {pipeline_mode = #tpu.pipeline_mode<synchronous>, transform_indices = @transform_33, window_bounds = array<i64: 1, 128>}, {pipeline_mode = #tpu.pipeline_mode<synchronous>, transform_indices = @transform_34, window_bounds = array<i64: 128, 128>}, {pipeline_mode = #tpu.pipeline_mode<synchronous>, transform_indices = @transform_35, window_bounds = array<i64: 1, 128>}, {pipeline_mode = #tpu.pipeline_mode<synchronous>, transform_indices = @transform_36, window_bounds = array<i64: 128, 128>}, {pipeline_mode = #tpu.pipeline_mode<synchronous>, transform_indices = @transform_37, window_bounds = array<i64: 1, 128>}, {pipeline_mode = #tpu.pipeline_mode<synchronous>, transform_indices = @transform_38, window_bounds = array<i64: 1, 128>}, {pipeline_mode = #tpu.pipeline_mode<synchronous>, transform_indices = @transform_39, window_bounds = array<i64: 1, 128>}, {pipeline_mode = #tpu.pipeline_mode<synchronous>, transform_indices = @transform_40, window_bounds = array<i64: 8, 128>}, {pipeline_mode = #tpu.pipeline_mode<synchronous>, transform_indices = @transform_41, window_bounds = array<i64: 8, 128>}, {pipeline_mode = #tpu.pipeline_mode<synchronous>, transform_indices = @transform_42, window_bounds = array<i64: 128, 128>}, {transform_indices = @transform_43, window_bounds = array<i64: 1, 1, 128>}]} {
    %c0 = arith.constant 0 : index
    %c0_0 = arith.constant 0 : index
    %c0_1 = arith.constant 0 : index
    %0 = vector.load %arg1[%c0, %c0_0, %c0_1] : memref<1x16x192xf32, #tpu.memory_space<vmem>>, vector<1x16x192xf32>
    %1 = vector.shape_cast %0 : vector<1x16x192xf32> to vector<16x192xf32>
    %c0_2 = arith.constant 0 : index
    %c0_3 = arith.constant 0 : index
    %2 = vector.load %arg2[%c0_2, %c0_3] : memref<192x128xf32, #tpu.memory_space<vmem>>, vector<192x128xf32>
    %cst = arith.constant dense<0.000000e+00> : vector<16x128xf32>
    %3 = tpu.matmul %1, %2, %cst {dimension_numbers = #tpu.dot_dimension_numbers<[1], [0], [0], [1], [0, 0, 1, 1], [], []>} : vector<16x192xf32>, vector<192x128xf32>, vector<16x128xf32> -> vector<16x128xf32>
    %4 = vector.shape_cast %3 : vector<16x128xf32> to vector<1x16x128xf32>
    %c0_4 = arith.constant 0 : index
    %c0_5 = arith.constant 0 : index
    %5 = vector.load %arg3[%c0_4, %c0_5] : memref<16x128xf32, #tpu.memory_space<vmem>>, vector<16x128xf32>
    %6 = vector.shape_cast %5 : vector<16x128xf32> to vector<1x16x128xf32>
    %7 = arith.addf %4, %6 : vector<1x16x128xf32>
    %8 = vector.shape_cast %7 : vector<1x16x128xf32> to vector<16x128xf32>
    %c0_6 = arith.constant 0 : index
    %c0_7 = arith.constant 0 : index
    %9 = vector.load %arg5[%c0_6, %c0_7] : memref<1x128xf32, #tpu.memory_space<vmem>>, vector<1x128xf32>
    %c0_8 = arith.constant 0 : index
    %c0_9 = arith.constant 0 : index
    %10 = vector.load %arg6[%c0_8, %c0_9] : memref<1x128xf32, #tpu.memory_space<vmem>>, vector<1x128xf32>
    %cst_10 = arith.constant dense<0.000000e+00> : vector<16xf32>
    %11 = vector.multi_reduction <add>, %8, %cst_10 [1] : vector<16x128xf32> to vector<16xf32>
    %12 = vector.shape_cast %11 : vector<16xf32> to vector<16x1xf32>
    %cst_11 = arith.constant 1.280000e+02 : f32
    %13 = vector.broadcast %cst_11 : f32 to vector<16x1xf32>
    %14 = arith.divf %12, %13 : vector<16x1xf32>
    %15 = vector.broadcast %14 : vector<16x1xf32> to vector<16x128xf32>
    %16 = arith.subf %8, %15 : vector<16x128xf32>
    %17 = arith.mulf %16, %16 : vector<16x128xf32>
    %cst_12 = arith.constant dense<0.000000e+00> : vector<16xf32>
    %18 = vector.multi_reduction <add>, %17, %cst_12 [1] : vector<16x128xf32> to vector<16xf32>
    %19 = vector.shape_cast %18 : vector<16xf32> to vector<16x1xf32>
    %cst_13 = arith.constant 1.280000e+02 : f32
    %20 = vector.broadcast %cst_13 : f32 to vector<16x1xf32>
    %21 = arith.divf %19, %20 : vector<16x1xf32>
    %22 = vector.broadcast %14 : vector<16x1xf32> to vector<16x128xf32>
    %23 = arith.subf %8, %22 : vector<16x128xf32>
    %cst_14 = arith.constant 9.99999974E-6 : f32
    %24 = vector.broadcast %cst_14 : f32 to vector<16x1xf32>
    %25 = arith.addf %21, %24 : vector<16x1xf32>
    %26 = math.rsqrt %25 : vector<16x1xf32>
    %27 = vector.broadcast %26 : vector<16x1xf32> to vector<16x128xf32>
    %28 = arith.mulf %23, %27 : vector<16x128xf32>
    %29 = vector.broadcast %9 : vector<1x128xf32> to vector<16x128xf32>
    %30 = arith.mulf %28, %29 : vector<16x128xf32>
    %31 = vector.broadcast %10 : vector<1x128xf32> to vector<16x128xf32>
    %32 = arith.addf %30, %31 : vector<16x128xf32>
    %c0_15 = arith.constant 0 : index
    %c0_16 = arith.constant 0 : index
    %c0_17 = arith.constant 0 : index
    %33 = vector.load %arg9[%c0_15, %c0_16, %c0_17] : memref<2x1x128xf32, #tpu.memory_space<vmem>>, vector<1x1x128xf32>
    %34 = vector.shape_cast %33 : vector<1x1x128xf32> to vector<1x128xf32>
    %c0_18 = arith.constant 0 : index
    %c0_19 = arith.constant 0 : index
    %c0_20 = arith.constant 0 : index
    %35 = vector.load %arg10[%c0_18, %c0_19, %c0_20] : memref<2x1x128xf32, #tpu.memory_space<vmem>>, vector<1x1x128xf32>
    %36 = vector.shape_cast %35 : vector<1x1x128xf32> to vector<1x128xf32>
    %cst_21 = arith.constant dense<0.000000e+00> : vector<16xf32>
    %37 = vector.multi_reduction <add>, %32, %cst_21 [1] : vector<16x128xf32> to vector<16xf32>
    %38 = vector.shape_cast %37 : vector<16xf32> to vector<16x1xf32>
    %cst_22 = arith.constant 1.280000e+02 : f32
    %39 = vector.broadcast %cst_22 : f32 to vector<16x1xf32>
    %40 = arith.divf %38, %39 : vector<16x1xf32>
    %41 = vector.broadcast %40 : vector<16x1xf32> to vector<16x128xf32>
    %42 = arith.subf %32, %41 : vector<16x128xf32>
    %43 = arith.mulf %42, %42 : vector<16x128xf32>
    %cst_23 = arith.constant dense<0.000000e+00> : vector<16xf32>
    %44 = vector.multi_reduction <add>, %43, %cst_23 [1] : vector<16x128xf32> to vector<16xf32>
    %45 = vector.shape_cast %44 : vector<16xf32> to vector<16x1xf32>
    %cst_24 = arith.constant 1.280000e+02 : f32
    %46 = vector.broadcast %cst_24 : f32 to vector<16x1xf32>
    %47 = arith.divf %45, %46 : vector<16x1xf32>
    %48 = vector.broadcast %40 : vector<16x1xf32> to vector<16x128xf32>
    %49 = arith.subf %32, %48 : vector<16x128xf32>
    %cst_25 = arith.constant 9.99999974E-6 : f32
    %50 = vector.broadcast %cst_25 : f32 to vector<16x1xf32>
    %51 = arith.addf %47, %50 : vector<16x1xf32>
    %52 = math.rsqrt %51 : vector<16x1xf32>
    %53 = vector.broadcast %52 : vector<16x1xf32> to vector<16x128xf32>
    %54 = arith.mulf %49, %53 : vector<16x128xf32>
    %55 = vector.broadcast %34 : vector<1x128xf32> to vector<16x128xf32>
    %56 = arith.mulf %54, %55 : vector<16x128xf32>
    %57 = vector.broadcast %36 : vector<1x128xf32> to vector<16x128xf32>
    %58 = arith.addf %56, %57 : vector<16x128xf32>
    %c0_26 = arith.constant 0 : index
    %c0_27 = arith.constant 0 : index
    %c0_28 = arith.constant 0 : index
    %59 = vector.load %arg11[%c0_26, %c0_27, %c0_28] : memref<2x128x384xf32, #tpu.memory_space<vmem>>, vector<1x128x384xf32>
    %60 = vector.shape_cast %59 : vector<1x128x384xf32> to vector<128x384xf32>
    %cst_29 = arith.constant dense<0.000000e+00> : vector<16x384xf32>
    %61 = tpu.matmul %58, %60, %cst_29 {dimension_numbers = #tpu.dot_dimension_numbers<[1], [0], [0], [1], [0, 0, 1, 1], [], []>} : vector<16x128xf32>, vector<128x384xf32>, vector<16x384xf32> -> vector<16x384xf32>
    %c0_30 = arith.constant 0 : index
    %c0_31 = arith.constant 0 : index
    %c0_32 = arith.constant 0 : index
    %62 = vector.load %arg12[%c0_30, %c0_31, %c0_32] : memref<2x1x384xf32, #tpu.memory_space<vmem>>, vector<1x1x384xf32>
    %63 = vector.shape_cast %62 : vector<1x1x384xf32> to vector<1x384xf32>
    %64 = vector.broadcast %63 : vector<1x384xf32> to vector<16x384xf32>
    %65 = arith.addf %61, %64 : vector<16x384xf32>
    %66 = vector.extract_strided_slice %65 {offsets = [0, 0], sizes = [16, 32], strides = [1, 1]} : vector<16x384xf32> to vector<16x32xf32>
    %67 = vector.shape_cast %66 : vector<16x32xf32> to vector<1x16x32xf32>
    %68 = vector.extract_strided_slice %65 {offsets = [0, 128], sizes = [16, 32], strides = [1, 1]} : vector<16x384xf32> to vector<16x32xf32>
    %69 = vector.shape_cast %68 : vector<16x32xf32> to vector<1x16x32xf32>
    %70 = vector.extract_strided_slice %65 {offsets = [0, 256], sizes = [16, 32], strides = [1, 1]} : vector<16x384xf32> to vector<16x32xf32>
    %71 = vector.shape_cast %70 : vector<16x32xf32> to vector<1x16x32xf32>
    "tpu.trace_start"() <{level = 10 : i32, message = "bqd,bkd->bqk"}> : () -> ()
    %cst_33 = arith.constant dense<0.000000e+00> : vector<1x16x16xf32>
    %72 = tpu.matmul %67, %69, %cst_33 {dimension_numbers = #tpu.dot_dimension_numbers<[2], [2], [1], [1], [0, 0, 0, 1, 1, 1], [0], [0]>} : vector<1x16x32xf32>, vector<1x16x32xf32>, vector<1x16x16xf32> -> vector<1x16x16xf32>
    "tpu.trace_stop"() : () -> ()
    %cst_34 = arith.constant 0.176776692 : f32
    %73 = vector.broadcast %cst_34 : f32 to vector<1x16x16xf32>
    %74 = arith.mulf %72, %73 : vector<1x16x16xf32>
    %cst_35 = arith.constant dense<0xFF800000> : vector<1x16xf32>
    %75 = vector.multi_reduction <maximumf>, %74, %cst_35 [2] : vector<1x16x16xf32> to vector<1x16xf32>
    %76 = vector.shape_cast %75 : vector<1x16xf32> to vector<1x16x1xf32>
    %77 = vector.broadcast %76 : vector<1x16x1xf32> to vector<1x16x16xf32>
    %78 = arith.subf %74, %77 : vector<1x16x16xf32>
    %79 = math.exp %78 : vector<1x16x16xf32>
    "tpu.trace_start"() <{level = 10 : i32, message = "bqk,bkd->bqd"}> : () -> ()
    %cst_36 = arith.constant dense<0.000000e+00> : vector<1x16x32xf32>
    %80 = tpu.matmul %79, %71, %cst_36 {dimension_numbers = #tpu.dot_dimension_numbers<[2], [1], [1], [2], [0, 0, 0, 1, 1, 2], [0], [0]>} : vector<1x16x16xf32>, vector<1x16x32xf32>, vector<1x16x32xf32> -> vector<1x16x32xf32>
    "tpu.trace_stop"() : () -> ()
    %cst_37 = arith.constant dense<0.000000e+00> : vector<1x16xf32>
    %81 = vector.multi_reduction <add>, %79, %cst_37 [2] : vector<1x16x16xf32> to vector<1x16xf32>
    %82 = vector.shape_cast %81 : vector<1x16xf32> to vector<1x16x1xf32>
    %83 = vector.broadcast %82 : vector<1x16x1xf32> to vector<1x16x32xf32>
    %84 = arith.divf %80, %83 : vector<1x16x32xf32>
    %85 = vector.extract_strided_slice %65 {offsets = [0, 32], sizes = [16, 32], strides = [1, 1]} : vector<16x384xf32> to vector<16x32xf32>
    %86 = vector.shape_cast %85 : vector<16x32xf32> to vector<1x16x32xf32>
    %87 = vector.extract_strided_slice %65 {offsets = [0, 160], sizes = [16, 32], strides = [1, 1]} : vector<16x384xf32> to vector<16x32xf32>
    %88 = vector.shape_cast %87 : vector<16x32xf32> to vector<1x16x32xf32>
    %89 = vector.extract_strided_slice %65 {offsets = [0, 288], sizes = [16, 32], strides = [1, 1]} : vector<16x384xf32> to vector<16x32xf32>
    %90 = vector.shape_cast %89 : vector<16x32xf32> to vector<1x16x32xf32>
    "tpu.trace_start"() <{level = 10 : i32, message = "bqd,bkd->bqk"}> : () -> ()
    %cst_38 = arith.constant dense<0.000000e+00> : vector<1x16x16xf32>
    %91 = tpu.matmul %86, %88, %cst_38 {dimension_numbers = #tpu.dot_dimension_numbers<[2], [2], [1], [1], [0, 0, 0, 1, 1, 1], [0], [0]>} : vector<1x16x32xf32>, vector<1x16x32xf32>, vector<1x16x16xf32> -> vector<1x16x16xf32>
    "tpu.trace_stop"() : () -> ()
    %cst_39 = arith.constant 0.176776692 : f32
    %92 = vector.broadcast %cst_39 : f32 to vector<1x16x16xf32>
    %93 = arith.mulf %91, %92 : vector<1x16x16xf32>
    %cst_40 = arith.constant dense<0xFF800000> : vector<1x16xf32>
    %94 = vector.multi_reduction <maximumf>, %93, %cst_40 [2] : vector<1x16x16xf32> to vector<1x16xf32>
    %95 = vector.shape_cast %94 : vector<1x16xf32> to vector<1x16x1xf32>
    %96 = vector.broadcast %95 : vector<1x16x1xf32> to vector<1x16x16xf32>
    %97 = arith.subf %93, %96 : vector<1x16x16xf32>
    %98 = math.exp %97 : vector<1x16x16xf32>
    "tpu.trace_start"() <{level = 10 : i32, message = "bqk,bkd->bqd"}> : () -> ()
    %cst_41 = arith.constant dense<0.000000e+00> : vector<1x16x32xf32>
    %99 = tpu.matmul %98, %90, %cst_41 {dimension_numbers = #tpu.dot_dimension_numbers<[2], [1], [1], [2], [0, 0, 0, 1, 1, 2], [0], [0]>} : vector<1x16x16xf32>, vector<1x16x32xf32>, vector<1x16x32xf32> -> vector<1x16x32xf32>
    "tpu.trace_stop"() : () -> ()
    %cst_42 = arith.constant dense<0.000000e+00> : vector<1x16xf32>
    %100 = vector.multi_reduction <add>, %98, %cst_42 [2] : vector<1x16x16xf32> to vector<1x16xf32>
    %101 = vector.shape_cast %100 : vector<1x16xf32> to vector<1x16x1xf32>
    %102 = vector.broadcast %101 : vector<1x16x1xf32> to vector<1x16x32xf32>
    %103 = arith.divf %99, %102 : vector<1x16x32xf32>
    %104 = vector.extract_strided_slice %65 {offsets = [0, 64], sizes = [16, 32], strides = [1, 1]} : vector<16x384xf32> to vector<16x32xf32>
    %105 = vector.shape_cast %104 : vector<16x32xf32> to vector<1x16x32xf32>
    %106 = vector.extract_strided_slice %65 {offsets = [0, 192], sizes = [16, 32], strides = [1, 1]} : vector<16x384xf32> to vector<16x32xf32>
    %107 = vector.shape_cast %106 : vector<16x32xf32> to vector<1x16x32xf32>
    %108 = vector.extract_strided_slice %65 {offsets = [0, 320], sizes = [16, 32], strides = [1, 1]} : vector<16x384xf32> to vector<16x32xf32>
    %109 = vector.shape_cast %108 : vector<16x32xf32> to vector<1x16x32xf32>
    "tpu.trace_start"() <{level = 10 : i32, message = "bqd,bkd->bqk"}> : () -> ()
    %cst_43 = arith.constant dense<0.000000e+00> : vector<1x16x16xf32>
    %110 = tpu.matmul %105, %107, %cst_43 {dimension_numbers = #tpu.dot_dimension_numbers<[2], [2], [1], [1], [0, 0, 0, 1, 1, 1], [0], [0]>} : vector<1x16x32xf32>, vector<1x16x32xf32>, vector<1x16x16xf32> -> vector<1x16x16xf32>
    "tpu.trace_stop"() : () -> ()
    %cst_44 = arith.constant 0.176776692 : f32
    %111 = vector.broadcast %cst_44 : f32 to vector<1x16x16xf32>
    %112 = arith.mulf %110, %111 : vector<1x16x16xf32>
    %cst_45 = arith.constant dense<0xFF800000> : vector<1x16xf32>
    %113 = vector.multi_reduction <maximumf>, %112, %cst_45 [2] : vector<1x16x16xf32> to vector<1x16xf32>
    %114 = vector.shape_cast %113 : vector<1x16xf32> to vector<1x16x1xf32>
    %115 = vector.broadcast %114 : vector<1x16x1xf32> to vector<1x16x16xf32>
    %116 = arith.subf %112, %115 : vector<1x16x16xf32>
    %117 = math.exp %116 : vector<1x16x16xf32>
    "tpu.trace_start"() <{level = 10 : i32, message = "bqk,bkd->bqd"}> : () -> ()
    %cst_46 = arith.constant dense<0.000000e+00> : vector<1x16x32xf32>
    %118 = tpu.matmul %117, %109, %cst_46 {dimension_numbers = #tpu.dot_dimension_numbers<[2], [1], [1], [2], [0, 0, 0, 1, 1, 2], [0], [0]>} : vector<1x16x16xf32>, vector<1x16x32xf32>, vector<1x16x32xf32> -> vector<1x16x32xf32>
    "tpu.trace_stop"() : () -> ()
    %cst_47 = arith.constant dense<0.000000e+00> : vector<1x16xf32>
    %119 = vector.multi_reduction <add>, %117, %cst_47 [2] : vector<1x16x16xf32> to vector<1x16xf32>
    %120 = vector.shape_cast %119 : vector<1x16xf32> to vector<1x16x1xf32>
    %121 = vector.broadcast %120 : vector<1x16x1xf32> to vector<1x16x32xf32>
    %122 = arith.divf %118, %121 : vector<1x16x32xf32>
    %123 = vector.extract_strided_slice %65 {offsets = [0, 96], sizes = [16, 32], strides = [1, 1]} : vector<16x384xf32> to vector<16x32xf32>
    %124 = vector.shape_cast %123 : vector<16x32xf32> to vector<1x16x32xf32>
    %125 = vector.extract_strided_slice %65 {offsets = [0, 224], sizes = [16, 32], strides = [1, 1]} : vector<16x384xf32> to vector<16x32xf32>
    %126 = vector.shape_cast %125 : vector<16x32xf32> to vector<1x16x32xf32>
    %127 = vector.extract_strided_slice %65 {offsets = [0, 352], sizes = [16, 32], strides = [1, 1]} : vector<16x384xf32> to vector<16x32xf32>
    %128 = vector.shape_cast %127 : vector<16x32xf32> to vector<1x16x32xf32>
    "tpu.trace_start"() <{level = 10 : i32, message = "bqd,bkd->bqk"}> : () -> ()
    %cst_48 = arith.constant dense<0.000000e+00> : vector<1x16x16xf32>
    %129 = tpu.matmul %124, %126, %cst_48 {dimension_numbers = #tpu.dot_dimension_numbers<[2], [2], [1], [1], [0, 0, 0, 1, 1, 1], [0], [0]>} : vector<1x16x32xf32>, vector<1x16x32xf32>, vector<1x16x16xf32> -> vector<1x16x16xf32>
    "tpu.trace_stop"() : () -> ()
    %cst_49 = arith.constant 0.176776692 : f32
    %130 = vector.broadcast %cst_49 : f32 to vector<1x16x16xf32>
    %131 = arith.mulf %129, %130 : vector<1x16x16xf32>
    %cst_50 = arith.constant dense<0xFF800000> : vector<1x16xf32>
    %132 = vector.multi_reduction <maximumf>, %131, %cst_50 [2] : vector<1x16x16xf32> to vector<1x16xf32>
    %133 = vector.shape_cast %132 : vector<1x16xf32> to vector<1x16x1xf32>
    %134 = vector.broadcast %133 : vector<1x16x1xf32> to vector<1x16x16xf32>
    %135 = arith.subf %131, %134 : vector<1x16x16xf32>
    %136 = math.exp %135 : vector<1x16x16xf32>
    "tpu.trace_start"() <{level = 10 : i32, message = "bqk,bkd->bqd"}> : () -> ()
    %cst_51 = arith.constant dense<0.000000e+00> : vector<1x16x32xf32>
    %137 = tpu.matmul %136, %128, %cst_51 {dimension_numbers = #tpu.dot_dimension_numbers<[2], [1], [1], [2], [0, 0, 0, 1, 1, 2], [0], [0]>} : vector<1x16x16xf32>, vector<1x16x32xf32>, vector<1x16x32xf32> -> vector<1x16x32xf32>
    "tpu.trace_stop"() : () -> ()
    %cst_52 = arith.constant dense<0.000000e+00> : vector<1x16xf32>
    %138 = vector.multi_reduction <add>, %136, %cst_52 [2] : vector<1x16x16xf32> to vector<1x16xf32>
    %139 = vector.shape_cast %138 : vector<1x16xf32> to vector<1x16x1xf32>
    %140 = vector.broadcast %139 : vector<1x16x1xf32> to vector<1x16x32xf32>
    %141 = arith.divf %137, %140 : vector<1x16x32xf32>
    %142 = tpu.concatenate %84, %103, %122, %141 in 2 : vector<1x16x32xf32>, vector<1x16x32xf32>, vector<1x16x32xf32>, vector<1x16x32xf32> -> vector<1x16x128xf32>
    %143 = vector.shape_cast %142 : vector<1x16x128xf32> to vector<16x128xf32>
    %c0_53 = arith.constant 0 : index
    %c0_54 = arith.constant 0 : index
    %c0_55 = arith.constant 0 : index
    %144 = vector.load %arg13[%c0_53, %c0_54, %c0_55] : memref<2x128x128xf32, #tpu.memory_space<vmem>>, vector<1x128x128xf32>
    %145 = vector.shape_cast %144 : vector<1x128x128xf32> to vector<128x128xf32>
    %cst_56 = arith.constant dense<0.000000e+00> : vector<16x128xf32>
    %146 = tpu.matmul %143, %145, %cst_56 {dimension_numbers = #tpu.dot_dimension_numbers<[1], [0], [0], [1], [0, 0, 1, 1], [], []>} : vector<16x128xf32>, vector<128x128xf32>, vector<16x128xf32> -> vector<16x128xf32>
    %c0_57 = arith.constant 0 : index
    %c0_58 = arith.constant 0 : index
    %c0_59 = arith.constant 0 : index
    %147 = vector.load %arg14[%c0_57, %c0_58, %c0_59] : memref<2x1x128xf32, #tpu.memory_space<vmem>>, vector<1x1x128xf32>
    %148 = vector.shape_cast %147 : vector<1x1x128xf32> to vector<1x128xf32>
    %149 = vector.broadcast %148 : vector<1x128xf32> to vector<16x128xf32>
    %150 = arith.addf %146, %149 : vector<16x128xf32>
    %151 = arith.addf %32, %150 : vector<16x128xf32>
    %c0_60 = arith.constant 0 : index
    %c0_61 = arith.constant 0 : index
    %c0_62 = arith.constant 0 : index
    %152 = vector.load %arg15[%c0_60, %c0_61, %c0_62] : memref<2x1x128xf32, #tpu.memory_space<vmem>>, vector<1x1x128xf32>
    %153 = vector.shape_cast %152 : vector<1x1x128xf32> to vector<1x128xf32>
    %c0_63 = arith.constant 0 : index
    %c0_64 = arith.constant 0 : index
    %c0_65 = arith.constant 0 : index
    %154 = vector.load %arg16[%c0_63, %c0_64, %c0_65] : memref<2x1x128xf32, #tpu.memory_space<vmem>>, vector<1x1x128xf32>
    %155 = vector.shape_cast %154 : vector<1x1x128xf32> to vector<1x128xf32>
    %cst_66 = arith.constant dense<0.000000e+00> : vector<16xf32>
    %156 = vector.multi_reduction <add>, %151, %cst_66 [1] : vector<16x128xf32> to vector<16xf32>
    %157 = vector.shape_cast %156 : vector<16xf32> to vector<16x1xf32>
    %cst_67 = arith.constant 1.280000e+02 : f32
    %158 = vector.broadcast %cst_67 : f32 to vector<16x1xf32>
    %159 = arith.divf %157, %158 : vector<16x1xf32>
    %160 = vector.broadcast %159 : vector<16x1xf32> to vector<16x128xf32>
    %161 = arith.subf %151, %160 : vector<16x128xf32>
    %162 = arith.mulf %161, %161 : vector<16x128xf32>
    %cst_68 = arith.constant dense<0.000000e+00> : vector<16xf32>
    %163 = vector.multi_reduction <add>, %162, %cst_68 [1] : vector<16x128xf32> to vector<16xf32>
    %164 = vector.shape_cast %163 : vector<16xf32> to vector<16x1xf32>
    %cst_69 = arith.constant 1.280000e+02 : f32
    %165 = vector.broadcast %cst_69 : f32 to vector<16x1xf32>
    %166 = arith.divf %164, %165 : vector<16x1xf32>
    %167 = vector.broadcast %159 : vector<16x1xf32> to vector<16x128xf32>
    %168 = arith.subf %151, %167 : vector<16x128xf32>
    %cst_70 = arith.constant 9.99999974E-6 : f32
    %169 = vector.broadcast %cst_70 : f32 to vector<16x1xf32>
    %170 = arith.addf %166, %169 : vector<16x1xf32>
    %171 = math.rsqrt %170 : vector<16x1xf32>
    %172 = vector.broadcast %171 : vector<16x1xf32> to vector<16x128xf32>
    %173 = arith.mulf %168, %172 : vector<16x128xf32>
    %174 = vector.broadcast %153 : vector<1x128xf32> to vector<16x128xf32>
    %175 = arith.mulf %173, %174 : vector<16x128xf32>
    %176 = vector.broadcast %155 : vector<1x128xf32> to vector<16x128xf32>
    %177 = arith.addf %175, %176 : vector<16x128xf32>
    %c0_71 = arith.constant 0 : index
    %c0_72 = arith.constant 0 : index
    %c0_73 = arith.constant 0 : index
    %178 = vector.load %arg17[%c0_71, %c0_72, %c0_73] : memref<2x128x512xf32, #tpu.memory_space<vmem>>, vector<1x128x512xf32>
    %179 = vector.shape_cast %178 : vector<1x128x512xf32> to vector<128x512xf32>
    %cst_74 = arith.constant dense<0.000000e+00> : vector<16x512xf32>
    %180 = tpu.matmul %177, %179, %cst_74 {dimension_numbers = #tpu.dot_dimension_numbers<[1], [0], [0], [1], [0, 0, 1, 1], [], []>} : vector<16x128xf32>, vector<128x512xf32>, vector<16x512xf32> -> vector<16x512xf32>
    %c0_75 = arith.constant 0 : index
    %c0_76 = arith.constant 0 : index
    %c0_77 = arith.constant 0 : index
    %181 = vector.load %arg18[%c0_75, %c0_76, %c0_77] : memref<2x1x512xf32, #tpu.memory_space<vmem>>, vector<1x1x512xf32>
    %182 = vector.shape_cast %181 : vector<1x1x512xf32> to vector<1x512xf32>
    %183 = vector.broadcast %182 : vector<1x512xf32> to vector<16x512xf32>
    %184 = arith.addf %180, %183 : vector<16x512xf32>
    %cst_78 = arith.constant 1.702000e+00 : f32
    %185 = vector.broadcast %cst_78 : f32 to vector<16x512xf32>
    %186 = arith.mulf %185, %184 : vector<16x512xf32>
    %187 = arith.negf %186 : vector<16x512xf32>
    %188 = math.exp %187 : vector<16x512xf32>
    %cst_79 = arith.constant 1.000000e+00 : f32
    %189 = vector.broadcast %cst_79 : f32 to vector<16x512xf32>
    %190 = arith.addf %189, %188 : vector<16x512xf32>
    %191 = arith.divf %189, %190 : vector<16x512xf32>
    %192 = arith.mulf %184, %191 : vector<16x512xf32>
    %c0_80 = arith.constant 0 : index
    %c0_81 = arith.constant 0 : index
    %c0_82 = arith.constant 0 : index
    %193 = vector.load %arg19[%c0_80, %c0_81, %c0_82] : memref<2x512x128xf32, #tpu.memory_space<vmem>>, vector<1x512x128xf32>
    %194 = vector.shape_cast %193 : vector<1x512x128xf32> to vector<512x128xf32>
    %cst_83 = arith.constant dense<0.000000e+00> : vector<16x128xf32>
    %195 = tpu.matmul %192, %194, %cst_83 {dimension_numbers = #tpu.dot_dimension_numbers<[1], [0], [0], [1], [0, 0, 1, 1], [], []>} : vector<16x512xf32>, vector<512x128xf32>, vector<16x128xf32> -> vector<16x128xf32>
    %c0_84 = arith.constant 0 : index
    %c0_85 = arith.constant 0 : index
    %c0_86 = arith.constant 0 : index
    %196 = vector.load %arg20[%c0_84, %c0_85, %c0_86] : memref<2x1x128xf32, #tpu.memory_space<vmem>>, vector<1x1x128xf32>
    %197 = vector.shape_cast %196 : vector<1x1x128xf32> to vector<1x128xf32>
    %198 = vector.broadcast %197 : vector<1x128xf32> to vector<16x128xf32>
    %199 = arith.addf %195, %198 : vector<16x128xf32>
    %200 = arith.addf %151, %199 : vector<16x128xf32>
    %c1 = arith.constant 1 : index
    %c0_87 = arith.constant 0 : index
    %c0_88 = arith.constant 0 : index
    %201 = vector.load %arg9[%c1, %c0_87, %c0_88] : memref<2x1x128xf32, #tpu.memory_space<vmem>>, vector<1x1x128xf32>
    %202 = vector.shape_cast %201 : vector<1x1x128xf32> to vector<1x128xf32>
    %c1_89 = arith.constant 1 : index
    %c0_90 = arith.constant 0 : index
    %c0_91 = arith.constant 0 : index
    %203 = vector.load %arg10[%c1_89, %c0_90, %c0_91] : memref<2x1x128xf32, #tpu.memory_space<vmem>>, vector<1x1x128xf32>
    %204 = vector.shape_cast %203 : vector<1x1x128xf32> to vector<1x128xf32>
    %cst_92 = arith.constant dense<0.000000e+00> : vector<16xf32>
    %205 = vector.multi_reduction <add>, %200, %cst_92 [1] : vector<16x128xf32> to vector<16xf32>
    %206 = vector.shape_cast %205 : vector<16xf32> to vector<16x1xf32>
    %cst_93 = arith.constant 1.280000e+02 : f32
    %207 = vector.broadcast %cst_93 : f32 to vector<16x1xf32>
    %208 = arith.divf %206, %207 : vector<16x1xf32>
    %209 = vector.broadcast %208 : vector<16x1xf32> to vector<16x128xf32>
    %210 = arith.subf %200, %209 : vector<16x128xf32>
    %211 = arith.mulf %210, %210 : vector<16x128xf32>
    %cst_94 = arith.constant dense<0.000000e+00> : vector<16xf32>
    %212 = vector.multi_reduction <add>, %211, %cst_94 [1] : vector<16x128xf32> to vector<16xf32>
    %213 = vector.shape_cast %212 : vector<16xf32> to vector<16x1xf32>
    %cst_95 = arith.constant 1.280000e+02 : f32
    %214 = vector.broadcast %cst_95 : f32 to vector<16x1xf32>
    %215 = arith.divf %213, %214 : vector<16x1xf32>
    %216 = vector.broadcast %208 : vector<16x1xf32> to vector<16x128xf32>
    %217 = arith.subf %200, %216 : vector<16x128xf32>
    %cst_96 = arith.constant 9.99999974E-6 : f32
    %218 = vector.broadcast %cst_96 : f32 to vector<16x1xf32>
    %219 = arith.addf %215, %218 : vector<16x1xf32>
    %220 = math.rsqrt %219 : vector<16x1xf32>
    %221 = vector.broadcast %220 : vector<16x1xf32> to vector<16x128xf32>
    %222 = arith.mulf %217, %221 : vector<16x128xf32>
    %223 = vector.broadcast %202 : vector<1x128xf32> to vector<16x128xf32>
    %224 = arith.mulf %222, %223 : vector<16x128xf32>
    %225 = vector.broadcast %204 : vector<1x128xf32> to vector<16x128xf32>
    %226 = arith.addf %224, %225 : vector<16x128xf32>
    %c1_97 = arith.constant 1 : index
    %c0_98 = arith.constant 0 : index
    %c0_99 = arith.constant 0 : index
    %227 = vector.load %arg11[%c1_97, %c0_98, %c0_99] : memref<2x128x384xf32, #tpu.memory_space<vmem>>, vector<1x128x384xf32>
    %228 = vector.shape_cast %227 : vector<1x128x384xf32> to vector<128x384xf32>
    %cst_100 = arith.constant dense<0.000000e+00> : vector<16x384xf32>
    %229 = tpu.matmul %226, %228, %cst_100 {dimension_numbers = #tpu.dot_dimension_numbers<[1], [0], [0], [1], [0, 0, 1, 1], [], []>} : vector<16x128xf32>, vector<128x384xf32>, vector<16x384xf32> -> vector<16x384xf32>
    %c1_101 = arith.constant 1 : index
    %c0_102 = arith.constant 0 : index
    %c0_103 = arith.constant 0 : index
    %230 = vector.load %arg12[%c1_101, %c0_102, %c0_103] : memref<2x1x384xf32, #tpu.memory_space<vmem>>, vector<1x1x384xf32>
    %231 = vector.shape_cast %230 : vector<1x1x384xf32> to vector<1x384xf32>
    %232 = vector.broadcast %231 : vector<1x384xf32> to vector<16x384xf32>
    %233 = arith.addf %229, %232 : vector<16x384xf32>
    %234 = vector.extract_strided_slice %233 {offsets = [0, 0], sizes = [16, 32], strides = [1, 1]} : vector<16x384xf32> to vector<16x32xf32>
    %235 = vector.shape_cast %234 : vector<16x32xf32> to vector<1x16x32xf32>
    %236 = vector.extract_strided_slice %233 {offsets = [0, 128], sizes = [16, 32], strides = [1, 1]} : vector<16x384xf32> to vector<16x32xf32>
    %237 = vector.shape_cast %236 : vector<16x32xf32> to vector<1x16x32xf32>
    %238 = vector.extract_strided_slice %233 {offsets = [0, 256], sizes = [16, 32], strides = [1, 1]} : vector<16x384xf32> to vector<16x32xf32>
    %239 = vector.shape_cast %238 : vector<16x32xf32> to vector<1x16x32xf32>
    "tpu.trace_start"() <{level = 10 : i32, message = "bqd,bkd->bqk"}> : () -> ()
    %cst_104 = arith.constant dense<0.000000e+00> : vector<1x16x16xf32>
    %240 = tpu.matmul %235, %237, %cst_104 {dimension_numbers = #tpu.dot_dimension_numbers<[2], [2], [1], [1], [0, 0, 0, 1, 1, 1], [0], [0]>} : vector<1x16x32xf32>, vector<1x16x32xf32>, vector<1x16x16xf32> -> vector<1x16x16xf32>
    "tpu.trace_stop"() : () -> ()
    %cst_105 = arith.constant 0.176776692 : f32
    %241 = vector.broadcast %cst_105 : f32 to vector<1x16x16xf32>
    %242 = arith.mulf %240, %241 : vector<1x16x16xf32>
    %cst_106 = arith.constant dense<0xFF800000> : vector<1x16xf32>
    %243 = vector.multi_reduction <maximumf>, %242, %cst_106 [2] : vector<1x16x16xf32> to vector<1x16xf32>
    %244 = vector.shape_cast %243 : vector<1x16xf32> to vector<1x16x1xf32>
    %245 = vector.broadcast %244 : vector<1x16x1xf32> to vector<1x16x16xf32>
    %246 = arith.subf %242, %245 : vector<1x16x16xf32>
    %247 = math.exp %246 : vector<1x16x16xf32>
    "tpu.trace_start"() <{level = 10 : i32, message = "bqk,bkd->bqd"}> : () -> ()
    %cst_107 = arith.constant dense<0.000000e+00> : vector<1x16x32xf32>
    %248 = tpu.matmul %247, %239, %cst_107 {dimension_numbers = #tpu.dot_dimension_numbers<[2], [1], [1], [2], [0, 0, 0, 1, 1, 2], [0], [0]>} : vector<1x16x16xf32>, vector<1x16x32xf32>, vector<1x16x32xf32> -> vector<1x16x32xf32>
    "tpu.trace_stop"() : () -> ()
    %cst_108 = arith.constant dense<0.000000e+00> : vector<1x16xf32>
    %249 = vector.multi_reduction <add>, %247, %cst_108 [2] : vector<1x16x16xf32> to vector<1x16xf32>
    %250 = vector.shape_cast %249 : vector<1x16xf32> to vector<1x16x1xf32>
    %251 = vector.broadcast %250 : vector<1x16x1xf32> to vector<1x16x32xf32>
    %252 = arith.divf %248, %251 : vector<1x16x32xf32>
    %253 = vector.extract_strided_slice %233 {offsets = [0, 32], sizes = [16, 32], strides = [1, 1]} : vector<16x384xf32> to vector<16x32xf32>
    %254 = vector.shape_cast %253 : vector<16x32xf32> to vector<1x16x32xf32>
    %255 = vector.extract_strided_slice %233 {offsets = [0, 160], sizes = [16, 32], strides = [1, 1]} : vector<16x384xf32> to vector<16x32xf32>
    %256 = vector.shape_cast %255 : vector<16x32xf32> to vector<1x16x32xf32>
    %257 = vector.extract_strided_slice %233 {offsets = [0, 288], sizes = [16, 32], strides = [1, 1]} : vector<16x384xf32> to vector<16x32xf32>
    %258 = vector.shape_cast %257 : vector<16x32xf32> to vector<1x16x32xf32>
    "tpu.trace_start"() <{level = 10 : i32, message = "bqd,bkd->bqk"}> : () -> ()
    %cst_109 = arith.constant dense<0.000000e+00> : vector<1x16x16xf32>
    %259 = tpu.matmul %254, %256, %cst_109 {dimension_numbers = #tpu.dot_dimension_numbers<[2], [2], [1], [1], [0, 0, 0, 1, 1, 1], [0], [0]>} : vector<1x16x32xf32>, vector<1x16x32xf32>, vector<1x16x16xf32> -> vector<1x16x16xf32>
    "tpu.trace_stop"() : () -> ()
    %cst_110 = arith.constant 0.176776692 : f32
    %260 = vector.broadcast %cst_110 : f32 to vector<1x16x16xf32>
    %261 = arith.mulf %259, %260 : vector<1x16x16xf32>
    %cst_111 = arith.constant dense<0xFF800000> : vector<1x16xf32>
    %262 = vector.multi_reduction <maximumf>, %261, %cst_111 [2] : vector<1x16x16xf32> to vector<1x16xf32>
    %263 = vector.shape_cast %262 : vector<1x16xf32> to vector<1x16x1xf32>
    %264 = vector.broadcast %263 : vector<1x16x1xf32> to vector<1x16x16xf32>
    %265 = arith.subf %261, %264 : vector<1x16x16xf32>
    %266 = math.exp %265 : vector<1x16x16xf32>
    "tpu.trace_start"() <{level = 10 : i32, message = "bqk,bkd->bqd"}> : () -> ()
    %cst_112 = arith.constant dense<0.000000e+00> : vector<1x16x32xf32>
    %267 = tpu.matmul %266, %258, %cst_112 {dimension_numbers = #tpu.dot_dimension_numbers<[2], [1], [1], [2], [0, 0, 0, 1, 1, 2], [0], [0]>} : vector<1x16x16xf32>, vector<1x16x32xf32>, vector<1x16x32xf32> -> vector<1x16x32xf32>
    "tpu.trace_stop"() : () -> ()
    %cst_113 = arith.constant dense<0.000000e+00> : vector<1x16xf32>
    %268 = vector.multi_reduction <add>, %266, %cst_113 [2] : vector<1x16x16xf32> to vector<1x16xf32>
    %269 = vector.shape_cast %268 : vector<1x16xf32> to vector<1x16x1xf32>
    %270 = vector.broadcast %269 : vector<1x16x1xf32> to vector<1x16x32xf32>
    %271 = arith.divf %267, %270 : vector<1x16x32xf32>
    %272 = vector.extract_strided_slice %233 {offsets = [0, 64], sizes = [16, 32], strides = [1, 1]} : vector<16x384xf32> to vector<16x32xf32>
    %273 = vector.shape_cast %272 : vector<16x32xf32> to vector<1x16x32xf32>
    %274 = vector.extract_strided_slice %233 {offsets = [0, 192], sizes = [16, 32], strides = [1, 1]} : vector<16x384xf32> to vector<16x32xf32>
    %275 = vector.shape_cast %274 : vector<16x32xf32> to vector<1x16x32xf32>
    %276 = vector.extract_strided_slice %233 {offsets = [0, 320], sizes = [16, 32], strides = [1, 1]} : vector<16x384xf32> to vector<16x32xf32>
    %277 = vector.shape_cast %276 : vector<16x32xf32> to vector<1x16x32xf32>
    "tpu.trace_start"() <{level = 10 : i32, message = "bqd,bkd->bqk"}> : () -> ()
    %cst_114 = arith.constant dense<0.000000e+00> : vector<1x16x16xf32>
    %278 = tpu.matmul %273, %275, %cst_114 {dimension_numbers = #tpu.dot_dimension_numbers<[2], [2], [1], [1], [0, 0, 0, 1, 1, 1], [0], [0]>} : vector<1x16x32xf32>, vector<1x16x32xf32>, vector<1x16x16xf32> -> vector<1x16x16xf32>
    "tpu.trace_stop"() : () -> ()
    %cst_115 = arith.constant 0.176776692 : f32
    %279 = vector.broadcast %cst_115 : f32 to vector<1x16x16xf32>
    %280 = arith.mulf %278, %279 : vector<1x16x16xf32>
    %cst_116 = arith.constant dense<0xFF800000> : vector<1x16xf32>
    %281 = vector.multi_reduction <maximumf>, %280, %cst_116 [2] : vector<1x16x16xf32> to vector<1x16xf32>
    %282 = vector.shape_cast %281 : vector<1x16xf32> to vector<1x16x1xf32>
    %283 = vector.broadcast %282 : vector<1x16x1xf32> to vector<1x16x16xf32>
    %284 = arith.subf %280, %283 : vector<1x16x16xf32>
    %285 = math.exp %284 : vector<1x16x16xf32>
    "tpu.trace_start"() <{level = 10 : i32, message = "bqk,bkd->bqd"}> : () -> ()
    %cst_117 = arith.constant dense<0.000000e+00> : vector<1x16x32xf32>
    %286 = tpu.matmul %285, %277, %cst_117 {dimension_numbers = #tpu.dot_dimension_numbers<[2], [1], [1], [2], [0, 0, 0, 1, 1, 2], [0], [0]>} : vector<1x16x16xf32>, vector<1x16x32xf32>, vector<1x16x32xf32> -> vector<1x16x32xf32>
    "tpu.trace_stop"() : () -> ()
    %cst_118 = arith.constant dense<0.000000e+00> : vector<1x16xf32>
    %287 = vector.multi_reduction <add>, %285, %cst_118 [2] : vector<1x16x16xf32> to vector<1x16xf32>
    %288 = vector.shape_cast %287 : vector<1x16xf32> to vector<1x16x1xf32>
    %289 = vector.broadcast %288 : vector<1x16x1xf32> to vector<1x16x32xf32>
    %290 = arith.divf %286, %289 : vector<1x16x32xf32>
    %291 = vector.extract_strided_slice %233 {offsets = [0, 96], sizes = [16, 32], strides = [1, 1]} : vector<16x384xf32> to vector<16x32xf32>
    %292 = vector.shape_cast %291 : vector<16x32xf32> to vector<1x16x32xf32>
    %293 = vector.extract_strided_slice %233 {offsets = [0, 224], sizes = [16, 32], strides = [1, 1]} : vector<16x384xf32> to vector<16x32xf32>
    %294 = vector.shape_cast %293 : vector<16x32xf32> to vector<1x16x32xf32>
    %295 = vector.extract_strided_slice %233 {offsets = [0, 352], sizes = [16, 32], strides = [1, 1]} : vector<16x384xf32> to vector<16x32xf32>
    %296 = vector.shape_cast %295 : vector<16x32xf32> to vector<1x16x32xf32>
    "tpu.trace_start"() <{level = 10 : i32, message = "bqd,bkd->bqk"}> : () -> ()
    %cst_119 = arith.constant dense<0.000000e+00> : vector<1x16x16xf32>
    %297 = tpu.matmul %292, %294, %cst_119 {dimension_numbers = #tpu.dot_dimension_numbers<[2], [2], [1], [1], [0, 0, 0, 1, 1, 1], [0], [0]>} : vector<1x16x32xf32>, vector<1x16x32xf32>, vector<1x16x16xf32> -> vector<1x16x16xf32>
    "tpu.trace_stop"() : () -> ()
    %cst_120 = arith.constant 0.176776692 : f32
    %298 = vector.broadcast %cst_120 : f32 to vector<1x16x16xf32>
    %299 = arith.mulf %297, %298 : vector<1x16x16xf32>
    %cst_121 = arith.constant dense<0xFF800000> : vector<1x16xf32>
    %300 = vector.multi_reduction <maximumf>, %299, %cst_121 [2] : vector<1x16x16xf32> to vector<1x16xf32>
    %301 = vector.shape_cast %300 : vector<1x16xf32> to vector<1x16x1xf32>
    %302 = vector.broadcast %301 : vector<1x16x1xf32> to vector<1x16x16xf32>
    %303 = arith.subf %299, %302 : vector<1x16x16xf32>
    %304 = math.exp %303 : vector<1x16x16xf32>
    "tpu.trace_start"() <{level = 10 : i32, message = "bqk,bkd->bqd"}> : () -> ()
    %cst_122 = arith.constant dense<0.000000e+00> : vector<1x16x32xf32>
    %305 = tpu.matmul %304, %296, %cst_122 {dimension_numbers = #tpu.dot_dimension_numbers<[2], [1], [1], [2], [0, 0, 0, 1, 1, 2], [0], [0]>} : vector<1x16x16xf32>, vector<1x16x32xf32>, vector<1x16x32xf32> -> vector<1x16x32xf32>
    "tpu.trace_stop"() : () -> ()
    %cst_123 = arith.constant dense<0.000000e+00> : vector<1x16xf32>
    %306 = vector.multi_reduction <add>, %304, %cst_123 [2] : vector<1x16x16xf32> to vector<1x16xf32>
    %307 = vector.shape_cast %306 : vector<1x16xf32> to vector<1x16x1xf32>
    %308 = vector.broadcast %307 : vector<1x16x1xf32> to vector<1x16x32xf32>
    %309 = arith.divf %305, %308 : vector<1x16x32xf32>
    %310 = tpu.concatenate %252, %271, %290, %309 in 2 : vector<1x16x32xf32>, vector<1x16x32xf32>, vector<1x16x32xf32>, vector<1x16x32xf32> -> vector<1x16x128xf32>
    %311 = vector.shape_cast %310 : vector<1x16x128xf32> to vector<16x128xf32>
    %c1_124 = arith.constant 1 : index
    %c0_125 = arith.constant 0 : index
    %c0_126 = arith.constant 0 : index
    %312 = vector.load %arg13[%c1_124, %c0_125, %c0_126] : memref<2x128x128xf32, #tpu.memory_space<vmem>>, vector<1x128x128xf32>
    %313 = vector.shape_cast %312 : vector<1x128x128xf32> to vector<128x128xf32>
    %cst_127 = arith.constant dense<0.000000e+00> : vector<16x128xf32>
    %314 = tpu.matmul %311, %313, %cst_127 {dimension_numbers = #tpu.dot_dimension_numbers<[1], [0], [0], [1], [0, 0, 1, 1], [], []>} : vector<16x128xf32>, vector<128x128xf32>, vector<16x128xf32> -> vector<16x128xf32>
    %c1_128 = arith.constant 1 : index
    %c0_129 = arith.constant 0 : index
    %c0_130 = arith.constant 0 : index
    %315 = vector.load %arg14[%c1_128, %c0_129, %c0_130] : memref<2x1x128xf32, #tpu.memory_space<vmem>>, vector<1x1x128xf32>
    %316 = vector.shape_cast %315 : vector<1x1x128xf32> to vector<1x128xf32>
    %317 = vector.broadcast %316 : vector<1x128xf32> to vector<16x128xf32>
    %318 = arith.addf %314, %317 : vector<16x128xf32>
    %319 = arith.addf %200, %318 : vector<16x128xf32>
    %c1_131 = arith.constant 1 : index
    %c0_132 = arith.constant 0 : index
    %c0_133 = arith.constant 0 : index
    %320 = vector.load %arg15[%c1_131, %c0_132, %c0_133] : memref<2x1x128xf32, #tpu.memory_space<vmem>>, vector<1x1x128xf32>
    %321 = vector.shape_cast %320 : vector<1x1x128xf32> to vector<1x128xf32>
    %c1_134 = arith.constant 1 : index
    %c0_135 = arith.constant 0 : index
    %c0_136 = arith.constant 0 : index
    %322 = vector.load %arg16[%c1_134, %c0_135, %c0_136] : memref<2x1x128xf32, #tpu.memory_space<vmem>>, vector<1x1x128xf32>
    %323 = vector.shape_cast %322 : vector<1x1x128xf32> to vector<1x128xf32>
    %cst_137 = arith.constant dense<0.000000e+00> : vector<16xf32>
    %324 = vector.multi_reduction <add>, %319, %cst_137 [1] : vector<16x128xf32> to vector<16xf32>
    %325 = vector.shape_cast %324 : vector<16xf32> to vector<16x1xf32>
    %cst_138 = arith.constant 1.280000e+02 : f32
    %326 = vector.broadcast %cst_138 : f32 to vector<16x1xf32>
    %327 = arith.divf %325, %326 : vector<16x1xf32>
    %328 = vector.broadcast %327 : vector<16x1xf32> to vector<16x128xf32>
    %329 = arith.subf %319, %328 : vector<16x128xf32>
    %330 = arith.mulf %329, %329 : vector<16x128xf32>
    %cst_139 = arith.constant dense<0.000000e+00> : vector<16xf32>
    %331 = vector.multi_reduction <add>, %330, %cst_139 [1] : vector<16x128xf32> to vector<16xf32>
    %332 = vector.shape_cast %331 : vector<16xf32> to vector<16x1xf32>
    %cst_140 = arith.constant 1.280000e+02 : f32
    %333 = vector.broadcast %cst_140 : f32 to vector<16x1xf32>
    %334 = arith.divf %332, %333 : vector<16x1xf32>
    %335 = vector.broadcast %327 : vector<16x1xf32> to vector<16x128xf32>
    %336 = arith.subf %319, %335 : vector<16x128xf32>
    %cst_141 = arith.constant 9.99999974E-6 : f32
    %337 = vector.broadcast %cst_141 : f32 to vector<16x1xf32>
    %338 = arith.addf %334, %337 : vector<16x1xf32>
    %339 = math.rsqrt %338 : vector<16x1xf32>
    %340 = vector.broadcast %339 : vector<16x1xf32> to vector<16x128xf32>
    %341 = arith.mulf %336, %340 : vector<16x128xf32>
    %342 = vector.broadcast %321 : vector<1x128xf32> to vector<16x128xf32>
    %343 = arith.mulf %341, %342 : vector<16x128xf32>
    %344 = vector.broadcast %323 : vector<1x128xf32> to vector<16x128xf32>
    %345 = arith.addf %343, %344 : vector<16x128xf32>
    %c1_142 = arith.constant 1 : index
    %c0_143 = arith.constant 0 : index
    %c0_144 = arith.constant 0 : index
    %346 = vector.load %arg17[%c1_142, %c0_143, %c0_144] : memref<2x128x512xf32, #tpu.memory_space<vmem>>, vector<1x128x512xf32>
    %347 = vector.shape_cast %346 : vector<1x128x512xf32> to vector<128x512xf32>
    %cst_145 = arith.constant dense<0.000000e+00> : vector<16x512xf32>
    %348 = tpu.matmul %345, %347, %cst_145 {dimension_numbers = #tpu.dot_dimension_numbers<[1], [0], [0], [1], [0, 0, 1, 1], [], []>} : vector<16x128xf32>, vector<128x512xf32>, vector<16x512xf32> -> vector<16x512xf32>
    %c1_146 = arith.constant 1 : index
    %c0_147 = arith.constant 0 : index
    %c0_148 = arith.constant 0 : index
    %349 = vector.load %arg18[%c1_146, %c0_147, %c0_148] : memref<2x1x512xf32, #tpu.memory_space<vmem>>, vector<1x1x512xf32>
    %350 = vector.shape_cast %349 : vector<1x1x512xf32> to vector<1x512xf32>
    %351 = vector.broadcast %350 : vector<1x512xf32> to vector<16x512xf32>
    %352 = arith.addf %348, %351 : vector<16x512xf32>
    %cst_149 = arith.constant 1.702000e+00 : f32
    %353 = vector.broadcast %cst_149 : f32 to vector<16x512xf32>
    %354 = arith.mulf %353, %352 : vector<16x512xf32>
    %355 = arith.negf %354 : vector<16x512xf32>
    %356 = math.exp %355 : vector<16x512xf32>
    %cst_150 = arith.constant 1.000000e+00 : f32
    %357 = vector.broadcast %cst_150 : f32 to vector<16x512xf32>
    %358 = arith.addf %357, %356 : vector<16x512xf32>
    %359 = arith.divf %357, %358 : vector<16x512xf32>
    %360 = arith.mulf %352, %359 : vector<16x512xf32>
    %c1_151 = arith.constant 1 : index
    %c0_152 = arith.constant 0 : index
    %c0_153 = arith.constant 0 : index
    %361 = vector.load %arg19[%c1_151, %c0_152, %c0_153] : memref<2x512x128xf32, #tpu.memory_space<vmem>>, vector<1x512x128xf32>
    %362 = vector.shape_cast %361 : vector<1x512x128xf32> to vector<512x128xf32>
    %cst_154 = arith.constant dense<0.000000e+00> : vector<16x128xf32>
    %363 = tpu.matmul %360, %362, %cst_154 {dimension_numbers = #tpu.dot_dimension_numbers<[1], [0], [0], [1], [0, 0, 1, 1], [], []>} : vector<16x512xf32>, vector<512x128xf32>, vector<16x128xf32> -> vector<16x128xf32>
    %c1_155 = arith.constant 1 : index
    %c0_156 = arith.constant 0 : index
    %c0_157 = arith.constant 0 : index
    %364 = vector.load %arg20[%c1_155, %c0_156, %c0_157] : memref<2x1x128xf32, #tpu.memory_space<vmem>>, vector<1x1x128xf32>
    %365 = vector.shape_cast %364 : vector<1x1x128xf32> to vector<1x128xf32>
    %366 = vector.broadcast %365 : vector<1x128xf32> to vector<16x128xf32>
    %367 = arith.addf %363, %366 : vector<16x128xf32>
    %368 = arith.addf %319, %367 : vector<16x128xf32>
    %369 = vector.shape_cast %368 : vector<16x128xf32> to vector<1x16x128xf32>
    %370 = vector.extract_strided_slice %369 {offsets = [0, 0, 0], sizes = [1, 1, 128], strides = [1, 1, 1]} : vector<1x16x128xf32> to vector<1x1x128xf32>
    %371 = vector.shape_cast %370 : vector<1x1x128xf32> to vector<1x128xf32>
    %c0_158 = arith.constant 0 : index
    %c0_159 = arith.constant 0 : index
    %372 = vector.load %arg7[%c0_158, %c0_159] : memref<1x128xf32, #tpu.memory_space<vmem>>, vector<1x128xf32>
    %c0_160 = arith.constant 0 : index
    %c0_161 = arith.constant 0 : index
    %373 = vector.load %arg8[%c0_160, %c0_161] : memref<1x128xf32, #tpu.memory_space<vmem>>, vector<1x128xf32>
    %cst_162 = arith.constant dense<0.000000e+00> : vector<1xf32>
    %374 = vector.multi_reduction <add>, %371, %cst_162 [1] : vector<1x128xf32> to vector<1xf32>
    %375 = vector.shape_cast %374 : vector<1xf32> to vector<1x1xf32>
    %cst_163 = arith.constant 1.280000e+02 : f32
    %376 = vector.broadcast %cst_163 : f32 to vector<1x1xf32>
    %377 = arith.divf %375, %376 : vector<1x1xf32>
    %378 = vector.broadcast %377 : vector<1x1xf32> to vector<1x128xf32>
    %379 = arith.subf %371, %378 : vector<1x128xf32>
    %380 = arith.mulf %379, %379 : vector<1x128xf32>
    %cst_164 = arith.constant dense<0.000000e+00> : vector<1xf32>
    %381 = vector.multi_reduction <add>, %380, %cst_164 [1] : vector<1x128xf32> to vector<1xf32>
    %382 = vector.shape_cast %381 : vector<1xf32> to vector<1x1xf32>
    %cst_165 = arith.constant 1.280000e+02 : f32
    %383 = vector.broadcast %cst_165 : f32 to vector<1x1xf32>
    %384 = arith.divf %382, %383 : vector<1x1xf32>
    %385 = vector.broadcast %377 : vector<1x1xf32> to vector<1x128xf32>
    %386 = arith.subf %371, %385 : vector<1x128xf32>
    %cst_166 = arith.constant 9.99999974E-6 : f32
    %387 = vector.broadcast %cst_166 : f32 to vector<1x1xf32>
    %388 = arith.addf %384, %387 : vector<1x1xf32>
    %389 = math.rsqrt %388 : vector<1x1xf32>
    %390 = vector.broadcast %389 : vector<1x1xf32> to vector<1x128xf32>
    %391 = arith.mulf %386, %390 : vector<1x128xf32>
    %392 = arith.mulf %391, %372 : vector<1x128xf32>
    %393 = arith.addf %392, %373 : vector<1x128xf32>
    %c0_167 = arith.constant 0 : index
    %c0_168 = arith.constant 0 : index
    %394 = vector.load %arg33[%c0_167, %c0_168] : memref<128x128xf32, #tpu.memory_space<vmem>>, vector<128x128xf32>
    %cst_169 = arith.constant dense<0.000000e+00> : vector<1x128xf32>
    %395 = tpu.matmul %393, %394, %cst_169 {dimension_numbers = #tpu.dot_dimension_numbers<[1], [0], [0], [1], [0, 0, 1, 1], [], []>} : vector<1x128xf32>, vector<128x128xf32>, vector<1x128xf32> -> vector<1x128xf32>
    %c0_170 = arith.constant 0 : index
    %c0_171 = arith.constant 0 : index
    %396 = vector.load %arg34[%c0_170, %c0_171] : memref<1x128xf32, #tpu.memory_space<vmem>>, vector<1x128xf32>
    %397 = arith.addf %395, %396 : vector<1x128xf32>
    %c0_172 = arith.constant 0 : index
    %c0_173 = arith.constant 0 : index
    %398 = vector.load %arg41[%c0_172, %c0_173] : memref<8x128xf32, #tpu.memory_space<vmem>>, vector<8x128xf32>
    %c0_174 = arith.constant 0 : index
    %c0_175 = arith.constant 0 : index
    %399 = vector.load %arg35[%c0_174, %c0_175] : memref<128x128xf32, #tpu.memory_space<vmem>>, vector<128x128xf32>
    %cst_176 = arith.constant dense<0.000000e+00> : vector<8x128xf32>
    %400 = tpu.matmul %398, %399, %cst_176 {dimension_numbers = #tpu.dot_dimension_numbers<[1], [0], [0], [1], [0, 0, 1, 1], [], []>} : vector<8x128xf32>, vector<128x128xf32>, vector<8x128xf32> -> vector<8x128xf32>
    %c0_177 = arith.constant 0 : index
    %c0_178 = arith.constant 0 : index
    %401 = vector.load %arg36[%c0_177, %c0_178] : memref<1x128xf32, #tpu.memory_space<vmem>>, vector<1x128xf32>
    %402 = vector.broadcast %401 : vector<1x128xf32> to vector<8x128xf32>
    %403 = arith.addf %400, %402 : vector<8x128xf32>
    %cst_179 = arith.constant dense<0.000000e+00> : vector<1x8xf32>
    %404 = tpu.matmul %397, %403, %cst_179 {dimension_numbers = #tpu.dot_dimension_numbers<[1], [1], [0], [0], [0, 0, 1, 0], [], []>} : vector<1x128xf32>, vector<8x128xf32>, vector<1x8xf32> -> vector<1x8xf32>
    %cst_180 = arith.constant 5.000000e-01 : f32
    %405 = vector.broadcast %cst_180 : f32 to vector<1x8xf32>
    %406 = arith.mulf %404, %405 : vector<1x8xf32>
    %407 = tpu.iota {dimensions = array<i32: 1>} : vector<1x8xi32>
    %c3_i32 = arith.constant 3 : i32
    %408 = vector.broadcast %c3_i32 : i32 to vector<1x8xi32>
    %409 = arith.cmpi slt, %407, %408 : vector<1x8xi32>
    %cst_181 = arith.constant -1.000000e+30 : f32
    %410 = vector.broadcast %cst_181 : f32 to vector<1x8xf32>
    %411 = arith.select %409, %406, %410 : vector<1x8xi1>, vector<1x8xf32>
    %cst_182 = arith.constant dense<0xFF800000> : vector<1xf32>
    %412 = vector.multi_reduction <maximumf>, %411, %cst_182 [1] : vector<1x8xf32> to vector<1xf32>
    %413 = vector.shape_cast %412 : vector<1xf32> to vector<1x1xf32>
    %414 = vector.broadcast %413 : vector<1x1xf32> to vector<1x8xf32>
    %415 = arith.subf %411, %414 : vector<1x8xf32>
    %416 = math.exp %415 : vector<1x8xf32>
    %cst_183 = arith.constant dense<0.000000e+00> : vector<1xf32>
    %417 = vector.multi_reduction <add>, %416, %cst_183 [1] : vector<1x8xf32> to vector<1xf32>
    %418 = vector.shape_cast %417 : vector<1xf32> to vector<1x1xf32>
    %419 = vector.broadcast %418 : vector<1x1xf32> to vector<1x8xf32>
    %420 = arith.divf %416, %419 : vector<1x8xf32>
    %cst_184 = arith.constant dense<0.000000e+00> : vector<1x128xf32>
    %421 = tpu.matmul %420, %403, %cst_184 {dimension_numbers = #tpu.dot_dimension_numbers<[1], [0], [0], [1], [0, 0, 1, 1], [], []>} : vector<1x8xf32>, vector<8x128xf32>, vector<1x128xf32> -> vector<1x128xf32>
    %c0_185 = arith.constant 0 : index
    %c0_186 = arith.constant 0 : index
    %422 = vector.load %arg37[%c0_185, %c0_186] : memref<128x128xf32, #tpu.memory_space<vmem>>, vector<128x128xf32>
    %cst_187 = arith.constant dense<0.000000e+00> : vector<1x128xf32>
    %423 = tpu.matmul %421, %422, %cst_187 {dimension_numbers = #tpu.dot_dimension_numbers<[1], [0], [0], [1], [0, 0, 1, 1], [], []>} : vector<1x128xf32>, vector<128x128xf32>, vector<1x128xf32> -> vector<1x128xf32>
    %c0_188 = arith.constant 0 : index
    %c0_189 = arith.constant 0 : index
    %424 = vector.load %arg38[%c0_188, %c0_189] : memref<1x128xf32, #tpu.memory_space<vmem>>, vector<1x128xf32>
    %425 = arith.addf %423, %424 : vector<1x128xf32>
    %c0_190 = arith.constant 0 : index
    %c0_191 = arith.constant 0 : index
    %426 = vector.load %arg39[%c0_190, %c0_191] : memref<1x128xf32, #tpu.memory_space<vmem>>, vector<1x128xf32>
    %c0_192 = arith.constant 0 : index
    %c0_193 = arith.constant 0 : index
    %427 = vector.load %arg40[%c0_192, %c0_193] : memref<1x128xf32, #tpu.memory_space<vmem>>, vector<1x128xf32>
    %cst_194 = arith.constant dense<0.000000e+00> : vector<1xf32>
    %428 = vector.multi_reduction <add>, %425, %cst_194 [1] : vector<1x128xf32> to vector<1xf32>
    %429 = vector.shape_cast %428 : vector<1xf32> to vector<1x1xf32>
    %cst_195 = arith.constant 1.280000e+02 : f32
    %430 = vector.broadcast %cst_195 : f32 to vector<1x1xf32>
    %431 = arith.divf %429, %430 : vector<1x1xf32>
    %432 = vector.broadcast %431 : vector<1x1xf32> to vector<1x128xf32>
    %433 = arith.subf %425, %432 : vector<1x128xf32>
    %434 = arith.mulf %433, %433 : vector<1x128xf32>
    %cst_196 = arith.constant dense<0.000000e+00> : vector<1xf32>
    %435 = vector.multi_reduction <add>, %434, %cst_196 [1] : vector<1x128xf32> to vector<1xf32>
    %436 = vector.shape_cast %435 : vector<1xf32> to vector<1x1xf32>
    %cst_197 = arith.constant 1.280000e+02 : f32
    %437 = vector.broadcast %cst_197 : f32 to vector<1x1xf32>
    %438 = arith.divf %436, %437 : vector<1x1xf32>
    %439 = vector.broadcast %431 : vector<1x1xf32> to vector<1x128xf32>
    %440 = arith.subf %425, %439 : vector<1x128xf32>
    %cst_198 = arith.constant 9.99999974E-6 : f32
    %441 = vector.broadcast %cst_198 : f32 to vector<1x1xf32>
    %442 = arith.addf %438, %441 : vector<1x1xf32>
    %443 = math.rsqrt %442 : vector<1x1xf32>
    %444 = vector.broadcast %443 : vector<1x1xf32> to vector<1x128xf32>
    %445 = arith.mulf %440, %444 : vector<1x128xf32>
    %446 = arith.mulf %445, %426 : vector<1x128xf32>
    %447 = arith.addf %446, %427 : vector<1x128xf32>
    %448 = arith.addf %421, %447 : vector<1x128xf32>
    %cst_199 = arith.constant 2.500000e-01 : f32
    %449 = vector.broadcast %cst_199 : f32 to vector<1x128xf32>
    %450 = arith.mulf %448, %449 : vector<1x128xf32>
    %c0_200 = arith.constant 0 : index
    %c0_201 = arith.constant 0 : index
    %451 = vector.load %arg42[%c0_200, %c0_201] : memref<8x128xf32, #tpu.memory_space<vmem>>, vector<8x128xf32>
    %c0_202 = arith.constant 0 : index
    %c0_203 = arith.constant 0 : index
    %452 = vector.load %arg35[%c0_202, %c0_203] : memref<128x128xf32, #tpu.memory_space<vmem>>, vector<128x128xf32>
    %cst_204 = arith.constant dense<0.000000e+00> : vector<8x128xf32>
    %453 = tpu.matmul %451, %452, %cst_204 {dimension_numbers = #tpu.dot_dimension_numbers<[1], [0], [0], [1], [0, 0, 1, 1], [], []>} : vector<8x128xf32>, vector<128x128xf32>, vector<8x128xf32> -> vector<8x128xf32>
    %c0_205 = arith.constant 0 : index
    %c0_206 = arith.constant 0 : index
    %454 = vector.load %arg36[%c0_205, %c0_206] : memref<1x128xf32, #tpu.memory_space<vmem>>, vector<1x128xf32>
    %455 = vector.broadcast %454 : vector<1x128xf32> to vector<8x128xf32>
    %456 = arith.addf %453, %455 : vector<8x128xf32>
    %cst_207 = arith.constant dense<0.000000e+00> : vector<1x8xf32>
    %457 = tpu.matmul %397, %456, %cst_207 {dimension_numbers = #tpu.dot_dimension_numbers<[1], [1], [0], [0], [0, 0, 1, 0], [], []>} : vector<1x128xf32>, vector<8x128xf32>, vector<1x8xf32> -> vector<1x8xf32>
    %cst_208 = arith.constant 5.000000e-01 : f32
    %458 = vector.broadcast %cst_208 : f32 to vector<1x8xf32>
    %459 = arith.mulf %457, %458 : vector<1x8xf32>
    %460 = tpu.iota {dimensions = array<i32: 1>} : vector<1x8xi32>
    %c5_i32 = arith.constant 5 : i32
    %461 = vector.broadcast %c5_i32 : i32 to vector<1x8xi32>
    %462 = arith.cmpi slt, %460, %461 : vector<1x8xi32>
    %cst_209 = arith.constant -1.000000e+30 : f32
    %463 = vector.broadcast %cst_209 : f32 to vector<1x8xf32>
    %464 = arith.select %462, %459, %463 : vector<1x8xi1>, vector<1x8xf32>
    %cst_210 = arith.constant dense<0xFF800000> : vector<1xf32>
    %465 = vector.multi_reduction <maximumf>, %464, %cst_210 [1] : vector<1x8xf32> to vector<1xf32>
    %466 = vector.shape_cast %465 : vector<1xf32> to vector<1x1xf32>
    %467 = vector.broadcast %466 : vector<1x1xf32> to vector<1x8xf32>
    %468 = arith.subf %464, %467 : vector<1x8xf32>
    %469 = math.exp %468 : vector<1x8xf32>
    %cst_211 = arith.constant dense<0.000000e+00> : vector<1xf32>
    %470 = vector.multi_reduction <add>, %469, %cst_211 [1] : vector<1x8xf32> to vector<1xf32>
    %471 = vector.shape_cast %470 : vector<1xf32> to vector<1x1xf32>
    %472 = vector.broadcast %471 : vector<1x1xf32> to vector<1x8xf32>
    %473 = arith.divf %469, %472 : vector<1x8xf32>
    %cst_212 = arith.constant dense<0.000000e+00> : vector<1x128xf32>
    %474 = tpu.matmul %473, %456, %cst_212 {dimension_numbers = #tpu.dot_dimension_numbers<[1], [0], [0], [1], [0, 0, 1, 1], [], []>} : vector<1x8xf32>, vector<8x128xf32>, vector<1x128xf32> -> vector<1x128xf32>
    %c0_213 = arith.constant 0 : index
    %c0_214 = arith.constant 0 : index
    %475 = vector.load %arg37[%c0_213, %c0_214] : memref<128x128xf32, #tpu.memory_space<vmem>>, vector<128x128xf32>
    %cst_215 = arith.constant dense<0.000000e+00> : vector<1x128xf32>
    %476 = tpu.matmul %474, %475, %cst_215 {dimension_numbers = #tpu.dot_dimension_numbers<[1], [0], [0], [1], [0, 0, 1, 1], [], []>} : vector<1x128xf32>, vector<128x128xf32>, vector<1x128xf32> -> vector<1x128xf32>
    %c0_216 = arith.constant 0 : index
    %c0_217 = arith.constant 0 : index
    %477 = vector.load %arg38[%c0_216, %c0_217] : memref<1x128xf32, #tpu.memory_space<vmem>>, vector<1x128xf32>
    %478 = arith.addf %476, %477 : vector<1x128xf32>
    %c0_218 = arith.constant 0 : index
    %c0_219 = arith.constant 0 : index
    %479 = vector.load %arg39[%c0_218, %c0_219] : memref<1x128xf32, #tpu.memory_space<vmem>>, vector<1x128xf32>
    %c0_220 = arith.constant 0 : index
    %c0_221 = arith.constant 0 : index
    %480 = vector.load %arg40[%c0_220, %c0_221] : memref<1x128xf32, #tpu.memory_space<vmem>>, vector<1x128xf32>
    %cst_222 = arith.constant dense<0.000000e+00> : vector<1xf32>
    %481 = vector.multi_reduction <add>, %478, %cst_222 [1] : vector<1x128xf32> to vector<1xf32>
    %482 = vector.shape_cast %481 : vector<1xf32> to vector<1x1xf32>
    %cst_223 = arith.constant 1.280000e+02 : f32
    %483 = vector.broadcast %cst_223 : f32 to vector<1x1xf32>
    %484 = arith.divf %482, %483 : vector<1x1xf32>
    %485 = vector.broadcast %484 : vector<1x1xf32> to vector<1x128xf32>
    %486 = arith.subf %478, %485 : vector<1x128xf32>
    %487 = arith.mulf %486, %486 : vector<1x128xf32>
    %cst_224 = arith.constant dense<0.000000e+00> : vector<1xf32>
    %488 = vector.multi_reduction <add>, %487, %cst_224 [1] : vector<1x128xf32> to vector<1xf32>
    %489 = vector.shape_cast %488 : vector<1xf32> to vector<1x1xf32>
    %cst_225 = arith.constant 1.280000e+02 : f32
    %490 = vector.broadcast %cst_225 : f32 to vector<1x1xf32>
    %491 = arith.divf %489, %490 : vector<1x1xf32>
    %492 = vector.broadcast %484 : vector<1x1xf32> to vector<1x128xf32>
    %493 = arith.subf %478, %492 : vector<1x128xf32>
    %cst_226 = arith.constant 9.99999974E-6 : f32
    %494 = vector.broadcast %cst_226 : f32 to vector<1x1xf32>
    %495 = arith.addf %491, %494 : vector<1x1xf32>
    %496 = math.rsqrt %495 : vector<1x1xf32>
    %497 = vector.broadcast %496 : vector<1x1xf32> to vector<1x128xf32>
    %498 = arith.mulf %493, %497 : vector<1x128xf32>
    %499 = arith.mulf %498, %479 : vector<1x128xf32>
    %500 = arith.addf %499, %480 : vector<1x128xf32>
    %501 = arith.addf %474, %500 : vector<1x128xf32>
    %cst_227 = arith.constant 2.500000e-01 : f32
    %502 = vector.broadcast %cst_227 : f32 to vector<1x128xf32>
    %503 = arith.mulf %501, %502 : vector<1x128xf32>
    %c0_228 = arith.constant 0 : index
    %c0_229 = arith.constant 0 : index
    %504 = vector.load %arg4[%c0_228, %c0_229] : memref<1x128xf32, #tpu.memory_space<vmem>>, vector<1x128xf32>
    %505 = vector.shape_cast %504 : vector<1x128xf32> to vector<1x1x128xf32>
    %c0_230 = arith.constant 0 : index
    %c0_231 = arith.constant 0 : index
    %c0_232 = arith.constant 0 : index
    %506 = vector.load %arg45[%c0_230, %c0_231, %c0_232] : memref<1x24x128xf32, #tpu.memory_space<vmem>>, vector<1x1x128xf32>
    tpu.vector_store %arg45[%c0_230, %c0_231, %c0_232], %505 {strides = array<i32>} : memref<1x24x128xf32, #tpu.memory_space<vmem>>, vector<1x1x128xf32>,
    %507 = vector.shape_cast %450 : vector<1x128xf32> to vector<1x1x128xf32>
    %c0_233 = arith.constant 0 : index
    %c1_234 = arith.constant 1 : index
    %c0_235 = arith.constant 0 : index
    %508 = vector.load %arg45[%c0_233, %c1_234, %c0_235] : memref<1x24x128xf32, #tpu.memory_space<vmem>>, vector<1x1x128xf32>
    tpu.vector_store %arg45[%c0_233, %c1_234, %c0_235], %507 {strides = array<i32>} : memref<1x24x128xf32, #tpu.memory_space<vmem>>, vector<1x1x128xf32>,
    %509 = vector.shape_cast %503 : vector<1x128xf32> to vector<1x1x128xf32>
    %c0_236 = arith.constant 0 : index
    %c2 = arith.constant 2 : index
    %c0_237 = arith.constant 0 : index
    %510 = vector.load %arg45[%c0_236, %c2, %c0_237] : memref<1x24x128xf32, #tpu.memory_space<vmem>>, vector<1x1x128xf32>
    tpu.vector_store %arg45[%c0_236, %c2, %c0_237], %509 {strides = array<i32>} : memref<1x24x128xf32, #tpu.memory_space<vmem>>, vector<1x1x128xf32>,
    %c0_238 = arith.constant 0 : index
    %c3 = arith.constant 3 : index
    %c0_239 = arith.constant 0 : index
    %511 = vector.load %arg45[%c0_238, %c3, %c0_239] : memref<1x24x128xf32, #tpu.memory_space<vmem>>, vector<1x16x128xf32>
    tpu.vector_store %arg45[%c0_238, %c3, %c0_239], %7 {strides = array<i32>} : memref<1x24x128xf32, #tpu.memory_space<vmem>>, vector<1x16x128xf32>,
    %cst_240 = arith.constant 0.000000e+00 : f32
    %512 = vector.broadcast %cst_240 : f32 to vector<1x5x128xf32>
    %c0_241 = arith.constant 0 : index
    %c19 = arith.constant 19 : index
    %c0_242 = arith.constant 0 : index
    %513 = vector.load %arg45[%c0_241, %c19, %c0_242] : memref<1x24x128xf32, #tpu.memory_space<vmem>>, vector<1x5x128xf32>
    tpu.vector_store %arg45[%c0_241, %c19, %c0_242], %512 {strides = array<i32>} : memref<1x24x128xf32, #tpu.memory_space<vmem>>, vector<1x5x128xf32>,
    %c0_243 = arith.constant 0 : index
    %c0_244 = arith.constant 0 : index
    %c0_245 = arith.constant 0 : index
    %514 = vector.load %arg45[%c0_243, %c0_244, %c0_245] : memref<1x24x128xf32, #tpu.memory_space<vmem>>, vector<1x24x128xf32>
    %515 = vector.shape_cast %514 : vector<1x24x128xf32> to vector<24x128xf32>
    %c0_246 = arith.constant 0 : index
    %c0_247 = arith.constant 0 : index
    %516 = vector.load %arg5[%c0_246, %c0_247] : memref<1x128xf32, #tpu.memory_space<vmem>>, vector<1x128xf32>
    %c0_248 = arith.constant 0 : index
    %c0_249 = arith.constant 0 : index
    %517 = vector.load %arg6[%c0_248, %c0_249] : memref<1x128xf32, #tpu.memory_space<vmem>>, vector<1x128xf32>
    %cst_250 = arith.constant dense<0.000000e+00> : vector<24xf32>
    %518 = vector.multi_reduction <add>, %515, %cst_250 [1] : vector<24x128xf32> to vector<24xf32>
    %519 = vector.shape_cast %518 : vector<24xf32> to vector<24x1xf32>
    %cst_251 = arith.constant 1.280000e+02 : f32
    %520 = vector.broadcast %cst_251 : f32 to vector<24x1xf32>
    %521 = arith.divf %519, %520 : vector<24x1xf32>
    %522 = vector.broadcast %521 : vector<24x1xf32> to vector<24x128xf32>
    %523 = arith.subf %515, %522 : vector<24x128xf32>
    %524 = arith.mulf %523, %523 : vector<24x128xf32>
    %cst_252 = arith.constant dense<0.000000e+00> : vector<24xf32>
    %525 = vector.multi_reduction <add>, %524, %cst_252 [1] : vector<24x128xf32> to vector<24xf32>
    %526 = vector.shape_cast %525 : vector<24xf32> to vector<24x1xf32>
    %cst_253 = arith.constant 1.280000e+02 : f32
    %527 = vector.broadcast %cst_253 : f32 to vector<24x1xf32>
    %528 = arith.divf %526, %527 : vector<24x1xf32>
    %529 = vector.broadcast %521 : vector<24x1xf32> to vector<24x128xf32>
    %530 = arith.subf %515, %529 : vector<24x128xf32>
    %cst_254 = arith.constant 9.99999974E-6 : f32
    %531 = vector.broadcast %cst_254 : f32 to vector<24x1xf32>
    %532 = arith.addf %528, %531 : vector<24x1xf32>
    %533 = math.rsqrt %532 : vector<24x1xf32>
    %534 = vector.broadcast %533 : vector<24x1xf32> to vector<24x128xf32>
    %535 = arith.mulf %530, %534 : vector<24x128xf32>
    %536 = vector.broadcast %516 : vector<1x128xf32> to vector<24x128xf32>
    %537 = arith.mulf %535, %536 : vector<24x128xf32>
    %538 = vector.broadcast %517 : vector<1x128xf32> to vector<24x128xf32>
    %539 = arith.addf %537, %538 : vector<24x128xf32>
    %540 = tpu.iota {dimensions = array<i32: 2>} : vector<1x1x24xi32>
    %c19_i32 = arith.constant 19 : i32
    %541 = vector.broadcast %c19_i32 : i32 to vector<1x1x24xi32>
    %542 = arith.cmpi sge, %540, %541 : vector<1x1x24xi32>
    %cst_255 = arith.constant -1.000000e+30 : f32
    %cst_256 = arith.constant 0.000000e+00 : f32
    %543 = vector.broadcast %cst_255 : f32 to vector<1x1x24xf32>
    %544 = vector.broadcast %cst_256 : f32 to vector<1x1x24xf32>
    %545 = arith.select %542, %543, %544 : vector<1x1x24xi1>, vector<1x1x24xf32>
    %c0_257 = arith.constant 0 : index
    %c0_258 = arith.constant 0 : index
    %c0_259 = arith.constant 0 : index
    %546 = vector.load %arg21[%c0_257, %c0_258, %c0_259] : memref<2x1x128xf32, #tpu.memory_space<vmem>>, vector<1x1x128xf32>
    %547 = vector.shape_cast %546 : vector<1x1x128xf32> to vector<1x128xf32>
    %c0_260 = arith.constant 0 : index
    %c0_261 = arith.constant 0 : index
    %c0_262 = arith.constant 0 : index
    %548 = vector.load %arg22[%c0_260, %c0_261, %c0_262] : memref<2x1x128xf32, #tpu.memory_space<vmem>>, vector<1x1x128xf32>
    %549 = vector.shape_cast %548 : vector<1x1x128xf32> to vector<1x128xf32>
    %cst_263 = arith.constant dense<0.000000e+00> : vector<24xf32>
    %550 = vector.multi_reduction <add>, %539, %cst_263 [1] : vector<24x128xf32> to vector<24xf32>
    %551 = vector.shape_cast %550 : vector<24xf32> to vector<24x1xf32>
    %cst_264 = arith.constant 1.280000e+02 : f32
    %552 = vector.broadcast %cst_264 : f32 to vector<24x1xf32>
    %553 = arith.divf %551, %552 : vector<24x1xf32>
    %554 = vector.broadcast %553 : vector<24x1xf32> to vector<24x128xf32>
    %555 = arith.subf %539, %554 : vector<24x128xf32>
    %556 = arith.mulf %555, %555 : vector<24x128xf32>
    %cst_265 = arith.constant dense<0.000000e+00> : vector<24xf32>
    %557 = vector.multi_reduction <add>, %556, %cst_265 [1] : vector<24x128xf32> to vector<24xf32>
    %558 = vector.shape_cast %557 : vector<24xf32> to vector<24x1xf32>
    %cst_266 = arith.constant 1.280000e+02 : f32
    %559 = vector.broadcast %cst_266 : f32 to vector<24x1xf32>
    %560 = arith.divf %558, %559 : vector<24x1xf32>
    %561 = vector.broadcast %553 : vector<24x1xf32> to vector<24x128xf32>
    %562 = arith.subf %539, %561 : vector<24x128xf32>
    %cst_267 = arith.constant 9.99999974E-6 : f32
    %563 = vector.broadcast %cst_267 : f32 to vector<24x1xf32>
    %564 = arith.addf %560, %563 : vector<24x1xf32>
    %565 = math.rsqrt %564 : vector<24x1xf32>
    %566 = vector.broadcast %565 : vector<24x1xf32> to vector<24x128xf32>
    %567 = arith.mulf %562, %566 : vector<24x128xf32>
    %568 = vector.broadcast %547 : vector<1x128xf32> to vector<24x128xf32>
    %569 = arith.mulf %567, %568 : vector<24x128xf32>
    %570 = vector.broadcast %549 : vector<1x128xf32> to vector<24x128xf32>
    %571 = arith.addf %569, %570 : vector<24x128xf32>
    %c0_268 = arith.constant 0 : index
    %c0_269 = arith.constant 0 : index
    %c0_270 = arith.constant 0 : index
    %572 = vector.load %arg23[%c0_268, %c0_269, %c0_270] : memref<2x128x384xf32, #tpu.memory_space<vmem>>, vector<1x128x384xf32>
    %573 = vector.shape_cast %572 : vector<1x128x384xf32> to vector<128x384xf32>
    %cst_271 = arith.constant dense<0.000000e+00> : vector<24x384xf32>
    %574 = tpu.matmul %571, %573, %cst_271 {dimension_numbers = #tpu.dot_dimension_numbers<[1], [0], [0], [1], [0, 0, 1, 1], [], []>} : vector<24x128xf32>, vector<128x384xf32>, vector<24x384xf32> -> vector<24x384xf32>
    %c0_272 = arith.constant 0 : index
    %c0_273 = arith.constant 0 : index
    %c0_274 = arith.constant 0 : index
    %575 = vector.load %arg24[%c0_272, %c0_273, %c0_274] : memref<2x1x384xf32, #tpu.memory_space<vmem>>, vector<1x1x384xf32>
    %576 = vector.shape_cast %575 : vector<1x1x384xf32> to vector<1x384xf32>
    %577 = vector.broadcast %576 : vector<1x384xf32> to vector<24x384xf32>
    %578 = arith.addf %574, %577 : vector<24x384xf32>
    %579 = vector.extract_strided_slice %578 {offsets = [0, 0], sizes = [24, 32], strides = [1, 1]} : vector<24x384xf32> to vector<24x32xf32>
    %580 = vector.shape_cast %579 : vector<24x32xf32> to vector<1x24x32xf32>
    %581 = vector.extract_strided_slice %578 {offsets = [0, 128], sizes = [24, 32], strides = [1, 1]} : vector<24x384xf32> to vector<24x32xf32>
    %582 = vector.shape_cast %581 : vector<24x32xf32> to vector<1x24x32xf32>
    %583 = vector.extract_strided_slice %578 {offsets = [0, 256], sizes = [24, 32], strides = [1, 1]} : vector<24x384xf32> to vector<24x32xf32>
    %584 = vector.shape_cast %583 : vector<24x32xf32> to vector<1x24x32xf32>
    "tpu.trace_start"() <{level = 10 : i32, message = "bqd,bkd->bqk"}> : () -> ()
    %cst_275 = arith.constant dense<0.000000e+00> : vector<1x24x24xf32>
    %585 = tpu.matmul %580, %582, %cst_275 {dimension_numbers = #tpu.dot_dimension_numbers<[2], [2], [1], [1], [0, 0, 0, 1, 1, 1], [0], [0]>} : vector<1x24x32xf32>, vector<1x24x32xf32>, vector<1x24x24xf32> -> vector<1x24x24xf32>
    "tpu.trace_stop"() : () -> ()
    %cst_276 = arith.constant 0.176776692 : f32
    %586 = vector.broadcast %cst_276 : f32 to vector<1x24x24xf32>
    %587 = arith.mulf %585, %586 : vector<1x24x24xf32>
    %588 = vector.broadcast %545 : vector<1x1x24xf32> to vector<1x24x24xf32>
    %589 = arith.addf %587, %588 : vector<1x24x24xf32>
    %cst_277 = arith.constant dense<0xFF800000> : vector<1x24xf32>
    %590 = vector.multi_reduction <maximumf>, %589, %cst_277 [2] : vector<1x24x24xf32> to vector<1x24xf32>
    %591 = vector.shape_cast %590 : vector<1x24xf32> to vector<1x24x1xf32>
    %592 = vector.broadcast %591 : vector<1x24x1xf32> to vector<1x24x24xf32>
    %593 = arith.subf %589, %592 : vector<1x24x24xf32>
    %594 = math.exp %593 : vector<1x24x24xf32>
    "tpu.trace_start"() <{level = 10 : i32, message = "bqk,bkd->bqd"}> : () -> ()
    %cst_278 = arith.constant dense<0.000000e+00> : vector<1x24x32xf32>
    %595 = tpu.matmul %594, %584, %cst_278 {dimension_numbers = #tpu.dot_dimension_numbers<[2], [1], [1], [2], [0, 0, 0, 1, 1, 2], [0], [0]>} : vector<1x24x24xf32>, vector<1x24x32xf32>, vector<1x24x32xf32> -> vector<1x24x32xf32>
    "tpu.trace_stop"() : () -> ()
    %cst_279 = arith.constant dense<0.000000e+00> : vector<1x24xf32>
    %596 = vector.multi_reduction <add>, %594, %cst_279 [2] : vector<1x24x24xf32> to vector<1x24xf32>
    %597 = vector.shape_cast %596 : vector<1x24xf32> to vector<1x24x1xf32>
    %598 = vector.broadcast %597 : vector<1x24x1xf32> to vector<1x24x32xf32>
    %599 = arith.divf %595, %598 : vector<1x24x32xf32>
    %600 = vector.extract_strided_slice %578 {offsets = [0, 32], sizes = [24, 32], strides = [1, 1]} : vector<24x384xf32> to vector<24x32xf32>
    %601 = vector.shape_cast %600 : vector<24x32xf32> to vector<1x24x32xf32>
    %602 = vector.extract_strided_slice %578 {offsets = [0, 160], sizes = [24, 32], strides = [1, 1]} : vector<24x384xf32> to vector<24x32xf32>
    %603 = vector.shape_cast %602 : vector<24x32xf32> to vector<1x24x32xf32>
    %604 = vector.extract_strided_slice %578 {offsets = [0, 288], sizes = [24, 32], strides = [1, 1]} : vector<24x384xf32> to vector<24x32xf32>
    %605 = vector.shape_cast %604 : vector<24x32xf32> to vector<1x24x32xf32>
    "tpu.trace_start"() <{level = 10 : i32, message = "bqd,bkd->bqk"}> : () -> ()
    %cst_280 = arith.constant dense<0.000000e+00> : vector<1x24x24xf32>
    %606 = tpu.matmul %601, %603, %cst_280 {dimension_numbers = #tpu.dot_dimension_numbers<[2], [2], [1], [1], [0, 0, 0, 1, 1, 1], [0], [0]>} : vector<1x24x32xf32>, vector<1x24x32xf32>, vector<1x24x24xf32> -> vector<1x24x24xf32>
    "tpu.trace_stop"() : () -> ()
    %cst_281 = arith.constant 0.176776692 : f32
    %607 = vector.broadcast %cst_281 : f32 to vector<1x24x24xf32>
    %608 = arith.mulf %606, %607 : vector<1x24x24xf32>
    %609 = vector.broadcast %545 : vector<1x1x24xf32> to vector<1x24x24xf32>
    %610 = arith.addf %608, %609 : vector<1x24x24xf32>
    %cst_282 = arith.constant dense<0xFF800000> : vector<1x24xf32>
    %611 = vector.multi_reduction <maximumf>, %610, %cst_282 [2] : vector<1x24x24xf32> to vector<1x24xf32>
    %612 = vector.shape_cast %611 : vector<1x24xf32> to vector<1x24x1xf32>
    %613 = vector.broadcast %612 : vector<1x24x1xf32> to vector<1x24x24xf32>
    %614 = arith.subf %610, %613 : vector<1x24x24xf32>
    %615 = math.exp %614 : vector<1x24x24xf32>
    "tpu.trace_start"() <{level = 10 : i32, message = "bqk,bkd->bqd"}> : () -> ()
    %cst_283 = arith.constant dense<0.000000e+00> : vector<1x24x32xf32>
    %616 = tpu.matmul %615, %605, %cst_283 {dimension_numbers = #tpu.dot_dimension_numbers<[2], [1], [1], [2], [0, 0, 0, 1, 1, 2], [0], [0]>} : vector<1x24x24xf32>, vector<1x24x32xf32>, vector<1x24x32xf32> -> vector<1x24x32xf32>
    "tpu.trace_stop"() : () -> ()
    %cst_284 = arith.constant dense<0.000000e+00> : vector<1x24xf32>
    %617 = vector.multi_reduction <add>, %615, %cst_284 [2] : vector<1x24x24xf32> to vector<1x24xf32>
    %618 = vector.shape_cast %617 : vector<1x24xf32> to vector<1x24x1xf32>
    %619 = vector.broadcast %618 : vector<1x24x1xf32> to vector<1x24x32xf32>
    %620 = arith.divf %616, %619 : vector<1x24x32xf32>
    %621 = vector.extract_strided_slice %578 {offsets = [0, 64], sizes = [24, 32], strides = [1, 1]} : vector<24x384xf32> to vector<24x32xf32>
    %622 = vector.shape_cast %621 : vector<24x32xf32> to vector<1x24x32xf32>
    %623 = vector.extract_strided_slice %578 {offsets = [0, 192], sizes = [24, 32], strides = [1, 1]} : vector<24x384xf32> to vector<24x32xf32>
    %624 = vector.shape_cast %623 : vector<24x32xf32> to vector<1x24x32xf32>
    %625 = vector.extract_strided_slice %578 {offsets = [0, 320], sizes = [24, 32], strides = [1, 1]} : vector<24x384xf32> to vector<24x32xf32>
    %626 = vector.shape_cast %625 : vector<24x32xf32> to vector<1x24x32xf32>
    "tpu.trace_start"() <{level = 10 : i32, message = "bqd,bkd->bqk"}> : () -> ()
    %cst_285 = arith.constant dense<0.000000e+00> : vector<1x24x24xf32>
    %627 = tpu.matmul %622, %624, %cst_285 {dimension_numbers = #tpu.dot_dimension_numbers<[2], [2], [1], [1], [0, 0, 0, 1, 1, 1], [0], [0]>} : vector<1x24x32xf32>, vector<1x24x32xf32>, vector<1x24x24xf32> -> vector<1x24x24xf32>
    "tpu.trace_stop"() : () -> ()
    %cst_286 = arith.constant 0.176776692 : f32
    %628 = vector.broadcast %cst_286 : f32 to vector<1x24x24xf32>
    %629 = arith.mulf %627, %628 : vector<1x24x24xf32>
    %630 = vector.broadcast %545 : vector<1x1x24xf32> to vector<1x24x24xf32>
    %631 = arith.addf %629, %630 : vector<1x24x24xf32>
    %cst_287 = arith.constant dense<0xFF800000> : vector<1x24xf32>
    %632 = vector.multi_reduction <maximumf>, %631, %cst_287 [2] : vector<1x24x24xf32> to vector<1x24xf32>
    %633 = vector.shape_cast %632 : vector<1x24xf32> to vector<1x24x1xf32>
    %634 = vector.broadcast %633 : vector<1x24x1xf32> to vector<1x24x24xf32>
    %635 = arith.subf %631, %634 : vector<1x24x24xf32>
    %636 = math.exp %635 : vector<1x24x24xf32>
    "tpu.trace_start"() <{level = 10 : i32, message = "bqk,bkd->bqd"}> : () -> ()
    %cst_288 = arith.constant dense<0.000000e+00> : vector<1x24x32xf32>
    %637 = tpu.matmul %636, %626, %cst_288 {dimension_numbers = #tpu.dot_dimension_numbers<[2], [1], [1], [2], [0, 0, 0, 1, 1, 2], [0], [0]>} : vector<1x24x24xf32>, vector<1x24x32xf32>, vector<1x24x32xf32> -> vector<1x24x32xf32>
    "tpu.trace_stop"() : () -> ()
    %cst_289 = arith.constant dense<0.000000e+00> : vector<1x24xf32>
    %638 = vector.multi_reduction <add>, %636, %cst_289 [2] : vector<1x24x24xf32> to vector<1x24xf32>
    %639 = vector.shape_cast %638 : vector<1x24xf32> to vector<1x24x1xf32>
    %640 = vector.broadcast %639 : vector<1x24x1xf32> to vector<1x24x32xf32>
    %641 = arith.divf %637, %640 : vector<1x24x32xf32>
    %642 = vector.extract_strided_slice %578 {offsets = [0, 96], sizes = [24, 32], strides = [1, 1]} : vector<24x384xf32> to vector<24x32xf32>
    %643 = vector.shape_cast %642 : vector<24x32xf32> to vector<1x24x32xf32>
    %644 = vector.extract_strided_slice %578 {offsets = [0, 224], sizes = [24, 32], strides = [1, 1]} : vector<24x384xf32> to vector<24x32xf32>
    %645 = vector.shape_cast %644 : vector<24x32xf32> to vector<1x24x32xf32>
    %646 = vector.extract_strided_slice %578 {offsets = [0, 352], sizes = [24, 32], strides = [1, 1]} : vector<24x384xf32> to vector<24x32xf32>
    %647 = vector.shape_cast %646 : vector<24x32xf32> to vector<1x24x32xf32>
    "tpu.trace_start"() <{level = 10 : i32, message = "bqd,bkd->bqk"}> : () -> ()
    %cst_290 = arith.constant dense<0.000000e+00> : vector<1x24x24xf32>
    %648 = tpu.matmul %643, %645, %cst_290 {dimension_numbers = #tpu.dot_dimension_numbers<[2], [2], [1], [1], [0, 0, 0, 1, 1, 1], [0], [0]>} : vector<1x24x32xf32>, vector<1x24x32xf32>, vector<1x24x24xf32> -> vector<1x24x24xf32>
    "tpu.trace_stop"() : () -> ()
    %cst_291 = arith.constant 0.176776692 : f32
    %649 = vector.broadcast %cst_291 : f32 to vector<1x24x24xf32>
    %650 = arith.mulf %648, %649 : vector<1x24x24xf32>
    %651 = vector.broadcast %545 : vector<1x1x24xf32> to vector<1x24x24xf32>
    %652 = arith.addf %650, %651 : vector<1x24x24xf32>
    %cst_292 = arith.constant dense<0xFF800000> : vector<1x24xf32>
    %653 = vector.multi_reduction <maximumf>, %652, %cst_292 [2] : vector<1x24x24xf32> to vector<1x24xf32>
    %654 = vector.shape_cast %653 : vector<1x24xf32> to vector<1x24x1xf32>
    %655 = vector.broadcast %654 : vector<1x24x1xf32> to vector<1x24x24xf32>
    %656 = arith.subf %652, %655 : vector<1x24x24xf32>
    %657 = math.exp %656 : vector<1x24x24xf32>
    "tpu.trace_start"() <{level = 10 : i32, message = "bqk,bkd->bqd"}> : () -> ()
    %cst_293 = arith.constant dense<0.000000e+00> : vector<1x24x32xf32>
    %658 = tpu.matmul %657, %647, %cst_293 {dimension_numbers = #tpu.dot_dimension_numbers<[2], [1], [1], [2], [0, 0, 0, 1, 1, 2], [0], [0]>} : vector<1x24x24xf32>, vector<1x24x32xf32>, vector<1x24x32xf32> -> vector<1x24x32xf32>
    "tpu.trace_stop"() : () -> ()
    %cst_294 = arith.constant dense<0.000000e+00> : vector<1x24xf32>
    %659 = vector.multi_reduction <add>, %657, %cst_294 [2] : vector<1x24x24xf32> to vector<1x24xf32>
    %660 = vector.shape_cast %659 : vector<1x24xf32> to vector<1x24x1xf32>
    %661 = vector.broadcast %660 : vector<1x24x1xf32> to vector<1x24x32xf32>
    %662 = arith.divf %658, %661 : vector<1x24x32xf32>
    %663 = tpu.concatenate %599, %620, %641, %662 in 2 : vector<1x24x32xf32>, vector<1x24x32xf32>, vector<1x24x32xf32>, vector<1x24x32xf32> -> vector<1x24x128xf32>
    %664 = vector.shape_cast %663 : vector<1x24x128xf32> to vector<24x128xf32>
    %c0_295 = arith.constant 0 : index
    %c0_296 = arith.constant 0 : index
    %c0_297 = arith.constant 0 : index
    %665 = vector.load %arg25[%c0_295, %c0_296, %c0_297] : memref<2x128x128xf32, #tpu.memory_space<vmem>>, vector<1x128x128xf32>
    %666 = vector.shape_cast %665 : vector<1x128x128xf32> to vector<128x128xf32>
    %cst_298 = arith.constant dense<0.000000e+00> : vector<24x128xf32>
    %667 = tpu.matmul %664, %666, %cst_298 {dimension_numbers = #tpu.dot_dimension_numbers<[1], [0], [0], [1], [0, 0, 1, 1], [], []>} : vector<24x128xf32>, vector<128x128xf32>, vector<24x128xf32> -> vector<24x128xf32>
    %c0_299 = arith.constant 0 : index
    %c0_300 = arith.constant 0 : index
    %c0_301 = arith.constant 0 : index
    %668 = vector.load %arg26[%c0_299, %c0_300, %c0_301] : memref<2x1x128xf32, #tpu.memory_space<vmem>>, vector<1x1x128xf32>
    %669 = vector.shape_cast %668 : vector<1x1x128xf32> to vector<1x128xf32>
    %670 = vector.broadcast %669 : vector<1x128xf32> to vector<24x128xf32>
    %671 = arith.addf %667, %670 : vector<24x128xf32>
    %672 = arith.addf %539, %671 : vector<24x128xf32>
    %c0_302 = arith.constant 0 : index
    %c0_303 = arith.constant 0 : index
    %c0_304 = arith.constant 0 : index
    %673 = vector.load %arg27[%c0_302, %c0_303, %c0_304] : memref<2x1x128xf32, #tpu.memory_space<vmem>>, vector<1x1x128xf32>
    %674 = vector.shape_cast %673 : vector<1x1x128xf32> to vector<1x128xf32>
    %c0_305 = arith.constant 0 : index
    %c0_306 = arith.constant 0 : index
    %c0_307 = arith.constant 0 : index
    %675 = vector.load %arg28[%c0_305, %c0_306, %c0_307] : memref<2x1x128xf32, #tpu.memory_space<vmem>>, vector<1x1x128xf32>
    %676 = vector.shape_cast %675 : vector<1x1x128xf32> to vector<1x128xf32>
    %cst_308 = arith.constant dense<0.000000e+00> : vector<24xf32>
    %677 = vector.multi_reduction <add>, %672, %cst_308 [1] : vector<24x128xf32> to vector<24xf32>
    %678 = vector.shape_cast %677 : vector<24xf32> to vector<24x1xf32>
    %cst_309 = arith.constant 1.280000e+02 : f32
    %679 = vector.broadcast %cst_309 : f32 to vector<24x1xf32>
    %680 = arith.divf %678, %679 : vector<24x1xf32>
    %681 = vector.broadcast %680 : vector<24x1xf32> to vector<24x128xf32>
    %682 = arith.subf %672, %681 : vector<24x128xf32>
    %683 = arith.mulf %682, %682 : vector<24x128xf32>
    %cst_310 = arith.constant dense<0.000000e+00> : vector<24xf32>
    %684 = vector.multi_reduction <add>, %683, %cst_310 [1] : vector<24x128xf32> to vector<24xf32>
    %685 = vector.shape_cast %684 : vector<24xf32> to vector<24x1xf32>
    %cst_311 = arith.constant 1.280000e+02 : f32
    %686 = vector.broadcast %cst_311 : f32 to vector<24x1xf32>
    %687 = arith.divf %685, %686 : vector<24x1xf32>
    %688 = vector.broadcast %680 : vector<24x1xf32> to vector<24x128xf32>
    %689 = arith.subf %672, %688 : vector<24x128xf32>
    %cst_312 = arith.constant 9.99999974E-6 : f32
    %690 = vector.broadcast %cst_312 : f32 to vector<24x1xf32>
    %691 = arith.addf %687, %690 : vector<24x1xf32>
    %692 = math.rsqrt %691 : vector<24x1xf32>
    %693 = vector.broadcast %692 : vector<24x1xf32> to vector<24x128xf32>
    %694 = arith.mulf %689, %693 : vector<24x128xf32>
    %695 = vector.broadcast %674 : vector<1x128xf32> to vector<24x128xf32>
    %696 = arith.mulf %694, %695 : vector<24x128xf32>
    %697 = vector.broadcast %676 : vector<1x128xf32> to vector<24x128xf32>
    %698 = arith.addf %696, %697 : vector<24x128xf32>
    %c0_313 = arith.constant 0 : index
    %c0_314 = arith.constant 0 : index
    %c0_315 = arith.constant 0 : index
    %699 = vector.load %arg29[%c0_313, %c0_314, %c0_315] : memref<2x128x512xf32, #tpu.memory_space<vmem>>, vector<1x128x512xf32>
    %700 = vector.shape_cast %699 : vector<1x128x512xf32> to vector<128x512xf32>
    %cst_316 = arith.constant dense<0.000000e+00> : vector<24x512xf32>
    %701 = tpu.matmul %698, %700, %cst_316 {dimension_numbers = #tpu.dot_dimension_numbers<[1], [0], [0], [1], [0, 0, 1, 1], [], []>} : vector<24x128xf32>, vector<128x512xf32>, vector<24x512xf32> -> vector<24x512xf32>
    %c0_317 = arith.constant 0 : index
    %c0_318 = arith.constant 0 : index
    %c0_319 = arith.constant 0 : index
    %702 = vector.load %arg30[%c0_317, %c0_318, %c0_319] : memref<2x1x512xf32, #tpu.memory_space<vmem>>, vector<1x1x512xf32>
    %703 = vector.shape_cast %702 : vector<1x1x512xf32> to vector<1x512xf32>
    %704 = vector.broadcast %703 : vector<1x512xf32> to vector<24x512xf32>
    %705 = arith.addf %701, %704 : vector<24x512xf32>
    %cst_320 = arith.constant 1.702000e+00 : f32
    %706 = vector.broadcast %cst_320 : f32 to vector<24x512xf32>
    %707 = arith.mulf %706, %705 : vector<24x512xf32>
    %708 = arith.negf %707 : vector<24x512xf32>
    %709 = math.exp %708 : vector<24x512xf32>
    %cst_321 = arith.constant 1.000000e+00 : f32
    %710 = vector.broadcast %cst_321 : f32 to vector<24x512xf32>
    %711 = arith.addf %710, %709 : vector<24x512xf32>
    %712 = arith.divf %710, %711 : vector<24x512xf32>
    %713 = arith.mulf %705, %712 : vector<24x512xf32>
    %c0_322 = arith.constant 0 : index
    %c0_323 = arith.constant 0 : index
    %c0_324 = arith.constant 0 : index
    %714 = vector.load %arg31[%c0_322, %c0_323, %c0_324] : memref<2x512x128xf32, #tpu.memory_space<vmem>>, vector<1x512x128xf32>
    %715 = vector.shape_cast %714 : vector<1x512x128xf32> to vector<512x128xf32>
    %cst_325 = arith.constant dense<0.000000e+00> : vector<24x128xf32>
    %716 = tpu.matmul %713, %715, %cst_325 {dimension_numbers = #tpu.dot_dimension_numbers<[1], [0], [0], [1], [0, 0, 1, 1], [], []>} : vector<24x512xf32>, vector<512x128xf32>, vector<24x128xf32> -> vector<24x128xf32>
    %c0_326 = arith.constant 0 : index
    %c0_327 = arith.constant 0 : index
    %c0_328 = arith.constant 0 : index
    %717 = vector.load %arg32[%c0_326, %c0_327, %c0_328] : memref<2x1x128xf32, #tpu.memory_space<vmem>>, vector<1x1x128xf32>
    %718 = vector.shape_cast %717 : vector<1x1x128xf32> to vector<1x128xf32>
    %719 = vector.broadcast %718 : vector<1x128xf32> to vector<24x128xf32>
    %720 = arith.addf %716, %719 : vector<24x128xf32>
    %721 = arith.addf %672, %720 : vector<24x128xf32>
    %c1_329 = arith.constant 1 : index
    %c0_330 = arith.constant 0 : index
    %c0_331 = arith.constant 0 : index
    %722 = vector.load %arg21[%c1_329, %c0_330, %c0_331] : memref<2x1x128xf32, #tpu.memory_space<vmem>>, vector<1x1x128xf32>
    %723 = vector.shape_cast %722 : vector<1x1x128xf32> to vector<1x128xf32>
    %c1_332 = arith.constant 1 : index
    %c0_333 = arith.constant 0 : index
    %c0_334 = arith.constant 0 : index
    %724 = vector.load %arg22[%c1_332, %c0_333, %c0_334] : memref<2x1x128xf32, #tpu.memory_space<vmem>>, vector<1x1x128xf32>
    %725 = vector.shape_cast %724 : vector<1x1x128xf32> to vector<1x128xf32>
    %cst_335 = arith.constant dense<0.000000e+00> : vector<24xf32>
    %726 = vector.multi_reduction <add>, %721, %cst_335 [1] : vector<24x128xf32> to vector<24xf32>
    %727 = vector.shape_cast %726 : vector<24xf32> to vector<24x1xf32>
    %cst_336 = arith.constant 1.280000e+02 : f32
    %728 = vector.broadcast %cst_336 : f32 to vector<24x1xf32>
    %729 = arith.divf %727, %728 : vector<24x1xf32>
    %730 = vector.broadcast %729 : vector<24x1xf32> to vector<24x128xf32>
    %731 = arith.subf %721, %730 : vector<24x128xf32>
    %732 = arith.mulf %731, %731 : vector<24x128xf32>
    %cst_337 = arith.constant dense<0.000000e+00> : vector<24xf32>
    %733 = vector.multi_reduction <add>, %732, %cst_337 [1] : vector<24x128xf32> to vector<24xf32>
    %734 = vector.shape_cast %733 : vector<24xf32> to vector<24x1xf32>
    %cst_338 = arith.constant 1.280000e+02 : f32
    %735 = vector.broadcast %cst_338 : f32 to vector<24x1xf32>
    %736 = arith.divf %734, %735 : vector<24x1xf32>
    %737 = vector.broadcast %729 : vector<24x1xf32> to vector<24x128xf32>
    %738 = arith.subf %721, %737 : vector<24x128xf32>
    %cst_339 = arith.constant 9.99999974E-6 : f32
    %739 = vector.broadcast %cst_339 : f32 to vector<24x1xf32>
    %740 = arith.addf %736, %739 : vector<24x1xf32>
    %741 = math.rsqrt %740 : vector<24x1xf32>
    %742 = vector.broadcast %741 : vector<24x1xf32> to vector<24x128xf32>
    %743 = arith.mulf %738, %742 : vector<24x128xf32>
    %744 = vector.broadcast %723 : vector<1x128xf32> to vector<24x128xf32>
    %745 = arith.mulf %743, %744 : vector<24x128xf32>
    %746 = vector.broadcast %725 : vector<1x128xf32> to vector<24x128xf32>
    %747 = arith.addf %745, %746 : vector<24x128xf32>
    %c1_340 = arith.constant 1 : index
    %c0_341 = arith.constant 0 : index
    %c0_342 = arith.constant 0 : index
    %748 = vector.load %arg23[%c1_340, %c0_341, %c0_342] : memref<2x128x384xf32, #tpu.memory_space<vmem>>, vector<1x128x384xf32>
    %749 = vector.shape_cast %748 : vector<1x128x384xf32> to vector<128x384xf32>
    %cst_343 = arith.constant dense<0.000000e+00> : vector<24x384xf32>
    %750 = tpu.matmul %747, %749, %cst_343 {dimension_numbers = #tpu.dot_dimension_numbers<[1], [0], [0], [1], [0, 0, 1, 1], [], []>} : vector<24x128xf32>, vector<128x384xf32>, vector<24x384xf32> -> vector<24x384xf32>
    %c1_344 = arith.constant 1 : index
    %c0_345 = arith.constant 0 : index
    %c0_346 = arith.constant 0 : index
    %751 = vector.load %arg24[%c1_344, %c0_345, %c0_346] : memref<2x1x384xf32, #tpu.memory_space<vmem>>, vector<1x1x384xf32>
    %752 = vector.shape_cast %751 : vector<1x1x384xf32> to vector<1x384xf32>
    %753 = vector.broadcast %752 : vector<1x384xf32> to vector<24x384xf32>
    %754 = arith.addf %750, %753 : vector<24x384xf32>
    %755 = vector.extract_strided_slice %754 {offsets = [0, 0], sizes = [24, 32], strides = [1, 1]} : vector<24x384xf32> to vector<24x32xf32>
    %756 = vector.shape_cast %755 : vector<24x32xf32> to vector<1x24x32xf32>
    %757 = vector.extract_strided_slice %754 {offsets = [0, 128], sizes = [24, 32], strides = [1, 1]} : vector<24x384xf32> to vector<24x32xf32>
    %758 = vector.shape_cast %757 : vector<24x32xf32> to vector<1x24x32xf32>
    %759 = vector.extract_strided_slice %754 {offsets = [0, 256], sizes = [24, 32], strides = [1, 1]} : vector<24x384xf32> to vector<24x32xf32>
    %760 = vector.shape_cast %759 : vector<24x32xf32> to vector<1x24x32xf32>
    "tpu.trace_start"() <{level = 10 : i32, message = "bqd,bkd->bqk"}> : () -> ()
    %cst_347 = arith.constant dense<0.000000e+00> : vector<1x24x24xf32>
    %761 = tpu.matmul %756, %758, %cst_347 {dimension_numbers = #tpu.dot_dimension_numbers<[2], [2], [1], [1], [0, 0, 0, 1, 1, 1], [0], [0]>} : vector<1x24x32xf32>, vector<1x24x32xf32>, vector<1x24x24xf32> -> vector<1x24x24xf32>
    "tpu.trace_stop"() : () -> ()
    %cst_348 = arith.constant 0.176776692 : f32
    %762 = vector.broadcast %cst_348 : f32 to vector<1x24x24xf32>
    %763 = arith.mulf %761, %762 : vector<1x24x24xf32>
    %764 = vector.broadcast %545 : vector<1x1x24xf32> to vector<1x24x24xf32>
    %765 = arith.addf %763, %764 : vector<1x24x24xf32>
    %cst_349 = arith.constant dense<0xFF800000> : vector<1x24xf32>
    %766 = vector.multi_reduction <maximumf>, %765, %cst_349 [2] : vector<1x24x24xf32> to vector<1x24xf32>
    %767 = vector.shape_cast %766 : vector<1x24xf32> to vector<1x24x1xf32>
    %768 = vector.broadcast %767 : vector<1x24x1xf32> to vector<1x24x24xf32>
    %769 = arith.subf %765, %768 : vector<1x24x24xf32>
    %770 = math.exp %769 : vector<1x24x24xf32>
    "tpu.trace_start"() <{level = 10 : i32, message = "bqk,bkd->bqd"}> : () -> ()
    %cst_350 = arith.constant dense<0.000000e+00> : vector<1x24x32xf32>
    %771 = tpu.matmul %770, %760, %cst_350 {dimension_numbers = #tpu.dot_dimension_numbers<[2], [1], [1], [2], [0, 0, 0, 1, 1, 2], [0], [0]>} : vector<1x24x24xf32>, vector<1x24x32xf32>, vector<1x24x32xf32> -> vector<1x24x32xf32>
    "tpu.trace_stop"() : () -> ()
    %cst_351 = arith.constant dense<0.000000e+00> : vector<1x24xf32>
    %772 = vector.multi_reduction <add>, %770, %cst_351 [2] : vector<1x24x24xf32> to vector<1x24xf32>
    %773 = vector.shape_cast %772 : vector<1x24xf32> to vector<1x24x1xf32>
    %774 = vector.broadcast %773 : vector<1x24x1xf32> to vector<1x24x32xf32>
    %775 = arith.divf %771, %774 : vector<1x24x32xf32>
    %776 = vector.extract_strided_slice %754 {offsets = [0, 32], sizes = [24, 32], strides = [1, 1]} : vector<24x384xf32> to vector<24x32xf32>
    %777 = vector.shape_cast %776 : vector<24x32xf32> to vector<1x24x32xf32>
    %778 = vector.extract_strided_slice %754 {offsets = [0, 160], sizes = [24, 32], strides = [1, 1]} : vector<24x384xf32> to vector<24x32xf32>
    %779 = vector.shape_cast %778 : vector<24x32xf32> to vector<1x24x32xf32>
    %780 = vector.extract_strided_slice %754 {offsets = [0, 288], sizes = [24, 32], strides = [1, 1]} : vector<24x384xf32> to vector<24x32xf32>
    %781 = vector.shape_cast %780 : vector<24x32xf32> to vector<1x24x32xf32>
    "tpu.trace_start"() <{level = 10 : i32, message = "bqd,bkd->bqk"}> : () -> ()
    %cst_352 = arith.constant dense<0.000000e+00> : vector<1x24x24xf32>
    %782 = tpu.matmul %777, %779, %cst_352 {dimension_numbers = #tpu.dot_dimension_numbers<[2], [2], [1], [1], [0, 0, 0, 1, 1, 1], [0], [0]>} : vector<1x24x32xf32>, vector<1x24x32xf32>, vector<1x24x24xf32> -> vector<1x24x24xf32>
    "tpu.trace_stop"() : () -> ()
    %cst_353 = arith.constant 0.176776692 : f32
    %783 = vector.broadcast %cst_353 : f32 to vector<1x24x24xf32>
    %784 = arith.mulf %782, %783 : vector<1x24x24xf32>
    %785 = vector.broadcast %545 : vector<1x1x24xf32> to vector<1x24x24xf32>
    %786 = arith.addf %784, %785 : vector<1x24x24xf32>
    %cst_354 = arith.constant dense<0xFF800000> : vector<1x24xf32>
    %787 = vector.multi_reduction <maximumf>, %786, %cst_354 [2] : vector<1x24x24xf32> to vector<1x24xf32>
    %788 = vector.shape_cast %787 : vector<1x24xf32> to vector<1x24x1xf32>
    %789 = vector.broadcast %788 : vector<1x24x1xf32> to vector<1x24x24xf32>
    %790 = arith.subf %786, %789 : vector<1x24x24xf32>
    %791 = math.exp %790 : vector<1x24x24xf32>
    "tpu.trace_start"() <{level = 10 : i32, message = "bqk,bkd->bqd"}> : () -> ()
    %cst_355 = arith.constant dense<0.000000e+00> : vector<1x24x32xf32>
    %792 = tpu.matmul %791, %781, %cst_355 {dimension_numbers = #tpu.dot_dimension_numbers<[2], [1], [1], [2], [0, 0, 0, 1, 1, 2], [0], [0]>} : vector<1x24x24xf32>, vector<1x24x32xf32>, vector<1x24x32xf32> -> vector<1x24x32xf32>
    "tpu.trace_stop"() : () -> ()
    %cst_356 = arith.constant dense<0.000000e+00> : vector<1x24xf32>
    %793 = vector.multi_reduction <add>, %791, %cst_356 [2] : vector<1x24x24xf32> to vector<1x24xf32>
    %794 = vector.shape_cast %793 : vector<1x24xf32> to vector<1x24x1xf32>
    %795 = vector.broadcast %794 : vector<1x24x1xf32> to vector<1x24x32xf32>
    %796 = arith.divf %792, %795 : vector<1x24x32xf32>
    %797 = vector.extract_strided_slice %754 {offsets = [0, 64], sizes = [24, 32], strides = [1, 1]} : vector<24x384xf32> to vector<24x32xf32>
    %798 = vector.shape_cast %797 : vector<24x32xf32> to vector<1x24x32xf32>
    %799 = vector.extract_strided_slice %754 {offsets = [0, 192], sizes = [24, 32], strides = [1, 1]} : vector<24x384xf32> to vector<24x32xf32>
    %800 = vector.shape_cast %799 : vector<24x32xf32> to vector<1x24x32xf32>
    %801 = vector.extract_strided_slice %754 {offsets = [0, 320], sizes = [24, 32], strides = [1, 1]} : vector<24x384xf32> to vector<24x32xf32>
    %802 = vector.shape_cast %801 : vector<24x32xf32> to vector<1x24x32xf32>
    "tpu.trace_start"() <{level = 10 : i32, message = "bqd,bkd->bqk"}> : () -> ()
    %cst_357 = arith.constant dense<0.000000e+00> : vector<1x24x24xf32>
    %803 = tpu.matmul %798, %800, %cst_357 {dimension_numbers = #tpu.dot_dimension_numbers<[2], [2], [1], [1], [0, 0, 0, 1, 1, 1], [0], [0]>} : vector<1x24x32xf32>, vector<1x24x32xf32>, vector<1x24x24xf32> -> vector<1x24x24xf32>
    "tpu.trace_stop"() : () -> ()
    %cst_358 = arith.constant 0.176776692 : f32
    %804 = vector.broadcast %cst_358 : f32 to vector<1x24x24xf32>
    %805 = arith.mulf %803, %804 : vector<1x24x24xf32>
    %806 = vector.broadcast %545 : vector<1x1x24xf32> to vector<1x24x24xf32>
    %807 = arith.addf %805, %806 : vector<1x24x24xf32>
    %cst_359 = arith.constant dense<0xFF800000> : vector<1x24xf32>
    %808 = vector.multi_reduction <maximumf>, %807, %cst_359 [2] : vector<1x24x24xf32> to vector<1x24xf32>
    %809 = vector.shape_cast %808 : vector<1x24xf32> to vector<1x24x1xf32>
    %810 = vector.broadcast %809 : vector<1x24x1xf32> to vector<1x24x24xf32>
    %811 = arith.subf %807, %810 : vector<1x24x24xf32>
    %812 = math.exp %811 : vector<1x24x24xf32>
    "tpu.trace_start"() <{level = 10 : i32, message = "bqk,bkd->bqd"}> : () -> ()
    %cst_360 = arith.constant dense<0.000000e+00> : vector<1x24x32xf32>
    %813 = tpu.matmul %812, %802, %cst_360 {dimension_numbers = #tpu.dot_dimension_numbers<[2], [1], [1], [2], [0, 0, 0, 1, 1, 2], [0], [0]>} : vector<1x24x24xf32>, vector<1x24x32xf32>, vector<1x24x32xf32> -> vector<1x24x32xf32>
    "tpu.trace_stop"() : () -> ()
    %cst_361 = arith.constant dense<0.000000e+00> : vector<1x24xf32>
    %814 = vector.multi_reduction <add>, %812, %cst_361 [2] : vector<1x24x24xf32> to vector<1x24xf32>
    %815 = vector.shape_cast %814 : vector<1x24xf32> to vector<1x24x1xf32>
    %816 = vector.broadcast %815 : vector<1x24x1xf32> to vector<1x24x32xf32>
    %817 = arith.divf %813, %816 : vector<1x24x32xf32>
    %818 = vector.extract_strided_slice %754 {offsets = [0, 96], sizes = [24, 32], strides = [1, 1]} : vector<24x384xf32> to vector<24x32xf32>
    %819 = vector.shape_cast %818 : vector<24x32xf32> to vector<1x24x32xf32>
    %820 = vector.extract_strided_slice %754 {offsets = [0, 224], sizes = [24, 32], strides = [1, 1]} : vector<24x384xf32> to vector<24x32xf32>
    %821 = vector.shape_cast %820 : vector<24x32xf32> to vector<1x24x32xf32>
    %822 = vector.extract_strided_slice %754 {offsets = [0, 352], sizes = [24, 32], strides = [1, 1]} : vector<24x384xf32> to vector<24x32xf32>
    %823 = vector.shape_cast %822 : vector<24x32xf32> to vector<1x24x32xf32>
    "tpu.trace_start"() <{level = 10 : i32, message = "bqd,bkd->bqk"}> : () -> ()
    %cst_362 = arith.constant dense<0.000000e+00> : vector<1x24x24xf32>
    %824 = tpu.matmul %819, %821, %cst_362 {dimension_numbers = #tpu.dot_dimension_numbers<[2], [2], [1], [1], [0, 0, 0, 1, 1, 1], [0], [0]>} : vector<1x24x32xf32>, vector<1x24x32xf32>, vector<1x24x24xf32> -> vector<1x24x24xf32>
    "tpu.trace_stop"() : () -> ()
    %cst_363 = arith.constant 0.176776692 : f32
    %825 = vector.broadcast %cst_363 : f32 to vector<1x24x24xf32>
    %826 = arith.mulf %824, %825 : vector<1x24x24xf32>
    %827 = vector.broadcast %545 : vector<1x1x24xf32> to vector<1x24x24xf32>
    %828 = arith.addf %826, %827 : vector<1x24x24xf32>
    %cst_364 = arith.constant dense<0xFF800000> : vector<1x24xf32>
    %829 = vector.multi_reduction <maximumf>, %828, %cst_364 [2] : vector<1x24x24xf32> to vector<1x24xf32>
    %830 = vector.shape_cast %829 : vector<1x24xf32> to vector<1x24x1xf32>
    %831 = vector.broadcast %830 : vector<1x24x1xf32> to vector<1x24x24xf32>
    %832 = arith.subf %828, %831 : vector<1x24x24xf32>
    %833 = math.exp %832 : vector<1x24x24xf32>
    "tpu.trace_start"() <{level = 10 : i32, message = "bqk,bkd->bqd"}> : () -> ()
    %cst_365 = arith.constant dense<0.000000e+00> : vector<1x24x32xf32>
    %834 = tpu.matmul %833, %823, %cst_365 {dimension_numbers = #tpu.dot_dimension_numbers<[2], [1], [1], [2], [0, 0, 0, 1, 1, 2], [0], [0]>} : vector<1x24x24xf32>, vector<1x24x32xf32>, vector<1x24x32xf32> -> vector<1x24x32xf32>
    "tpu.trace_stop"() : () -> ()
    %cst_366 = arith.constant dense<0.000000e+00> : vector<1x24xf32>
    %835 = vector.multi_reduction <add>, %833, %cst_366 [2] : vector<1x24x24xf32> to vector<1x24xf32>
    %836 = vector.shape_cast %835 : vector<1x24xf32> to vector<1x24x1xf32>
    %837 = vector.broadcast %836 : vector<1x24x1xf32> to vector<1x24x32xf32>
    %838 = arith.divf %834, %837 : vector<1x24x32xf32>
    %839 = tpu.concatenate %775, %796, %817, %838 in 2 : vector<1x24x32xf32>, vector<1x24x32xf32>, vector<1x24x32xf32>, vector<1x24x32xf32> -> vector<1x24x128xf32>
    %840 = vector.shape_cast %839 : vector<1x24x128xf32> to vector<24x128xf32>
    %c1_367 = arith.constant 1 : index
    %c0_368 = arith.constant 0 : index
    %c0_369 = arith.constant 0 : index
    %841 = vector.load %arg25[%c1_367, %c0_368, %c0_369] : memref<2x128x128xf32, #tpu.memory_space<vmem>>, vector<1x128x128xf32>
    %842 = vector.shape_cast %841 : vector<1x128x128xf32> to vector<128x128xf32>
    %cst_370 = arith.constant dense<0.000000e+00> : vector<24x128xf32>
    %843 = tpu.matmul %840, %842, %cst_370 {dimension_numbers = #tpu.dot_dimension_numbers<[1], [0], [0], [1], [0, 0, 1, 1], [], []>} : vector<24x128xf32>, vector<128x128xf32>, vector<24x128xf32> -> vector<24x128xf32>
    %c1_371 = arith.constant 1 : index
    %c0_372 = arith.constant 0 : index
    %c0_373 = arith.constant 0 : index
    %844 = vector.load %arg26[%c1_371, %c0_372, %c0_373] : memref<2x1x128xf32, #tpu.memory_space<vmem>>, vector<1x1x128xf32>
    %845 = vector.shape_cast %844 : vector<1x1x128xf32> to vector<1x128xf32>
    %846 = vector.broadcast %845 : vector<1x128xf32> to vector<24x128xf32>
    %847 = arith.addf %843, %846 : vector<24x128xf32>
    %848 = arith.addf %721, %847 : vector<24x128xf32>
    %c1_374 = arith.constant 1 : index
    %c0_375 = arith.constant 0 : index
    %c0_376 = arith.constant 0 : index
    %849 = vector.load %arg27[%c1_374, %c0_375, %c0_376] : memref<2x1x128xf32, #tpu.memory_space<vmem>>, vector<1x1x128xf32>
    %850 = vector.shape_cast %849 : vector<1x1x128xf32> to vector<1x128xf32>
    %c1_377 = arith.constant 1 : index
    %c0_378 = arith.constant 0 : index
    %c0_379 = arith.constant 0 : index
    %851 = vector.load %arg28[%c1_377, %c0_378, %c0_379] : memref<2x1x128xf32, #tpu.memory_space<vmem>>, vector<1x1x128xf32>
    %852 = vector.shape_cast %851 : vector<1x1x128xf32> to vector<1x128xf32>
    %cst_380 = arith.constant dense<0.000000e+00> : vector<24xf32>
    %853 = vector.multi_reduction <add>, %848, %cst_380 [1] : vector<24x128xf32> to vector<24xf32>
    %854 = vector.shape_cast %853 : vector<24xf32> to vector<24x1xf32>
    %cst_381 = arith.constant 1.280000e+02 : f32
    %855 = vector.broadcast %cst_381 : f32 to vector<24x1xf32>
    %856 = arith.divf %854, %855 : vector<24x1xf32>
    %857 = vector.broadcast %856 : vector<24x1xf32> to vector<24x128xf32>
    %858 = arith.subf %848, %857 : vector<24x128xf32>
    %859 = arith.mulf %858, %858 : vector<24x128xf32>
    %cst_382 = arith.constant dense<0.000000e+00> : vector<24xf32>
    %860 = vector.multi_reduction <add>, %859, %cst_382 [1] : vector<24x128xf32> to vector<24xf32>
    %861 = vector.shape_cast %860 : vector<24xf32> to vector<24x1xf32>
    %cst_383 = arith.constant 1.280000e+02 : f32
    %862 = vector.broadcast %cst_383 : f32 to vector<24x1xf32>
    %863 = arith.divf %861, %862 : vector<24x1xf32>
    %864 = vector.broadcast %856 : vector<24x1xf32> to vector<24x128xf32>
    %865 = arith.subf %848, %864 : vector<24x128xf32>
    %cst_384 = arith.constant 9.99999974E-6 : f32
    %866 = vector.broadcast %cst_384 : f32 to vector<24x1xf32>
    %867 = arith.addf %863, %866 : vector<24x1xf32>
    %868 = math.rsqrt %867 : vector<24x1xf32>
    %869 = vector.broadcast %868 : vector<24x1xf32> to vector<24x128xf32>
    %870 = arith.mulf %865, %869 : vector<24x128xf32>
    %871 = vector.broadcast %850 : vector<1x128xf32> to vector<24x128xf32>
    %872 = arith.mulf %870, %871 : vector<24x128xf32>
    %873 = vector.broadcast %852 : vector<1x128xf32> to vector<24x128xf32>
    %874 = arith.addf %872, %873 : vector<24x128xf32>
    %c1_385 = arith.constant 1 : index
    %c0_386 = arith.constant 0 : index
    %c0_387 = arith.constant 0 : index
    %875 = vector.load %arg29[%c1_385, %c0_386, %c0_387] : memref<2x128x512xf32, #tpu.memory_space<vmem>>, vector<1x128x512xf32>
    %876 = vector.shape_cast %875 : vector<1x128x512xf32> to vector<128x512xf32>
    %cst_388 = arith.constant dense<0.000000e+00> : vector<24x512xf32>
    %877 = tpu.matmul %874, %876, %cst_388 {dimension_numbers = #tpu.dot_dimension_numbers<[1], [0], [0], [1], [0, 0, 1, 1], [], []>} : vector<24x128xf32>, vector<128x512xf32>, vector<24x512xf32> -> vector<24x512xf32>
    %c1_389 = arith.constant 1 : index
    %c0_390 = arith.constant 0 : index
    %c0_391 = arith.constant 0 : index
    %878 = vector.load %arg30[%c1_389, %c0_390, %c0_391] : memref<2x1x512xf32, #tpu.memory_space<vmem>>, vector<1x1x512xf32>
    %879 = vector.shape_cast %878 : vector<1x1x512xf32> to vector<1x512xf32>
    %880 = vector.broadcast %879 : vector<1x512xf32> to vector<24x512xf32>
    %881 = arith.addf %877, %880 : vector<24x512xf32>
    %cst_392 = arith.constant 1.702000e+00 : f32
    %882 = vector.broadcast %cst_392 : f32 to vector<24x512xf32>
    %883 = arith.mulf %882, %881 : vector<24x512xf32>
    %884 = arith.negf %883 : vector<24x512xf32>
    %885 = math.exp %884 : vector<24x512xf32>
    %cst_393 = arith.constant 1.000000e+00 : f32
    %886 = vector.broadcast %cst_393 : f32 to vector<24x512xf32>
    %887 = arith.addf %886, %885 : vector<24x512xf32>
    %888 = arith.divf %886, %887 : vector<24x512xf32>
    %889 = arith.mulf %881, %888 : vector<24x512xf32>
    %c1_394 = arith.constant 1 : index
    %c0_395 = arith.constant 0 : index
    %c0_396 = arith.constant 0 : index
    %890 = vector.load %arg31[%c1_394, %c0_395, %c0_396] : memref<2x512x128xf32, #tpu.memory_space<vmem>>, vector<1x512x128xf32>
    %891 = vector.shape_cast %890 : vector<1x512x128xf32> to vector<512x128xf32>
    %cst_397 = arith.constant dense<0.000000e+00> : vector<24x128xf32>
    %892 = tpu.matmul %889, %891, %cst_397 {dimension_numbers = #tpu.dot_dimension_numbers<[1], [0], [0], [1], [0, 0, 1, 1], [], []>} : vector<24x512xf32>, vector<512x128xf32>, vector<24x128xf32> -> vector<24x128xf32>
    %c1_398 = arith.constant 1 : index
    %c0_399 = arith.constant 0 : index
    %c0_400 = arith.constant 0 : index
    %893 = vector.load %arg32[%c1_398, %c0_399, %c0_400] : memref<2x1x128xf32, #tpu.memory_space<vmem>>, vector<1x1x128xf32>
    %894 = vector.shape_cast %893 : vector<1x1x128xf32> to vector<1x128xf32>
    %895 = vector.broadcast %894 : vector<1x128xf32> to vector<24x128xf32>
    %896 = arith.addf %892, %895 : vector<24x128xf32>
    %897 = arith.addf %848, %896 : vector<24x128xf32>
    %898 = vector.shape_cast %897 : vector<24x128xf32> to vector<1x24x128xf32>
    %899 = vector.extract_strided_slice %898 {offsets = [0, 1, 0], sizes = [1, 1, 128], strides = [1, 1, 1]} : vector<1x24x128xf32> to vector<1x1x128xf32>
    %900 = vector.shape_cast %899 : vector<1x1x128xf32> to vector<1x128xf32>
    %c0_401 = arith.constant 0 : index
    %c0_402 = arith.constant 0 : index
    %901 = vector.load %arg7[%c0_401, %c0_402] : memref<1x128xf32, #tpu.memory_space<vmem>>, vector<1x128xf32>
    %c0_403 = arith.constant 0 : index
    %c0_404 = arith.constant 0 : index
    %902 = vector.load %arg8[%c0_403, %c0_404] : memref<1x128xf32, #tpu.memory_space<vmem>>, vector<1x128xf32>
    %cst_405 = arith.constant dense<0.000000e+00> : vector<1xf32>
    %903 = vector.multi_reduction <add>, %900, %cst_405 [1] : vector<1x128xf32> to vector<1xf32>
    %904 = vector.shape_cast %903 : vector<1xf32> to vector<1x1xf32>
    %cst_406 = arith.constant 1.280000e+02 : f32
    %905 = vector.broadcast %cst_406 : f32 to vector<1x1xf32>
    %906 = arith.divf %904, %905 : vector<1x1xf32>
    %907 = vector.broadcast %906 : vector<1x1xf32> to vector<1x128xf32>
    %908 = arith.subf %900, %907 : vector<1x128xf32>
    %909 = arith.mulf %908, %908 : vector<1x128xf32>
    %cst_407 = arith.constant dense<0.000000e+00> : vector<1xf32>
    %910 = vector.multi_reduction <add>, %909, %cst_407 [1] : vector<1x128xf32> to vector<1xf32>
    %911 = vector.shape_cast %910 : vector<1xf32> to vector<1x1xf32>
    %cst_408 = arith.constant 1.280000e+02 : f32
    %912 = vector.broadcast %cst_408 : f32 to vector<1x1xf32>
    %913 = arith.divf %911, %912 : vector<1x1xf32>
    %914 = vector.broadcast %906 : vector<1x1xf32> to vector<1x128xf32>
    %915 = arith.subf %900, %914 : vector<1x128xf32>
    %cst_409 = arith.constant 9.99999974E-6 : f32
    %916 = vector.broadcast %cst_409 : f32 to vector<1x1xf32>
    %917 = arith.addf %913, %916 : vector<1x1xf32>
    %918 = math.rsqrt %917 : vector<1x1xf32>
    %919 = vector.broadcast %918 : vector<1x1xf32> to vector<1x128xf32>
    %920 = arith.mulf %915, %919 : vector<1x128xf32>
    %921 = arith.mulf %920, %901 : vector<1x128xf32>
    %922 = arith.addf %921, %902 : vector<1x128xf32>
    %c0_410 = arith.constant 0 : index
    %c0_411 = arith.constant 0 : index
    %923 = vector.load %arg43[%c0_410, %c0_411] : memref<128x128xf32, #tpu.memory_space<vmem>>, vector<128x128xf32>
    %cst_412 = arith.constant dense<0.000000e+00> : vector<1x128xf32>
    %924 = tpu.matmul %922, %923, %cst_412 {dimension_numbers = #tpu.dot_dimension_numbers<[1], [0], [0], [1], [0, 0, 1, 1], [], []>} : vector<1x128xf32>, vector<128x128xf32>, vector<1x128xf32> -> vector<1x128xf32>
    %925 = vector.shape_cast %924 : vector<1x128xf32> to vector<1x1x128xf32>
    %c0_413 = arith.constant 0 : index
    %c0_414 = arith.constant 0 : index
    %c0_415 = arith.constant 0 : index
    %926 = vector.load %arg44[%c0_413, %c0_414, %c0_415] : memref<1x1x128xf32, #tpu.memory_space<vmem>>, vector<1x1x128xf32>
    tpu.vector_store %arg44[%c0_413, %c0_414, %c0_415], %925 {strides = array<i32>} : memref<1x1x128xf32, #tpu.memory_space<vmem>>, vector<1x1x128xf32>,
    return
  }
  func.func @transform_0(%arg0: i32) -> (i32, i32, i32) {
    %c0_i32 = arith.constant 0 : i32
    %c0_i32_0 = arith.constant 0 : i32
    %c0_i32_1 = arith.constant 0 : i32
    return %arg0, %c0_i32, %c0_i32_0 : i32, i32, i32
  }
  func.func @transform_1(%arg0: i32) -> (i32, i32) {
    %c0_i32 = arith.constant 0 : i32
    %c0_i32_0 = arith.constant 0 : i32
    %c0_i32_1 = arith.constant 0 : i32
    return %c0_i32, %c0_i32_0 : i32, i32
  }
  func.func @transform_2(%arg0: i32) -> (i32, i32) {
    %c0_i32 = arith.constant 0 : i32
    %c0_i32_0 = arith.constant 0 : i32
    %c0_i32_1 = arith.constant 0 : i32
    return %c0_i32, %c0_i32_0 : i32, i32
  }
  func.func @transform_3(%arg0: i32) -> (i32, i32) {
    %c0_i32 = arith.constant 0 : i32
    %c0_i32_0 = arith.constant 0 : i32
    %c0_i32_1 = arith.constant 0 : i32
    return %c0_i32, %c0_i32_0 : i32, i32
  }
  func.func @transform_4(%arg0: i32) -> (i32, i32) {
    %c0_i32 = arith.constant 0 : i32
    %c0_i32_0 = arith.constant 0 : i32
    %c0_i32_1 = arith.constant 0 : i32
    return %c0_i32, %c0_i32_0 : i32, i32
  }
  func.func @transform_5(%arg0: i32) -> (i32, i32) {
    %c0_i32 = arith.constant 0 : i32
    %c0_i32_0 = arith.constant 0 : i32
    %c0_i32_1 = arith.constant 0 : i32
    return %c0_i32, %c0_i32_0 : i32, i32
  }
  func.func @transform_6(%arg0: i32) -> (i32, i32) {
    %c0_i32 = arith.constant 0 : i32
    %c0_i32_0 = arith.constant 0 : i32
    %c0_i32_1 = arith.constant 0 : i32
    return %c0_i32, %c0_i32_0 : i32, i32
  }
  func.func @transform_7(%arg0: i32) -> (i32, i32) {
    %c0_i32 = arith.constant 0 : i32
    %c0_i32_0 = arith.constant 0 : i32
    %c0_i32_1 = arith.constant 0 : i32
    return %c0_i32, %c0_i32_0 : i32, i32
  }
  func.func @transform_8(%arg0: i32) -> (i32, i32, i32) {
    %c0_i32 = arith.constant 0 : i32
    %c0_i32_0 = arith.constant 0 : i32
    %c0_i32_1 = arith.constant 0 : i32
    %c0_i32_2 = arith.constant 0 : i32
    return %c0_i32, %c0_i32_0, %c0_i32_1 : i32, i32, i32
  }
  func.func @transform_9(%arg0: i32) -> (i32, i32, i32) {
    %c0_i32 = arith.constant 0 : i32
    %c0_i32_0 = arith.constant 0 : i32
    %c0_i32_1 = arith.constant 0 : i32
    %c0_i32_2 = arith.constant 0 : i32
    return %c0_i32, %c0_i32_0, %c0_i32_1 : i32, i32, i32
  }
  func.func @transform_10(%arg0: i32) -> (i32, i32, i32) {
    %c0_i32 = arith.constant 0 : i32
    %c0_i32_0 = arith.constant 0 : i32
    %c0_i32_1 = arith.constant 0 : i32
    %c0_i32_2 = arith.constant 0 : i32
    return %c0_i32, %c0_i32_0, %c0_i32_1 : i32, i32, i32
  }
  func.func @transform_11(%arg0: i32) -> (i32, i32, i32) {
    %c0_i32 = arith.constant 0 : i32
    %c0_i32_0 = arith.constant 0 : i32
    %c0_i32_1 = arith.constant 0 : i32
    %c0_i32_2 = arith.constant 0 : i32
    return %c0_i32, %c0_i32_0, %c0_i32_1 : i32, i32, i32
  }
  func.func @transform_12(%arg0: i32) -> (i32, i32, i32) {
    %c0_i32 = arith.constant 0 : i32
    %c0_i32_0 = arith.constant 0 : i32
    %c0_i32_1 = arith.constant 0 : i32
    %c0_i32_2 = arith.constant 0 : i32
    return %c0_i32, %c0_i32_0, %c0_i32_1 : i32, i32, i32
  }
  func.func @transform_13(%arg0: i32) -> (i32, i32, i32) {
    %c0_i32 = arith.constant 0 : i32
    %c0_i32_0 = arith.constant 0 : i32
    %c0_i32_1 = arith.constant 0 : i32
    %c0_i32_2 = arith.constant 0 : i32
    return %c0_i32, %c0_i32_0, %c0_i32_1 : i32, i32, i32
  }
  func.func @transform_14(%arg0: i32) -> (i32, i32, i32) {
    %c0_i32 = arith.constant 0 : i32
    %c0_i32_0 = arith.constant 0 : i32
    %c0_i32_1 = arith.constant 0 : i32
    %c0_i32_2 = arith.constant 0 : i32
    return %c0_i32, %c0_i32_0, %c0_i32_1 : i32, i32, i32
  }
  func.func @transform_15(%arg0: i32) -> (i32, i32, i32) {
    %c0_i32 = arith.constant 0 : i32
    %c0_i32_0 = arith.constant 0 : i32
    %c0_i32_1 = arith.constant 0 : i32
    %c0_i32_2 = arith.constant 0 : i32
    return %c0_i32, %c0_i32_0, %c0_i32_1 : i32, i32, i32
  }
  func.func @transform_16(%arg0: i32) -> (i32, i32, i32) {
    %c0_i32 = arith.constant 0 : i32
    %c0_i32_0 = arith.constant 0 : i32
    %c0_i32_1 = arith.constant 0 : i32
    %c0_i32_2 = arith.constant 0 : i32
    return %c0_i32, %c0_i32_0, %c0_i32_1 : i32, i32, i32
  }
  func.func @transform_17(%arg0: i32) -> (i32, i32, i32) {
    %c0_i32 = arith.constant 0 : i32
    %c0_i32_0 = arith.constant 0 : i32
    %c0_i32_1 = arith.constant 0 : i32
    %c0_i32_2 = arith.constant 0 : i32
    return %c0_i32, %c0_i32_0, %c0_i32_1 : i32, i32, i32
  }
  func.func @transform_18(%arg0: i32) -> (i32, i32, i32) {
    %c0_i32 = arith.constant 0 : i32
    %c0_i32_0 = arith.constant 0 : i32
    %c0_i32_1 = arith.constant 0 : i32
    %c0_i32_2 = arith.constant 0 : i32
    return %c0_i32, %c0_i32_0, %c0_i32_1 : i32, i32, i32
  }
  func.func @transform_19(%arg0: i32) -> (i32, i32, i32) {
    %c0_i32 = arith.constant 0 : i32
    %c0_i32_0 = arith.constant 0 : i32
    %c0_i32_1 = arith.constant 0 : i32
    %c0_i32_2 = arith.constant 0 : i32
    return %c0_i32, %c0_i32_0, %c0_i32_1 : i32, i32, i32
  }
  func.func @transform_20(%arg0: i32) -> (i32, i32, i32) {
    %c0_i32 = arith.constant 0 : i32
    %c0_i32_0 = arith.constant 0 : i32
    %c0_i32_1 = arith.constant 0 : i32
    %c0_i32_2 = arith.constant 0 : i32
    return %c0_i32, %c0_i32_0, %c0_i32_1 : i32, i32, i32
  }
  func.func @transform_21(%arg0: i32) -> (i32, i32, i32) {
    %c0_i32 = arith.constant 0 : i32
    %c0_i32_0 = arith.constant 0 : i32
    %c0_i32_1 = arith.constant 0 : i32
    %c0_i32_2 = arith.constant 0 : i32
    return %c0_i32, %c0_i32_0, %c0_i32_1 : i32, i32, i32
  }
  func.func @transform_22(%arg0: i32) -> (i32, i32, i32) {
    %c0_i32 = arith.constant 0 : i32
    %c0_i32_0 = arith.constant 0 : i32
    %c0_i32_1 = arith.constant 0 : i32
    %c0_i32_2 = arith.constant 0 : i32
    return %c0_i32, %c0_i32_0, %c0_i32_1 : i32, i32, i32
  }
  func.func @transform_23(%arg0: i32) -> (i32, i32, i32) {
    %c0_i32 = arith.constant 0 : i32
    %c0_i32_0 = arith.constant 0 : i32
    %c0_i32_1 = arith.constant 0 : i32
    %c0_i32_2 = arith.constant 0 : i32
    return %c0_i32, %c0_i32_0, %c0_i32_1 : i32, i32, i32
  }
  func.func @transform_24(%arg0: i32) -> (i32, i32, i32) {
    %c0_i32 = arith.constant 0 : i32
    %c0_i32_0 = arith.constant 0 : i32
    %c0_i32_1 = arith.constant 0 : i32
    %c0_i32_2 = arith.constant 0 : i32
    return %c0_i32, %c0_i32_0, %c0_i32_1 : i32, i32, i32
  }
  func.func @transform_25(%arg0: i32) -> (i32, i32, i32) {
    %c0_i32 = arith.constant 0 : i32
    %c0_i32_0 = arith.constant 0 : i32
    %c0_i32_1 = arith.constant 0 : i32
    %c0_i32_2 = arith.constant 0 : i32
    return %c0_i32, %c0_i32_0, %c0_i32_1 : i32, i32, i32
  }
  func.func @transform_26(%arg0: i32) -> (i32, i32, i32) {
    %c0_i32 = arith.constant 0 : i32
    %c0_i32_0 = arith.constant 0 : i32
    %c0_i32_1 = arith.constant 0 : i32
    %c0_i32_2 = arith.constant 0 : i32
    return %c0_i32, %c0_i32_0, %c0_i32_1 : i32, i32, i32
  }
  func.func @transform_27(%arg0: i32) -> (i32, i32, i32) {
    %c0_i32 = arith.constant 0 : i32
    %c0_i32_0 = arith.constant 0 : i32
    %c0_i32_1 = arith.constant 0 : i32
    %c0_i32_2 = arith.constant 0 : i32
    return %c0_i32, %c0_i32_0, %c0_i32_1 : i32, i32, i32
  }
  func.func @transform_28(%arg0: i32) -> (i32, i32, i32) {
    %c0_i32 = arith.constant 0 : i32
    %c0_i32_0 = arith.constant 0 : i32
    %c0_i32_1 = arith.constant 0 : i32
    %c0_i32_2 = arith.constant 0 : i32
    return %c0_i32, %c0_i32_0, %c0_i32_1 : i32, i32, i32
  }
  func.func @transform_29(%arg0: i32) -> (i32, i32, i32) {
    %c0_i32 = arith.constant 0 : i32
    %c0_i32_0 = arith.constant 0 : i32
    %c0_i32_1 = arith.constant 0 : i32
    %c0_i32_2 = arith.constant 0 : i32
    return %c0_i32, %c0_i32_0, %c0_i32_1 : i32, i32, i32
  }
  func.func @transform_30(%arg0: i32) -> (i32, i32, i32) {
    %c0_i32 = arith.constant 0 : i32
    %c0_i32_0 = arith.constant 0 : i32
    %c0_i32_1 = arith.constant 0 : i32
    %c0_i32_2 = arith.constant 0 : i32
    return %c0_i32, %c0_i32_0, %c0_i32_1 : i32, i32, i32
  }
  func.func @transform_31(%arg0: i32) -> (i32, i32, i32) {
    %c0_i32 = arith.constant 0 : i32
    %c0_i32_0 = arith.constant 0 : i32
    %c0_i32_1 = arith.constant 0 : i32
    %c0_i32_2 = arith.constant 0 : i32
    return %c0_i32, %c0_i32_0, %c0_i32_1 : i32, i32, i32
  }
  func.func @transform_32(%arg0: i32) -> (i32, i32) {
    %c0_i32 = arith.constant 0 : i32
    %c0_i32_0 = arith.constant 0 : i32
    %c0_i32_1 = arith.constant 0 : i32
    return %c0_i32, %c0_i32_0 : i32, i32
  }
  func.func @transform_33(%arg0: i32) -> (i32, i32) {
    %c0_i32 = arith.constant 0 : i32
    %c0_i32_0 = arith.constant 0 : i32
    %c0_i32_1 = arith.constant 0 : i32
    return %c0_i32, %c0_i32_0 : i32, i32
  }
  func.func @transform_34(%arg0: i32) -> (i32, i32) {
    %c0_i32 = arith.constant 0 : i32
    %c0_i32_0 = arith.constant 0 : i32
    %c0_i32_1 = arith.constant 0 : i32
    return %c0_i32, %c0_i32_0 : i32, i32
  }
  func.func @transform_35(%arg0: i32) -> (i32, i32) {
    %c0_i32 = arith.constant 0 : i32
    %c0_i32_0 = arith.constant 0 : i32
    %c0_i32_1 = arith.constant 0 : i32
    return %c0_i32, %c0_i32_0 : i32, i32
  }
  func.func @transform_36(%arg0: i32) -> (i32, i32) {
    %c0_i32 = arith.constant 0 : i32
    %c0_i32_0 = arith.constant 0 : i32
    %c0_i32_1 = arith.constant 0 : i32
    return %c0_i32, %c0_i32_0 : i32, i32
  }
  func.func @transform_37(%arg0: i32) -> (i32, i32) {
    %c0_i32 = arith.constant 0 : i32
    %c0_i32_0 = arith.constant 0 : i32
    %c0_i32_1 = arith.constant 0 : i32
    return %c0_i32, %c0_i32_0 : i32, i32
  }
  func.func @transform_38(%arg0: i32) -> (i32, i32) {
    %c0_i32 = arith.constant 0 : i32
    %c0_i32_0 = arith.constant 0 : i32
    %c0_i32_1 = arith.constant 0 : i32
    return %c0_i32, %c0_i32_0 : i32, i32
  }
  func.func @transform_39(%arg0: i32) -> (i32, i32) {
    %c0_i32 = arith.constant 0 : i32
    %c0_i32_0 = arith.constant 0 : i32
    %c0_i32_1 = arith.constant 0 : i32
    return %c0_i32, %c0_i32_0 : i32, i32
  }
  func.func @transform_40(%arg0: i32) -> (i32, i32) {
    %c0_i32 = arith.constant 0 : i32
    %c0_i32_0 = arith.constant 0 : i32
    %c0_i32_1 = arith.constant 0 : i32
    return %c0_i32, %c0_i32_0 : i32, i32
  }
  func.func @transform_41(%arg0: i32) -> (i32, i32) {
    %c0_i32 = arith.constant 0 : i32
    %c0_i32_0 = arith.constant 0 : i32
    %c0_i32_1 = arith.constant 0 : i32
    return %c0_i32, %c0_i32_0 : i32, i32
  }
  func.func @transform_42(%arg0: i32) -> (i32, i32) {
    %c0_i32 = arith.constant 0 : i32
    %c0_i32_0 = arith.constant 0 : i32
    %c0_i32_1 = arith.constant 0 : i32
    return %c0_i32, %c0_i32_0 : i32, i32
  }
  func.func @transform_43(%arg0: i32) -> (i32, i32, i32) {
    %c0_i32 = arith.constant 0 : i32
    %c0_i32_0 = arith.constant 0 : i32
    %c0_i32_1 = arith.constant 0 : i32
    return %arg0, %c0_i32, %c0_i32_0 : i32, i32, i32
  }
}

</mosaic_0001>

<bundles_post_ra>
// kernel: forward.1
= control target key start
LH: loop header
LB: loop body
LE: loop exit
PB: predicated region body
PF: predicated region fallthrough
CT: control target
= control target key end

     0   :  { %s15200_s6 = smov 1   ;;  %s15201_s10 = smov 2   ;;  %s17697_s0 = inlined_call_operand.smem [shape: u32[44], index: -1, kind: input, shape index: {}] }
   0x1   :  { %s15284_s5 = sld [smem:[%s17697_s0]]   ;;  %s15202_s14 = smov 3  }
   0x2   :  { %s15289_s9 = sld [smem:[%s17697_s0 + %s15200_s6]]   ;;  %s15203_s18 = smov 4  }
   0x3   :  { %s15294_s13 = sld [smem:[%s17697_s0 + %s15201_s10]]   ;;  %s15204_s22 = smov 5  }
   0x4   :  { %s15299_s17 = sld [smem:[%s17697_s0 + %s15202_s14]]   ;;  %s15205_s26 = smov 6  }
   0x5   :  { %s15304_s21 = sld [smem:[%s17697_s0 + %s15203_s18]]   ;;  %s15206_s30 = smov 7  }
   0x6   :  { %s15309_s25 = sld [smem:[%s17697_s0 + %s15204_s22]]   ;;  %s15207_s4 = smov 8  }
   0x7   :  { %17764 = sst [smem:[#allocation44_spill]] %s15284_s5  ;;  %s15208_s10 = smov 9  }
   0x8   :  { %17765 = sst [smem:[#allocation45_spill]] %s15289_s9  ;;  %s15209_s15 = smov 10  }
   0x9   :  { %17766 = sst [smem:[#allocation46_spill]] %s15294_s13  ;;  %s15210_s20 = smov 11  }
   0xa   :  { %17767 = sst [smem:[#allocation47_spill]] %s15299_s17  ;;  %s15212_s1 = smov 13  }
   0xb   :  { %17768 = sst [smem:[#allocation48_spill]] %s15304_s21  ;;  %s15213_s7 = smov 14  }
   0xc   :  { %17769 = sst [smem:[#allocation49_spill]] %s15309_s25  ;;  %s15215_s22 = smov 16  }
   0xd   :  { %s15314_s29 = sld [smem:[%s17697_s0 + %s15205_s26]]   ;;  %s15211_s26 = smov 12  }
   0xe   :  { %s15319_s3 = sld [smem:[%s17697_s0 + %s15206_s30]]   ;;  %s15216_s28 = smov 17  }
   0xf   :  { %s15324_s8 = sld [smem:[%s17697_s0 + %s15207_s4]]  }
  0x10   :  { %s15329_s14 = sld [smem:[%s17697_s0 + %s15208_s10]]  }
  0x11   :  { %s15334_s19 = sld [smem:[%s17697_s0 + %s15209_s15]]   ;;  %s15214_s15 = smov 15  }
  0x12   :  { %s15339_s24 = sld [smem:[%s17697_s0 + %s15210_s20]]  }
  0x13   :  { %17770 = sst [smem:[#allocation50_spill]] %s15314_s29 }
  0x14   :  { %17771 = sst [smem:[#allocation51_spill]] %s15319_s3 }
  0x15   :  { %17772 = sst [smem:[#allocation52_spill]] %s15324_s8 }
  0x16   :  { %17773 = sst [smem:[#allocation53_spill]] %s15329_s14 }
  0x17   :  { %s15344_s30 = sld [smem:[%s17697_s0 + %s15211_s26]]  }
  0x18   :  { %17774 = sst [smem:[#allocation54_spill]] %s15339_s24 }
  0x19   :  { %s15349_s6 = sld [smem:[%s17697_s0 + %s15212_s1]]  }
  0x1a   :  { %s15354_s12 = sld [smem:[%s17697_s0 + %s15213_s7]]   ;;  %s15217_s7 = smov 18  }
  0x1b   :  { %s15359_s20 = sld [smem:[%s17697_s0 + %s15214_s15]]   ;;  %s15218_s15 = smov 19  }
  0x1c   :  { %s15364_s27 = sld [smem:[%s17697_s0 + %s15215_s22]]   ;;  %s15219_s22 = smov 20  }
  0x1d   :  { %17775 = sst [smem:[#allocation55_spill]] %s15344_s30 }
  0x1e   :  { %s15369_s4 = sld [smem:[%s17697_s0 + %s15216_s28]]   ;;  %s15220_s28 = smov 21  }
  0x1f   :  { %17776 = sst [smem:[#allocation56_spill]] %s15349_s6 }
  0x20   :  { %17777 = sst [smem:[#allocation57_spill]] %s15354_s12 }
  0x21   :  { %17778 = sst [smem:[#allocation58_spill]] %s15359_s20 }
  0x22   :  { %17779 = sst [smem:[#allocation59_spill]] %s15364_s27 }
  0x23   :  { %s15374_s17 = sld [smem:[%s17697_s0 + %s15217_s7]]   ;;  %s15221_s7 = smov 22  }
  0x24   :  { %17780 = sst [smem:[#allocation60_spill]] %s15369_s4 }
  0x25   :  { %s15379_s3 = sld [smem:[%s17697_s0 + %s15218_s15]]   ;;  %s15222_s15 = smov 23  }
  0x26   :  { %s15384_s29 = sld [smem:[%s17697_s0 + %s15219_s22]]   ;;  %s15223_s22 = smov 24  }
  0x27   :  { %s15389_s4 = sld [smem:[%s17697_s0 + %s15220_s28]]   ;;  %s15224_s28 = smov 25  }
  0x28   :  { %s15404_s20 = sld [smem:[%s17697_s0 + %s15223_s22]]   ;;  %s15227_s22 = smov 28  }
  0x29   :  { %17781 = sst [smem:[#allocation61_spill]] %s15374_s17 }
  0x2a   :  { %s15394_s17 = sld [smem:[%s17697_s0 + %s15221_s7]]   ;;  %s15225_s7 = smov 26  }
  0x2b   :  { %17782 = sst [smem:[#allocation62_spill]] %s15379_s3 }
  0x2c   :  { %s15399_s3 = sld [smem:[%s17697_s0 + %s15222_s15]]   ;;  %s15226_s15 = smov 27  }
  0x2d   :  { %17783 = sst [smem:[#allocation63_spill]] %s15389_s4 }
  0x2e   :  { %s15409_s12 = sld [smem:[%s17697_s0 + %s15224_s28]]   ;;  %s15228_s28 = smov 29  }
  0x2f   :  { %s15414_s27 = sld [smem:[%s17697_s0 + %s15225_s7]]   ;;  %s15229_s7 = smov 30  }
  0x30   :  { %s15419_s6 = sld [smem:[%s17697_s0 + %s15226_s15]]   ;;  %s15230_s15 = smov 31  }
  0x31   :  { %s15424_s30 = sld [smem:[%s17697_s0 + %s15227_s22]]   ;;  %s15231_s22 = smov 32  }
  0x32   :  { %17784 = sst [smem:[#allocation64_spill]] %s15399_s3 }
  0x33   :  { %s15429_s24 = sld [smem:[%s17697_s0 + %s15228_s28]]   ;;  %s15232_s28 = smov 33  }
  0x34   :  { %s15434_s14 = sld [smem:[%s17697_s0 + %s15229_s7]]   ;;  %s15233_s7 = smov 34  }
  0x35   :  { %s15439_s8 = sld [smem:[%s17697_s0 + %s15230_s15]]   ;;  %s15234_s15 = smov 35  }
  0x36   :  { %17785 = sst [smem:[#allocation65_spill]] %s15419_s6 }
  0x37   :  { %17786 = sst [smem:[#allocation66_spill]] %s15424_s30 }
  0x38   :  { %s15444_s30 = sld [smem:[%s17697_s0 + %s15231_s22]]   ;;  %s15235_s22 = smov 36  }
  0x39   :  { %17787 = sst [smem:[#allocation67_spill]] %s15429_s24 }
  0x3a   :  { %s15449_s24 = sld [smem:[%s17697_s0 + %s15232_s28]]   ;;  %s15236_s28 = smov 37  }
  0x3b   :  { %17788 = sst [smem:[#allocation68_spill]] %s15439_s8 }
  0x3c   :  { %s15454_s25 = sld [smem:[%s17697_s0 + %s15233_s7]]   ;;  %s15237_s7 = smov 38  }
  0x3d   :  { %s15459_s21 = sld [smem:[%s17697_s0 + %s15234_s15]]   ;;  %s15238_s15 = smov 39  }
  0x3e   :  { %17789 = sst [smem:[#allocation69_spill]] %s15444_s30 }
  0x3f   :  { %s15464_s13 = sld [smem:[%s17697_s0 + %s15235_s22]]   ;;  %s15239_s22 = smov 40  }
  0x40   :  { %17790 = sst [smem:[#allocation70_spill]] %s15449_s24 }
  0x41   :  { %s15469_s24 = sld [smem:[%s17697_s0 + %s15236_s28]]   ;;  %s15240_s28 = smov 41  }
  0x42   :  { %s15474_s5 = sld [smem:[%s17697_s0 + %s15237_s7]]   ;;  %s15241_s7 = smov 42  }
  0x43   :  { %17791 = sst [smem:[#allocation71_spill]] %s15459_s21 }
  0x44   :  { %s15479_s21 = sld [smem:[%s17697_s0 + %s15238_s15]]   ;;  %s15242_s15 = smov 43  }
  0x45   :  { %17792 = sst [smem:[#allocation72_spill]] %s15464_s13 }
  0x46   :  { %s15484_s13 = sld [smem:[%s17697_s0 + %s15239_s22]]  }
  0x47   :  { %s15489_s30 = sld [smem:[%s17697_s0 + %s15240_s28]]  }
  0x48   :  { %17793 = sst [smem:[#allocation73_spill]] %s15474_s5 }
  0x49   :  { %s15494_s5 = sld [smem:[%s17697_s0 + %s15241_s7]]  }
  0x4a   :  { %17794 = sst [smem:[#allocation74_spill]] %s15479_s21 }
  0x4b   :  { %s15499_s21 = sld [smem:[%s17697_s0 + %s15242_s15]]  }
  0x4f   :  { %17795 = sst [smem:[#allocation75_spill]] %s15494_s5 }
  0x50   :  { %92 = vsyncpa [#allocation4], 0 }
  0x51   :  { %93 = vsyncpa [#allocation7], 0 }
  0x52   :  { %94 = vsyncpa [#allocation10], 0 }
  0x53   :  { %95 = vsyncpa [#allocation13], 0 }
  0x54   :  { %96 = vsyncpa [#allocation16], 0 }
  0x55   :  { %97 = vsyncpa [#allocation19], 0 }
  0x56   :  { %98 = vsyncpa [#allocation22], 0 }
  0x57   :  { %99 = vsyncpa [#allocation25], 0 }
  0x58   :  { %100 = vsyncpa [#allocation28], 0 }
  0x59   :  { %101 = vsyncpa [#allocation31], 0 }
  0x5a   :  { %102 = vsyncpa [#allocation5], 0 }
  0x5b   :  { %104 = vsyncpa [#allocation5 + $0x1], 0  ;;  %s15501_s22 = smov 0   ;;  %s15503_s23 = smov 0  }
  0x5c   :  { %s15505_s26 = smov 0   ;;  %s15507_s0 = smov 0  }
  0x5d LB: > { %s17796_s9 = sld [smem:[#allocation45_spill]]  ;;  %s17797_s8 = sld [smem:[#allocation68_spill]]  ;;  %s15190_s23 = sphi %s15503_s23, %s17893_s23   ;;  %s15186_s22 = sphi %s15501_s22, %s17892_s22   ;;  %s15198_s0 = sphi %s15507_s0, %s17889_s0   ;;  %s15194_s26 = sphi %s15505_s26, %s17891_s26  }
  0x5e   : > { %s17798_s5 = sld [smem:[#allocation75_spill]]  ;;  %s17799_s6 = sld [smem:[#allocation65_spill]] }
  0x5f   : > { %s17800_s3 = sld [smem:[#allocation64_spill]]  ;;  %s17801_s4 = sld [smem:[#allocation63_spill]] }
  0x60   : > { %17802 = sst [smem:[#allocation76_spill]] %s15186_s22  ;;  %s15522_s28 = sadd.s32 4294967295, %s15198_s0  }
  0x61   : > { %17803 = sst [smem:[#allocation77_spill]] %s15194_s26  ;;  %s10521_s1 = sadd.s32 4294967294, %s15198_s0  }
  0x62   : > { %17804 = sst [smem:[#allocation78_spill]] %s15198_s0  ;;  %s15526_s2 = sadd.s32 1, %s15198_s0  }
  0x63   : > { %17805 = sst [smem:[#allocation79_spill]] %s15526_s2  ;;  %s1025_s7 = sadd.s32 1, %s15194_s26 }
  0x64   : > { %s1022_s10 = ssub.s32 %s15198_s0, %s15526_s2  ;;  %p1035_p0 = scmp.ne.s32.totalorder %s15194_s26, %s15190_s23 }
  0x65   : > { %p1023_p1 = scmp.eq.s32.totalorder %s1022_s10, 0  ;;  %p1036_p2 = scmp.eq.s32.totalorder %s15522_s28, 1 }
  0x66   : > { %p1041_p3 = scmp.ne.s32.totalorder %s15190_s23, %s15186_s22  ;;  %p1042_p4 = scmp.eq.s32.totalorder %s10521_s1, 1 }
  0x67   : > { %s15537_s11 = scalar_select %p1023_p1, %s15194_s26, %s1025_s7  }
  0x68   : > { %p15539_p5 = por %p1036_p2, %p1035_p0  ;;  %p15543_p6 = por %p1042_p4, %p1041_p3 }
  0x69   : > { %17806 = sst [smem:[#allocation80_spill]] %s15537_s11  ;;  %p10522_p7 = scmp.ge.s32.totalorder %s15198_s0, 1 }
  0x6a   : > { %s17807_s15 = scalar_select %p15539_p5, 1, 0 }
  0x6b   : > { %s17809_s16 = scalar_select %p15543_p6, 1, 0 }
  0x6c   : > { %17808 = sst [smem:[#allocation81_spill]] %s17807_s15  ;;  %p1049_p8 = scmp.lt.s32.totalorder %s15198_s0, 3 }
  0x6d   : > { %17810 = sst [smem:[#allocation82_spill]] %s17809_s16  ;;  %p17722_p9 = scmp.eq.s32.totalorder %s15522_s28, 0 }
  0x6e   : > { %p15550_p10 = pnand %p10522_p7, %p1049_p8  ;;  %s15243_s1 = smov [#allocation6]  }
  0x6f   : > { %s1098_s7 = sshll.u32 %s15243_s1, 4  ;;  %s15244_s11 = smov [#allocation9]   ;;  %s1099_s7 = int_to_ptr.vmem [resolvable:$true] %s1098_s7 }
  0x70   : > { %s17811_s18 = scalar_select %p15550_p10, 1, 0 }
  0x71   : > { %p13853_p11 = pneg %p15550_p10  ;;  %s1151_s26 = sshll.u32 %s15244_s11, 4  ;;  %s1152_s26 = int_to_ptr.vmem [resolvable:$true] %s1151_s26 }
  0x72   : > { %s14592_s2 = scalar_lea.hbm %s15334_s19, 12288 }
  0x73   : > { %p15558_p12 = pnand %p17722_p9, %p13853_p11  ;;  %p14593_p13 = scmp.ne.s32.totalorder %s15334_s19, %s14592_s2 }
  0x74   : > { %p14599_p3 = scmp.lt.u32.totalorder %s14592_s2, %s15334_s19 }
  0x75   : > { %p15566_p0 = pneg %p15558_p12 }
  0x77   : > { %p14595_p1 = pnand %p15566_p0, %p14593_p13 }
  0x79   : > { %p14596_p2 = pneg %p14595_p1 }
  0x7b   : > { %p14601_p4 = pnand %p14599_p3, %p14596_p2 }
  0x7d   : > { %14604 = shalt.err (!%p14601_p4)
}
  0x7e   : > { %s14605_s1 = scalar_lea.vmem %s1099_s7, 12288  ;;  %p14613_p9 = scmp.lt.s32.totalorder %s1099_s7, %s1099_s7 }
  0x7f   : > { %p14606_p7 = scmp.ne.s32.totalorder %s1099_s7, %s14605_s1  ;;  %p14614_p6 = scmp.lt.s32.totalorder %s14605_s1, %s14605_s1 }
  0x81   : > { %p14608_p8 = pnand %p14606_p7, %p15566_p0  ;;  %p14615_p5 = por %p14614_p6, %p14613_p9 }
  0x83   : > { %p14609_p11 = pneg %p14608_p8 }
  0x85   : > { %p14616_p10 = pnand %p14615_p5, %p14609_p11 }
  0x87   : > { %14619 = shalt.err (!%p14616_p10)
}
  0x88   : > { %s17729_s11 = smov 384   ;;  %s17730_s2 = smov 24  }
  0x89   : > { %13859 = dma.hbm_to_vmem [thread:$0]  (!%p15558_p12), %s15334_s19, 12288, %s1099_s7, [#allocation7], %s17729_s11, %s17729_s11, %s17730_s2  }
  0x8a   : > { %s15247_s22 = smov [#allocation12]   ;;  %s14620_s1 = scalar_lea.hbm %s17801_s4, 32 }
  0x8b   : > { %s1177_s0 = sshll.u32 %s15247_s22, 4  ;;  %p14621_p6 = scmp.ne.s32.totalorder %s17801_s4, %s14620_s1  ;;  %s1178_s0 = int_to_ptr.vmem [resolvable:$true] %s1177_s0 }
  0x8c   : > { %p14627_p10 = scmp.lt.u32.totalorder %s14620_s1, %s17801_s4 }
  0x8d   : > { %p14623_p5 = pnand %p14621_p6, %p15566_p0 }
  0x8f   : > { %p14624_p9 = pneg %p14623_p5 }
  0x91   : > { %p14629_p13 = pnand %p14627_p10, %p14624_p9 }
  0x93   : > { %14632 = shalt.err (!%p14629_p13)
}
  0x94   : > { %s14633_s15 = scalar_lea.vmem %s1152_s26, 32  ;;  %p14641_p4 = scmp.lt.s32.totalorder %s1152_s26, %s1152_s26 }
  0x95   : > { %p14634_p1 = scmp.ne.s32.totalorder %s1152_s26, %s14633_s15  ;;  %p14642_p7 = scmp.lt.s32.totalorder %s14633_s15, %s14633_s15 }
  0x97   : > { %p14636_p2 = pnand %p14634_p1, %p15566_p0  ;;  %p14643_p8 = por %p14642_p7, %p14641_p4 }
  0x99   : > { %p14637_p3 = pneg %p14636_p2 }
  0x9b   : > { %p14644_p11 = pnand %p14643_p8, %p14637_p3 }
  0x9d   : > { %14647 = shalt.err (!%p14644_p11)
}
  0x9e   : > { %s17731_s22 = smov 16   ;;  %s17733_s7 = smov 1  }
  0x9f   : > { %13865 = dma.hbm_to_vmem [thread:$0]  (!%p15558_p12), %s17801_s4, 32, %s1152_s26, [#allocation10], %s17731_s22, %s17731_s22, %s17733_s7  }
  0xa0   : > { %s14648_s1 = scalar_lea.hbm %s17800_s3, 96 }
  0xa1   : > { %p14649_p6 = scmp.ne.s32.totalorder %s17800_s3, %s14648_s1  ;;  %p14655_p10 = scmp.lt.u32.totalorder %s14648_s1, %s17800_s3 }
  0xa3   : > { %p14651_p5 = pnand %p14649_p6, %p15566_p0 }
  0xa5   : > { %p14652_p9 = pneg %p14651_p5 }
  0xa7   : > { %p14657_p13 = pnand %p14655_p10, %p14652_p9 }
  0xa9   : > { %14660 = shalt.err (!%p14657_p13)
}
  0xaa   : > { %s14661_s15 = scalar_lea.vmem %s1178_s0, 96  ;;  %p14669_p4 = scmp.lt.s32.totalorder %s1178_s0, %s1178_s0 }
  0xab   : > { %p14662_p1 = scmp.ne.s32.totalorder %s1178_s0, %s14661_s15  ;;  %p14670_p7 = scmp.lt.s32.totalorder %s14661_s15, %s14661_s15 }
  0xad   : > { %p14664_p2 = pnand %p14662_p1, %p15566_p0  ;;  %p14671_p8 = por %p14670_p7, %p14669_p4 }
  0xaf   : > { %p14665_p3 = pneg %p14664_p2 }
  0xb1   : > { %p14672_p11 = pnand %p14671_p8, %p14665_p3 }
  0xb3   : > { %14675 = shalt.err (!%p14672_p11)
}
  0xb4   : > { %s15250_s26 = smov 48   ;;  %s15251_s1 = smov 3  }
  0xb5   : > { %13871 = dma.hbm_to_vmem [thread:$0]  (!%p15558_p12), %s17800_s3, 96, %s1178_s0, [#allocation13], %s15250_s26, %s15250_s26, %s15251_s1  }
  0xb6   : > { %s15252_s11 = smov [#allocation15]   ;;  %s15253_s22 = smov [#allocation18]  }
  0xb7   : > { %s1203_s2 = sshll.u32 %s15252_s11, 4  ;;  %s1229_s7 = sshll.u32 %s15253_s22, 4  ;;  %s1204_s2 = int_to_ptr.vmem [resolvable:$true] %s1203_s2  ;;  %s1230_s7 = int_to_ptr.vmem [resolvable:$true] %s1229_s7 }
  0xb8   : > { %s14676_s4 = scalar_lea.hbm %s15409_s12, 32 }
  0xb9   : > { %p14677_p6 = scmp.ne.s32.totalorder %s15409_s12, %s14676_s4  ;;  %p14683_p10 = scmp.lt.u32.totalorder %s14676_s4, %s15409_s12 }
  0xbb   : > { %p14679_p5 = pnand %p14677_p6, %p15566_p0 }
  0xbd   : > { %p14680_p9 = pneg %p14679_p5 }
  0xbf   : > { %p14685_p13 = pnand %p14683_p10, %p14680_p9 }
  0xc1   : > { %14688 = shalt.err (!%p14685_p13)
}
  0xc2   : > { %s14689_s15 = scalar_lea.vmem %s1204_s2, 32  ;;  %p14697_p4 = scmp.lt.s32.totalorder %s1204_s2, %s1204_s2 }
  0xc3   : > { %p14690_p1 = scmp.ne.s32.totalorder %s1204_s2, %s14689_s15  ;;  %p14698_p7 = scmp.lt.s32.totalorder %s14689_s15, %s14689_s15 }
  0xc5   : > { %p14692_p2 = pnand %p14690_p1, %p15566_p0  ;;  %p14699_p8 = por %p14698_p7, %p14697_p4 }
  0xc7   : > { %p14693_p3 = pneg %p14692_p2 }
  0xc9   : > { %p14700_p11 = pnand %p14699_p8, %p14693_p3 }
  0xcb   : > { %14703 = shalt.err (!%p14700_p11)
}
  0xcc   : > { %s17814_s0 = smov 1   ;;  %s17815_s11 = smov 16  }
  0xcd   : > { %13877 = dma.hbm_to_vmem [thread:$0]  (!%p15558_p12), %s15409_s12, 32, %s1204_s2, [#allocation16], %s17815_s11, %s17815_s11, %s17814_s0  }
  0xce   : > { %s14704_s4 = scalar_lea.hbm %s17799_s6, 32 }
  0xcf   : > { %p14705_p6 = scmp.ne.s32.totalorder %s17799_s6, %s14704_s4  ;;  %p14711_p10 = scmp.lt.u32.totalorder %s14704_s4, %s17799_s6 }
  0xd1   : > { %p14707_p5 = pnand %p14705_p6, %p15566_p0 }
  0xd3   : > { %p14708_p9 = pneg %p14707_p5 }
  0xd5   : > { %p14713_p13 = pnand %p14711_p10, %p14708_p9 }
  0xd7   : > { %14716 = shalt.err (!%p14713_p13)
}
  0xd8   : > { %s14717_s22 = scalar_lea.vmem %s1230_s7, 32  ;;  %p14725_p4 = scmp.lt.s32.totalorder %s1230_s7, %s1230_s7 }
  0xd9   : > { %p14718_p1 = scmp.ne.s32.totalorder %s1230_s7, %s14717_s22  ;;  %p14726_p7 = scmp.lt.s32.totalorder %s14717_s22, %s14717_s22 }
  0xdb   : > { %p14720_p2 = pnand %p14718_p1, %p15566_p0  ;;  %p14727_p8 = por %p14726_p7, %p14725_p4 }
  0xdd   : > { %p14721_p3 = pneg %p14720_p2 }
  0xdf   : > { %p14728_p11 = pnand %p14727_p8, %p14721_p3 }
  0xe1   : > { %14731 = shalt.err (!%p14728_p11)
}
  0xe2   : > { %13883 = dma.hbm_to_vmem [thread:$0]  (!%p15558_p12), %s17799_s6, 32, %s1230_s7, [#allocation19], %s17815_s11, %s17815_s11, %s17814_s0  }
  0xe3   : > { %s15254_s2 = smov [#allocation21]   ;;  %s14732_s1 = scalar_lea.hbm %s17797_s8, 32 }
  0xe4   : > { %s1261_s26 = sshll.u32 %s15254_s2, 4  ;;  %p14733_p6 = scmp.ne.s32.totalorder %s17797_s8, %s14732_s1  ;;  %s1262_s26 = int_to_ptr.vmem [resolvable:$true] %s1261_s26 }
  0xe5   : > { %p14739_p10 = scmp.lt.u32.totalorder %s14732_s1, %s17797_s8 }
  0xe6   : > { %p14735_p5 = pnand %p14733_p6, %p15566_p0 }
  0xe8   : > { %p14736_p9 = pneg %p14735_p5 }
  0xea   : > { %p14741_p13 = pnand %p14739_p10, %p14736_p9 }
  0xec   : > { %14744 = shalt.err (!%p14741_p13)
}
  0xed   : > { %s14745_s15 = scalar_lea.vmem %s1262_s26, 32  ;;  %p14753_p4 = scmp.lt.s32.totalorder %s1262_s26, %s1262_s26 }
  0xee   : > { %p14746_p1 = scmp.ne.s32.totalorder %s1262_s26, %s14745_s15  ;;  %p14754_p7 = scmp.lt.s32.totalorder %s14745_s15, %s14745_s15 }
  0xf0   : > { %p14748_p2 = pnand %p14746_p1, %p15566_p0  ;;  %p14755_p8 = por %p14754_p7, %p14753_p4 }
  0xf2   : > { %p14749_p3 = pneg %p14748_p2 }
  0xf4   : > { %p14756_p11 = pnand %p14755_p8, %p14749_p3 }
  0xf6   : > { %14759 = shalt.err (!%p14756_p11)
}
  0xf7   : > { %13889 = dma.hbm_to_vmem [thread:$0]  (!%p15558_p12), %s17797_s8, 32, %s1262_s26, [#allocation22], %s17815_s11, %s17815_s11, %s17814_s0  }
  0xf8   : > { %s15255_s7 = smov [#allocation24]   ;;  %s15256_s22 = smov [#allocation27]  }
  0xf9   : > { %s1290_s4 = sshll.u32 %s15255_s7, 4  ;;  %s1320_s2 = sshll.u32 %s15256_s22, 4  ;;  %s1291_s4 = int_to_ptr.vmem [resolvable:$true] %s1290_s4  ;;  %s15643_s2 = int_to_ptr.vmem [resolvable:$true] %s1320_s2 }
  0xfa   : > { %s14760_s1 = scalar_lea.hbm %s15454_s25, 2048 }
  0xfb   : > { %p14761_p6 = scmp.ne.s32.totalorder %s15454_s25, %s14760_s1  ;;  %p14767_p10 = scmp.lt.u32.totalorder %s14760_s1, %s15454_s25 }
  0xfd   : > { %p14763_p5 = pnand %p14761_p6, %p15566_p0 }
  0xff   : > { %p14764_p9 = pneg %p14763_p5 }
 0x101   : > { %p14769_p13 = pnand %p14767_p10, %p14764_p9 }
 0x103   : > { %14772 = shalt.err (!%p14769_p13)
}
 0x104   : > { %s14773_s15 = scalar_lea.vmem %s1291_s4, 2048  ;;  %p14781_p4 = scmp.lt.s32.totalorder %s1291_s4, %s1291_s4 }
 0x105   : > { %p14774_p1 = scmp.ne.s32.totalorder %s1291_s4, %s14773_s15  ;;  %p14782_p7 = scmp.lt.s32.totalorder %s14773_s15, %s14773_s15 }
 0x107   : > { %p14776_p2 = pnand %p14774_p1, %p15566_p0  ;;  %p14783_p8 = por %p14782_p7, %p14781_p4 }
 0x109   : > { %p14777_p3 = pneg %p14776_p2 }
 0x10b   : > { %p14784_p11 = pnand %p14783_p8, %p14777_p3 }
 0x10d   : > { %14787 = shalt.err (!%p14784_p11)
}
 0x10e   : > { %s17736_s26 = smov 128   ;;  %s17738_s7 = smov 8  }
 0x10f   : > { %13895 = dma.hbm_to_vmem [thread:$0]  (!%p15558_p12), %s15454_s25, 2048, %s1291_s4, [#allocation25], %s17736_s26, %s17736_s26, %s17738_s7  }
 0x110   : > { %s14788_s22 = scalar_lea.hbm %s15469_s24, 16 }
 0x111   : > { %p14789_p6 = scmp.ne.s32.totalorder %s15469_s24, %s14788_s22  ;;  %p14795_p10 = scmp.lt.u32.totalorder %s14788_s22, %s15469_s24 }
 0x113   : > { %p14791_p5 = pnand %p14789_p6, %p15566_p0 }
 0x115   : > { %p14792_p9 = pneg %p14791_p5 }
 0x117   : > { %p14797_p13 = pnand %p14795_p10, %p14792_p9 }
 0x119   : > { %14800 = shalt.err (!%p14797_p13)
}
 0x11a   : > { %s14801_s1 = scalar_lea.vmem %s15643_s2, 16  ;;  %s14808_s15 = scalar_lea.vmem %s15643_s2, 32 }
 0x11b   : > { %p14802_p1 = scmp.ne.s32.totalorder %s15643_s2, %s14801_s1  ;;  %p14809_p4 = scmp.lt.s32.totalorder %s15643_s2, %s15643_s2 }
 0x11c   : > { %p14810_p7 = scmp.lt.s32.totalorder %s14808_s15, %s14801_s1 }
 0x11d   : > { %p14804_p2 = pnand %p14802_p1, %p15566_p0 }
 0x11e   : > { %p14811_p8 = por %p14810_p7, %p14809_p4 }
 0x11f   : > { %p14805_p3 = pneg %p14804_p2 }
 0x121   : > { %p14812_p11 = pnand %p14811_p8, %p14805_p3 }
 0x123   : > { %14815 = shalt.err (!%p14812_p11)
}
 0x124   : > { %13901 = dma.hbm_to_vmem [thread:$0]  (!%p15558_p12), %s15469_s24, 16, %s15643_s2, [#allocation28]  }
 0x125   : > { %s15259_s4 = smov [#allocation3]   ;;  %s15260_s26 = smov [#allocation8]  }
 0x126   : > { %s1061_s22 = sshll.u32 %s15259_s4, 4  ;;  %s1138_s7 = sshll.u32 %s15260_s26, 4  ;;  %s1062_s22 = int_to_ptr.vmem [resolvable:$true] %s1061_s22  ;;  %s15674_s7 = int_to_ptr.vmem [resolvable:$true] %s1138_s7 }
 0x127   : > { %s14816_s1 = scalar_lea.hbm %s17796_s9, 3072 }
 0x128   : > { %p14817_p6 = scmp.ne.s32.totalorder %s17796_s9, %s14816_s1  ;;  %p14823_p10 = scmp.lt.u32.totalorder %s14816_s1, %s17796_s9 }
 0x12a   : > { %p14819_p5 = pnand %p14817_p6, %p15566_p0 }
 0x12c   : > { %p14820_p9 = pneg %p14819_p5 }
 0x12e   : > { %p14825_p13 = pnand %p14823_p10, %p14820_p9 }
 0x130   : > { %14828 = shalt.err (!%p14825_p13)
}
 0x131   : > { %s14829_s15 = scalar_lea.vmem %s1062_s22, 3072  ;;  %p14837_p4 = scmp.lt.s32.totalorder %s1062_s22, %s1062_s22 }
 0x132   : > { %p14830_p1 = scmp.ne.s32.totalorder %s1062_s22, %s14829_s15  ;;  %p14838_p7 = scmp.lt.s32.totalorder %s14829_s15, %s14829_s15 }
 0x134   : > { %p14832_p2 = pnand %p14830_p1, %p15566_p0  ;;  %p14839_p8 = por %p14838_p7, %p14837_p4 }
 0x136   : > { %p14833_p3 = pneg %p14832_p2 }
 0x138   : > { %p14840_p11 = pnand %p14839_p8, %p14833_p3 }
 0x13a   : > { %14843 = shalt.err (!%p14840_p11)
}
 0x13b   : > { %s17816_s2 = smov 8   ;;  %s17817_s26 = smov 128  }
 0x13c   : > { %13856 = dma.hbm_to_vmem [thread:$0]  (!%p15558_p12), %s17796_s9, 3072, %s1062_s22, [#allocation4], %s17817_s26, %s17817_s26, %s17816_s2  }
 0x13d   : > { %s14844_s4 = scalar_lea.hbm %s15384_s29, 32 }
 0x13e   : > { %p14845_p6 = scmp.ne.s32.totalorder %s15384_s29, %s14844_s4  ;;  %p14851_p10 = scmp.lt.u32.totalorder %s14844_s4, %s15384_s29 }
 0x140   : > { %p14847_p5 = pnand %p14845_p6, %p15566_p0 }
 0x142   : > { %p14848_p9 = pneg %p14847_p5 }
 0x144   : > { %p14853_p13 = pnand %p14851_p10, %p14848_p9 }
 0x146   : > { %14856 = shalt.err (!%p14853_p13)
}
 0x147   : > { %s14857_s1 = scalar_lea.vmem %s15674_s7, 32  ;;  %p14865_p4 = scmp.lt.s32.totalorder %s15674_s7, %s15674_s7 }
 0x148   : > { %p14858_p1 = scmp.ne.s32.totalorder %s15674_s7, %s14857_s1  ;;  %p14866_p7 = scmp.lt.s32.totalorder %s14857_s1, %s14857_s1 }
 0x14a   : > { %p14860_p2 = pnand %p14858_p1, %p15566_p0  ;;  %p14867_p8 = por %p14866_p7, %p14865_p4 }
 0x14c   : > { %p14861_p3 = pneg %p14860_p2 }
 0x14e   : > { %p14868_p11 = pnand %p14867_p8, %p14861_p3 }
 0x150   : > { %14871 = shalt.err (!%p14868_p11)
}
 0x151   : > { %13862 = dma.hbm_to_vmem [thread:$0]  (!%p15558_p12), %s15384_s29, 32, %s15674_s7, [#allocation7], %s17815_s11, %s17815_s11, %s17814_s0  }
 0x152   : > { %s15261_s22 = smov [#allocation11]   ;;  %s15262_s4 = smov [#allocation14]  }
 0x153   : > { %s1164_s15 = sshll.u32 %s15261_s22, 4  ;;  %s1190_s3 = sshll.u32 %s15262_s4, 4  ;;  %s1165_s15 = int_to_ptr.vmem [resolvable:$true] %s1164_s15  ;;  %s15707_s3 = int_to_ptr.vmem [resolvable:$true] %s1190_s3 }
 0x154   : > { %s14872_s1 = scalar_lea.hbm %s15394_s17, 12288 }
 0x155   : > { %p14873_p6 = scmp.ne.s32.totalorder %s15394_s17, %s14872_s1  ;;  %p14879_p10 = scmp.lt.u32.totalorder %s14872_s1, %s15394_s17 }
 0x157   : > { %p14875_p5 = pnand %p14873_p6, %p15566_p0 }
 0x159   : > { %p14876_p9 = pneg %p14875_p5 }
 0x15b   : > { %p14881_p13 = pnand %p14879_p10, %p14876_p9 }
 0x15d   : > { %14884 = shalt.err (!%p14881_p13)
}
 0x15e   : > { %s14885_s6 = scalar_lea.vmem %s1165_s15, 12288  ;;  %p14893_p4 = scmp.lt.s32.totalorder %s1165_s15, %s1165_s15 }
 0x15f   : > { %p14886_p1 = scmp.ne.s32.totalorder %s1165_s15, %s14885_s6  ;;  %p14894_p7 = scmp.lt.s32.totalorder %s14885_s6, %s14885_s6 }
 0x161   : > { %p14888_p2 = pnand %p14886_p1, %p15566_p0  ;;  %p14895_p8 = por %p14894_p7, %p14893_p4 }
 0x163   : > { %p14889_p3 = pneg %p14888_p2 }
 0x165   : > { %p14896_p11 = pnand %p14895_p8, %p14889_p3 }
 0x167   : > { %14899 = shalt.err (!%p14896_p11)
}
 0x168   : > { %s17818_s7 = smov 24   ;;  %s17819_s22 = smov 384  }
 0x169   : > { %13868 = dma.hbm_to_vmem [thread:$0]  (!%p15558_p12), %s15394_s17, 12288, %s1165_s15, [#allocation10], %s17819_s22, %s17819_s22, %s17818_s7  }
 0x16a   : > { %s14900_s4 = scalar_lea.hbm %s15404_s20, 4096 }
 0x16b   : > { %p14901_p6 = scmp.ne.s32.totalorder %s15404_s20, %s14900_s4  ;;  %p14907_p10 = scmp.lt.u32.totalorder %s14900_s4, %s15404_s20 }
 0x16d   : > { %p14903_p5 = pnand %p14901_p6, %p15566_p0 }
 0x16f   : > { %p14904_p9 = pneg %p14903_p5 }
 0x171   : > { %p14909_p13 = pnand %p14907_p10, %p14904_p9 }
 0x173   : > { %14912 = shalt.err (!%p14909_p13)
}
 0x174   : > { %s14913_s6 = scalar_lea.vmem %s15707_s3, 4096  ;;  %p14921_p4 = scmp.lt.s32.totalorder %s15707_s3, %s15707_s3 }
 0x175   : > { %p14914_p1 = scmp.ne.s32.totalorder %s15707_s3, %s14913_s6  ;;  %p14922_p7 = scmp.lt.s32.totalorder %s14913_s6, %s14913_s6 }
 0x177   : > { %p14916_p2 = pnand %p14914_p1, %p15566_p0  ;;  %p14923_p8 = por %p14922_p7, %p14921_p4 }
 0x179   : > { %p14917_p3 = pneg %p14916_p2 }
 0x17b   : > { %p14924_p11 = pnand %p14923_p8, %p14917_p3 }
 0x17d   : > { %14927 = shalt.err (!%p14924_p11)
}
 0x17e   : > { %13874 = dma.hbm_to_vmem [thread:$0]  (!%p15558_p12), %s15404_s20, 4096, %s15707_s3, [#allocation13], %s17817_s26, %s17817_s26, %s17816_s2  }
 0x17f   : > { %s15263_s15 = smov [#allocation17]   ;;  %s15264_s7 = smov [#allocation20]  }
 0x180   : > { %s1216_s1 = sshll.u32 %s15263_s15, 4  ;;  %s1248_s22 = sshll.u32 %s15264_s7, 4  ;;  %s1217_s1 = int_to_ptr.vmem [resolvable:$true] %s1216_s1  ;;  %s15740_s22 = int_to_ptr.vmem [resolvable:$true] %s1248_s22 }
 0x181   : > { %s14928_s4 = scalar_lea.hbm %s15414_s27, 32 }
 0x182   : > { %p14929_p6 = scmp.ne.s32.totalorder %s15414_s27, %s14928_s4  ;;  %p14935_p10 = scmp.lt.u32.totalorder %s14928_s4, %s15414_s27 }
 0x184   : > { %p14931_p5 = pnand %p14929_p6, %p15566_p0 }
 0x186   : > { %p14932_p9 = pneg %p14931_p5 }
 0x188   : > { %p14937_p13 = pnand %p14935_p10, %p14932_p9 }
 0x18a   : > { %14940 = shalt.err (!%p14937_p13)
}
 0x18b   : > { %s14941_s6 = scalar_lea.vmem %s1217_s1, 32  ;;  %p14949_p4 = scmp.lt.s32.totalorder %s1217_s1, %s1217_s1 }
 0x18c   : > { %p14942_p1 = scmp.ne.s32.totalorder %s1217_s1, %s14941_s6  ;;  %p14950_p7 = scmp.lt.s32.totalorder %s14941_s6, %s14941_s6 }
 0x18e   : > { %p14944_p2 = pnand %p14942_p1, %p15566_p0  ;;  %p14951_p8 = por %p14950_p7, %p14949_p4 }
 0x190   : > { %p14945_p3 = pneg %p14944_p2 }
 0x192   : > { %p14952_p11 = pnand %p14951_p8, %p14945_p3 }
 0x194   : > { %14955 = shalt.err (!%p14952_p11)
}
 0x195   : > { %13880 = dma.hbm_to_vmem [thread:$0]  (!%p15558_p12), %s15414_s27, 32, %s1217_s1, [#allocation16], %s17815_s11, %s17815_s11, %s17814_s0  }
 0x196   : > { %s14956_s3 = scalar_lea.hbm %s15434_s14, 16384 }
 0x197   : > { %p14957_p6 = scmp.ne.s32.totalorder %s15434_s14, %s14956_s3  ;;  %p14963_p10 = scmp.lt.u32.totalorder %s14956_s3, %s15434_s14 }
 0x199   : > { %p14959_p5 = pnand %p14957_p6, %p15566_p0 }
 0x19b   : > { %p14960_p9 = pneg %p14959_p5 }
 0x19d   : > { %p14965_p13 = pnand %p14963_p10, %p14960_p9 }
 0x19f   : > { %14968 = shalt.err (!%p14965_p13)
}
 0x1a0   : > { %s14969_s15 = scalar_lea.vmem %s15740_s22, 16384  ;;  %p14977_p4 = scmp.lt.s32.totalorder %s15740_s22, %s15740_s22 }
 0x1a1   : > { %p14970_p1 = scmp.ne.s32.totalorder %s15740_s22, %s14969_s15  ;;  %p14978_p7 = scmp.lt.s32.totalorder %s14969_s15, %s14969_s15 }
 0x1a3   : > { %p14972_p2 = pnand %p14970_p1, %p15566_p0  ;;  %p14979_p8 = por %p14978_p7, %p14977_p4 }
 0x1a5   : > { %p14973_p3 = pneg %p14972_p2 }
 0x1a7   : > { %p14980_p11 = pnand %p14979_p8, %p14973_p3 }
 0x1a9   : > { %14983 = shalt.err (!%p14980_p11)
}
 0x1aa   : > { %s17820_s0 = sld [smem:[#allocation69_spill]]  ;;  %s15265_s1 = smov [#allocation23]  }
 0x1ab   : > { %13886 = dma.hbm_to_vmem [thread:$0]  (!%p15558_p12), %s15434_s14, 16384, %s15740_s22, [#allocation19], %s17817_s26, %s17817_s26, %s17816_s2  }
 0x1ac   : > { %s1274_s7 = sshll.u32 %s15265_s1, 4  ;;  %s15266_s4 = smov [#allocation26]   ;;  %s1275_s7 = int_to_ptr.vmem [resolvable:$true] %s1274_s7 }
 0x1ad   : > { %s1306_s6 = sshll.u32 %s15266_s4, 4  ;;  %s15773_s6 = int_to_ptr.vmem [resolvable:$true] %s1306_s6 }
 0x1b0   : > { %s17821_s11 = smov %s17820_s0  ;;  %s14984_s3 = scalar_lea.hbm %s17820_s0, 2048 }
 0x1b1   : > { %p14985_p6 = scmp.ne.s32.totalorder %s17821_s11, %s14984_s3  ;;  %p14991_p10 = scmp.lt.u32.totalorder %s14984_s3, %s17821_s11 }
 0x1b3   : > { %p14987_p5 = pnand %p14985_p6, %p15566_p0 }
 0x1b5   : > { %p14988_p9 = pneg %p14987_p5 }
 0x1b7   : > { %p14993_p13 = pnand %p14991_p10, %p14988_p9 }
 0x1b9   : > { %14996 = shalt.err (!%p14993_p13)
}
 0x1ba   : > { %s14997_s15 = scalar_lea.vmem %s1275_s7, 2048  ;;  %p15005_p4 = scmp.lt.s32.totalorder %s1275_s7, %s1275_s7 }
 0x1bb   : > { %p14998_p1 = scmp.ne.s32.totalorder %s1275_s7, %s14997_s15  ;;  %p15006_p7 = scmp.lt.s32.totalorder %s14997_s15, %s14997_s15 }
 0x1bd   : > { %p15000_p2 = pnand %p14998_p1, %p15566_p0  ;;  %p15007_p8 = por %p15006_p7, %p15005_p4 }
 0x1bf   : > { %p15001_p3 = pneg %p15000_p2 }
 0x1c1   : > { %p15008_p11 = pnand %p15007_p8, %p15001_p3 }
 0x1c3   : > { %15011 = shalt.err (!%p15008_p11)
}
 0x1c4   : > { %s17822_s22 = sld [smem:[#allocation72_spill]] }
 0x1c5   : > { %13892 = dma.hbm_to_vmem [thread:$0]  (!%p15558_p12), %s17821_s11, 2048, %s1275_s7, [#allocation22], %s17817_s26, %s17817_s26, %s17816_s2  }
 0x1ca   : > { %s17823_s1 = smov %s17822_s22  ;;  %s15012_s0 = scalar_lea.hbm %s17822_s22, 2048 }
 0x1cb   : > { %p15013_p6 = scmp.ne.s32.totalorder %s17823_s1, %s15012_s0  ;;  %p15019_p10 = scmp.lt.u32.totalorder %s15012_s0, %s17823_s1 }
 0x1cd   : > { %p15015_p5 = pnand %p15013_p6, %p15566_p0 }
 0x1cf   : > { %p15016_p9 = pneg %p15015_p5 }
 0x1d1   : > { %p15021_p13 = pnand %p15019_p10, %p15016_p9 }
 0x1d3   : > { %15024 = shalt.err (!%p15021_p13)
}
 0x1d4   : > { %s15025_s4 = scalar_lea.vmem %s15773_s6, 2048  ;;  %p15033_p4 = scmp.lt.s32.totalorder %s15773_s6, %s15773_s6 }
 0x1d5   : > { %p15026_p1 = scmp.ne.s32.totalorder %s15773_s6, %s15025_s4  ;;  %p15034_p7 = scmp.lt.s32.totalorder %s15025_s4, %s15025_s4 }
 0x1d7   : > { %p15028_p2 = pnand %p15026_p1, %p15566_p0  ;;  %p15035_p8 = por %p15034_p7, %p15033_p4 }
 0x1d9   : > { %p15029_p3 = pneg %p15028_p2 }
 0x1db   : > { %p15036_p11 = pnand %p15035_p8, %p15029_p3 }
 0x1dd   : > { %15039 = shalt.err (!%p15036_p11)
}
 0x1de   : > { %13898 = dma.hbm_to_vmem [thread:$0]  (!%p15558_p12), %s17823_s1, 2048, %s15773_s6, [#allocation25], %s17817_s26, %s17817_s26, %s17816_s2  }
 0x1df   : > { %s15267_s7 = smov [#allocation29]   ;;  %s15268_s15 = smov [#allocation30]  }
 0x1e0   : > { %s1340_s3 = sshll.u32 %s15267_s7, 4  ;;  %s1350_s22 = sshll.u32 %s15268_s15, 4  ;;  %s1341_s3 = int_to_ptr.vmem [resolvable:$true] %s1340_s3  ;;  %s15806_s22 = int_to_ptr.vmem [resolvable:$true] %s1350_s22 }
 0x1e1   : > { %s15040_s0 = scalar_lea.hbm %s15489_s30, 128 }
 0x1e2   : > { %p15041_p6 = scmp.ne.s32.totalorder %s15489_s30, %s15040_s0  ;;  %p15047_p10 = scmp.lt.u32.totalorder %s15040_s0, %s15489_s30 }
 0x1e4   : > { %p15043_p5 = pnand %p15041_p6, %p15566_p0 }
 0x1e6   : > { %p15044_p9 = pneg %p15043_p5 }
 0x1e8   : > { %p15049_p13 = pnand %p15047_p10, %p15044_p9 }
 0x1ea   : > { %15052 = shalt.err (!%p15049_p13)
}
 0x1eb   : > { %s15053_s4 = scalar_lea.vmem %s1341_s3, 128  ;;  %p15061_p4 = scmp.lt.s32.totalorder %s1341_s3, %s1341_s3 }
 0x1ec   : > { %p15054_p1 = scmp.ne.s32.totalorder %s1341_s3, %s15053_s4  ;;  %p15062_p7 = scmp.lt.s32.totalorder %s15053_s4, %s15053_s4 }
 0x1ee   : > { %p15056_p2 = pnand %p15054_p1, %p15566_p0  ;;  %p15063_p8 = por %p15062_p7, %p15061_p4 }
 0x1f0   : > { %p15057_p3 = pneg %p15056_p2 }
 0x1f2   : > { %p15064_p11 = pnand %p15063_p8, %p15057_p3 }
 0x1f4   : > { %15067 = shalt.err (!%p15064_p11)
}
 0x1f5   : > { %13904 = dma.hbm_to_vmem [thread:$0]  (!%p15558_p12), %s15489_s30, 128, %s1341_s3, [#allocation28]  }
 0x1f6   : > { %s15068_s6 = scalar_lea.hbm %s17798_s5, 2048 }
 0x1f7   : > { %p15069_p6 = scmp.ne.s32.totalorder %s17798_s5, %s15068_s6  ;;  %p15075_p10 = scmp.lt.u32.totalorder %s15068_s6, %s17798_s5 }
 0x1f9   : > { %p15071_p5 = pnand %p15069_p6, %p15566_p0 }
 0x1fb   : > { %p15072_p9 = pneg %p15071_p5 }
 0x1fd   : > { %p15077_p13 = pnand %p15075_p10, %p15072_p9 }
 0x1ff   : > { %15080 = shalt.err (!%p15077_p13)
}
 0x200   : > { %s15081_s7 = scalar_lea.vmem %s15806_s22, 2048  ;;  %p15089_p4 = scmp.lt.s32.totalorder %s15806_s22, %s15806_s22 }
 0x201   : > { %p15082_p1 = scmp.ne.s32.totalorder %s15806_s22, %s15081_s7  ;;  %p15090_p7 = scmp.lt.s32.totalorder %s15081_s7, %s15081_s7 }
 0x203   : > { %p15084_p2 = pnand %p15082_p1, %p15566_p0  ;;  %p15091_p8 = por %p15090_p7, %p15089_p4 }
 0x205   : > { %p15085_p3 = pneg %p15084_p2 }
 0x207   : > { %p15092_p11 = pnand %p15091_p8, %p15085_p3 }
 0x209   : > { %15095 = shalt.err (!%p15092_p11)
}
 0x20a   : > { %13907 = dma.hbm_to_vmem [thread:$0]  (!%p15558_p12), %s17798_s5, 2048, %s15806_s22, [#allocation31], %s17817_s26, %s17817_s26, %s17816_s2  }
 0x20b   : > { %p17824_p6 = scmp.ne.s32.totalorder %s17811_s18, 0 }
 0x20c   : > { %p17825_p0 = scmp.eq.s32.totalorder (!%p17824_p6), %s15522_s28, 0 }
 0x20d   : > { %1374 = sbr.rel (%p17824_p6) target bundleno = 15447 (0x3c57), region = 192 }
 0x214   : > { %15141 = dma.done.wait (%p17825_p0), [#allocation4], 3072   ;;  %p17826_p5 = pmov %p17825_p0 }
 0x215   : > { %p17827_p9 = pmov %p17825_p0 }
 0x216   : > { %15143 = vsyncadd (%p17826_p5), [#allocation4], 4294964224 }
 0x217   : > { %15145 = dma.done.wait (%p17827_p9), [#allocation7], 12320   ;;  %p17828_p10 = pmov %p17825_p0 }
 0x218   : > { %p17829_p13 = pmov %p17825_p0 }
 0x219   : > { %15147 = vsyncadd (%p17828_p10), [#allocation7], 4294954976 }
 0x21a   : > { %15149 = dma.done.wait (%p17829_p13), [#allocation10], 12320   ;;  %p17830_p12 = pmov %p17825_p0 }
 0x21b   : > { %p17831_p1 = pmov %p17825_p0 }
 0x21c   : > { %15151 = vsyncadd (%p17830_p12), [#allocation10], 4294954976 }
 0x21d   : > { %15153 = dma.done.wait (%p17831_p1), [#allocation13], 4192   ;;  %p17832_p2 = pmov %p17825_p0 }
 0x21e   : > { %p17833_p3 = pmov %p17825_p0 }
 0x21f   : > { %15155 = vsyncadd (%p17832_p2), [#allocation13], 4294963104 }
 0x220   : > { %15157 = dma.done.wait (%p17833_p3), [#allocation16], 64   ;;  %p17834_p4 = pmov %p17825_p0 }
 0x221   : > { %p17835_p7 = pmov %p17825_p0 }
 0x222   : > { %15159 = vsyncadd (%p17834_p4), [#allocation16], 4294967232 }
 0x223   : > { %15161 = dma.done.wait (%p17835_p7), [#allocation19], 16416   ;;  %p17836_p8 = pmov %p17825_p0 }
 0x224   : > { %p17837_p11 = pmov %p17825_p0 }
 0x225   : > { %15163 = vsyncadd (%p17836_p8), [#allocation19], 4294950880 }
 0x226   : > { %15165 = dma.done.wait (%p17837_p11), [#allocation22], 2080   ;;  %p17838_p6 = pmov %p17825_p0 }
 0x228   : > { %15167 = vsyncadd (%p17838_p6), [#allocation22], 4294965216 }
 0x229   : > { %15169 = dma.done.wait (%p17825_p0), [#allocation25], 4096   ;;  %p17839_p5 = pmov %p17825_p0 }
 0x22a   : > { %p17840_p9 = pmov %p17825_p0 }
 0x22b   : > { %15171 = vsyncadd (%p17839_p5), [#allocation25], 4294963200 }
 0x22c   : > { %15173 = dma.done.wait (%p17840_p9), [#allocation28], 144   ;;  %p17841_p10 = pmov %p17825_p0 }
 0x22d   : > { %p17842_p13 = pmov %p17825_p0 }
 0x22e   : > { %15175 = vsyncadd (%p17841_p10), [#allocation28], 4294967152 }
 0x22f   : > { %15177 = dma.done.wait (%p17842_p13), [#allocation31], 2048   ;;  %p17843_p12 = pmov %p17825_p0 }
 0x230   : > { %s17844_s16 = sld [smem:[#allocation44_spill]]  ;;  %v15269_v0 = vmov 0.0|0.0   ;;  %p1545_p1 = scmp.lt.s32.totalorder %s15522_s28, 1  ;;  %v1554_v1 = vld [vmem:[#allocation3] sm:$0xff]  ;;  %v1555_v2 = vld [vmem:[#allocation3 + $0x8] sm:$0xff]  ;;  %v1556_v3 = vld [vmem:[#allocation3 + $0x10] sm:$0xff] }
 0x231   : > { %15179 = vsyncadd (%p17843_p12), [#allocation31], 4294965248  ;;  %12599 = vmatprep.subr.bf16.mxu0 %v15269_v0  ;;  %v12600_v4 = vpack.c.bf16 %v1555_v2, %v1554_v1  ;;  %v1557_v5 = vld [vmem:[#allocation3 + $0x18] sm:$0xff]  ;;  %v1558_v7 = vld [vmem:[#allocation3 + $0x20] sm:$0xff]  ;;  %vm1578_vm0 = vcmask 523264   ;;  %s17845_s26 = sld [smem:[#allocation46_spill]] }
 0x232   : > { %s1546_s18 = scalar_select %p1545_p1, %s15522_s28, 1  ;;  %v12603_v6 = vpack.c.bf16 %v1557_v5, %v1556_v3  ;;  %v1559_v8 = vld [vmem:[#allocation3 + $0x28] sm:$0xff]  ;;  %v1560_v10 = vld [vmem:[#allocation3 + $0x30] sm:$0xff]  ;;  %v1561_v11 = vld [vmem:[#allocation3 + $0x38] sm:$0xff]  ;;  %v15270_v41 = vmov 0.0   ;;  %vm1962_vm1 = vcmask 261120  }
 0x233   : > { %12601 = vmatpush1.bf16.msra.mxu0 %v12600_v4  ;;  %v12606_v9 = vpack.c.bf16 %v1559_v8, %v1558_v7  ;;  %v12609_v13 = vpack.c.bf16 %v1561_v11, %v1560_v10  ;;  %v1562_v14 = vld [vmem:[#allocation3 + $0x40] sm:$0xff]  ;;  %v1563_v15 = vld [vmem:[#allocation3 + $0x48] sm:$0xff]  ;;  %v1564_v17 = vld [vmem:[#allocation3 + $0x50] sm:$0xff]  ;;  %1874 = vmatprep.mubr.f32.mxu1 %v15270_v41  ;;  %6012 = vst [vmem:[#allocation2 + $0x13] sm:$0x1f] %v15270_v41  ;;  %s17847_s15 = sld [smem:[#allocation48_spill]] }
 0x234   : > { %s10978_s10 = sshll.u32 %s1546_s18, 5  ;;  %12602 = vmatprep.subr.bf16.mxu0 %v15269_v0  ;;  %v12612_v16 = vpack.c.bf16 %v1563_v15, %v1562_v14  ;;  %v1565_v18 = vld [vmem:[#allocation3 + $0x58] sm:$0xff]  ;;  %v1566_v20 = vld [vmem:[#allocation3 + $0x60] sm:$0xff]  ;;  %v1567_v21 = vld [vmem:[#allocation3 + $0x68] sm:$0xff]  ;;  %s17848_s22 = sld [smem:[#allocation49_spill]]  ;;  %vm2052_vm3 = vcmask 130048  }
 0x235   : > { %v12615_v19 = vpack.c.bf16 %v1565_v18, %v1564_v17  ;;  %v12618_v22 = vpack.c.bf16 %v1567_v21, %v1566_v20  ;;  %v1568_v23 = vld [vmem:[#allocation3 + $0x70] sm:$0xff]  ;;  %v1569_v24 = vld [vmem:[#allocation3 + $0x78] sm:$0xff]  ;;  %v1570_v26 = vld [vmem:[#allocation3 + $0x80] sm:$0xff]  ;;  %s17850_s0 = sld [smem:[#allocation52_spill]]  ;;  %s17852_s7 = sld [smem:[#allocation53_spill]]  ;;  %vm2792_vm4 = vcmask 785408  }
 0x236   : > { %s15883_s2 = scalar_lea.vmem %s17844_s16, %s10978_s10  ;;  %v12621_v25 = vpack.c.bf16 %v1569_v24, %v1568_v23  ;;  %v1571_v27 = vld [vmem:[#allocation3 + $0x88] sm:$0xff]  ;;  %v1572_v29 = vld [vmem:[#allocation3 + $0x90] sm:$0xff]  ;;  %v1573_v30 = vld [vmem:[#allocation3 + $0x98] sm:$0xff]  ;;  %s17853_s16 = sld [smem:[#allocation54_spill]]  ;;  %vm5227_vm5 = vcmask 1040384   ;;  %vm15274_vm6 = vmmov 0  }
 0x237   : > { %12604 = vmatpush1.bf16.msra.mxu0 %v12603_v6  ;;  %v1551_v12 = vld [vmem:[%s15883_s2 + $0x8] sm:$0xff]  ;;  %v12624_v28 = vpack.c.bf16 %v1571_v27, %v1570_v26  ;;  %v12627_v31 = vpack.c.bf16 %v1573_v30, %v1572_v29  ;;  %v1574_v32 = vld [vmem:[#allocation3 + $0xa0] sm:$0xff]  ;;  %v1575_v33 = vld [vmem:[#allocation3 + $0xa8] sm:$0xff]  ;;  %s17846_s3 = smov %s17845_s26  ;;  %s17742_s18 = smov 96   ;;  %vm5499_vm8 = vcmask 57344   ;;  %vm5511_vm9 = vcmask 64512  }
 0x238   : > { %12605 = vmatprep.subr.bf16.mxu0 %v15269_v0  ;;  %10563 = vmatprep.mubr.msk.f32.mxu0 %vm1578_vm0, %v1551_v12  ;;  %v12630_v34 = vpack.c.bf16 %v1575_v33, %v1574_v32  ;;  %v1576_v35 = vld [vmem:[#allocation3 + $0xb0] sm:$0xff]  ;;  %v1577_v36 = vld [vmem:[#allocation3 + $0xb8] sm:$0xff]  ;;  %v1550_v38 = vld [vmem:[%s15883_s2] sm:$0xff]  ;;  %s17746_s10 = smov 64   ;;  %s17867_s5 = sld [smem:[#allocation61_spill]]  ;;  %vm6456_vm12 = vcmask 195584  }
 0x239   : > { %v12633_v37 = vpack.c.bf16 %v1577_v36, %v1576_v35  ;;  %v1553_v39 = vld [vmem:[%s15883_s2 + $0x18] sm:$0xff]  ;;  %v1552_v40 = vld [vmem:[%s15883_s2 + $0x10] sm:$0xff]  ;;  %v1660_v42 = vld [vmem:[%s17845_s26] sm:$0xff]  ;;  %s17744_s2 = smov 32   ;;  %s17856_s26 = sld [smem:[#allocation55_spill]]  ;;  %vm10118_vm13 = vcmask 1041409  }
 0x23a   : > { %v1661_v46 = vld [vmem:[%s17846_s3 + $0x8] sm:$0xff]  ;;  %s17849_s4 = smov %s17848_s22  ;;  %v10565_v2 = vld [vmem:[%s17847_s15] ss:$0 sm:$0xff]  ;;  %v1749_v12 = vld [vmem:[#allocation6 + $0x20] sm:$0xff] }
 0x23b   : > { %12607 = vmatpush1.bf16.msra.mxu0 %v12606_v9  ;;  %v10566_v4 = vld [vmem:[%s17848_s22] ss:$0 sm:$0xff]  ;;  %v1748_v15 = vld [vmem:[#allocation6 + $0x18] sm:$0xff]  ;;  %v1755_v17 = vld [vmem:[#allocation6 + $0x50] sm:$0xff]  ;;  %s17851_s6 = smov %s17850_s0  ;;  %s17858_s22 = smov 96  }
 0x23c   : > { %12608 = vmatprep.subr.bf16.mxu0 %v15269_v0  ;;  %v1746_v11 = vld [vmem:[#allocation6 + $0x8] sm:$0xff]  ;;  %v1751_v20 = vld [vmem:[#allocation6 + $0x30] sm:$0xff]  ;;  %v1761_v23 = vld [vmem:[#allocation6 + $0x80] sm:$0xff] }
 0x23d   : > { %v12635_v14 = vpack.c.bf16 %v1749_v12, %v1746_v11  ;;  %v1754_v21 = vld [vmem:[#allocation6 + $0x48] sm:$0xff]  ;;  %v1757_v26 = vld [vmem:[#allocation6 + $0x60] sm:$0xff]  ;;  %v1760_v27 = vld [vmem:[#allocation6 + $0x78] sm:$0xff] }
 0x23e   : > { %v12641_v24 = vpack.c.bf16 %v1754_v21, %v1751_v20  ;;  %v1753_v20 = vld [vmem:[#allocation6 + $0x40] sm:$0xff]  ;;  %v1756_v21 = vld [vmem:[#allocation6 + $0x58] sm:$0xff]  ;;  %vm15943_vm2 = vmpackc.low %vm1962_vm1, %vm1962_vm1 }
 0x23f   : > { %12610 = vmatpush1.bf16.msra.mxu0 %v12609_v13  ;;  %v1745_v13 = vld [vmem:[#allocation6] sm:$0xff]  ;;  %12636 = vmatprep.subr.bf16.mxu1 %v12635_v14 }
 0x240   : > { %12611 = vmatprep.subr.bf16.mxu0 %v15269_v0  ;;  %v12637_v18 = vpack.c.bf16 %v1748_v15, %v1745_v13 }
 0x242   : > { %12638 = vmatpush1.bf16.msra.mxu1 %v12637_v18 }
 0x243   : > { %12613 = vmatpush1.bf16.msra.mxu0 %v12612_v16  ;;  %v1752_v16 = vld [vmem:[#allocation6 + $0x38] sm:$0xff] }
 0x244   : > { %12614 = vmatprep.subr.bf16.mxu0 %v15269_v0 }
 0x247   : > { %12616 = vmatpush1.bf16.msra.mxu0 %v12615_v19  ;;  %v12639_v19 = vpack.c.bf16 %v1755_v17, %v1752_v16  ;;  %v10567_v17 = vld [vmem:[%s17850_s0] ss:$0 sm:$0xff]  ;;  %s17859_s0 = sld [smem:[#allocation56_spill]] }
 0x248   : > { %12617 = vmatprep.subr.bf16.mxu0 %v15269_v0 }
 0x249   : > { %12640 = vmatprep.subr.bf16.mxu1 %v12639_v19  ;;  %v10568_v19 = vld [vmem:[%s17852_s7] ss:$0 sm:$0xff] }
 0x24a   : > { %12642 = vmatpush1.bf16.msra.mxu1 %v12641_v24 }
 0x24b   : > { %12619 = vmatpush1.bf16.msra.mxu0 %v12618_v22  ;;  %v1758_v22 = vld [vmem:[#allocation6 + $0x68] sm:$0xff] }
 0x24c   : > { %12620 = vmatprep.subr.bf16.mxu0 %v15269_v0 }
 0x24f   : > { %12622 = vmatpush1.bf16.msra.mxu0 %v12621_v25  ;;  %v12643_v25 = vpack.c.bf16 %v1761_v23, %v1758_v22 }
 0x250   : > { %12623 = vmatprep.subr.bf16.mxu0 %v15269_v0 }
 0x251   : > { %12644 = vmatprep.subr.bf16.mxu1 %v12643_v25  ;;  %v12671_v25 = vpack.c.bf16 %v1756_v21, %v1753_v20 }
 0x253   : > { %12625 = vmatpush1.bf16.msra.mxu0 %v12624_v28  ;;  %v12645_v28 = vpack.c.bf16 %v1760_v27, %v1757_v26  ;;  %v1759_v27 = vld [vmem:[#allocation6 + $0x70] sm:$0xff] }
 0x254   : > { %12626 = vmatprep.subr.bf16.mxu0 %v15269_v0 }
 0x255   : > { %12646 = vmatpush1.bf16.msra.mxu1 %v12645_v28  ;;  %v1762_v28 = vld [vmem:[#allocation6 + $0x88] sm:$0xff] }
 0x257   : > { %12628 = vmatpush1.bf16.msra.mxu0 %v12627_v31 }
 0x258   : > { %12629 = vmatprep.subr.bf16.mxu0 %v15269_v0 }
 0x25b   : > { %12631 = vmatpush1.bf16.msra.mxu0 %v12630_v34 }
 0x25c   : > { %12632 = vmatprep.subr.bf16.mxu0 %v15269_v0 }
 0x25f   : > { %12634 = vmatpush1.bf16.msra.mxu0 %v12633_v37  ;;  %v1764_v37 = vld [vmem:[#allocation6 + $0x98] sm:$0xff] }
 0x262   : > { %1650 = vmatmul.mubr.f32.vlgmr.msra.gmra.mrb[0].mxu0 %v1550_v38  ;;  %v1767_v38 = vld [vmem:[#allocation6 + $0xb0] sm:$0xff] }
 0x263   : > { %10564 = vmatprep.mubr.msk.f32.mxu0 %vm1578_vm0, %v1553_v39  ;;  %v12647_v39 = vpack.c.bf16 %v1767_v38, %v1764_v37  ;;  %v1774_v37 = vld [vmem:[#allocation6 + $0xe8] sm:$0xff]  ;;  %v1777_v38 = vld [vmem:[#allocation6 + $0x100] sm:$0xff] }
 0x265   : > { %12648 = vmatprep.subr.bf16.mxu1 %v12647_v39  ;;  %v1780_v39 = vld [vmem:[#allocation6 + $0x118] sm:$0xff] }
 0x266   : > { %1655 = vmatmul.mubr.f32.gmra.mrb[2].mxu0 %v1552_v40  ;;  %v1763_v40 = vld [vmem:[#allocation6 + $0x90] sm:$0xff] }
 0x335   : > { %v1651_v43 = vpop.f32.mrb[0].mxu0 }
 0x336   : > { %v1662_v44 = vadd.f32 %v1660_v42, %v1651_v43  ;;  %v1653_v45 = vpop.f32.mrb[1].mxu0  ;;  %v1766_v42 = vld [vmem:[#allocation6 + $0xa8] sm:$0xff] }
 0x337   : > { %v12649_v43 = vpack.c.bf16 %v1766_v42, %v1763_v40  ;;  %v1773_v45 = vld [vmem:[#allocation6 + $0xe0] sm:$0xff]  ;;  %v12687_v40 = vpack.c.bf16 %v1780_v39, %v1777_v38  ;;  %v1783_v42 = vld [vmem:[#allocation6 + $0x130] sm:$0xff] }
 0x338   : > { %6010 = vst [vmem:[#allocation2 + $0x3] sm:$0xff] %v1662_v44  ;;  %1666 = vadd.xlane.f32.xlu0 %v1662_v44 }
 0x339   : > { %v1656_v47 = vpop.f32.mrb[2].mxu0  ;;  %12650 = vmatpush1.bf16.msra.mxu1 %v12649_v43  ;;  %v1786_v43 = vld [vmem:[#allocation6 + $0x148] sm:$0xff] }
 0x33a   : > { %v1663_v48 = vadd.f32 %v1661_v46, %v1656_v47  ;;  %v1658_v49 = vpop.f32.mrb[3].mxu0  ;;  %v1769_v47 = vld [vmem:[#allocation6 + $0xc0] sm:$0xff] }
 0x33c   : > { %6011 = vst [vmem:[#allocation2 + $0xb] sm:$0xff] %v1663_v48  ;;  %1668 = vadd.xlane.f32.xlu0 %v1663_v48 }
 0x3c5   : > { %v1667_v50 = vpop.xlane.xlu0 %1666 }
 0x3c6   : > { %v1671_v51 = vmul.f32 0.0078125, %v1667_v50  ;;  %v1776_v50 = vld [vmem:[#allocation6 + $0xf8] sm:$0xff] }
 0x3c8   : > { %v1673_v52 = vsub.f32 %v1662_v44, %v1671_v51  ;;  %v1770_v44 = vld [vmem:[#allocation6 + $0xc8] sm:$0xff]  ;;  %v1779_v51 = vld [vmem:[#allocation6 + $0x110] sm:$0xff] }
 0x3c9   : > { %v1669_v53 = vpop.xlane.xlu0 %1668  ;;  %v12651_v46 = vpack.c.bf16 %v1773_v45, %v1770_v44  ;;  %v12691_v44 = vpack.c.bf16 %v1786_v43, %v1783_v42  ;;  %v1789_v45 = vld [vmem:[#allocation6 + $0x160] sm:$0xff] }
 0x3ca   : > { %v1672_v54 = vmul.f32 0.0078125, %v1669_v53  ;;  %v1675_v55 = vmul.f32 %v1673_v52, %v1673_v52  ;;  %v1775_v53 = vld [vmem:[#allocation6 + $0xf0] sm:$0xff] }
 0x3cb   : > { %12652 = vmatprep.subr.bf16.mxu1 %v12651_v46  ;;  %v1792_v46 = vld [vmem:[#allocation6 + $0x178] sm:$0xff] }
 0x3cc   : > { %1677 = vadd.xlane.f32.xlu1 %v1675_v55  ;;  %v1674_v56 = vsub.f32 %v1663_v48, %v1672_v54  ;;  %v1772_v48 = vld [vmem:[#allocation6 + $0xd8] sm:$0xff]  ;;  %v1778_v54 = vld [vmem:[#allocation6 + $0x108] sm:$0xff] }
 0x3cd   : > { %v12653_v49 = vpack.c.bf16 %v1772_v48, %v1769_v47  ;;  %v12657_v55 = vpack.c.bf16 %v1778_v54, %v1775_v53  ;;  %v12695_v47 = vpack.c.bf16 %v1792_v46, %v1789_v45  ;;  %v1795_v48 = vlaneseq }
 0x3ce   : > { %v1676_v57 = vmul.f32 %v1674_v56, %v1674_v56 }
 0x3cf   : > { %12654 = vmatpush1.bf16.msra.mxu1 %v12653_v49  ;;  %v15924_v49 = vshrl.u32 %v1795_v48, 7 }
 0x3d0   : > { %1679 = vadd.xlane.f32.xlu1 %v1676_v57  ;;  %v1785_v57 = vld [vmem:[#allocation6 + $0x140] sm:$0xff] }
 0x3d1   : > { %v15932_v53 = vsub.s32 1, %v15924_v49 }
 0x459   : > { %v1678_v58 = vpop.xlane.xlu1 %1677 }
 0x45a   : > { %v1681_v59 = vmul.f32 0.0078125, %v1678_v58  ;;  %v1781_v58 = vld [vmem:[#allocation6 + $0x120] sm:$0xff] }
 0x45c   : > { %v1683_v60 = vadd.f32 1e-05, %v1681_v59 }
 0x45d   : > { %v1680_v61 = vpop.xlane.xlu1 %1679 }
 0x45e   : > { %14206 = vrsqrt.f32 %v1683_v60  ;;  %v1682_v62 = vmul.f32 0.0078125, %v1680_v61  ;;  %v1784_v60 = vld [vmem:[#allocation6 + $0x138] sm:$0xff] }
 0x45f   : > { %v1788_v61 = vld [vmem:[#allocation6 + $0x158] sm:$0xff] }
 0x460   : > { %v1684_v63 = vadd.f32 1e-05, %v1682_v62  ;;  %v1791_v62 = vld [vmem:[#allocation6 + $0x170] sm:$0xff] }
 0x462   : > { %14208 = vrsqrt.f32 %v1684_v63  ;;  %v12661_v63 = vpack.c.bf16 %v1784_v60, %v1781_v58 }
 0x468   : > { %v14207_v1 = vpop.eup %14206 }
 0x469   : > { %v1687_v3 = vmul.f32 %v14207_v1, %v1673_v52  ;;  %v12655_v52 = vpack.c.bf16 %v1779_v51, %v1776_v50  ;;  %v12663_v1 = vpack.c.bf16 %v1791_v62, %v1788_v61  ;;  %v15927_v50 = vsub.s32 0, %v15924_v49  ;;  %v1793_v51 = vld [vmem:[%s17853_s16] sm:$0x7] }
 0x46b   : > { %v1695_v5 = vmul.f32 %v10565_v2, %v1687_v3  ;;  %12656 = vmatprep.subr.bf16.mxu1 %v12655_v52  ;;  %v1790_v3 = vld [vmem:[#allocation6 + $0x168] sm:$0xff]  ;;  %v1798_v52 = vrot.slane %v1793_v51, %v15927_v50 }
 0x46c   : > { %v14209_v6 = vpop.eup %14208  ;;  %12658 = vmatpush1.bf16.msra.mxu1 %v12657_v55 }
 0x46d   : > { %v15907_v7 = vadd.f32 %v10566_v4, %v1695_v5  ;;  %v1688_v8 = vmul.f32 %v14209_v6, %v1674_v56  ;;  %v1782_v56 = vld [vmem:[#allocation6 + $0x128] sm:$0xff] }
 0x46e   : > { %v12659_v59 = vpack.c.bf16 %v1785_v57, %v1782_v56  ;;  %v1750_v5 = vld [vmem:[#allocation6 + $0x28] sm:$0xff]  ;;  %v1802_v57 = vrot.slane %v1793_v51, %v15932_v53 }
 0x46f   : > { %1707 = vadd.xlane.f32.xlu0 %v15907_v7  ;;  %v1696_v9 = vmul.f32 %v10565_v2, %v1688_v8  ;;  %v1787_v2 = vld [vmem:[#allocation6 + $0x150] sm:$0xff] }
 0x470   : > { %12660 = vmatprep.subr.bf16.mxu1 %v12659_v59  ;;  %v12665_v6 = vpack.c.bf16 %v1790_v3, %v1787_v2  ;;  %v15968_v3 = vsub.s32 2, %v15924_v49 }
 0x471   : > { %v15910_v10 = vadd.f32 %v10566_v4, %v1696_v9  ;;  %v1747_v4 = vld [vmem:[#allocation6 + $0x10] sm:$0xff]  ;;  %12662 = vmatpush1.bf16.msra.mxu1 %v12661_v63 }
 0x472   : > { %12664 = vmatprep.subr.bf16.mxu1 %v12663_v1  ;;  %v12667_v8 = vpack.c.bf16 %v1750_v5, %v1747_v4  ;;  %v1806_v4 = vrot.slane %v1793_v51, %v15968_v3 }
 0x473   : > { %1709 = vadd.xlane.f32.xlu1 %v15910_v10 }
 0x475   : > { %12666 = vmatpush1.bf16.msra.mxu1 %v12665_v6 }
 0x476   : > { %12668 = vmatprep.subr.bf16.mxu1 %v12667_v8 }
 0x4fc   : > { %v1708_v29 = vpop.xlane.xlu0 %1707 }
 0x4fd   : > { %v1711_v30 = vmul.f32 0.0078125, %v1708_v29 }
 0x4ff   : > { %v1713_v31 = vsub.f32 %v15907_v7, %v1711_v30 }
 0x500   : > { %v1710_v32 = vpop.xlane.xlu1 %1709 }
 0x501   : > { %v1712_v33 = vmul.f32 0.0078125, %v1710_v32  ;;  %v1715_v34 = vmul.f32 %v1713_v31, %v1713_v31  ;;  %v12675_v32 = vpack.c.bf16 %v1762_v28, %v1759_v27 }
 0x503   : > { %1717 = vadd.xlane.f32.xlu0 %v1715_v34  ;;  %v15915_v35 = vsub.f32 %v15910_v10, %v1712_v33  ;;  %v1768_v33 = vld [vmem:[#allocation6 + $0xb8] sm:$0xff] }
 0x505   : > { %v1716_v36 = vmul.f32 %v15915_v35, %v15915_v35 }
 0x507   : > { %1719 = vadd.xlane.f32.xlu1 %v1716_v36  ;;  %v1771_v36 = vld [vmem:[#allocation6 + $0xd0] sm:$0xff] }
 0x590   : > { %v1718_v9 = vpop.xlane.xlu0 %1717 }
 0x591   : > { %v1721_v11 = vmul.f32 0.0078125, %v1718_v9 }
 0x593   : > { %v1723_v12 = vadd.f32 1e-05, %v1721_v11 }
 0x594   : > { %v1720_v13 = vpop.xlane.xlu1 %1719 }
 0x595   : > { %14210 = vrsqrt.f32 %v1723_v12  ;;  %v1722_v14 = vmul.f32 0.0078125, %v1720_v13 }
 0x597   : > { %v1724_v15 = vadd.f32 1e-05, %v1722_v14 }
 0x599   : > { %14212 = vrsqrt.f32 %v1724_v15 }
 0x59f   : > { %v14211_v16 = vpop.eup %14210 }
 0x5a0   : > { %v1727_v18 = vmul.f32 %v14211_v16, %v1713_v31  ;;  %v1765_v31 = vld [vmem:[#allocation6 + $0xa0] sm:$0xff] }
 0x5a1   : > { %v12679_v34 = vpack.c.bf16 %v1768_v33, %v1765_v31 }
 0x5a2   : > { %v1735_v22 = vmul.f32 %v10567_v17, %v1727_v18 }
 0x5a3   : > { %v14213_v23 = vpop.eup %14212 }
 0x5a4   : > { %v1743_v24 = vadd.f32 %v10568_v19, %v1735_v22  ;;  %v1728_v26 = vmul.f32 %v14213_v23, %v15915_v35  ;;  %v12683_v35 = vpack.c.bf16 %v1774_v37, %v1771_v36 }
 0x5a6   : > { %1875 = vmatmul.mubr.f32.vlgmr.msra.gmra.mrb[0].mxu1 %v1743_v24  ;;  %v1736_v29 = vmul.f32 %v10567_v17, %v1728_v26 }
 0x5a7   : > { %12670 = vmatpush3.bf16.msra.mxu1 %v12667_v8  ;;  %1880 = vmatprep.mubr.f32.mxu1 %v15270_v41 }
 0x5a8   : > { %12672 = vmatprep.subr.bf16.mxu1 %v12671_v25  ;;  %v1744_v30 = vadd.f32 %v10568_v19, %v1736_v29 }
 0x5aa   : > { %1881 = vmatmul.mubr.f32.gmra.mrb[2].mxu1 %v1744_v30 }
 0x5ab   : > { %12674 = vmatpush3.bf16.msra.mxu1 %v12671_v25  ;;  %11745 = vmatprep.mubr.f32.mxu1 %v1743_v24 }
 0x5ac   : > { %12676 = vmatprep.subr.bf16.mxu1 %v12675_v32 }
 0x5af   : > { %12678 = vmatpush3.bf16.msra.mxu1 %v12675_v32 }
 0x5b0   : > { %12680 = vmatprep.subr.bf16.mxu1 %v12679_v34 }
 0x5b3   : > { %12682 = vmatpush3.bf16.msra.mxu1 %v12679_v34 }
 0x5b4   : > { %12684 = vmatprep.subr.bf16.mxu1 %v12683_v35 }
 0x5b7   : > { %12686 = vmatpush3.bf16.msra.mxu1 %v12683_v35 }
 0x5b8   : > { %12688 = vmatprep.subr.bf16.mxu1 %v12687_v40 }
 0x5bb   : > { %12690 = vmatpush3.bf16.msra.mxu1 %v12687_v40 }
 0x5bc   : > { %12692 = vmatprep.subr.bf16.mxu1 %v12691_v44 }
 0x5bf   : > { %12694 = vmatpush3.bf16.msra.mxu1 %v12691_v44 }
 0x5c0   : > { %12696 = vmatprep.subr.bf16.mxu1 %v12695_v47 }
 0x5c3   : > { %12698 = vmatpush3.bf16.msra.mxu1 %v12695_v47 }
 0x5c6   : > { %11746 = vmatmul.mubr.f32.vlgmr.msra.gmra.mrb[4].mxu1 %v1744_v30 }
 0x679   : > { %v1876_v54 = vpop.f32.mrb[0].mxu1 }
 0x67a   : > { %v15934_v55 = vadd.f32 %v1876_v54, %v1798_v52  ;;  %v1878_v56 = vpop.f32.mrb[1].mxu1 }
 0x67b   : > { %v1879_v60 = vadd.f32 %v1878_v56, %v1802_v57 }
 0x67c   : > { %2156 = vrot.lane.b32.xlu1 %v15934_v55, %s17742_s18  ;;  %11752 = vmatprep.mubr.msk.f32.mxu0 %vm1962_vm1, %v15934_v55 }
 0x67d   : > { %v1882_v58 = vpop.f32.mrb[2].mxu1 }
 0x67e   : > { %v1884_v59 = vpop.f32.mrb[3].mxu1  ;;  %v15957_v2 = vadd.f32 %v1882_v58, %v1798_v52 }
 0x67f   : > { %v1885_v61 = vadd.f32 %v1884_v59, %v1802_v57 }
 0x681   : > { %v15947_v63 = vpack.i.bf16 %v1885_v61, %v1879_v60  ;;  %v12699_v1 = vpack.c.bf16 %v1885_v61, %v1879_v60 }
 0x683   : > { %14057 = vrot.lane.b32.xlu0 %v15947_v63, %s17742_s18  ;;  %12701 = vmatprep.subr.msk.bf16.mxu0 %vm15943_vm2, %v12699_v1 }
 0x684   : > { %14062 = vrot.lane.b32.xlu1 %v15947_v63, %s17746_s10  ;;  %12704 = vmatpush3.bf16.xpose.msk.msra.mxu0 %vm15943_vm2, %v12699_v1 }
 0x687   : > { %2360 = vrot.lane.b32.xlu0 %v15934_v55, %s17746_s10 }
 0x688   : > { %2158 = vrot.lane.b32.xlu1 %v15957_v2, %s17742_s18 }
 0x68b   : > { %11753 = vmatmul.mubr.msk.f32.vlgmr.msra.gmra.mrb[4].mxu0 %vm1962_vm1, %v15957_v2 }
 0x68c   : > { %2362 = vrot.lane.b32.xlu1 %v15957_v2, %s17746_s10 }
 0x699   : > { %v11747_v5 = vpop.f32.mrb[4].mxu1 }
 0x69a   : > { %v1959_v6 = vadd.f32 %v11747_v5, %v1806_v4  ;;  %v1953_v8 = vpop.f32.mrb[5].mxu1 }
 0x69b   : > { %v1954_v9 = vadd.f32 %v1953_v8, %v1806_v4 }
 0x69d   : > { %v12705_v11 = vpack.c.bf16 %v1959_v6, %v1954_v9  ;;  %v15971_v12 = vpack.i.bf16 %v1959_v6, %v1954_v9 }
 0x69f   : > { %12706 = vmatprep.subr.bf16.mxu1 %v12705_v11 }
 0x6a0   : > { %12708 = vmatpush3.bf16.msra.mxu1 %v12705_v11 }
 0x6ee   : > { %v2157_v13 = vpop.permute.xlu1 %2156 }
 0x6ef   : > { %11766 = vmatprep.mubr.msk.f32.mxu0 %vm1962_vm1, %v2157_v13 }
 0x6f5   : > { %v14058_v14 = vpop.permute.xlu0 %14057 }
 0x6f6   : > { %v14060_v15 = vunpack.i.h.bf16 %v14058_v14  ;;  %v14059_v16 = vunpack.i.l.bf16 %v14058_v14  ;;  %v14063_v17 = vpop.permute.xlu1 %14062 }
 0x6f7   : > { %v14065_v18 = vunpack.i.h.bf16 %v14063_v17  ;;  %v14064_v19 = vunpack.i.l.bf16 %v14063_v17 }
 0x6f8   : > { %v12709_v20 = vpack.c.bf16 %v14060_v15, %v14059_v16 }
 0x6f9   : > { %v12719_v21 = vpack.c.bf16 %v14065_v18, %v14064_v19  ;;  %v2361_v23 = vpop.permute.xlu0 %2360 }
 0x6fa   : > { %12711 = vmatprep.subr.msk.bf16.mxu0 %vm15943_vm2, %v12709_v20  ;;  %v2159_v22 = vpop.permute.xlu1 %2158 }
 0x6fb   : > { %12714 = vmatpush3.bf16.xpose.msk.msra.mxu0 %vm15943_vm2, %v12709_v20 }
 0x6fc   : > { %12721 = vmatprep.subr.msk.bf16.mxu0 %vm15943_vm2, %v12719_v21 }
 0x6fe   : > { %v2363_v24 = vpop.permute.xlu1 %2362 }
 0x702   : > { %11767 = vmatmul.mubr.msk.f32.vlgmr.msra.gmra.mrb[6].mxu0 %vm1962_vm1, %v2159_v22 }
 0x703   : > { %12724 = vmatpush3.bf16.xpose.msk.msra.mxu0 %vm15943_vm2, %v12719_v21  ;;  %11780 = vmatprep.mubr.msk.f32.mxu0 %vm1962_vm1, %v2361_v23 }
 0x70a   : > { %11781 = vmatmul.mubr.msk.f32.vlgmr.msra.gmra.mrb[8].mxu0 %vm1962_vm1, %v2363_v24 }
 0x75e   : > { %v11754_v25 = vpop.f32.mrb[4].mxu0 }
 0x75f   : > { %v2051_v26 = vmul.f32 0.17677669, %v11754_v25  ;;  %v2041_v27 = vpop.f32.mrb[5].mxu0 }
 0x760   : > { %v2050_v28 = vmul.f32 0.17677669, %v2041_v27 }
 0x761   : > { %v2056_v29 = vsel %vm2052_vm3, %v2051_v26, -inf }
 0x762   : > { %2057 = vmax.xlane.f32.xlu1 %v2056_v29  ;;  %v2053_v30 = vsel %vm2052_vm3, %v2050_v28, -inf }
 0x763   : > { %2054 = vmax.xlane.f32.xlu0 %v2053_v30 }
 0x7d5   : > { %v11768_v32 = vpop.f32.mrb[6].mxu0 }
 0x7d6   : > { %v2248_v31 = vmul.f32 0.17677669, %v11768_v32  ;;  %v2238_v33 = vpop.f32.mrb[7].mxu0 }
 0x7d7   : > { %v2247_v34 = vmul.f32 0.17677669, %v2238_v33 }
 0x7d8   : > { %v2252_v36 = vsel %vm2052_vm3, %v2248_v31, -inf }
 0x7d9   : > { %2253 = vmax.xlane.f32.xlu0 %v2252_v36  ;;  %v2249_v37 = vsel %vm2052_vm3, %v2247_v34, -inf }
 0x7dd   : > { %v11782_v35 = vpop.f32.mrb[8].mxu0  ;;  %2250 = vmax.xlane.f32.xlu0 %v2249_v37 }
 0x7de   : > { %v2452_v38 = vmul.f32 0.17677669, %v11782_v35  ;;  %v2442_v39 = vpop.f32.mrb[9].mxu0 }
 0x7df   : > { %v2451_v40 = vmul.f32 0.17677669, %v2442_v39 }
 0x7e0   : > { %v2456_v42 = vsel %vm2052_vm3, %v2452_v38, -inf }
 0x7e1   : > { %2457 = vmax.xlane.f32.xlu1 %v2456_v42  ;;  %v2453_v43 = vsel %vm2052_vm3, %v2451_v40, -inf }
 0x7e2   : > { %2454 = vmax.xlane.f32.xlu0 %v2453_v43 }
 0x7ef   : > { %v2058_v44 = vpop.xlane.xlu1 %2057 }
 0x7f0   : > { %v2060_v45 = vsub.f32 %v2051_v26, %v2058_v44  ;;  %v2055_v46 = vpop.xlane.xlu0 %2054 }
 0x7f1   : > { %v2059_v47 = vsub.f32 %v2050_v28, %v2055_v46 }
 0x7f2   : > { %v2063_v51 = vmul.f32 1.442695, %v2060_v45  ;;  %14072 = vrot.lane.b32.xlu1 %v15971_v12, %s17746_s10 }
 0x7f3   : > { %v2061_v52 = vmul.f32 1.442695, %v2059_v47 }
 0x7f5   : > { %14214 = vpow2.f32 %v2061_v52 }
 0x7f6   : > { %14216 = vpow2.f32 %v2063_v51  ;;  %14077 = vrot.lane.b32.xlu1 %v15947_v63, %s17744_s2 }
 0x7f8   : > { %14067 = vrot.lane.b32.xlu0 %v15971_v12, %s17742_s18  ;;  %s17857_s18 = smov %s17856_s26 }
 0x7fa   : > { %2562 = vrot.lane.b32.xlu1 %v15934_v55, %s17744_s2 }
 0x7fc   : > { %2564 = vrot.lane.b32.xlu0 %v15957_v2, %s17744_s2 }
 0x7ff   : > { %v16001_v54 = vpop.eup %14214 }
 0x800   : > { %v16003_v56 = vpop.eup %14216  ;;  %11759 = vmatprep.mubr.msk.f32.mxu1 %vm2052_vm3, %v16001_v54 }
 0x801   : > { %11760 = vmatmul.mubr.msk.f32.vlgmr.msra.gmra.mrb[6].mxu1 %vm2052_vm3, %v16003_v56 }
 0x866   : > { %v2254_v57 = vpop.xlane.xlu0 %2253 }
 0x867   : > { %v2256_v58 = vsub.f32 %v2248_v31, %v2254_v57 }
 0x869   : > { %v2259_v61 = vmul.f32 1.442695, %v2256_v58 }
 0x86a   : > { %v2251_v59 = vpop.xlane.xlu0 %2250 }
 0x86b   : > { %v2255_v60 = vsub.f32 %v2247_v34, %v2251_v59 }
 0x86d   : > { %v2257_v63 = vmul.f32 1.442695, %v2255_v60 }
 0x86e   : > { %v2458_v55 = vpop.xlane.xlu1 %2457 }
 0x86f   : > { %14218 = vpow2.f32 %v2257_v63  ;;  %v2460_v1 = vsub.f32 %v2452_v38, %v2458_v55  ;;  %v2455_v2 = vpop.xlane.xlu0 %2454 }
 0x870   : > { %v2459_v4 = vsub.f32 %v2451_v40, %v2455_v2  ;;  %14220 = vpow2.f32 %v2259_v61 }
 0x871   : > { %v2463_v5 = vmul.f32 1.442695, %v2460_v1 }
 0x872   : > { %v2461_v6 = vmul.f32 1.442695, %v2459_v4  ;;  %v14073_v8 = vpop.permute.xlu1 %14072 }
 0x873   : > { %v14075_v9 = vunpack.i.h.bf16 %v14073_v8  ;;  %v14068_v11 = vpop.permute.xlu0 %14067  ;;  %v14074_v13 = vunpack.i.l.bf16 %v14073_v8 }
 0x874   : > { %14222 = vpow2.f32 %v2461_v6  ;;  %v14070_v14 = vunpack.i.h.bf16 %v14068_v11  ;;  %v14069_v15 = vunpack.i.l.bf16 %v14068_v11  ;;  %v2146_v11 = vsel %vm2052_vm3, %v16001_v54, 0.0  ;;  %v2795_v54 = vld [vmem:[%s17856_s26] sm:$0xff]  ;;  %s17861_s26 = sld [smem:[#allocation59_spill]] }
 0x875   : > { %14224 = vpow2.f32 %v2463_v5  ;;  %v12725_v20 = vpack.c.bf16 %v14075_v9, %v14074_v13 }
 0x876   : > { %v14078_v16 = vpop.permute.xlu1 %14077  ;;  %v12715_v17 = vpack.c.bf16 %v14070_v14, %v14069_v15 }
 0x877   : > { %v14080_v18 = vunpack.i.h.bf16 %v14078_v16  ;;  %v14079_v19 = vunpack.i.l.bf16 %v14078_v16  ;;  %v2565_v27 = vpop.permute.xlu0 %2564  ;;  %v2149_v16 = vsel %vm2052_vm3, %v16003_v56, 0.0  ;;  %v2798_v56 = vld [vmem:[%s17857_s18 + $0x18] sm:$0xff] }
 0x878   : > { %12716 = vmatprep.subr.bf16.mxu1 %v12715_v17 }
 0x879   : > { %v14219_v21 = vpop.eup %14218  ;;  %12718 = vmatpush3.bf16.msra.mxu1 %v12715_v17  ;;  %v12729_v23 = vpack.c.bf16 %v14080_v18, %v14079_v19 }
 0x87a   : > { %11773 = vmatprep.mubr.msk.f32.mxu1 %vm2052_vm3, %v14219_v21  ;;  %12726 = vmatprep.subr.bf16.mxu1 %v12725_v20  ;;  %v14221_v22 = vpop.eup %14220  ;;  %v2563_v26 = vpop.permute.xlu1 %2562  ;;  %v2350_v40 = vsel %vm2052_vm3, %v14219_v21, 0.0 }
 0x87b   : > { %v2353_v42 = vsel %vm2052_vm3, %v14221_v22, 0.0 }
 0x87c   : > { %11774 = vmatmul.mubr.msk.f32.vlgmr.msra.gmra.mrb[8].mxu1 %vm2052_vm3, %v14221_v22  ;;  %v2796_v22 = vld [vmem:[%s17857_s18 + $0x8] sm:$0xff] }
 0x87d   : > { %12728 = vmatpush3.bf16.msra.mxu1 %v12725_v20 }
 0x87e   : > { %v14223_v24 = vpop.eup %14222  ;;  %12731 = vmatprep.subr.msk.bf16.mxu1 %vm15943_vm2, %v12729_v23 }
 0x87f   : > { %v14225_v25 = vpop.eup %14224  ;;  %11787 = vmatprep.mubr.msk.f32.mxu1 %vm2052_vm3, %v14223_v24  ;;  %v2552_v43 = vsel %vm2052_vm3, %v14223_v24, 0.0  ;;  %v12739_v24 = vpack.c.bf16 %v2796_v22, %v2795_v54  ;;  %v10593_v54 = vld [vmem:[%s17859_s0] ss:$0 sm:$0xff] }
 0x880   : > { %11788 = vmatmul.mubr.msk.f32.vlgmr.msra.gmra.mrb[10].mxu1 %vm2052_vm3, %v14225_v25  ;;  %v2555_v44 = vsel %vm2052_vm3, %v14225_v25, 0.0 }
 0x881   : > { %11794 = vmatprep.mubr.msk.f32.mxu1 %vm1962_vm1, %v2563_v26  ;;  %v2799_v26 = vld [vmem:[%s17857_s18 + $0x20] sm:$0xff] }
 0x886   : > { %12734 = vmatpush3.bf16.xpose.msk.msra.mxu1 %vm15943_vm2, %v12729_v23  ;;  %v2797_v23 = vld [vmem:[%s17857_s18 + $0x10] sm:$0xff] }
 0x887   : > { %v12743_v25 = vpack.c.bf16 %v2798_v56, %v2797_v23 }
 0x88d   : > { %11795 = vmatmul.mubr.msk.f32.vlgmr.msra.gmra.mrb[12].mxu1 %vm1962_vm1, %v2565_v27  ;;  %v2800_v27 = vld [vmem:[%s17857_s18 + $0x28] sm:$0xff] }
 0x88e   : > { %3085 = vmatprep.mubr.f32.mxu1 %v15270_v41 }
 0x8d4   : > { %v16020_v28 = vpop.f32.mrb[6].mxu1 }
 0x8d5   : > { %v16022_v29 = vpop.f32.mrb[7].mxu1 }
 0x94f   : > { %v11775_v30 = vpop.f32.mrb[8].mxu1 }
 0x950   : > { %v2341_v32 = vpop.f32.mrb[9].mxu1 }
 0x953   : > { %v11789_v31 = vpop.f32.mrb[10].mxu1 }
 0x954   : > { %v2543_v33 = vpop.f32.mrb[11].mxu1 }
 0x960   : > { %v11796_v34 = vpop.f32.mrb[12].mxu1 }
 0x961   : > { %v2654_v36 = vmul.f32 0.17677669, %v11796_v34  ;;  %v2644_v37 = vpop.f32.mrb[13].mxu1  ;;  %v2803_v34 = vld [vmem:[%s17857_s18 + $0x40] sm:$0xff] }
 0x962   : > { %v2653_v35 = vmul.f32 0.17677669, %v2644_v37 }
 0x963   : > { %v2658_v38 = vsel %vm2052_vm3, %v2654_v36, -inf }
 0x964   : > { %2659 = vmax.xlane.f32.xlu0 %v2658_v38  ;;  %v2655_v39 = vsel %vm2052_vm3, %v2653_v35, -inf  ;;  %v2806_v38 = vld [vmem:[%s17857_s18 + $0x58] sm:$0xff] }
 0x965   : > { %2656 = vmax.xlane.f32.xlu1 %v2655_v39 }
 0x969   : > { %2351 = vadd.xlane.f32.xlu1 %v2350_v40  ;;  %v2807_v40 = vld [vmem:[%s17857_s18 + $0x60] sm:$0xff] }
 0x96d   : > { %2354 = vadd.xlane.f32.xlu1 %v2353_v42  ;;  %v2808_v42 = vld [vmem:[%s17857_s18 + $0x68] sm:$0xff] }
 0x971   : > { %2553 = vadd.xlane.f32.xlu1 %v2552_v43  ;;  %v12763_v43 = vpack.c.bf16 %v2808_v42, %v2807_v40 }
 0x975   : > { %2556 = vadd.xlane.f32.xlu1 %v2555_v44 }
 0x97a   : > { %14082 = vrot.lane.b32.xlu0 %v15971_v12, %s17744_s2 }
 0x9f1   : > { %v2660_v45 = vpop.xlane.xlu0 %2659 }
 0x9f2   : > { %v2662_v46 = vsub.f32 %v2654_v36, %v2660_v45  ;;  %v2657_v47 = vpop.xlane.xlu1 %2656  ;;  %v2804_v36 = vld [vmem:[%s17857_s18 + $0x48] sm:$0xff] }
 0x9f3   : > { %v2661_v51 = vsub.f32 %v2653_v35, %v2657_v47  ;;  %v12755_v37 = vpack.c.bf16 %v2804_v36, %v2803_v34  ;;  %v2805_v35 = vld [vmem:[%s17857_s18 + $0x50] sm:$0xff]  ;;  %v2810_v47 = vld [vmem:[%s17857_s18 + $0x78] sm:$0xff] }
 0x9f4   : > { %v2665_v52 = vmul.f32 1.442695, %v2662_v46  ;;  %v12759_v39 = vpack.c.bf16 %v2806_v38, %v2805_v35  ;;  %v2809_v46 = vld [vmem:[%s17857_s18 + $0x70] sm:$0xff] }
 0x9f5   : > { %v2663_v57 = vmul.f32 1.442695, %v2661_v51  ;;  %v14083_v58 = vpop.permute.xlu0 %14082  ;;  %v12767_v51 = vpack.c.bf16 %v2810_v47, %v2809_v46 }
 0x9f6   : > { %14226 = vpow2.f32 %v2665_v52  ;;  %v14085_v59 = vunpack.i.h.bf16 %v14083_v58  ;;  %v14084_v60 = vunpack.i.l.bf16 %v14083_v58  ;;  %v2352_v61 = vpop.xlane.xlu1 %2351 }
 0x9f7   : > { %14228 = vpow2.f32 %v2663_v57 }
 0x9f8   : > { %v12735_v63 = vpack.c.bf16 %v14085_v59, %v14084_v60  ;;  %14230 = vrcp.f32 %v2352_v61 }
 0x9fa   : > { %12736 = vmatprep.subr.bf16.mxu0 %v12735_v63  ;;  %v2355_v55 = vpop.xlane.xlu1 %2354 }
 0x9fb   : > { %14232 = vrcp.f32 %v2355_v55  ;;  %12738 = vmatpush3.bf16.msra.mxu0 %v12735_v63 }
 0x9fc   : > { %12740 = vmatprep.subr.bf16.mxu0 %v12739_v24 }
 0x9fe   : > { %v2554_v1 = vpop.xlane.xlu1 %2553 }
 0x9ff   : > { %14234 = vrcp.f32 %v2554_v1 }
 0xa00   : > { %v14227_v12 = vpop.eup %14226 }
 0xa01   : > { %v14229_v2 = vpop.eup %14228  ;;  %v2757_v4 = vsel %vm2052_vm3, %v14227_v12, 0.0 }
 0xa02   : > { %2758 = vadd.xlane.f32.xlu0 %v2757_v4  ;;  %11801 = vmatprep.mubr.msk.f32.mxu0 %vm2052_vm3, %v14229_v2  ;;  %v2557_v5 = vpop.xlane.xlu1 %2556  ;;  %v2754_v6 = vsel %vm2052_vm3, %v14229_v2, 0.0  ;;  %v14231_v8 = vpop.eup %14230 }
 0xa03   : > { %14236 = vrcp.f32 %v2557_v5  ;;  %2755 = vadd.xlane.f32.xlu1 %v2754_v6  ;;  %11802 = vmatmul.mubr.msk.f32.vlgmr.msra.gmra.mrb[10].mxu0 %vm2052_vm3, %v14227_v12  ;;  %v2357_v13 = vmul.f32 %v14231_v8, %v2341_v32  ;;  %v2801_v32 = vld [vmem:[%s17857_s18 + $0x30] sm:$0xff] }
 0xa04   : > { %12742 = vmatpush3.bf16.msra.mxu0 %v12739_v24 }
 0xa05   : > { %v14233_v9 = vpop.eup %14232  ;;  %12744 = vmatprep.subr.bf16.mxu0 %v12743_v25 }
 0xa06   : > { %v2359_v14 = vmul.f32 %v14233_v9, %v11775_v30  ;;  %v12747_v30 = vpack.c.bf16 %v2800_v27, %v2799_v26  ;;  %v2936_v27 = vld [vmem:[%s17861_s26 + $0x8] sm:$0xff] }
 0xa07   : > { %2147 = vadd.xlane.f32.xlu1 %v2146_v11 }
 0xa08   : > { %v14086_v15 = vpack.i.bf16 %v2359_v14, %v2357_v13  ;;  %12746 = vmatpush3.bf16.msra.mxu0 %v12743_v25 }
 0xa09   : > { %v14235_v17 = vpop.eup %14234  ;;  %12748 = vmatprep.subr.bf16.mxu0 %v12747_v30 }
 0xa0a   : > { %v2559_v19 = vmul.f32 %v14235_v17, %v2543_v33 }
 0xa0b   : > { %2150 = vadd.xlane.f32.xlu1 %v2149_v16 }
 0xa0c   : > { %12750 = vmatpush3.bf16.msra.mxu0 %v12747_v30 }
 0xa0d   : > { %v14237_v18 = vpop.eup %14236 }
 0xa0e   : > { %v2561_v20 = vmul.f32 %v14237_v18, %v11789_v31  ;;  %v2802_v31 = vld [vmem:[%s17857_s18 + $0x38] sm:$0xff] }
 0xa0f   : > { %v12751_v33 = vpack.c.bf16 %v2802_v31, %v2801_v32 }
 0xa10   : > { %v14091_v21 = vpack.i.bf16 %v2561_v20, %v2559_v19 }
 0xa11   : > { %12752 = vmatprep.subr.bf16.mxu0 %v12751_v33 }
 0xa12   : > { %12754 = vmatpush3.bf16.msra.mxu0 %v12751_v33 }
 0xa13   : > { %12756 = vmatprep.subr.bf16.mxu0 %v12755_v37 }
 0xa16   : > { %12758 = vmatpush3.bf16.msra.mxu0 %v12755_v37 }
 0xa17   : > { %12760 = vmatprep.subr.bf16.mxu0 %v12759_v39 }
 0xa1a   : > { %12762 = vmatpush3.bf16.msra.mxu0 %v12759_v39 }
 0xa1b   : > { %12764 = vmatprep.subr.bf16.mxu0 %v12763_v43 }
 0xa1c   : > { %14087 = vrot.lane.b32.xlu1 %v14086_v15, %s17744_s2  ;;  %s17860_s2 = smov %s17859_s0  ;;  %s17863_s0 = sld [smem:[#allocation57_spill]] }
 0xa1e   : > { %12766 = vmatpush3.bf16.msra.mxu0 %v12763_v43 }
 0xa1f   : > { %12768 = vmatprep.subr.bf16.mxu0 %v12767_v51 }
 0xa20   : > { %14092 = vrot.lane.b32.xlu1 %v14091_v21, %s17746_s10  ;;  %s17862_s10 = smov %s17861_s26  ;;  %s17865_s26 = sld [smem:[#allocation58_spill]] }
 0xa21   : > { %v2940_v30 = vld [vmem:[%s17862_s10 + $0x28] sm:$0xff]  ;;  %v2938_v32 = vld [vmem:[%s17862_s10 + $0x18] sm:$0xff]  ;;  %v2935_v34 = vld [vmem:[%s17862_s10] sm:$0xff] }
 0xa22   : > { %12770 = vmatpush3.bf16.msra.mxu0 %v12767_v51  ;;  %v12771_v31 = vpack.c.bf16 %v2940_v30, %v2936_v27  ;;  %v2942_v33 = vld [vmem:[%s17862_s10 + $0x38] sm:$0xff]  ;;  %v2939_v36 = vld [vmem:[%s17862_s10 + $0x20] sm:$0xff]  ;;  %v2937_v37 = vld [vmem:[%s17862_s10 + $0x10] sm:$0xff]  ;;  %s17864_s1 = smov %s17863_s0 }
 0xa23   : > { %v2941_v35 = vld [vmem:[%s17862_s10 + $0x30] sm:$0xff]  ;;  %v2944_v38 = vld [vmem:[%s17862_s10 + $0x48] sm:$0xff]  ;;  %v2946_v42 = vld [vmem:[%s17862_s10 + $0x58] sm:$0xff] }
 0xa24   : > { %12772 = vmatprep.subr.bf16.mxu1 %v12771_v31  ;;  %v12805_v39 = vpack.c.bf16 %v2941_v35, %v2937_v37  ;;  %v2948_v40 = vld [vmem:[%s17862_s10 + $0x68] sm:$0xff]  ;;  %v2950_v43 = vld [vmem:[%s17862_s10 + $0x78] sm:$0xff]  ;;  %v2943_v46 = vld [vmem:[%s17862_s10 + $0x40] sm:$0xff] }
 0xa25   : > { %v2947_v47 = vld [vmem:[%s17862_s10 + $0x60] sm:$0xff]  ;;  %v2945_v51 = vld [vmem:[%s17862_s10 + $0x50] sm:$0xff]  ;;  %v2972_v31 = vld [vmem:[%s17862_s10 + $0x128] sm:$0xff] }
 0xa26   : > { %v2965_v27 = vld [vmem:[%s17862_s10 + $0xf0] sm:$0xff]  ;;  %s17866_s3 = smov %s17865_s26 }
 0xa8f   : > { %v2759_v44 = vpop.xlane.xlu0 %2758 }
 0xa90   : > { %v2756_v45 = vpop.xlane.xlu1 %2755  ;;  %14238 = vrcp.f32 %v2759_v44  ;;  %v12775_v44 = vpack.c.bf16 %v2948_v40, %v2944_v38  ;;  %v2969_v38 = vld [vmem:[%s17862_s10 + $0x110] sm:$0xff] }
 0xa91   : > { %14240 = vrcp.f32 %v2756_v45  ;;  %v12807_v45 = vpack.c.bf16 %v2950_v43, %v2946_v42  ;;  %v2976_v42 = vld [vmem:[%s17862_s10 + $0x148] sm:$0xff] }
 0xa92   : > { %v2980_v43 = vld [vmem:[%s17862_s10 + $0x168] sm:$0xff] }
 0xa94   : > { %v2148_v55 = vpop.xlane.xlu1 %2147 }
 0xa95   : > { %14242 = vrcp.f32 %v2148_v55  ;;  %v2958_v55 = vld [vmem:[%s17862_s10 + $0xb8] sm:$0xff] }
 0xa98   : > { %v2151_v1 = vpop.xlane.xlu1 %2150 }
 0xa99   : > { %14244 = vrcp.f32 %v2151_v1  ;;  %v2951_v1 = vld [vmem:[%s17862_s10 + $0x80] sm:$0xff] }
 0xa9a   : > { %v14239_v52 = vpop.eup %14238 }
 0xa9b   : > { %v14241_v58 = vpop.eup %14240 }
 0xa9c   : > { %v14088_v12 = vpop.permute.xlu1 %14087 }
 0xa9d   : > { %v14090_v9 = vunpack.i.h.bf16 %v14088_v12  ;;  %v14089_v11 = vunpack.i.l.bf16 %v14088_v12 }
 0xa9f   : > { %v14243_v2 = vpop.eup %14242 }
 0xaa0   : > { %v14093_v5 = vpop.permute.xlu1 %14092  ;;  %v2153_v6 = vmul.f32 %v14243_v2, %v16022_v29  ;;  %v2955_v2 = vld [vmem:[%s17862_s10 + $0xa0] sm:$0xff] }
 0xaa1   : > { %v14094_v13 = vunpack.i.l.bf16 %v14093_v5  ;;  %v14095_v16 = vunpack.i.h.bf16 %v14093_v5  ;;  %v2957_v5 = vld [vmem:[%s17862_s10 + $0xb0] sm:$0xff] }
 0xaa2   : > { %v2788_v14 = vsel %vm1962_vm1, %v2153_v6, %v14089_v11  ;;  %v12781_v6 = vpack.c.bf16 %v2955_v2, %v2951_v1  ;;  %v2990_v1 = vld [vmem:[%s17862_s10 + $0x1b8] sm:$0xff] }
 0xaa3   : > { %v14245_v4 = vpop.eup %14244  ;;  %v2790_v20 = vsel %vm1578_vm0, %v2788_v14, %v14094_v13 }
 0xaa4   : > { %v2155_v8 = vmul.f32 %v14245_v4, %v16020_v28  ;;  %v2953_v4 = vld [vmem:[%s17862_s10 + $0x90] sm:$0xff] }
 0xaa6   : > { %v2789_v15 = vsel %vm1962_vm1, %v2155_v8, %v14090_v9  ;;  %v12813_v8 = vpack.c.bf16 %v2957_v5, %v2953_v4  ;;  %v2983_v4 = vld [vmem:[%s17862_s10 + $0x180] sm:$0xff] }
 0xaa7   : > { %v2791_v29 = vsel %vm1578_vm0, %v2789_v15, %v14095_v16  ;;  %v2987_v5 = vld [vmem:[%s17862_s10 + $0x1a0] sm:$0xff] }
 0xad6   : > { %v11803_v57 = vpop.f32.mrb[10].mxu0 }
 0xad7   : > { %v2763_v59 = vmul.f32 %v14239_v52, %v11803_v57  ;;  %v2745_v60 = vpop.f32.mrb[11].mxu0  ;;  %v12777_v52 = vpack.c.bf16 %v2947_v47, %v2943_v46  ;;  %v2949_v57 = vld [vmem:[%s17862_s10 + $0x70] sm:$0xff]  ;;  %v2982_v46 = vld [vmem:[%s17862_s10 + $0x178] sm:$0xff]  ;;  %v2975_v47 = vld [vmem:[%s17862_s10 + $0x140] sm:$0xff] }
 0xad8   : > { %v2761_v61 = vmul.f32 %v14241_v58, %v2745_v60  ;;  %v2952_v58 = vld [vmem:[%s17862_s10 + $0x88] sm:$0xff]  ;;  %v12809_v60 = vpack.c.bf16 %v2949_v57, %v2945_v51  ;;  %v2979_v51 = vld [vmem:[%s17862_s10 + $0x160] sm:$0xff] }
 0xad9   : > { %v12793_v57 = vpack.c.bf16 %v2979_v51, %v2975_v47 }
 0xada   : > { %v14096_v63 = vpack.i.bf16 %v2763_v59, %v2761_v61  ;;  %v2956_v59 = vld [vmem:[%s17862_s10 + $0xa8] sm:$0xff] }
 0xadb   : > { %v12779_v61 = vpack.c.bf16 %v2956_v59, %v2952_v58  ;;  %v2977_v58 = vld [vmem:[%s17862_s10 + $0x150] sm:$0xff] }
 0xadc   : > { %14097 = vrot.lane.b32.xlu0 %v14096_v63, %s17858_s22  ;;  %v2954_v63 = vld [vmem:[%s17862_s10 + $0x98] sm:$0xff]  ;;  %v2981_v59 = vld [vmem:[%s17862_s10 + $0x170] sm:$0xff] }
 0xadd   : > { %v12811_v12 = vpack.c.bf16 %v2958_v55, %v2954_v63  ;;  %v2988_v63 = vld [vmem:[%s17862_s10 + $0x1a8] sm:$0xff]  ;;  %v2986_v55 = vld [vmem:[%s17862_s10 + $0x198] sm:$0xff] }
 0xade   : > { %v12827_v2 = vpack.c.bf16 %v2990_v1, %v2986_v55  ;;  %v3290_v55 = vld [vmem:[%s17867_s5 + $0x198] sm:$0xff]  ;;  %v3241_v1 = vld [vmem:[%s17867_s5 + $0x10] sm:$0xff] }
 0xb4e   : > { %v14098_v17 = vpop.permute.xlu0 %14097 }
 0xb4f   : > { %v14100_v18 = vunpack.i.h.bf16 %v14098_v17  ;;  %v14099_v19 = vunpack.i.l.bf16 %v14098_v17 }
 0xb51   : > { %v2793_v28 = vsel %vm2792_vm4, %v2790_v20, %v14099_v19  ;;  %v2794_v21 = vsel %vm2792_vm4, %v2791_v29, %v14100_v18  ;;  %v2960_v19 = vld [vmem:[%s17862_s10 + $0xc8] sm:$0xff]  ;;  %v2962_v29 = vld [vmem:[%s17862_s10 + $0xd8] sm:$0xff] }
 0xb52   : > { %11836 = vmatprep.mubr.f32.mxu0 %v2793_v28  ;;  %v2964_v20 = vld [vmem:[%s17862_s10 + $0xe8] sm:$0xff] }
 0xb53   : > { %11837 = vmatmul.mubr.f32.vlgmr.msra.gmra.mrb[12].mxu0 %v2794_v21  ;;  %v12783_v28 = vpack.c.bf16 %v2964_v20, %v2960_v19  ;;  %v2966_v21 = vld [vmem:[%s17862_s10 + $0xf8] sm:$0xff]  ;;  %v2991_v20 = vld [vmem:[%s17862_s10 + $0x1c0] sm:$0xff] }
 0xb54   : > { %3162 = vmatprep.mubr.f32.mxu0 %v15270_v41  ;;  %v2998_v19 = vld [vmem:[%s17862_s10 + $0x1f8] sm:$0xff] }
 0xc26   : > { %v11838_v22 = vpop.f32.mrb[12].mxu0 }
 0xc27   : > { %v2890_v23 = vadd.f32 %v11838_v22, %v10593_v54  ;;  %v2884_v24 = vpop.f32.mrb[13].mxu0  ;;  %v2963_v22 = vld [vmem:[%s17862_s10 + $0xe0] sm:$0xff] }
 0xc28   : > { %v2885_v56 = vadd.f32 %v10593_v54, %v2884_v24  ;;  %v2959_v54 = vld [vmem:[%s17862_s10 + $0xc0] sm:$0xff] }
 0xc29   : > { %v16070_v25 = vadd.f32 %v2890_v23, %v15910_v10  ;;  %v12803_v10 = vpack.c.bf16 %v2942_v33, %v2938_v32  ;;  %v12815_v23 = vpack.c.bf16 %v2966_v21, %v2962_v29  ;;  %v12785_v24 = vpack.c.bf16 %v2963_v22, %v2959_v54  ;;  %v2968_v32 = vld [vmem:[%s17862_s10 + $0x108] sm:$0xff]  ;;  %v2970_v33 = vld [vmem:[%s17862_s10 + $0x118] sm:$0xff]  ;;  %v2993_v21 = vld [vmem:[%s17862_s10 + $0x1d0] sm:$0xff] }
 0xc2a   : > { %v16073_v26 = vadd.f32 %v2885_v56, %v15907_v7  ;;  %v12773_v7 = vpack.c.bf16 %v2939_v36, %v2935_v34  ;;  %v2961_v56 = vld [vmem:[%s17862_s10 + $0xd0] sm:$0xff]  ;;  %v12787_v34 = vpack.c.bf16 %v2972_v31, %v2968_v32  ;;  %v2974_v36 = vld [vmem:[%s17862_s10 + $0x138] sm:$0xff] }
 0xc2b   : > { %2899 = vadd.xlane.f32.xlu0 %v16070_v25  ;;  %12804 = vmatprep.subr.bf16.mxu0 %v12803_v10  ;;  %v12817_v30 = vpack.c.bf16 %v2965_v27, %v2961_v56  ;;  %v2967_v10 = vld [vmem:[%s17862_s10 + $0x100] sm:$0xff]  ;;  %v12819_v37 = vpack.c.bf16 %v2974_v36, %v2970_v33  ;;  %v2997_v54 = vld [vmem:[%s17862_s10 + $0x1f0] sm:$0xff] }
 0xc2c   : > { %2897 = vadd.xlane.f32.xlu1 %v16073_v26  ;;  %12774 = vmatpush1.bf16.msra.mxu1 %v12773_v7  ;;  %v2971_v7 = vld [vmem:[%s17862_s10 + $0x120] sm:$0xff] }
 0xc2d   : > { %12806 = vmatpush1.bf16.msra.mxu0 %v12805_v39  ;;  %12776 = vmatprep.subr.bf16.mxu1 %v12775_v44  ;;  %v12789_v35 = vpack.c.bf16 %v2971_v7, %v2967_v10  ;;  %v2973_v39 = vld [vmem:[%s17862_s10 + $0x130] sm:$0xff]  ;;  %v2978_v44 = vld [vmem:[%s17862_s10 + $0x158] sm:$0xff]  ;;  %v10595_v10 = vld [vmem:[%s17865_s26] ss:$0 sm:$0xff]  ;;  %s17870_s26 = sld [smem:[#allocation62_spill]] }
 0xc2e   : > { %12808 = vmatprep.subr.bf16.mxu0 %v12807_v45  ;;  %v12821_v40 = vpack.c.bf16 %v2973_v39, %v2969_v38  ;;  %v12791_v45 = vpack.c.bf16 %v2980_v43, %v2976_v42  ;;  %v3256_v42 = vld [vmem:[%s17867_s5 + $0x88] sm:$0xff]  ;;  %v3287_v43 = vld [vmem:[%s17867_s5 + $0x180] sm:$0xff] }
 0xc30   : > { %12778 = vmatpush1.bf16.msra.mxu1 %v12777_v52  ;;  %v12823_v52 = vpack.c.bf16 %v2982_v46, %v2978_v44  ;;  %v3240_v46 = vld [vmem:[%s17867_s5 + $0x8] sm:$0xff] }
 0xc31   : > { %12810 = vmatpush1.bf16.msra.mxu0 %v12809_v60  ;;  %12780 = vmatprep.subr.bf16.mxu1 %v12779_v61  ;;  %v2984_v60 = vld [vmem:[%s17862_s10 + $0x188] sm:$0xff]  ;;  %v12825_v61 = vpack.c.bf16 %v2981_v59, %v2977_v58  ;;  %v3257_v59 = vld [vmem:[%s17867_s5 + $0x90] sm:$0xff] }
 0xc32   : > { %12812 = vmatprep.subr.bf16.mxu0 %v12811_v12  ;;  %v12795_v12 = vpack.c.bf16 %v2988_v63, %v2984_v60  ;;  %v3258_v60 = vld [vmem:[%s17867_s5 + $0x98] sm:$0xff] }
 0xc33   : > { %v12839_v63 = vpack.c.bf16 %v3258_v60, %v3257_v59  ;;  %v3250_v59 = vld [vmem:[%s17867_s5 + $0x58] sm:$0xff]  ;;  %s17871_s9 = smov %s17870_s26 }
 0xc34   : > { %12782 = vmatpush1.bf16.msra.mxu1 %v12781_v6  ;;  %v2985_v6 = vld [vmem:[%s17862_s10 + $0x190] sm:$0xff] }
 0xc35   : > { %12814 = vmatpush1.bf16.msra.mxu0 %v12813_v8  ;;  %12784 = vmatprep.subr.bf16.mxu1 %v12783_v28  ;;  %v12797_v8 = vpack.c.bf16 %v2987_v5, %v2983_v4  ;;  %v2995_v28 = vld [vmem:[%s17862_s10 + $0x1e0] sm:$0xff]  ;;  %v3273_v5 = vld [vmem:[%s17867_s5 + $0x110] sm:$0xff] }
 0xc36   : > { %12816 = vmatprep.subr.bf16.mxu0 %v12815_v23  ;;  %v12801_v22 = vpack.c.bf16 %v2995_v28, %v2991_v20  ;;  %v12833_v23 = vpack.c.bf16 %v2997_v54, %v2993_v21  ;;  %v3275_v28 = vld [vmem:[%s17867_s5 + $0x120] sm:$0xff]  ;;  %v3276_v21 = vld [vmem:[%s17867_s5 + $0x128] sm:$0xff] }
 0xc37   : > { %v12877_v54 = vpack.c.bf16 %v3276_v21, %v3275_v28  ;;  %v3302_v21 = vld [vmem:[%s17867_s5 + $0x1f8] sm:$0xff] }
 0xc38   : > { %12786 = vmatpush1.bf16.msra.mxu1 %v12785_v24 }
 0xc39   : > { %12818 = vmatpush1.bf16.msra.mxu0 %v12817_v30  ;;  %12788 = vmatprep.subr.bf16.mxu1 %v12787_v34  ;;  %v10594_v34 = vld [vmem:[%s17863_s0] ss:$0 sm:$0xff]  ;;  %s17868_s0 = sld [smem:[#allocation60_spill]] }
 0xc3a   : > { %12820 = vmatprep.subr.bf16.mxu0 %v12819_v37 }
 0xc3c   : > { %12790 = vmatpush1.bf16.msra.mxu1 %v12789_v35 }
 0xc3d   : > { %12822 = vmatpush1.bf16.msra.mxu0 %v12821_v40  ;;  %12792 = vmatprep.subr.bf16.mxu1 %v12791_v45  ;;  %v3255_v40 = vld [vmem:[%s17867_s5 + $0x80] sm:$0xff] }
 0xc3e   : > { %12824 = vmatprep.subr.bf16.mxu0 %v12823_v52  ;;  %v12835_v44 = vpack.c.bf16 %v3256_v42, %v3255_v40  ;;  %v3239_v45 = vld [vmem:[%s17867_s5] sm:$0xff]  ;;  %v3248_v40 = vld [vmem:[%s17867_s5 + $0x48] sm:$0xff] }
 0xc3f   : > { %v12837_v51 = vpack.c.bf16 %v3240_v46, %v3239_v45  ;;  %v3271_v52 = vld [vmem:[%s17867_s5 + $0x100] sm:$0xff]  ;;  %v3265_v46 = vld [vmem:[%s17867_s5 + $0xd0] sm:$0xff]  ;;  %s17869_s8 = smov %s17868_s0 }
 0xc40   : > { %12794 = vmatpush1.bf16.msra.mxu1 %v12793_v57  ;;  %v3272_v57 = vld [vmem:[%s17867_s5 + $0x108] sm:$0xff] }
 0xc41   : > { %12826 = vmatpush1.bf16.msra.mxu0 %v12825_v61  ;;  %12796 = vmatprep.subr.bf16.mxu1 %v12795_v12  ;;  %v12869_v58 = vpack.c.bf16 %v3272_v57, %v3271_v52  ;;  %v3289_v61 = vld [vmem:[%s17867_s5 + $0x190] sm:$0xff]  ;;  %v3242_v12 = vld [vmem:[%s17867_s5 + $0x18] sm:$0xff] }
 0xc42   : > { %12828 = vmatprep.subr.bf16.mxu0 %v12827_v2  ;;  %v12871_v2 = vpack.c.bf16 %v3290_v55, %v3289_v61  ;;  %v12841_v4 = vpack.c.bf16 %v3242_v12, %v3241_v1  ;;  %v3298_v57 = vld [vmem:[%s17867_s5 + $0x1d8] sm:$0xff]  ;;  %v3267_v12 = vld [vmem:[%s17867_s5 + $0xe0] sm:$0xff] }
 0xc43   : > { %v3282_v55 = vld [vmem:[%s17867_s5 + $0x158] sm:$0xff] }
 0xc44   : > { %12798 = vmatpush1.bf16.msra.mxu1 %v12797_v8 }
 0xcb8   : > { %v2900_v9 = vpop.xlane.xlu0 %2899 }
 0xcb9   : > { %v2898_v11 = vpop.xlane.xlu1 %2897  ;;  %v2902_v13 = vmul.f32 0.0078125, %v2900_v9  ;;  %v2989_v9 = vld [vmem:[%s17862_s10 + $0x1b0] sm:$0xff] }
 0xcba   : > { %v2901_v14 = vmul.f32 0.0078125, %v2898_v11  ;;  %v2992_v11 = vld [vmem:[%s17862_s10 + $0x1c8] sm:$0xff] }
 0xcbb   : > { %v16107_v17 = vsub.f32 %v16070_v25, %v2902_v13  ;;  %v2996_v13 = vld [vmem:[%s17862_s10 + $0x1e8] sm:$0xff] }
 0xcbc   : > { %v16102_v15 = vsub.f32 %v16073_v26, %v2901_v14  ;;  %v12829_v14 = vpack.c.bf16 %v2989_v9, %v2985_v6  ;;  %v3274_v6 = vld [vmem:[%s17867_s5 + $0x118] sm:$0xff]  ;;  %v3259_v9 = vld [vmem:[%s17867_s5 + $0xa0] sm:$0xff] }
 0xcbd   : > { %v2906_v18 = vmul.f32 %v16107_v17, %v16107_v17  ;;  %v12873_v8 = vpack.c.bf16 %v3274_v6, %v3273_v5  ;;  %v3300_v6 = vld [vmem:[%s17867_s5 + $0x1e8] sm:$0xff] }
 0xcbe   : > { %v2905_v16 = vmul.f32 %v16102_v15, %v16102_v15  ;;  %12830 = vmatpush1.bf16.msra.mxu0 %v12829_v14 }
 0xcc0   : > { %2907 = vadd.xlane.f32.xlu1 %v2905_v16  ;;  %v12799_v16 = vpack.c.bf16 %v2996_v13, %v2992_v11  ;;  %v3260_v11 = vld [vmem:[%s17867_s5 + $0xa8] sm:$0xff]  ;;  %v3291_v13 = vld [vmem:[%s17867_s5 + $0x1a0] sm:$0xff] }
 0xcc1   : > { %v12843_v14 = vpack.c.bf16 %v3260_v11, %v3259_v9  ;;  %v3252_v9 = vld [vmem:[%s17867_s5 + $0x68] sm:$0xff] }
 0xcc2   : > { %12800 = vmatprep.subr.bf16.mxu1 %v12799_v16  ;;  %v3292_v16 = vld [vmem:[%s17867_s5 + $0x1a8] sm:$0xff] }
 0xcc3   : > { %12802 = vmatpush1.bf16.msra.mxu1 %v12801_v22  ;;  %v12875_v20 = vpack.c.bf16 %v3292_v16, %v3291_v13  ;;  %v3261_v22 = vld [vmem:[%s17867_s5 + $0xb0] sm:$0xff]  ;;  %v3284_v16 = vld [vmem:[%s17867_s5 + $0x168] sm:$0xff] }
 0xcc4   : > { %2909 = vadd.xlane.f32.xlu1 %v2906_v18  ;;  %v2994_v18 = vld [vmem:[%s17862_s10 + $0x1d8] sm:$0xff]  ;;  %12836 = vmatprep.subr.bf16.mxu1 %v12835_v44  ;;  %v3279_v44 = vld [vmem:[%s17867_s5 + $0x140] sm:$0xff] }
 0xcc5   : > { %v12831_v29 = vpack.c.bf16 %v2998_v19, %v2994_v18  ;;  %v3243_v18 = vld [vmem:[%s17867_s5 + $0x20] sm:$0xff]  ;;  %v3244_v19 = vld [vmem:[%s17867_s5 + $0x28] sm:$0xff] }
 0xcc7   : > { %12832 = vmatprep.subr.bf16.mxu0 %v12831_v29  ;;  %v12845_v29 = vpack.c.bf16 %v3244_v19, %v3243_v18  ;;  %v3269_v19 = vld [vmem:[%s17867_s5 + $0xf0] sm:$0xff] }
 0xcc8   : > { %12834 = vmatpush1.bf16.msra.mxu0 %v12833_v23  ;;  %v3262_v23 = vld [vmem:[%s17867_s5 + $0xb8] sm:$0xff] }
 0xd4d   : > { %v2908_v24 = vpop.xlane.xlu1 %2907 }
 0xd4e   : > { %v2911_v56 = vmul.f32 0.0078125, %v2908_v24  ;;  %v3293_v24 = vld [vmem:[%s17867_s5 + $0x1b0] sm:$0xff] }
 0xd50   : > { %v2913_v27 = vadd.f32 1e-05, %v2911_v56  ;;  %v12847_v56 = vpack.c.bf16 %v3262_v23, %v3261_v22  ;;  %v3254_v22 = vld [vmem:[%s17867_s5 + $0x78] sm:$0xff] }
 0xd51   : > { %v2910_v30 = vpop.xlane.xlu1 %2909 }
 0xd52   : > { %14246 = vrsqrt.f32 %v2913_v27  ;;  %v2912_v32 = vmul.f32 0.0078125, %v2910_v30  ;;  %v3294_v27 = vld [vmem:[%s17867_s5 + $0x1b8] sm:$0xff]  ;;  %v3245_v30 = vld [vmem:[%s17867_s5 + $0x30] sm:$0xff] }
 0xd54   : > { %v2914_v31 = vadd.f32 1e-05, %v2912_v32  ;;  %v3246_v32 = vld [vmem:[%s17867_s5 + $0x38] sm:$0xff] }
 0xd56   : > { %14248 = vrsqrt.f32 %v2914_v31  ;;  %v12879_v31 = vpack.c.bf16 %v3294_v27, %v3293_v24  ;;  %v3286_v27 = vld [vmem:[%s17867_s5 + $0x178] sm:$0xff] }
 0xd5c   : > { %v14247_v33 = vpop.eup %14246 }
 0xd5d   : > { %v2917_v36 = vmul.f32 %v14247_v33, %v16102_v15  ;;  %v12849_v33 = vpack.c.bf16 %v3246_v32, %v3245_v30  ;;  %v2999_v32 = vld [vmem:[%s17868_s0] sm:$0xf]  ;;  %s17872_s0 = smov 64  }
 0xd5f   : > { %v2925_v7 = vmul.f32 %v10594_v34, %v2917_v36  ;;  %v3278_v36 = vld [vmem:[%s17867_s5 + $0x138] sm:$0xff] }
 0xd60   : > { %v14249_v37 = vpop.eup %14248 }
 0xd61   : > { %v2933_v35 = vadd.f32 %v10595_v10, %v2925_v7  ;;  %v2918_v38 = vmul.f32 %v14249_v37, %v16107_v17  ;;  %v3288_v17 = vld [vmem:[%s17867_s5 + $0x188] sm:$0xff]  ;;  %v3263_v7 = vld [vmem:[%s17867_s5 + $0xc0] sm:$0xff] }
 0xd62   : > { %v12867_v47 = vpack.c.bf16 %v3288_v17, %v3287_v43  ;;  %v3264_v37 = vld [vmem:[%s17867_s5 + $0xc8] sm:$0xff] }
 0xd63   : > { %3086 = vmatmul.mubr.f32.vlgmr.msra.gmra.mrb[14].mxu1 %v2933_v35  ;;  %3163 = vmatmul.mubr.f32.vlgmr.msra.gmra.mrb[14].mxu0 %v2933_v35  ;;  %v2926_v39 = vmul.f32 %v10594_v34, %v2918_v38  ;;  %v3277_v34 = vld [vmem:[%s17867_s5 + $0x130] sm:$0xff]  ;;  %v3295_v35 = vld [vmem:[%s17867_s5 + $0x1c0] sm:$0xff]  ;;  %v12851_v38 = vpack.c.bf16 %v3264_v37, %v3263_v7  ;;  %v3280_v17 = vld [vmem:[%s17867_s5 + $0x148] sm:$0xff] }
 0xd64   : > { %3091 = vmatprep.mubr.f32.mxu1 %v15270_v41  ;;  %3168 = vmatprep.mubr.f32.mxu0 %v15270_v41  ;;  %v12885_v45 = vpack.c.bf16 %v3280_v17, %v3279_v44 }
 0xd65   : > { %v2934_v15 = vadd.f32 %v10595_v10, %v2926_v39  ;;  %12868 = vmatprep.subr.bf16.mxu0 %v12867_v47  ;;  %12838 = vmatpush3.bf16.msra.mxu1 %v12837_v51  ;;  %v12881_v10 = vpack.c.bf16 %v3278_v36, %v3277_v34  ;;  %v3296_v39 = vld [vmem:[%s17867_s5 + $0x1c8] sm:$0xff]  ;;  %v3266_v47 = vld [vmem:[%s17867_s5 + $0xd8] sm:$0xff]  ;;  %v3297_v51 = vld [vmem:[%s17867_s5 + $0x1d0] sm:$0xff]  ;;  %v3012_v34 = vrot.slane %v2999_v32, %v15968_v3 }
 0xd66   : > { %12870 = vmatpush3.bf16.msra.mxu0 %v12869_v58  ;;  %12840 = vmatprep.subr.bf16.mxu1 %v12839_v63  ;;  %v12883_v42 = vpack.c.bf16 %v3296_v39, %v3295_v35  ;;  %v12855_v52 = vpack.c.bf16 %v3266_v47, %v3265_v46  ;;  %v3249_v58 = vld [vmem:[%s17867_s5 + $0x50] sm:$0xff]  ;;  %v12887_v60 = vpack.c.bf16 %v3298_v57, %v3297_v51 }
 0xd67   : > { %3092 = vmatmul.mubr.f32.gmra.mrb[16].mxu1 %v2934_v15  ;;  %3169 = vmatmul.mubr.f32.gmra.mrb[16].mxu0 %v2934_v15  ;;  %v3247_v15 = vld [vmem:[%s17867_s5 + $0x40] sm:$0xff]  ;;  %v12857_v61 = vpack.c.bf16 %v3250_v59, %v3249_v58  ;;  %v3281_v63 = vld [vmem:[%s17867_s5 + $0x150] sm:$0xff]  ;;  %v3008_v36 = vrot.slane %v2999_v32, %v15932_v53 }
 0xd68   : > { %12872 = vmatprep.subr.bf16.mxu0 %v12871_v2  ;;  %v12853_v43 = vpack.c.bf16 %v3248_v40, %v3247_v15  ;;  %v12889_v1 = vpack.c.bf16 %v3282_v55, %v3281_v63  ;;  %v3268_v2 = vld [vmem:[%s17867_s5 + $0xe8] sm:$0xff] }
 0xd69   : > { %12842 = vmatpush3.bf16.msra.mxu1 %v12841_v4  ;;  %v3299_v4 = vld [vmem:[%s17867_s5 + $0x1e0] sm:$0xff]  ;;  %v12859_v5 = vpack.c.bf16 %v3268_v2, %v3267_v12 }
 0xd6a   : > { %12874 = vmatpush3.bf16.msra.mxu0 %v12873_v8  ;;  %12844 = vmatprep.subr.bf16.mxu1 %v12843_v14  ;;  %v3251_v8 = vld [vmem:[%s17867_s5 + $0x60] sm:$0xff]  ;;  %v12891_v11 = vpack.c.bf16 %v3300_v6, %v3299_v4 }
 0xd6b   : > { %12876 = vmatprep.subr.bf16.mxu0 %v12875_v20  ;;  %v12861_v13 = vpack.c.bf16 %v3252_v9, %v3251_v8  ;;  %v3283_v14 = vld [vmem:[%s17867_s5 + $0x160] sm:$0xff]  ;;  %v3270_v20 = vld [vmem:[%s17867_s5 + $0xf8] sm:$0xff] }
 0xd6c   : > { %v12893_v18 = vpack.c.bf16 %v3284_v16, %v3283_v14  ;;  %v12863_v28 = vpack.c.bf16 %v3270_v20, %v3269_v19 }
 0xd6d   : > { %12846 = vmatpush3.bf16.msra.mxu1 %v12845_v29  ;;  %v3301_v29 = vld [vmem:[%s17867_s5 + $0x1f0] sm:$0xff] }
 0xd6e   : > { %12878 = vmatpush3.bf16.msra.mxu0 %v12877_v54  ;;  %12848 = vmatprep.subr.bf16.mxu1 %v12847_v56  ;;  %v3253_v54 = vld [vmem:[%s17867_s5 + $0x70] sm:$0xff]  ;;  %v12895_v23 = vpack.c.bf16 %v3302_v21, %v3301_v29 }
 0xd6f   : > { %12880 = vmatprep.subr.bf16.mxu0 %v12879_v31  ;;  %v12865_v24 = vpack.c.bf16 %v3254_v22, %v3253_v54  ;;  %v3285_v56 = vld [vmem:[%s17867_s5 + $0x170] sm:$0xff]  ;;  %v16223_v31 = vsub.s32 3, %v15924_v49 }
 0xd70   : > { %v12897_v30 = vpack.c.bf16 %v3286_v27, %v3285_v56 }
 0xd71   : > { %12850 = vmatpush3.bf16.msra.mxu1 %v12849_v33  ;;  %v3004_v33 = vrot.slane %v2999_v32, %v15927_v50 }
 0xd72   : > { %12882 = vmatpush3.bf16.msra.mxu0 %v12881_v10  ;;  %12852 = vmatprep.subr.bf16.mxu1 %v12851_v38  ;;  %v3016_v10 = vrot.slane %v2999_v32, %v16223_v31 }
 0xd73   : > { %12884 = vmatprep.subr.bf16.mxu0 %v12883_v42 }
 0xd75   : > { %12854 = vmatpush3.bf16.msra.mxu1 %v12853_v43 }
 0xd76   : > { %12886 = vmatpush3.bf16.msra.mxu0 %v12885_v45  ;;  %12856 = vmatprep.subr.bf16.mxu1 %v12855_v52 }
 0xd77   : > { %12888 = vmatprep.subr.bf16.mxu0 %v12887_v60 }
 0xd79   : > { %12858 = vmatpush3.bf16.msra.mxu1 %v12857_v61 }
 0xd7a   : > { %12890 = vmatpush3.bf16.msra.mxu0 %v12889_v1  ;;  %12860 = vmatprep.subr.bf16.mxu1 %v12859_v5 }
 0xd7b   : > { %12892 = vmatprep.subr.bf16.mxu0 %v12891_v11 }
 0xd7d   : > { %12862 = vmatpush3.bf16.msra.mxu1 %v12861_v13 }
 0xd7e   : > { %12894 = vmatpush3.bf16.msra.mxu0 %v12893_v18  ;;  %12864 = vmatprep.subr.bf16.mxu1 %v12863_v28 }
 0xd7f   : > { %12896 = vmatprep.subr.bf16.mxu0 %v12895_v23 }
 0xd81   : > { %12866 = vmatpush3.bf16.msra.mxu1 %v12865_v24 }
 0xd82   : > { %12898 = vmatpush3.bf16.msra.mxu0 %v12897_v30 }
 0xe36   : > { %v3087_v7 = vpop.f32.mrb[14].mxu1  ;;  %v3164_v37 = vpop.f32.mrb[14].mxu0 }
 0xe37   : > { %v16229_v35 = vadd.f32 %v3087_v7, %v3004_v33  ;;  %v16231_v38 = vadd.f32 %v3164_v37, %v3012_v34  ;;  %v3089_v39 = vpop.f32.mrb[15].mxu1  ;;  %v3166_v15 = vpop.f32.mrb[15].mxu0 }
 0xe38   : > { %v3090_v40 = vadd.f32 %v3089_v39, %v3008_v36  ;;  %v16233_v42 = vadd.f32 %v3166_v15, %v3016_v10 }
 0xe39   : > { %v10596_v49 = vmul.f32 -1.702, %v16229_v35  ;;  %v10598_v43 = vmul.f32 -1.702, %v16231_v38 }
 0xe3a   : > { %v10597_v44 = vmul.f32 -1.702, %v3090_v40  ;;  %v10599_v17 = vmul.f32 -1.702, %v16233_v42  ;;  %v3093_v45 = vpop.f32.mrb[16].mxu1  ;;  %v3170_v46 = vpop.f32.mrb[16].mxu0 }
 0xe3b   : > { %v3191_v47 = vmul.f32 1.442695, %v10596_v49  ;;  %v3195_v51 = vmul.f32 1.442695, %v10598_v43  ;;  %v16238_v52 = vadd.f32 %v3093_v45, %v3004_v33  ;;  %v16240_v57 = vadd.f32 %v3170_v46, %v3012_v34  ;;  %v3095_v58 = vpop.f32.mrb[17].mxu1  ;;  %v3172_v59 = vpop.f32.mrb[17].mxu0 }
 0xe3c   : > { %v3193_v60 = vmul.f32 1.442695, %v10597_v44  ;;  %v3197_v61 = vmul.f32 1.442695, %v10599_v17  ;;  %v3096_v63 = vadd.f32 %v3095_v58, %v3008_v36  ;;  %v3173_v55 = vadd.f32 %v3172_v59, %v3016_v10 }
 0xe3d   : > { %14250 = vpow2.f32 %v3191_v47  ;;  %v10600_v1 = vmul.f32 -1.702, %v16238_v52  ;;  %v10602_v12 = vmul.f32 -1.702, %v16240_v57 }
 0xe3e   : > { %14252 = vpow2.f32 %v3195_v51  ;;  %v10601_v2 = vmul.f32 -1.702, %v3096_v63  ;;  %v10603_v4 = vmul.f32 -1.702, %v3173_v55 }
 0xe3f   : > { %14254 = vpow2.f32 %v3193_v60  ;;  %v3199_v5 = vmul.f32 1.442695, %v10600_v1  ;;  %v3203_v6 = vmul.f32 1.442695, %v10602_v12 }
 0xe40   : > { %14256 = vpow2.f32 %v3197_v61  ;;  %v3201_v8 = vmul.f32 1.442695, %v10601_v2  ;;  %v3205_v9 = vmul.f32 1.442695, %v10603_v4 }
 0xe41   : > { %14258 = vpow2.f32 %v3199_v5 }
 0xe42   : > { %14260 = vpow2.f32 %v3203_v6  ;;  %v3506_v6 = vld [vmem:[#allocation6 + $0x188] sm:$0xff] }
 0xe43   : > { %14262 = vpow2.f32 %v3201_v8  ;;  %v3509_v8 = vld [vmem:[#allocation6 + $0x1a0] sm:$0xff] }
 0xe44   : > { %14264 = vpow2.f32 %v3205_v9  ;;  %v3505_v9 = vld [vmem:[#allocation6 + $0x180] sm:$0xff] }
 0xe47   : > { %v14251_v11 = vpop.eup %14250 }
 0xe48   : > { %v14253_v13 = vpop.eup %14252  ;;  %v3207_v14 = vadd.f32 1.0, %v14251_v11  ;;  %v12899_v11 = vpack.c.bf16 %v3509_v8, %v3506_v6  ;;  %v3534_v6 = vld [vmem:[#allocation6 + $0x268] sm:$0xff]  ;;  %v3535_v8 = vld [vmem:[#allocation6 + $0x270] sm:$0xff] }
 0xe49   : > { %v14255_v16 = vpop.eup %14254  ;;  %v3209_v18 = vadd.f32 1.0, %v14253_v13  ;;  %v3508_v13 = vld [vmem:[#allocation6 + $0x198] sm:$0xff] }
 0xe4a   : > { %v14257_v19 = vpop.eup %14256  ;;  %14266 = vrcp.f32 %v3207_v14  ;;  %v3208_v20 = vadd.f32 1.0, %v14255_v16  ;;  %v3512_v14 = vld [vmem:[#allocation6 + $0x1b8] sm:$0xff]  ;;  %v3515_v16 = vld [vmem:[#allocation6 + $0x1d0] sm:$0xff]  ;;  %12900 = vmatprep.subr.bf16.mxu1 %v12899_v11 }
 0xe4b   : > { %v14259_v29 = vpop.eup %14258  ;;  %14268 = vrcp.f32 %v3209_v18  ;;  %v3210_v28 = vadd.f32 1.0, %v14257_v19  ;;  %v12901_v18 = vpack.c.bf16 %v3508_v13, %v3505_v9  ;;  %v12903_v19 = vpack.c.bf16 %v3515_v16, %v3512_v14  ;;  %v3538_v9 = vld [vmem:[#allocation6 + $0x288] sm:$0xff]  ;;  %v3545_v16 = vld [vmem:[#allocation6 + $0x2c0] sm:$0xff] }
 0xe4c   : > { %v14261_v21 = vpop.eup %14260  ;;  %14270 = vrcp.f32 %v3208_v20  ;;  %v3211_v54 = vadd.f32 1.0, %v14259_v29  ;;  %v3507_v20 = vld [vmem:[#allocation6 + $0x190] sm:$0xff]  ;;  %v12921_v13 = vpack.c.bf16 %v3538_v9, %v3535_v8  ;;  %v3542_v14 = vld [vmem:[#allocation6 + $0x2a8] sm:$0xff] }
 0xe4d   : > { %v14263_v22 = vpop.eup %14262  ;;  %14272 = vrcp.f32 %v3210_v28  ;;  %v3213_v23 = vadd.f32 1.0, %v14261_v21  ;;  %v3511_v29 = vld [vmem:[#allocation6 + $0x1b0] sm:$0xff]  ;;  %v3514_v21 = vld [vmem:[#allocation6 + $0x1c8] sm:$0xff] }
 0xe4e   : > { %v14265_v24 = vpop.eup %14264  ;;  %14274 = vrcp.f32 %v3211_v54  ;;  %v3212_v56 = vadd.f32 1.0, %v14263_v22  ;;  %v3518_v54 = vld [vmem:[#allocation6 + $0x1e8] sm:$0xff]  ;;  %v12905_v22 = vpack.c.bf16 %v3514_v21, %v3511_v29  ;;  %v3544_v29 = vld [vmem:[#allocation6 + $0x2b8] sm:$0xff] }
 0xe4f   : > { %14276 = vrcp.f32 %v3213_v23  ;;  %v3214_v27 = vadd.f32 1.0, %v14265_v24  ;;  %v3513_v23 = vld [vmem:[#allocation6 + $0x1c0] sm:$0xff]  ;;  %v3516_v24 = vld [vmem:[#allocation6 + $0x1d8] sm:$0xff] }
 0xe50   : > { %14278 = vrcp.f32 %v3212_v56 }
 0xe51   : > { %14280 = vrcp.f32 %v3214_v27  ;;  %v12935_v27 = vpack.c.bf16 %v3516_v24, %v3513_v23  ;;  %v3546_v24 = vld [vmem:[#allocation6 + $0x2c8] sm:$0xff] }
 0xe54   : > { %v14267_v30 = vpop.eup %14266 }
 0xe55   : > { %v14269_v32 = vpop.eup %14268  ;;  %v3231_v7 = vmul.f32 %v14267_v30, %v16229_v35  ;;  %v3517_v30 = vld [vmem:[#allocation6 + $0x1e0] sm:$0xff] }
 0xe56   : > { %v14271_v33 = vpop.eup %14270  ;;  %v3233_v15 = vmul.f32 %v14269_v32, %v16231_v38  ;;  %v3520_v32 = vld [vmem:[#allocation6 + $0x1f8] sm:$0xff] }
 0xe57   : > { %v14273_v34 = vpop.eup %14272  ;;  %v3232_v36 = vmul.f32 %v14271_v33, %v3090_v40  ;;  %v12909_v33 = vpack.c.bf16 %v3520_v32, %v3517_v30 }
 0xe58   : > { %v14275_v10 = vpop.eup %14274  ;;  %v3234_v37 = vmul.f32 %v14273_v34, %v16233_v42  ;;  %v10604_v42 = vld [vmem:[%s17870_s26] ss:$0 sm:$0xff]  ;;  %s17873_s26 = smov 32  }
 0xe59   : > { %v14277_v39 = vpop.eup %14276  ;;  %3374 = vmatprep.mubr.f32.mxu1 %v3232_v36  ;;  %v3235_v17 = vmul.f32 %v14275_v10, %v16238_v52 }
 0xe5a   : > { %v14279_v49 = vpop.eup %14278  ;;  %3449 = vmatprep.mubr.f32.mxu0 %v3234_v37  ;;  %3375 = vmatmul.mubr.f32.vlgmr.msra.gmra.mrb[18].mxu1 %v3231_v7  ;;  %v3237_v40 = vmul.f32 %v14277_v39, %v16240_v57 }
 0xe5b   : > { %v14281_v43 = vpop.eup %14280  ;;  %v3236_v44 = vmul.f32 %v14279_v49, %v3096_v63  ;;  %3450 = vmatmul.mubr.f32.vlgmr.msra.gmra.mrb[18].mxu0 %v3233_v15  ;;  %12902 = vmatpush1.bf16.msra.mxu1 %v12901_v18  ;;  %v3537_v18 = vld [vmem:[#allocation6 + $0x280] sm:$0xff] }
 0xe5c   : > { %v3238_v45 = vmul.f32 %v14281_v43, %v3173_v55  ;;  %12904 = vmatprep.subr.bf16.mxu1 %v12903_v19  ;;  %v3524_v43 = vld [vmem:[#allocation6 + $0x218] sm:$0xff]  ;;  %v12923_v19 = vpack.c.bf16 %v3545_v16, %v3542_v14 }
 0xe5d   : > { %3379 = vmatprep.mubr.f32.mxu1 %v3236_v44  ;;  %v3527_v44 = vld [vmem:[#allocation6 + $0x230] sm:$0xff] }
 0xe5e   : > { %3454 = vmatprep.mubr.f32.mxu0 %v3238_v45  ;;  %3380 = vmatmul.mubr.f32.gmra.mrb[20].mxu1 %v3235_v17  ;;  %v3519_v17 = vld [vmem:[#allocation6 + $0x1f0] sm:$0xff]  ;;  %v12911_v45 = vpack.c.bf16 %v3527_v44, %v3524_v43 }
 0xe5f   : > { %3455 = vmatmul.mubr.f32.gmra.mrb[20].mxu0 %v3237_v40  ;;  %3635 = vmatprep.mubr.f32.mxu1 %v15270_v41  ;;  %v3522_v40 = vld [vmem:[#allocation6 + $0x208] sm:$0xff] }
 0xe60   : > { %12906 = vmatpush1.bf16.msra.mxu1 %v12905_v22  ;;  %v3543_v22 = vld [vmem:[#allocation6 + $0x2b0] sm:$0xff] }
 0xe61   : > { %v12955_v30 = vpack.c.bf16 %v3546_v24, %v3543_v22 }
 0xf2d   : > { %v11079_v35 = vpop.f32.mrb[18].mxu1 }
 0xf2e   : > { %v11117_v38 = vpop.f32.mrb[18].mxu0  ;;  %v11080_v46 = vpop.f32.mrb[19].mxu1 }
 0xf2f   : > { %v11081_v47 = vadd.f32 %v11080_v46, %v11079_v35  ;;  %v11118_v51 = vpop.f32.mrb[19].mxu0  ;;  %v3523_v35 = vld [vmem:[#allocation6 + $0x210] sm:$0xff] }
 0xf30   : > { %v11119_v58 = vadd.f32 %v11118_v51, %v11117_v38  ;;  %v3526_v38 = vld [vmem:[#allocation6 + $0x228] sm:$0xff]  ;;  %v3533_v51 = vld [vmem:[#allocation6 + $0x260] sm:$0xff] }
 0xf31   : > { %v3377_v59 = vadd.f32 %v11081_v47, %v10604_v42  ;;  %v11082_v60 = vpop.f32.mrb[20].mxu1  ;;  %v12913_v46 = vpack.c.bf16 %v3526_v38, %v3523_v35  ;;  %v3530_v47 = vld [vmem:[#allocation6 + $0x248] sm:$0xff] }
 0xf32   : > { %v11120_v61 = vpop.f32.mrb[20].mxu0  ;;  %v11083_v52 = vpop.f32.mrb[21].mxu1  ;;  %v10608_v35 = vld [vmem:[%s17852_s7 + $0x1] ss:$0 sm:$0xff] }
 0xf33   : > { %v3452_v63 = vadd.f32 %v11119_v58, %v3377_v59  ;;  %v11084_v55 = vadd.f32 %v11083_v52, %v11082_v60  ;;  %v11121_v57 = vpop.f32.mrb[21].mxu0  ;;  %v3525_v58 = vld [vmem:[#allocation6 + $0x220] sm:$0xff]  ;;  %v12915_v59 = vpack.c.bf16 %v3533_v51, %v3530_v47  ;;  %v3528_v60 = vld [vmem:[#allocation6 + $0x238] sm:$0xff] }
 0xf34   : > { %v11122_v1 = vadd.f32 %v11121_v57, %v11120_v61  ;;  %v3529_v61 = vld [vmem:[#allocation6 + $0x240] sm:$0xff]  ;;  %v3532_v52 = vld [vmem:[#allocation6 + $0x258] sm:$0xff] }
 0xf35   : > { %v3382_v12 = vadd.f32 %v11084_v55, %v10604_v42  ;;  %v16252_v2 = vadd.f32 %v3452_v63, %v16073_v26  ;;  %v3510_v26 = vld [vmem:[#allocation6 + $0x1a8] sm:$0xff]  ;;  %v12939_v42 = vpack.c.bf16 %v3522_v40, %v3519_v17  ;;  %v12943_v63 = vpack.c.bf16 %v3528_v60, %v3525_v58  ;;  %v3536_v57 = vld [vmem:[#allocation6 + $0x278] sm:$0xff] }
 0xf36   : > { %v12931_v28 = vpack.c.bf16 %v3510_v26, %v3507_v20  ;;  %v12917_v55 = vpack.c.bf16 %v3532_v52, %v3529_v61  ;;  %v3540_v20 = vld [vmem:[#allocation6 + $0x298] sm:$0xff]  ;;  %v3541_v26 = vld [vmem:[#allocation6 + $0x2a0] sm:$0xff] }
 0xf37   : > { %v3457_v4 = vadd.f32 %v11122_v1, %v3382_v12  ;;  %3466 = vadd.xlane.f32.xlu1 %v16252_v2  ;;  %v3539_v1 = vld [vmem:[#allocation6 + $0x290] sm:$0xff]  ;;  %v12925_v21 = vpack.c.bf16 %v3544_v29, %v3541_v26 }
 0xf38   : > { %12932 = vmatprep.subr.bf16.mxu0 %v12931_v28  ;;  %v3531_v12 = vld [vmem:[#allocation6 + $0x250] sm:$0xff] }
 0xf39   : > { %v16256_v5 = vadd.f32 %v3457_v4, %v16070_v25  ;;  %v3521_v25 = vld [vmem:[#allocation6 + $0x200] sm:$0xff]  ;;  %12934 = vmatpush3.bf16.msra.mxu0 %v12931_v28  ;;  %v12919_v4 = vpack.c.bf16 %v3539_v1, %v3536_v57  ;;  %v12947_v11 = vpack.c.bf16 %v3534_v6, %v3531_v12  ;;  %v12951_v28 = vpack.c.bf16 %v3540_v20, %v3537_v18 }
 0xf3a   : > { %v12907_v56 = vpack.c.bf16 %v3521_v25, %v3518_v54  ;;  %12936 = vmatprep.subr.bf16.mxu0 %v12935_v27  ;;  %v3548_v54 = vld [vmem:[#allocation6 + $0x2d8] sm:$0xff]  ;;  %v3551_v25 = vld [vmem:[#allocation6 + $0x2f0] sm:$0xff] }
 0xf3b   : > { %3468 = vadd.xlane.f32.xlu1 %v16256_v5  ;;  %v12927_v23 = vpack.c.bf16 %v3551_v25, %v3548_v54 }
 0xf3c   : > { %12908 = vmatprep.subr.bf16.mxu1 %v12907_v56  ;;  %v3547_v56 = vld [vmem:[#allocation6 + $0x2d0] sm:$0xff] }
 0xf3d   : > { %12938 = vmatpush3.bf16.msra.mxu0 %v12935_v27  ;;  %12910 = vmatpush1.bf16.msra.mxu1 %v12909_v33  ;;  %v3550_v27 = vld [vmem:[#allocation6 + $0x2e8] sm:$0xff]  ;;  %v3549_v33 = vld [vmem:[#allocation6 + $0x2e0] sm:$0xff] }
 0xf3e   : > { %12912 = vmatprep.subr.bf16.mxu1 %v12911_v45  ;;  %12940 = vmatprep.subr.bf16.mxu0 %v12939_v42  ;;  %v12929_v32 = vpack.c.bf16 %v3550_v27, %v3547_v56  ;;  %v10607_v45 = vld [vmem:[%s17851_s6 + $0x1] ss:$0 sm:$0xff]  ;;  %s15275_s6 = smov [#allocation32]  }
 0xf3f   : > { %s15100_s7 = sshll.u32 %s15275_s6, 4  ;;  %s15101_s7 = int_to_ptr.vmem [resolvable:$false] %s15100_s7 }
 0xf41   : > { %12914 = vmatpush1.bf16.msra.mxu1 %v12913_v46  ;;  %12942 = vmatpush3.bf16.msra.mxu0 %v12939_v42 }
 0xf42   : > { %12916 = vmatprep.subr.bf16.mxu1 %v12915_v59  ;;  %12944 = vmatprep.subr.bf16.mxu0 %v12943_v63  ;;  %v10609_v59 = vld [vmem:[%s17853_s16 + $0x3] sm:$0x7] }
 0xf43   : > { %v3559_v60 = vrot.slane %v10609_v59, %v15927_v50 }
 0xf45   : > { %12918 = vmatpush1.bf16.msra.mxu1 %v12917_v55  ;;  %12946 = vmatpush3.bf16.msra.mxu0 %v12943_v63  ;;  %v3567_v63 = vrot.slane %v10609_v59, %v15968_v3  ;;  %v3563_v55 = vrot.slane %v10609_v59, %v15932_v53 }
 0xf46   : > { %12920 = vmatprep.subr.bf16.mxu1 %v12919_v4  ;;  %12948 = vmatprep.subr.bf16.mxu0 %v12947_v11 }
 0xf49   : > { %12922 = vmatpush1.bf16.msra.mxu1 %v12921_v13  ;;  %12950 = vmatpush3.bf16.msra.mxu0 %v12947_v11 }
 0xf4a   : > { %12924 = vmatprep.subr.bf16.mxu1 %v12923_v19  ;;  %12952 = vmatprep.subr.bf16.mxu0 %v12951_v28 }
 0xf4d   : > { %12926 = vmatpush1.bf16.msra.mxu1 %v12925_v21  ;;  %12954 = vmatpush3.bf16.msra.mxu0 %v12951_v28 }
 0xf4e   : > { %12928 = vmatprep.subr.bf16.mxu1 %v12927_v23  ;;  %12956 = vmatprep.subr.bf16.mxu0 %v12955_v30 }
 0xf51   : > { %12930 = vmatpush1.bf16.msra.mxu1 %v12929_v32  ;;  %12958 = vmatpush3.bf16.msra.mxu0 %v12955_v30 }
 0xfc4   : > { %v3467_v34 = vpop.xlane.xlu1 %3466 }
 0xfc5   : > { %v3470_v36 = vmul.f32 0.0078125, %v3467_v34  ;;  %v3552_v34 = vld [vmem:[#allocation6 + $0x2f8] sm:$0xff] }
 0xfc7   : > { %v16260_v10 = vsub.f32 %v16252_v2, %v3470_v36  ;;  %v12959_v36 = vpack.c.bf16 %v3552_v34, %v3549_v33 }
 0xfc8   : > { %v3469_v7 = vpop.xlane.xlu1 %3468 }
 0xfc9   : > { %v3471_v37 = vmul.f32 0.0078125, %v3469_v7  ;;  %v3474_v39 = vmul.f32 %v16260_v10, %v16260_v10  ;;  %12960 = vmatprep.subr.bf16.mxu0 %v12959_v36 }
 0xfca   : > { %12962 = vmatpush3.bf16.msra.mxu0 %v12959_v36 }
 0xfcb   : > { %3476 = vadd.xlane.f32.xlu1 %v3474_v39  ;;  %v16265_v15 = vsub.f32 %v16256_v5, %v3471_v37 }
 0xfcd   : > { %v3475_v49 = vmul.f32 %v16265_v15, %v16265_v15 }
 0xfcf   : > { %3478 = vadd.xlane.f32.xlu0 %v3475_v49 }
0x1058   : > { %v3477_v7 = vpop.xlane.xlu1 %3476 }
0x1059   : > { %v3480_v37 = vmul.f32 0.0078125, %v3477_v7 }
0x105b   : > { %v3482_v39 = vadd.f32 1e-05, %v3480_v37 }
0x105c   : > { %v3479_v49 = vpop.xlane.xlu0 %3478 }
0x105d   : > { %14282 = vrsqrt.f32 %v3482_v39  ;;  %v3481_v43 = vmul.f32 0.0078125, %v3479_v49 }
0x105f   : > { %v3483_v44 = vadd.f32 1e-05, %v3481_v43 }
0x1061   : > { %14284 = vrsqrt.f32 %v3483_v44 }
0x1067   : > { %v14283_v17 = vpop.eup %14282 }
0x1068   : > { %v3486_v40 = vmul.f32 %v14283_v17, %v16260_v10 }
0x106a   : > { %v3494_v38 = vmul.f32 %v10607_v45, %v3486_v40 }
0x106b   : > { %v14285_v42 = vpop.eup %14284 }
0x106c   : > { %v3502_v46 = vadd.f32 %v10608_v35, %v3494_v38  ;;  %v3487_v47 = vmul.f32 %v14285_v42, %v16265_v15 }
0x106e   : > { %3636 = vmatmul.mubr.f32.vlgmr.msra.gmra.mrb[22].mxu1 %v3502_v46  ;;  %11871 = vmatprep.mubr.f32.mxu0 %v3502_v46  ;;  %v3495_v51 = vmul.f32 %v10607_v45, %v3487_v47 }
0x106f   : > { %3641 = vmatprep.mubr.f32.mxu1 %v15270_v41 }
0x1070   : > { %v3503_v58 = vadd.f32 %v10608_v35, %v3495_v51 }
0x1072   : > { %3642 = vmatmul.mubr.f32.gmra.mrb[24].mxu1 %v3503_v58  ;;  %11872 = vmatmul.mubr.f32.vlgmr.msra.gmra.mrb[22].mxu0 %v3503_v58 }
0x1141   : > { %v3637_v61 = vpop.f32.mrb[22].mxu1 }
0x1142   : > { %v16276_v52 = vadd.f32 %v3637_v61, %v3559_v60  ;;  %v3639_v10 = vpop.f32.mrb[23].mxu1 }
0x1143   : > { %v3640_v6 = vadd.f32 %v3639_v10, %v3563_v55 }
0x1144   : > { %11878 = vmatprep.mubr.msk.f32.mxu1 %vm1962_vm1, %v16276_v52 }
0x1145   : > { %v3643_v15 = vpop.f32.mrb[24].mxu1  ;;  %v11873_v57 = vpop.f32.mrb[22].mxu0 }
0x1146   : > { %v3720_v1 = vadd.f32 %v11873_v57, %v3567_v63  ;;  %v3645_v12 = vpop.f32.mrb[25].mxu1  ;;  %v3714_v4 = vpop.f32.mrb[23].mxu0  ;;  %v3644_v18 = vadd.f32 %v3643_v15, %v3559_v60 }
0x1147   : > { %v3646_v8 = vadd.f32 %v3645_v12, %v3563_v55  ;;  %v3715_v9 = vadd.f32 %v3714_v4, %v3567_v63 }
0x1149   : > { %v12963_v11 = vpack.c.bf16 %v3646_v8, %v3640_v6  ;;  %v12969_v13 = vpack.c.bf16 %v3720_v1, %v3715_v9  ;;  %v14101_v14 = vpack.i.bf16 %v3646_v8, %v3640_v6  ;;  %v16282_v16 = vpack.i.bf16 %v3720_v1, %v3715_v9 }
0x114b   : > { %12965 = vmatprep.subr.msk.bf16.mxu1 %vm15943_vm2, %v12963_v11 }
0x114c   : > { %12968 = vmatpush3.bf16.xpose.msk.msra.mxu1 %vm15943_vm2, %v12963_v11 }
0x114d   : > { %12970 = vmatprep.subr.bf16.mxu1 %v12969_v13 }
0x1153   : > { %11879 = vmatmul.mubr.msk.f32.vlgmr.msra.gmra.mrb[26].mxu1 %vm1962_vm1, %v3644_v18 }
0x1154   : > { %12972 = vmatpush3.bf16.msra.mxu1 %v12969_v13 }
0x1226   : > { %v11880_v19 = vpop.f32.mrb[26].mxu1 }
0x1227   : > { %v3811_v20 = vmul.f32 0.17677669, %v11880_v19  ;;  %v3801_v26 = vpop.f32.mrb[27].mxu1 }
0x1228   : > { %v3810_v29 = vmul.f32 0.17677669, %v3801_v26 }
0x1229   : > { %v3815_v28 = vsel %vm2052_vm3, %v3811_v20, -inf }
0x122a   : > { %3816 = vmax.xlane.f32.xlu0 %v3815_v28  ;;  %v3812_v21 = vsel %vm2052_vm3, %v3810_v29, -inf }
0x122b   : > { %3813 = vmax.xlane.f32.xlu1 %v3812_v21 }
0x123c   : > { %14102 = vrot.lane.b32.xlu1 %v14101_v14, %s17858_s22 }
0x1240   : > { %3915 = vrot.lane.b32.xlu0 %v16276_v52, %s17858_s22  ;;  %3917 = vrot.lane.b32.xlu1 %v3644_v18, %s17858_s22 }
0x1244   : > { %14112 = vrot.lane.b32.xlu1 %v14101_v14, %s17872_s0 }
0x12b7   : > { %v3817_v54 = vpop.xlane.xlu0 %3816 }
0x12b8   : > { %v3819_v25 = vsub.f32 %v3811_v20, %v3817_v54  ;;  %v3814_v22 = vpop.xlane.xlu1 %3813 }
0x12b9   : > { %v3818_v23 = vsub.f32 %v3810_v29, %v3814_v22 }
0x12ba   : > { %v3822_v24 = vmul.f32 1.442695, %v3819_v25 }
0x12bb   : > { %v3820_v56 = vmul.f32 1.442695, %v3818_v23  ;;  %v3916_v7 = vpop.permute.xlu0 %3915 }
0x12bc   : > { %v14103_v27 = vpop.permute.xlu1 %14102 }
0x12bd   : > { %14286 = vpow2.f32 %v3820_v56  ;;  %v14105_v30 = vunpack.i.h.bf16 %v14103_v27  ;;  %v14104_v32 = vunpack.i.l.bf16 %v14103_v27 }
0x12be   : > { %14288 = vpow2.f32 %v3822_v24 }
0x12bf   : > { %v12973_v33 = vpack.c.bf16 %v14105_v30, %v14104_v32 }
0x12c0   : > { %v3918_v37 = vpop.permute.xlu1 %3917 }
0x12c1   : > { %12975 = vmatprep.subr.msk.bf16.mxu1 %vm15943_vm2, %v12973_v33 }
0x12c4   : > { %v14113_v38 = vpop.permute.xlu1 %14112 }
0x12c5   : > { %v14115_v61 = vunpack.i.h.bf16 %v14113_v38  ;;  %v14114_v10 = vunpack.i.l.bf16 %v14113_v38 }
0x12c7   : > { %v16298_v34 = vpop.eup %14286  ;;  %v12983_v57 = vpack.c.bf16 %v14115_v61, %v14114_v10 }
0x12c8   : > { %v16300_v36 = vpop.eup %14288  ;;  %11885 = vmatprep.mubr.msk.f32.mxu1 %vm2052_vm3, %v16298_v34 }
0x12c9   : > { %11886 = vmatmul.mubr.msk.f32.vlgmr.msra.gmra.mrb[28].mxu1 %vm2052_vm3, %v16300_v36 }
0x12ca   : > { %12978 = vmatpush3.bf16.xpose.msk.msra.mxu1 %vm15943_vm2, %v12973_v33  ;;  %11892 = vmatprep.mubr.msk.f32.mxu1 %vm1962_vm1, %v3916_v7 }
0x12d1   : > { %11893 = vmatmul.mubr.msk.f32.vlgmr.msra.gmra.mrb[30].mxu1 %vm1962_vm1, %v3918_v37 }
0x139c   : > { %v16310_v39 = vpop.f32.mrb[28].mxu1 }
0x139d   : > { %v16312_v49 = vpop.f32.mrb[29].mxu1 }
0x13a4   : > { %v11894_v43 = vpop.f32.mrb[30].mxu1 }
0x13a5   : > { %v4007_v44 = vmul.f32 0.17677669, %v11894_v43  ;;  %v3997_v17 = vpop.f32.mrb[31].mxu1 }
0x13a6   : > { %v4006_v45 = vmul.f32 0.17677669, %v3997_v17 }
0x13a7   : > { %v4011_v40 = vsel %vm2052_vm3, %v4007_v44, -inf }
0x13a8   : > { %4012 = vmax.xlane.f32.xlu0 %v4011_v40  ;;  %v4008_v35 = vsel %vm2052_vm3, %v4006_v45, -inf }
0x13a9   : > { %4009 = vmax.xlane.f32.xlu1 %v4008_v35 }
0x13ba   : > { %14117 = vrot.lane.b32.xlu1 %v14101_v14, %s17873_s26 }
0x13be   : > { %14107 = vrot.lane.b32.xlu0 %v16282_v16, %s17858_s22  ;;  %4121 = vrot.lane.b32.xlu1 %v3644_v18, %s17872_s0 }
0x13c2   : > { %4119 = vrot.lane.b32.xlu0 %v16276_v52, %s17872_s0  ;;  %4323 = vrot.lane.b32.xlu1 %v3644_v18, %s17873_s26 }
0x13c6   : > { %4321 = vrot.lane.b32.xlu0 %v16276_v52, %s17873_s26 }
0x1435   : > { %v4013_v42 = vpop.xlane.xlu0 %4012 }
0x1436   : > { %v4015_v46 = vsub.f32 %v4007_v44, %v4013_v42  ;;  %v4010_v47 = vpop.xlane.xlu1 %4009 }
0x1437   : > { %v4014_v51 = vsub.f32 %v4006_v45, %v4010_v47 }
0x1438   : > { %v4018_v58 = vmul.f32 1.442695, %v4015_v46 }
0x1439   : > { %v4016_v59 = vmul.f32 1.442695, %v4014_v51  ;;  %v14108_v60 = vpop.permute.xlu0 %14107 }
0x143a   : > { %v14110_v63 = vunpack.i.h.bf16 %v14108_v60  ;;  %v14109_v55 = vunpack.i.l.bf16 %v14108_v60  ;;  %v14118_v1 = vpop.permute.xlu1 %14117 }
0x143b   : > { %14290 = vpow2.f32 %v4016_v59  ;;  %v14120_v52 = vunpack.i.h.bf16 %v14118_v1  ;;  %v14119_v12 = vunpack.i.l.bf16 %v14118_v1 }
0x143c   : > { %14292 = vpow2.f32 %v4018_v58  ;;  %v12979_v15 = vpack.c.bf16 %v14110_v63, %v14109_v55 }
0x143d   : > { %v12993_v8 = vpack.c.bf16 %v14120_v52, %v14119_v12  ;;  %v4120_v9 = vpop.permute.xlu0 %4119 }
0x143e   : > { %12980 = vmatprep.subr.bf16.mxu1 %v12979_v15  ;;  %v4122_v11 = vpop.permute.xlu1 %4121 }
0x143f   : > { %12982 = vmatpush3.bf16.msra.mxu1 %v12979_v15 }
0x1440   : > { %12985 = vmatprep.subr.msk.bf16.mxu1 %vm15943_vm2, %v12983_v57 }
0x1441   : > { %v4322_v13 = vpop.permute.xlu0 %4321 }
0x1442   : > { %v4324_v14 = vpop.permute.xlu1 %4323 }
0x1445   : > { %v14291_v4 = vpop.eup %14290 }
0x1446   : > { %v14293_v6 = vpop.eup %14292  ;;  %11899 = vmatprep.mubr.msk.f32.mxu1 %vm2052_vm3, %v14291_v4  ;;  %v4109_v30 = vsel %vm2052_vm3, %v14291_v4, 0.0  ;;  %v3908_v4 = vsel %vm2052_vm3, %v16300_v36, 0.0 }
0x1447   : > { %11900 = vmatmul.mubr.msk.f32.vlgmr.msra.gmra.mrb[32].mxu1 %vm2052_vm3, %v14293_v6  ;;  %v4112_v32 = vsel %vm2052_vm3, %v14293_v6, 0.0 }
0x1448   : > { %12988 = vmatpush3.bf16.xpose.msk.msra.mxu1 %vm15943_vm2, %v12983_v57  ;;  %11906 = vmatprep.mubr.msk.f32.mxu1 %vm1962_vm1, %v4120_v9 }
0x1449   : > { %12995 = vmatprep.subr.msk.bf16.mxu1 %vm15943_vm2, %v12993_v8 }
0x144f   : > { %11907 = vmatmul.mubr.msk.f32.vlgmr.msra.gmra.mrb[34].mxu1 %vm1962_vm1, %v4122_v11 }
0x1450   : > { %12998 = vmatpush3.bf16.xpose.msk.msra.mxu1 %vm15943_vm2, %v12993_v8  ;;  %11920 = vmatprep.mubr.msk.f32.mxu1 %vm1962_vm1, %v4322_v13  ;;  %v3905_v8 = vsel %vm2052_vm3, %v16298_v34, 0.0  ;;  %v10634_v34 = vld [vmem:[%s17857_s18 + $0x80] sm:$0xff] }
0x1457   : > { %11921 = vmatmul.mubr.msk.f32.vlgmr.msra.gmra.mrb[36].mxu1 %vm1962_vm1, %v4324_v14 }
0x1458   : > { %4849 = vmatprep.mubr.f32.mxu1 %v15270_v41 }
0x151a   : > { %v16340_v18 = vpop.f32.mrb[32].mxu1 }
0x151b   : > { %v16342_v19 = vpop.f32.mrb[33].mxu1 }
0x1522   : > { %v11908_v20 = vpop.f32.mrb[34].mxu1 }
0x1523   : > { %v4211_v26 = vmul.f32 0.17677669, %v11908_v20  ;;  %v4201_v29 = vpop.f32.mrb[35].mxu1 }
0x1524   : > { %v4210_v28 = vmul.f32 0.17677669, %v4201_v29  ;;  %v10635_v29 = vld [vmem:[%s17857_s18 + $0x88] sm:$0xff] }
0x1525   : > { %v4215_v21 = vsel %vm2052_vm3, %v4211_v26, -inf }
0x1526   : > { %4216 = vmax.xlane.f32.xlu1 %v4215_v21  ;;  %v4212_v54 = vsel %vm2052_vm3, %v4210_v28, -inf  ;;  %v13003_v21 = vpack.c.bf16 %v10635_v29, %v10634_v34 }
0x1527   : > { %4213 = vmax.xlane.f32.xlu0 %v4212_v54  ;;  %v10637_v54 = vld [vmem:[%s17857_s18 + $0x98] sm:$0xff] }
0x152a   : > { %v11922_v25 = vpop.f32.mrb[36].mxu1 }
0x152b   : > { %v4413_v22 = vmul.f32 0.17677669, %v11922_v25  ;;  %v4403_v23 = vpop.f32.mrb[37].mxu1 }
0x152c   : > { %v4412_v24 = vmul.f32 0.17677669, %v4403_v23  ;;  %v10639_v23 = vld [vmem:[%s17857_s18 + $0xa8] sm:$0xff] }
0x152d   : > { %v4417_v56 = vsel %vm2052_vm3, %v4413_v22, -inf }
0x152e   : > { %4418 = vmax.xlane.f32.xlu0 %v4417_v56  ;;  %v4414_v27 = vsel %vm2052_vm3, %v4412_v24, -inf }
0x1532   : > { %4415 = vmax.xlane.f32.xlu0 %v4414_v27 }
0x1537   : > { %14122 = vrot.lane.b32.xlu1 %v16282_v16, %s17872_s0 }
0x1548   : > { %14127 = vrot.lane.b32.xlu0 %v16282_v16, %s17873_s26 }
0x155b   : > { %4110 = vadd.xlane.f32.xlu1 %v4109_v30 }
0x1567   : > { %4113 = vadd.xlane.f32.xlu0 %v4112_v32  ;;  %v10642_v32 = vld [vmem:[%s17857_s18 + $0xc0] sm:$0xff] }
0x15b3   : > { %v4217_v33 = vpop.xlane.xlu1 %4216 }
0x15b4   : > { %v4219_v7 = vsub.f32 %v4211_v26, %v4217_v33  ;;  %v4214_v37 = vpop.xlane.xlu0 %4213  ;;  %v10643_v33 = vld [vmem:[%s17857_s18 + $0xc8] sm:$0xff] }
0x15b5   : > { %v4218_v43 = vsub.f32 %v4210_v28, %v4214_v37  ;;  %v10636_v28 = vld [vmem:[%s17857_s18 + $0x90] sm:$0xff] }
0x15b6   : > { %v4222_v44 = vmul.f32 1.442695, %v4219_v7  ;;  %v13007_v25 = vpack.c.bf16 %v10637_v54, %v10636_v28  ;;  %v13019_v7 = vpack.c.bf16 %v10643_v33, %v10642_v32  ;;  %v10644_v37 = vld [vmem:[%s17857_s18 + $0xd0] sm:$0xff]  ;;  %v10657_v33 = vld [vmem:[%s17862_s10 + $0x208] sm:$0xff] }
0x15b7   : > { %v4220_v17 = vmul.f32 1.442695, %v4218_v43  ;;  %v14123_v45 = vpop.permute.xlu1 %14122  ;;  %v10645_v43 = vld [vmem:[%s17857_s18 + $0xd8] sm:$0xff] }
0x15b8   : > { %14294 = vpow2.f32 %v4222_v44  ;;  %v14125_v40 = vunpack.i.h.bf16 %v14123_v45  ;;  %v14124_v35 = vunpack.i.l.bf16 %v14123_v45  ;;  %v10646_v44 = vld [vmem:[%s17857_s18 + $0xe0] sm:$0xff]  ;;  %v10647_v45 = vld [vmem:[%s17857_s18 + $0xe8] sm:$0xff] }
0x15b9   : > { %14296 = vpow2.f32 %v4220_v17  ;;  %v13023_v17 = vpack.c.bf16 %v10645_v43, %v10644_v37  ;;  %v10659_v37 = vld [vmem:[%s17862_s10 + $0x218] sm:$0xff] }
0x15ba   : > { %v12989_v38 = vpack.c.bf16 %v14125_v40, %v14124_v35  ;;  %v13027_v40 = vpack.c.bf16 %v10647_v45, %v10646_v44  ;;  %v10663_v44 = vld [vmem:[%s17862_s10 + $0x238] sm:$0xff]  ;;  %v10660_v45 = vld [vmem:[%s17862_s10 + $0x220] sm:$0xff] }
0x15bb   : > { %v4419_v42 = vpop.xlane.xlu0 %4418 }
0x15bc   : > { %v4421_v16 = vsub.f32 %v4413_v22, %v4419_v42  ;;  %12990 = vmatprep.subr.bf16.mxu0 %v12989_v38  ;;  %v10638_v22 = vld [vmem:[%s17857_s18 + $0xa0] sm:$0xff] }
0x15bd   : > { %12992 = vmatpush3.bf16.msra.mxu0 %v12989_v38 }
0x15be   : > { %v4424_v46 = vmul.f32 1.442695, %v4421_v16 }
0x15bf   : > { %v4416_v47 = vpop.xlane.xlu0 %4415 }
0x15c0   : > { %14298 = vpow2.f32 %v4424_v46  ;;  %v4420_v51 = vsub.f32 %v4412_v24, %v4416_v47  ;;  %v10640_v24 = vld [vmem:[%s17857_s18 + $0xb0] sm:$0xff] }
0x15c2   : > { %v14295_v58 = vpop.eup %14294  ;;  %v4422_v59 = vmul.f32 1.442695, %v4420_v51 }
0x15c3   : > { %v14297_v60 = vpop.eup %14296  ;;  %v14128_v61 = vpop.permute.xlu0 %14127  ;;  %v4314_v10 = vsel %vm2052_vm3, %v14295_v58, 0.0 }
0x15c4   : > { %14300 = vpow2.f32 %v4422_v59  ;;  %v14130_v63 = vunpack.i.h.bf16 %v14128_v61  ;;  %v14129_v55 = vunpack.i.l.bf16 %v14128_v61  ;;  %11913 = vmatprep.mubr.msk.f32.mxu0 %vm2052_vm3, %v14297_v60  ;;  %4315 = vadd.xlane.f32.xlu0 %v4314_v10  ;;  %v4311_v15 = vsel %vm2052_vm3, %v14297_v60, 0.0  ;;  %v10648_v59 = vld [vmem:[%s17857_s18 + $0xf0] sm:$0xff]  ;;  %v10649_v60 = vld [vmem:[%s17857_s18 + $0xf8] sm:$0xff] }
0x15c5   : > { %4312 = vadd.xlane.f32.xlu1 %v4311_v15  ;;  %11914 = vmatmul.mubr.msk.f32.vlgmr.msra.gmra.mrb[24].mxu0 %vm2052_vm3, %v14295_v58  ;;  %v13031_v61 = vpack.c.bf16 %v10649_v60, %v10648_v59  ;;  %v10664_v60 = vld [vmem:[%s17862_s10 + $0x240] sm:$0xff] }
0x15c6   : > { %v12999_v57 = vpack.c.bf16 %v14130_v63, %v14129_v55 }
0x15c8   : > { %13000 = vmatprep.subr.bf16.mxu0 %v12999_v57 }
0x15c9   : > { %13002 = vmatpush3.bf16.msra.mxu0 %v12999_v57 }
0x15ca   : > { %v14299_v1 = vpop.eup %14298  ;;  %13004 = vmatprep.subr.bf16.mxu0 %v13003_v21 }
0x15cb   : > { %v4516_v52 = vsel %vm2052_vm3, %v14299_v1, 0.0 }
0x15cc   : > { %4517 = vadd.xlane.f32.xlu0 %v4516_v52 }
0x15ce   : > { %v14301_v12 = vpop.eup %14300 }
0x15cf   : > { %11927 = vmatprep.mubr.msk.f32.mxu0 %vm2052_vm3, %v14301_v12  ;;  %v4513_v6 = vsel %vm2052_vm3, %v14301_v12, 0.0 }
0x15d0   : > { %3909 = vadd.xlane.f32.xlu0 %v3908_v4  ;;  %4514 = vadd.xlane.f32.xlu1 %v4513_v6 }
0x15d1   : > { %11928 = vmatmul.mubr.msk.f32.vlgmr.msra.gmra.mrb[26].mxu0 %vm2052_vm3, %v14299_v1 }
0x15d2   : > { %13006 = vmatpush3.bf16.msra.mxu0 %v13003_v21 }
0x15d3   : > { %13008 = vmatprep.subr.bf16.mxu0 %v13007_v25 }
0x15d4   : > { %3906 = vadd.xlane.f32.xlu1 %v3905_v8 }
0x15d6   : > { %13010 = vmatpush3.bf16.msra.mxu0 %v13007_v25 }
0x15e8   : > { %v4111_v9 = vpop.xlane.xlu1 %4110 }
0x15e9   : > { %14302 = vrcp.f32 %v4111_v9 }
0x15f3   : > { %v14303_v36 = vpop.eup %14302 }
0x15f4   : > { %v4114_v11 = vpop.xlane.xlu0 %4113  ;;  %v4116_v14 = vmul.f32 %v14303_v36, %v16342_v19  ;;  %v13011_v19 = vpack.c.bf16 %v10639_v23, %v10638_v22 }
0x15f5   : > { %14304 = vrcp.f32 %v4114_v11 }
0x15f6   : > { %13012 = vmatprep.subr.bf16.mxu0 %v13011_v19 }
0x15f7   : > { %13014 = vmatpush3.bf16.msra.mxu0 %v13011_v19 }
0x15ff   : > { %v14305_v13 = vpop.eup %14304 }
0x1600   : > { %v4118_v20 = vmul.f32 %v14305_v13, %v16340_v18  ;;  %v10641_v18 = vld [vmem:[%s17857_s18 + $0xb8] sm:$0xff] }
0x1601   : > { %v13015_v56 = vpack.c.bf16 %v10641_v18, %v10640_v24 }
0x1602   : > { %v14131_v26 = vpack.i.bf16 %v4118_v20, %v4116_v14 }
0x1603   : > { %13016 = vmatprep.subr.bf16.mxu0 %v13015_v56 }
0x1604   : > { %14132 = vrot.lane.b32.xlu1 %v14131_v26, %s17873_s26  ;;  %13018 = vmatpush3.bf16.msra.mxu0 %v13015_v56 }
0x1605   : > { %13020 = vmatprep.subr.bf16.mxu0 %v13019_v7 }
0x1608   : > { %13022 = vmatpush3.bf16.msra.mxu0 %v13019_v7  ;;  %v10661_v7 = vld [vmem:[%s17862_s10 + $0x228] sm:$0xff] }
0x1609   : > { %13024 = vmatprep.subr.bf16.mxu0 %v13023_v17  ;;  %v13035_v43 = vpack.c.bf16 %v10661_v7, %v10657_v33  ;;  %v10691_v33 = vld [vmem:[%s17862_s10 + $0x318] sm:$0xff] }
0x160b   : > { %13036 = vmatprep.subr.bf16.mxu1 %v13035_v43  ;;  %v10688_v43 = vld [vmem:[%s17862_s10 + $0x300] sm:$0xff] }
0x160c   : > { %13026 = vmatpush3.bf16.msra.mxu0 %v13023_v17  ;;  %v10656_v17 = vld [vmem:[%s17862_s10 + $0x200] sm:$0xff] }
0x160d   : > { %13028 = vmatprep.subr.bf16.mxu0 %v13027_v40 }
0x1610   : > { %13030 = vmatpush3.bf16.msra.mxu0 %v13027_v40  ;;  %v13067_v40 = vpack.c.bf16 %v10663_v44, %v10659_v37  ;;  %v10695_v37 = vld [vmem:[%s17862_s10 + $0x338] sm:$0xff]  ;;  %v10692_v44 = vld [vmem:[%s17862_s10 + $0x320] sm:$0xff] }
0x1611   : > { %13032 = vmatprep.subr.bf16.mxu0 %v13031_v61 }
0x1614   : > { %13034 = vmatpush3.bf16.msra.mxu0 %v13031_v61  ;;  %v10668_v61 = vld [vmem:[%s17862_s10 + $0x260] sm:$0xff] }
0x1615   : > { %13068 = vmatprep.subr.bf16.mxu0 %v13067_v40  ;;  %v10690_v40 = vld [vmem:[%s17862_s10 + $0x310] sm:$0xff] }
0x1651   : > { %v4316_v27 = vpop.xlane.xlu0 %4315 }
0x1652   : > { %v4313_v30 = vpop.xlane.xlu1 %4312  ;;  %14306 = vrcp.f32 %v4316_v27 }
0x1653   : > { %14308 = vrcp.f32 %v4313_v30 }
0x1659   : > { %v4518_v35 = vpop.xlane.xlu0 %4517 }
0x165a   : > { %14310 = vrcp.f32 %v4518_v35  ;;  %v13037_v35 = vpack.c.bf16 %v10660_v45, %v10656_v17  ;;  %v13083_v17 = vpack.c.bf16 %v10695_v37, %v10691_v33  ;;  %v13053_v45 = vpack.c.bf16 %v10692_v44, %v10688_v43  ;;  %v16484_v43 = vld [vmem:[%s17866_s3 + $0x1] ss:$0 sm:$0xff]  ;;  %s17876_s3 = sld [smem:[#allocation71_spill]] }
0x165c   : > { %v14307_v38 = vpop.eup %14306  ;;  %13038 = vmatpush1.bf16.msra.mxu1 %v13037_v35  ;;  %v10694_v35 = vld [vmem:[%s17862_s10 + $0x330] sm:$0xff] }
0x165d   : > { %v4515_v42 = vpop.xlane.xlu1 %4514  ;;  %v14309_v46 = vpop.eup %14308 }
0x165e   : > { %14312 = vrcp.f32 %v4515_v42  ;;  %v3910_v4 = vpop.xlane.xlu0 %3909  ;;  %v10665_v42 = vld [vmem:[%s17862_s10 + $0x248] sm:$0xff] }
0x165f   : > { %14314 = vrcp.f32 %v3910_v4  ;;  %v10679_v4 = vld [vmem:[%s17862_s10 + $0x2b8] sm:$0xff] }
0x1661   : > { %v3907_v6 = vpop.xlane.xlu1 %3906 }
0x1662   : > { %14316 = vrcp.f32 %v3907_v6  ;;  %v10672_v6 = vld [vmem:[%s17862_s10 + $0x280] sm:$0xff] }
0x1664   : > { %v14311_v63 = vpop.eup %14310 }
0x1668   : > { %v14313_v15 = vpop.eup %14312 }
0x1669   : > { %v14315_v9 = vpop.eup %14314 }
0x166a   : > { %v3914_v29 = vmul.f32 %v14315_v9, %v16310_v39  ;;  %v10651_v39 = vld [vmem:[%s17860_s2 + $0x1] ss:$0 sm:$0xff]  ;;  %s17875_s2 = sld [smem:[#allocation51_spill]] }
0x166b   : > { %v10676_v9 = vld [vmem:[%s17862_s10 + $0x2a0] sm:$0xff] }
0x166c   : > { %v14317_v36 = vpop.eup %14316 }
0x166d   : > { %v3912_v34 = vmul.f32 %v14317_v36, %v16312_v49  ;;  %v10678_v36 = vld [vmem:[%s17862_s10 + $0x2b0] sm:$0xff] }
0x1676   : > { %v14133_v8 = vpop.permute.xlu1 %14132 }
0x1677   : > { %v14135_v13 = vunpack.i.h.bf16 %v14133_v8  ;;  %v14134_v14 = vunpack.i.l.bf16 %v14133_v8 }
0x1679   : > { %v4547_v25 = vsel %vm1962_vm1, %v3912_v34, %v14134_v14  ;;  %v4548_v22 = vsel %vm1962_vm1, %v3914_v29, %v14135_v13  ;;  %v13045_v13 = vpack.c.bf16 %v10676_v9, %v10672_v6  ;;  %v10706_v9 = vld [vmem:[%s17862_s10 + $0x390] sm:$0xff] }
0x1698   : > { %v11915_v16 = vpop.f32.mrb[24].mxu0 }
0x1699   : > { %v4320_v47 = vmul.f32 %v14307_v38, %v11915_v16  ;;  %v4302_v51 = vpop.f32.mrb[25].mxu0  ;;  %v10658_v38 = vld [vmem:[%s17862_s10 + $0x210] sm:$0xff] }
0x169a   : > { %v4318_v58 = vmul.f32 %v14309_v46, %v4302_v51  ;;  %v10669_v46 = vld [vmem:[%s17862_s10 + $0x268] sm:$0xff]  ;;  %v10671_v51 = vld [vmem:[%s17862_s10 + $0x278] sm:$0xff] }
0x169c   : > { %v14136_v10 = vpack.i.bf16 %v4320_v47, %v4318_v58  ;;  %v10667_v47 = vld [vmem:[%s17862_s10 + $0x258] sm:$0xff]  ;;  %v13039_v58 = vpack.c.bf16 %v10669_v46, %v10665_v42  ;;  %v10701_v42 = vld [vmem:[%s17862_s10 + $0x368] sm:$0xff] }
0x169d   : > { %v13071_v59 = vpack.c.bf16 %v10671_v51, %v10667_v47  ;;  %v10703_v46 = vld [vmem:[%s17862_s10 + $0x378] sm:$0xff] }
0x169e   : > { %14137 = vrot.lane.b32.xlu0 %v14136_v10, %s17872_s0  ;;  %v10666_v10 = vld [vmem:[%s17862_s10 + $0x250] sm:$0xff]  ;;  %13040 = vmatprep.subr.bf16.mxu1 %v13039_v58  ;;  %v10696_v58 = vld [vmem:[%s17862_s10 + $0x340] sm:$0xff] }
0x16a4   : > { %v11929_v55 = vpop.f32.mrb[26].mxu0 }
0x16a5   : > { %v4522_v57 = vmul.f32 %v14311_v63, %v11929_v55  ;;  %v4504_v1 = vpop.f32.mrb[27].mxu0  ;;  %v13041_v63 = vpack.c.bf16 %v10668_v61, %v10664_v60  ;;  %v10670_v55 = vld [vmem:[%s17862_s10 + $0x270] sm:$0xff] }
0x16a6   : > { %v4520_v52 = vmul.f32 %v14313_v15, %v4504_v1  ;;  %v10673_v15 = vld [vmem:[%s17862_s10 + $0x288] sm:$0xff]  ;;  %v13073_v1 = vpack.c.bf16 %v10670_v55, %v10666_v10  ;;  %v10698_v60 = vld [vmem:[%s17862_s10 + $0x350] sm:$0xff] }
0x16a7   : > { %13042 = vmatpush1.bf16.msra.mxu1 %v13041_v63  ;;  %v10702_v10 = vld [vmem:[%s17862_s10 + $0x370] sm:$0xff]  ;;  %v10705_v55 = vld [vmem:[%s17862_s10 + $0x388] sm:$0xff] }
0x16a8   : > { %v14141_v12 = vpack.i.bf16 %v4522_v57, %v4520_v52  ;;  %v10677_v57 = vld [vmem:[%s17862_s10 + $0x2a8] sm:$0xff]  ;;  %v13089_v63 = vpack.c.bf16 %v10702_v10, %v10698_v60  ;;  %v10779_v60 = vld [vmem:[%s17867_s5 + $0x390] sm:$0xff]  ;;  %v10780_v10 = vld [vmem:[%s17867_s5 + $0x398] sm:$0xff] }
0x16a9   : > { %v13043_v52 = vpack.c.bf16 %v10677_v57, %v10673_v15  ;;  %v10709_v15 = vld [vmem:[%s17862_s10 + $0x3a8] sm:$0xff]  ;;  %v10707_v57 = vld [vmem:[%s17862_s10 + $0x398] sm:$0xff] }
0x16aa   : > { %14142 = vrot.lane.b32.xlu1 %v14141_v12, %s17858_s22  ;;  %v10675_v12 = vld [vmem:[%s17862_s10 + $0x298] sm:$0xff] }
0x16ab   : > { %v13075_v8 = vpack.c.bf16 %v10679_v4, %v10675_v12  ;;  %13044 = vmatprep.subr.bf16.mxu1 %v13043_v52  ;;  %v10711_v52 = vld [vmem:[%s17862_s10 + $0x3b8] sm:$0xff]  ;;  %v10704_v12 = vld [vmem:[%s17862_s10 + $0x380] sm:$0xff] }
0x16ac   : > { %13046 = vmatpush1.bf16.msra.mxu1 %v13045_v13  ;;  %v10708_v4 = vld [vmem:[%s17862_s10 + $0x3a0] sm:$0xff]  ;;  %v13091_v6 = vpack.c.bf16 %v10711_v52, %v10707_v57  ;;  %v10764_v52 = vld [vmem:[%s17867_s5 + $0x318] sm:$0xff] }
0x1710   : > { %v14138_v11 = vpop.permute.xlu0 %14137 }
0x1711   : > { %v14140_v20 = vunpack.i.h.bf16 %v14138_v11  ;;  %v14139_v26 = vunpack.i.l.bf16 %v14138_v11  ;;  %v10674_v11 = vld [vmem:[%s17862_s10 + $0x290] sm:$0xff] }
0x1712   : > { %v13077_v14 = vpack.c.bf16 %v10678_v36, %v10674_v11  ;;  %v10710_v11 = vld [vmem:[%s17862_s10 + $0x3b0] sm:$0xff]  ;;  %v10713_v36 = vld [vmem:[%s17862_s10 + $0x3c8] sm:$0xff] }
0x1713   : > { %v4549_v23 = vsel %vm1578_vm0, %v4547_v25, %v14139_v26  ;;  %v4550_v19 = vsel %vm1578_vm0, %v4548_v22, %v14140_v20  ;;  %v10683_v25 = vld [vmem:[%s17862_s10 + $0x2d8] sm:$0xff]  ;;  %v13093_v13 = vpack.c.bf16 %v10710_v11, %v10706_v9  ;;  %v10782_v11 = vld [vmem:[%s17867_s5 + $0x3a8] sm:$0xff] }
0x171c   : > { %v14143_v28 = vpop.permute.xlu1 %14142 }
0x171d   : > { %v14145_v21 = vunpack.i.h.bf16 %v14143_v28  ;;  %v14144_v54 = vunpack.i.l.bf16 %v14143_v28 }
0x171f   : > { %v4551_v24 = vsel %vm2792_vm4, %v4549_v23, %v14144_v54  ;;  %v4552_v49 = vsel %vm2792_vm4, %v4550_v19, %v14145_v21  ;;  %v10681_v21 = vld [vmem:[%s17862_s10 + $0x2c8] sm:$0xff]  ;;  %v10687_v23 = vld [vmem:[%s17862_s10 + $0x2f8] sm:$0xff]  ;;  %v10680_v19 = vld [vmem:[%s17862_s10 + $0x2c0] sm:$0xff] }
0x1720   : > { %11962 = vmatprep.mubr.f32.mxu0 %v4551_v24  ;;  %v10685_v54 = vld [vmem:[%s17862_s10 + $0x2e8] sm:$0xff]  ;;  %v10684_v24 = vld [vmem:[%s17862_s10 + $0x2e0] sm:$0xff] }
0x1721   : > { %11963 = vmatmul.mubr.f32.vlgmr.msra.gmra.mrb[28].mxu0 %v4552_v49  ;;  %v13047_v22 = vpack.c.bf16 %v10685_v54, %v10681_v21  ;;  %v13079_v49 = vpack.c.bf16 %v10687_v23, %v10683_v25  ;;  %v10712_v54 = vld [vmem:[%s17862_s10 + $0x3c0] sm:$0xff] }
0x1722   : > { %4926 = vmatprep.mubr.f32.mxu0 %v15270_v41  ;;  %v10716_v25 = vld [vmem:[%s17862_s10 + $0x3e0] sm:$0xff] }
0x1723   : > { %13048 = vmatprep.subr.bf16.mxu1 %v13047_v22  ;;  %v10714_v22 = vld [vmem:[%s17862_s10 + $0x3d0] sm:$0xff]  ;;  %v13065_v23 = vpack.c.bf16 %v10716_v25, %v10712_v54  ;;  %v10752_v25 = vld [vmem:[%s17867_s5 + $0x2b8] sm:$0xff] }
0x1724   : > { %v10751_v54 = vld [vmem:[%s17867_s5 + $0x2b0] sm:$0xff] }
0x17f4   : > { %v11964_v18 = vpop.f32.mrb[28].mxu0 }
0x17f5   : > { %v4650_v56 = vadd.f32 %v11964_v18, %v10651_v39  ;;  %v4644_v27 = vpop.f32.mrb[29].mxu0  ;;  %v10682_v18 = vld [vmem:[%s17862_s10 + $0x2d0] sm:$0xff] }
0x17f6   : > { %v4645_v30 = vadd.f32 %v10651_v39, %v4644_v27  ;;  %v13049_v39 = vpack.c.bf16 %v10684_v24, %v10680_v19  ;;  %v10689_v27 = vld [vmem:[%s17862_s10 + $0x308] sm:$0xff]  ;;  %v10718_v19 = vld [vmem:[%s17862_s10 + $0x3f0] sm:$0xff] }
0x17f7   : > { %v16431_v28 = vadd.f32 %v4650_v56, %v16256_v5  ;;  %v10686_v5 = vld [vmem:[%s17862_s10 + $0x2f0] sm:$0xff]  ;;  %v13097_v24 = vpack.c.bf16 %v10718_v19, %v10714_v22  ;;  %v10784_v19 = vld [vmem:[%s17867_s5 + $0x3b8] sm:$0xff] }
0x17f8   : > { %v16398_v32 = vadd.f32 %v4645_v30, %v16252_v2  ;;  %v10662_v2 = vld [vmem:[%s17862_s10 + $0x230] sm:$0xff]  ;;  %v13081_v56 = vpack.c.bf16 %v10686_v5, %v10682_v18  ;;  %13050 = vmatpush1.bf16.msra.mxu1 %v13049_v39  ;;  %v10693_v30 = vld [vmem:[%s17862_s10 + $0x328] sm:$0xff] }
0x17f9   : > { %v13069_v16 = vpack.c.bf16 %v10662_v2, %v10658_v38  ;;  %v13051_v7 = vpack.c.bf16 %v10693_v30, %v10689_v27  ;;  %v10697_v38 = vld [vmem:[%s17862_s10 + $0x348] sm:$0xff]  ;;  %v13085_v2 = vpack.c.bf16 %v10694_v35, %v10690_v40  ;;  %v10783_v22 = vld [vmem:[%s17867_s5 + $0x3b0] sm:$0xff] }
0x17fa   : > { %4659 = vadd.xlane.f32.xlu1 %v16398_v32  ;;  %v13055_v47 = vpack.c.bf16 %v10701_v42, %v10697_v38  ;;  %v10778_v35 = vld [vmem:[%s17867_s5 + $0x388] sm:$0xff]  ;;  %v10729_v38 = vld [vmem:[%s17867_s5 + $0x200] sm:$0xff] }
0x17fb   : > { %13070 = vmatpush1.bf16.msra.mxu0 %v13069_v16  ;;  %13052 = vmatprep.subr.bf16.mxu1 %v13051_v7  ;;  %v10699_v16 = vld [vmem:[%s17862_s10 + $0x358] sm:$0xff]  ;;  %v16480_v7 = vld [vmem:[%s17864_s1 + $0x1] ss:$0 sm:$0xff]  ;;  %s17874_s1 = sld [smem:[#allocation50_spill]] }
0x17fc   : > { %13072 = vmatprep.subr.bf16.mxu0 %v13071_v59  ;;  %13054 = vmatpush1.bf16.msra.mxu1 %v13053_v45  ;;  %v13087_v51 = vpack.c.bf16 %v10703_v46, %v10699_v16  ;;  %v10700_v59 = vld [vmem:[%s17862_s10 + $0x360] sm:$0xff]  ;;  %v10746_v45 = vld [vmem:[%s17867_s5 + $0x288] sm:$0xff] }
0x17fd   : > { %v13057_v61 = vpack.c.bf16 %v10700_v59, %v10696_v58  ;;  %13056 = vmatprep.subr.bf16.mxu1 %v13055_v47  ;;  %v10761_v46 = vld [vmem:[%s17867_s5 + $0x300] sm:$0xff]  ;;  %v10762_v47 = vld [vmem:[%s17867_s5 + $0x308] sm:$0xff]  ;;  %v10747_v58 = vld [vmem:[%s17867_s5 + $0x290] sm:$0xff] }
0x17fe   : > { %v10748_v59 = vld [vmem:[%s17867_s5 + $0x298] sm:$0xff] }
0x17ff   : > { %13074 = vmatpush1.bf16.msra.mxu0 %v13073_v1  ;;  %v13059_v1 = vpack.c.bf16 %v10709_v15, %v10705_v55  ;;  %v10732_v55 = vld [vmem:[%s17867_s5 + $0x218] sm:$0xff]  ;;  %v13135_v15 = vpack.c.bf16 %v10780_v10, %v10779_v60 }
0x1800   : > { %13076 = vmatprep.subr.bf16.mxu0 %v13075_v8  ;;  %13058 = vmatpush1.bf16.msra.mxu1 %v13057_v61  ;;  %v13061_v8 = vpack.c.bf16 %v10708_v4, %v10704_v12  ;;  %v13103_v61 = vpack.c.bf16 %v10748_v59, %v10747_v58  ;;  %v10749_v4 = vld [vmem:[%s17867_s5 + $0x2a0] sm:$0xff]  ;;  %v10788_v58 = vld [vmem:[%s17867_s5 + $0x3d8] sm:$0xff]  ;;  %v10739_v59 = vld [vmem:[%s17867_s5 + $0x250] sm:$0xff] }
0x1801   : > { %13060 = vmatprep.subr.bf16.mxu1 %v13059_v1  ;;  %v10763_v1 = vld [vmem:[%s17867_s5 + $0x310] sm:$0xff]  ;;  %v10740_v60 = vld [vmem:[%s17867_s5 + $0x258] sm:$0xff] }
0x1802   : > { %v13137_v12 = vpack.c.bf16 %v10764_v52, %v10763_v1  ;;  %v13121_v10 = vpack.c.bf16 %v10740_v60, %v10739_v59  ;;  %v10758_v1 = vld [vmem:[%s17867_s5 + $0x2e8] sm:$0xff]  ;;  %v10789_v52 = vld [vmem:[%s17867_s5 + $0x3e0] sm:$0xff] }
0x1803   : > { %13078 = vmatpush1.bf16.msra.mxu0 %v13077_v14  ;;  %v10717_v14 = vld [vmem:[%s17862_s10 + $0x3e8] sm:$0xff] }
0x1804   : > { %13080 = vmatprep.subr.bf16.mxu0 %v13079_v49  ;;  %13062 = vmatpush1.bf16.msra.mxu1 %v13061_v8  ;;  %v10781_v8 = vld [vmem:[%s17867_s5 + $0x3a0] sm:$0xff] }
0x1807   : > { %13082 = vmatpush1.bf16.msra.mxu0 %v13081_v56 }
0x1808   : > { %13084 = vmatprep.subr.bf16.mxu0 %v13083_v17  ;;  %v10745_v17 = vld [vmem:[%s17867_s5 + $0x280] sm:$0xff] }
0x1809   : > { %v13099_v40 = vpack.c.bf16 %v10746_v45, %v10745_v17  ;;  %v10786_v17 = vld [vmem:[%s17867_s5 + $0x3c8] sm:$0xff]  ;;  %v10737_v45 = vld [vmem:[%s17867_s5 + $0x240] sm:$0xff] }
0x180b   : > { %13086 = vmatpush1.bf16.msra.mxu0 %v13085_v2  ;;  %v10730_v2 = vld [vmem:[%s17867_s5 + $0x208] sm:$0xff] }
0x180c   : > { %13088 = vmatprep.subr.bf16.mxu0 %v13087_v51  ;;  %v13101_v16 = vpack.c.bf16 %v10730_v2, %v10729_v38  ;;  %v13133_v51 = vpack.c.bf16 %v10762_v47, %v10761_v46  ;;  %v10769_v38 = vld [vmem:[%s17867_s5 + $0x340] sm:$0xff]  ;;  %v10770_v2 = vld [vmem:[%s17867_s5 + $0x348] sm:$0xff]  ;;  %v10756_v46 = vld [vmem:[%s17867_s5 + $0x2d8] sm:$0xff] }
0x180d   : > { %v10787_v47 = vld [vmem:[%s17867_s5 + $0x3d0] sm:$0xff] }
0x180f   : > { %13090 = vmatpush1.bf16.msra.mxu0 %v13089_v63  ;;  %v10731_v63 = vld [vmem:[%s17867_s5 + $0x210] sm:$0xff] }
0x1810   : > { %13092 = vmatprep.subr.bf16.mxu0 %v13091_v6  ;;  %v13105_v57 = vpack.c.bf16 %v10732_v55, %v10731_v63  ;;  %v10750_v6 = vld [vmem:[%s17867_s5 + $0x2a8] sm:$0xff]  ;;  %v10771_v63 = vld [vmem:[%s17867_s5 + $0x350] sm:$0xff]  ;;  %v10772_v55 = vld [vmem:[%s17867_s5 + $0x358] sm:$0xff] }
0x1811   : > { %v13107_v9 = vpack.c.bf16 %v10750_v6, %v10749_v4  ;;  %v10790_v4 = vld [vmem:[%s17867_s5 + $0x3e8] sm:$0xff]  ;;  %v10741_v6 = vld [vmem:[%s17867_s5 + $0x260] sm:$0xff] }
0x1813   : > { %13094 = vmatpush1.bf16.msra.mxu0 %v13093_v13  ;;  %v10734_v13 = vld [vmem:[%s17867_s5 + $0x228] sm:$0xff] }
0x1887   : > { %v4660_v20 = vpop.xlane.xlu1 %4659 }
0x1888   : > { %v4663_v26 = vmul.f32 0.0078125, %v4660_v20  ;;  %v10715_v20 = vld [vmem:[%s17862_s10 + $0x3d8] sm:$0xff] }
0x188a   : > { %v16426_v34 = vsub.f32 %v16398_v32, %v4663_v26  ;;  %v10719_v26 = vld [vmem:[%s17862_s10 + $0x3f8] sm:$0xff] }
0x188b   : > { %v13095_v21 = vpack.c.bf16 %v10719_v26, %v10715_v20  ;;  %v10765_v26 = vld [vmem:[%s17867_s5 + $0x320] sm:$0xff] }
0x188c   : > { %v4667_v29 = vmul.f32 %v16426_v34, %v16426_v34 }
0x188d   : > { %13096 = vmatprep.subr.bf16.mxu0 %v13095_v21 }
0x188e   : > { %4669 = vadd.xlane.f32.xlu0 %v4667_v29  ;;  %v13063_v29 = vpack.c.bf16 %v10717_v14, %v10713_v36  ;;  %13098 = vmatpush1.bf16.msra.mxu0 %v13097_v24  ;;  %v10733_v36 = vld [vmem:[%s17867_s5 + $0x220] sm:$0xff]  ;;  %v13139_v14 = vpack.c.bf16 %v10782_v11, %v10781_v8  ;;  %v10735_v24 = vld [vmem:[%s17867_s5 + $0x230] sm:$0xff]  ;;  %v10742_v8 = vld [vmem:[%s17867_s5 + $0x268] sm:$0xff] }
0x188f   : > { %v13109_v20 = vpack.c.bf16 %v10734_v13, %v10733_v36  ;;  %v13125_v11 = vpack.c.bf16 %v10742_v8, %v10741_v6  ;;  %v10773_v36 = vld [vmem:[%s17867_s5 + $0x360] sm:$0xff]  ;;  %v10774_v13 = vld [vmem:[%s17867_s5 + $0x368] sm:$0xff] }
0x1890   : > { %13064 = vmatprep.subr.bf16.mxu1 %v13063_v29  ;;  %v10766_v29 = vld [vmem:[%s17867_s5 + $0x328] sm:$0xff] }
0x1891   : > { %13066 = vmatpush1.bf16.msra.mxu1 %v13065_v23  ;;  %v13141_v21 = vpack.c.bf16 %v10766_v29, %v10765_v26  ;;  %v13111_v23 = vpack.c.bf16 %v10752_v25, %v10751_v54  ;;  %v10760_v26 = vld [vmem:[%s17867_s5 + $0x2f8] sm:$0xff]  ;;  %v10791_v29 = vld [vmem:[%s17867_s5 + $0x3f0] sm:$0xff] }
0x1892   : > { %4661 = vadd.xlane.f32.xlu0 %v16431_v28  ;;  %13100 = vmatprep.subr.bf16.mxu1 %v13099_v40  ;;  %v10792_v54 = vld [vmem:[%s17867_s5 + $0x3f8] sm:$0xff]  ;;  %v10743_v25 = vld [vmem:[%s17867_s5 + $0x270] sm:$0xff] }
0x191b   : > { %v4670_v49 = vpop.xlane.xlu0 %4669 }
0x191c   : > { %v4673_v39 = vmul.f32 0.0078125, %v4670_v49  ;;  %v10736_v49 = vld [vmem:[%s17867_s5 + $0x238] sm:$0xff] }
0x191e   : > { %v4675_v18 = vadd.f32 1e-05, %v4673_v39  ;;  %v13143_v39 = vpack.c.bf16 %v10784_v19, %v10783_v22  ;;  %v10744_v22 = vld [vmem:[%s17867_s5 + $0x278] sm:$0xff] }
0x191f   : > { %v4662_v5 = vpop.xlane.xlu0 %4661  ;;  %v13129_v19 = vpack.c.bf16 %v10744_v22, %v10743_v25 }
0x1920   : > { %14318 = vrsqrt.f32 %v4675_v18  ;;  %v4664_v56 = vmul.f32 0.0078125, %v4662_v5  ;;  %v13113_v18 = vpack.c.bf16 %v10736_v49, %v10735_v24  ;;  %v10767_v5 = vld [vmem:[%s17867_s5 + $0x330] sm:$0xff]  ;;  %v10776_v49 = vld [vmem:[%s17867_s5 + $0x378] sm:$0xff] }
0x1921   : > { %v10775_v24 = vld [vmem:[%s17867_s5 + $0x370] sm:$0xff] }
0x1922   : > { %v16475_v27 = vsub.f32 %v16431_v28, %v4664_v56  ;;  %v10768_v56 = vld [vmem:[%s17867_s5 + $0x338] sm:$0xff] }
0x1924   : > { %v4668_v30 = vmul.f32 %v16475_v27, %v16475_v27 }
0x1926   : > { %4671 = vadd.xlane.f32.xlu1 %v4668_v30  ;;  %v13145_v30 = vpack.c.bf16 %v10768_v56, %v10767_v5 }
0x192a   : > { %v14319_v33 = vpop.eup %14318 }
0x192b   : > { %v4679_v37 = vmul.f32 %v14319_v33, %v16426_v34  ;;  %v10777_v34 = vld [vmem:[%s17867_s5 + $0x380] sm:$0xff] }
0x192c   : > { %v13131_v42 = vpack.c.bf16 %v10778_v35, %v10777_v34  ;;  %v10753_v33 = vld [vmem:[%s17867_s5 + $0x2c0] sm:$0xff]  ;;  %v10738_v34 = vld [vmem:[%s17867_s5 + $0x248] sm:$0xff] }
0x192d   : > { %v4687_v44 = vmul.f32 %v16480_v7, %v4679_v37  ;;  %v10754_v37 = vld [vmem:[%s17867_s5 + $0x2c8] sm:$0xff]  ;;  %v13117_v35 = vpack.c.bf16 %v10738_v34, %v10737_v45 }
0x192e   : > { %13132 = vmatprep.subr.bf16.mxu0 %v13131_v42  ;;  %v13149_v42 = vpack.c.bf16 %v10770_v2, %v10769_v38 }
0x192f   : > { %v4695_v28 = vadd.f32 %v16484_v43, %v4687_v44  ;;  %v10785_v44 = vld [vmem:[%s17867_s5 + $0x3c0] sm:$0xff] }
0x1930   : > { %v13147_v40 = vpack.c.bf16 %v10786_v17, %v10785_v44 }
0x1931   : > { %4850 = vmatmul.mubr.f32.vlgmr.msra.gmra.mrb[38].mxu1 %v4695_v28  ;;  %4927 = vmatmul.mubr.f32.vlgmr.msra.gmra.mrb[30].mxu0 %v4695_v28  ;;  %v13115_v28 = vpack.c.bf16 %v10754_v37, %v10753_v33 }
0x1932   : > { %4855 = vmatprep.mubr.f32.mxu1 %v15270_v41  ;;  %4932 = vmatprep.mubr.f32.mxu0 %v15270_v41 }
0x1933   : > { %13102 = vmatpush3.bf16.msra.mxu1 %v13101_v16  ;;  %13134 = vmatpush3.bf16.msra.mxu0 %v13133_v51  ;;  %v10755_v16 = vld [vmem:[%s17867_s5 + $0x2d0] sm:$0xff] }
0x1934   : > { %13104 = vmatprep.subr.bf16.mxu1 %v13103_v61  ;;  %13136 = vmatprep.subr.bf16.mxu0 %v13135_v15  ;;  %v13119_v51 = vpack.c.bf16 %v10756_v46, %v10755_v16  ;;  %v13151_v61 = vpack.c.bf16 %v10788_v58, %v10787_v47  ;;  %v13153_v15 = vpack.c.bf16 %v10772_v55, %v10771_v63 }
0x1937   : > { %13106 = vmatpush3.bf16.msra.mxu1 %v13105_v57  ;;  %13138 = vmatpush3.bf16.msra.mxu0 %v13137_v12  ;;  %v10757_v57 = vld [vmem:[%s17867_s5 + $0x2e0] sm:$0xff] }
0x1938   : > { %13108 = vmatprep.subr.bf16.mxu1 %v13107_v9  ;;  %13140 = vmatprep.subr.bf16.mxu0 %v13139_v14  ;;  %v13123_v12 = vpack.c.bf16 %v10758_v1, %v10757_v57  ;;  %v13155_v9 = vpack.c.bf16 %v10790_v4, %v10789_v52  ;;  %v13157_v14 = vpack.c.bf16 %v10774_v13, %v10773_v36 }
0x193b   : > { %13110 = vmatpush3.bf16.msra.mxu1 %v13109_v20  ;;  %13142 = vmatpush3.bf16.msra.mxu0 %v13141_v21  ;;  %v10759_v20 = vld [vmem:[%s17867_s5 + $0x2f0] sm:$0xff]  ;;  %s17877_s5 = sld [smem:[#allocation70_spill]] }
0x193c   : > { %13112 = vmatprep.subr.bf16.mxu1 %v13111_v23  ;;  %13144 = vmatprep.subr.bf16.mxu0 %v13143_v39  ;;  %v13127_v21 = vpack.c.bf16 %v10760_v26, %v10759_v20  ;;  %v13159_v23 = vpack.c.bf16 %v10792_v54, %v10791_v29  ;;  %v13161_v39 = vpack.c.bf16 %v10776_v49, %v10775_v24 }
0x193f   : > { %13114 = vmatpush3.bf16.msra.mxu1 %v13113_v18  ;;  %13146 = vmatpush3.bf16.msra.mxu0 %v13145_v30 }
0x1940   : > { %13116 = vmatprep.subr.bf16.mxu1 %v13115_v28  ;;  %13148 = vmatprep.subr.bf16.mxu0 %v13147_v40  ;;  %v10720_v28 = vld [vmem:[%s17869_s8 + $0x4] sm:$0xf] }
0x1941   : > { %v4768_v17 = vrot.slane %v10720_v28, %v15927_v50  ;;  %v4776_v45 = vrot.slane %v10720_v28, %v15968_v3  ;;  %v4772_v34 = vrot.slane %v10720_v28, %v15932_v53  ;;  %v4780_v40 = vrot.slane %v10720_v28, %v16223_v31 }
0x1943   : > { %13118 = vmatpush3.bf16.msra.mxu1 %v13117_v35  ;;  %13150 = vmatpush3.bf16.msra.mxu0 %v13149_v42 }
0x1944   : > { %13120 = vmatprep.subr.bf16.mxu1 %v13119_v51  ;;  %13152 = vmatprep.subr.bf16.mxu0 %v13151_v61 }
0x1947   : > { %13122 = vmatpush3.bf16.msra.mxu1 %v13121_v10  ;;  %13154 = vmatpush3.bf16.msra.mxu0 %v13153_v15 }
0x1948   : > { %13124 = vmatprep.subr.bf16.mxu1 %v13123_v12  ;;  %13156 = vmatprep.subr.bf16.mxu0 %v13155_v9 }
0x194b   : > { %13126 = vmatpush3.bf16.msra.mxu1 %v13125_v11  ;;  %13158 = vmatpush3.bf16.msra.mxu0 %v13157_v14 }
0x194c   : > { %13128 = vmatprep.subr.bf16.mxu1 %v13127_v21  ;;  %13160 = vmatprep.subr.bf16.mxu0 %v13159_v23 }
0x194f   : > { %13130 = vmatpush3.bf16.msra.mxu1 %v13129_v19  ;;  %13162 = vmatpush3.bf16.msra.mxu0 %v13161_v39 }
0x1950   : > { %13163 = vmatprep.subr.bf16.mxu1 %v15269_v0  ;;  %13187 = vmatprep.subr.bf16.mxu0 %v15269_v0 }
0x19b3   : > { %v4672_v18 = vpop.xlane.xlu1 %4671 }
0x19b4   : > { %v4674_v5 = vmul.f32 0.0078125, %v4672_v18 }
0x19b6   : > { %v4676_v56 = vadd.f32 1e-05, %v4674_v5 }
0x19b8   : > { %14320 = vrsqrt.f32 %v4676_v56 }
0x19c2   : > { %v14321_v30 = vpop.eup %14320 }
0x19c3   : > { %v4680_v33 = vmul.f32 %v14321_v30, %v16475_v27 }
0x19c5   : > { %v4688_v37 = vmul.f32 %v16480_v7, %v4680_v33 }
0x19c7   : > { %v4696_v44 = vadd.f32 %v16484_v43, %v4688_v37 }
0x19c9   : > { %4856 = vmatmul.mubr.f32.gmra.mrb[40].mxu1 %v4696_v44  ;;  %4933 = vmatmul.mubr.f32.gmra.mrb[32].mxu0 %v4696_v44 }
0x1a04   : > { %v4851_v35 = vpop.f32.mrb[38].mxu1  ;;  %v4928_v38 = vpop.f32.mrb[30].mxu0 }
0x1a05   : > { %v4852_v2 = vadd.f32 %v4851_v35, %v4768_v17  ;;  %v4929_v42 = vadd.f32 %v4928_v38, %v4776_v45  ;;  %v4853_v27 = vpop.f32.mrb[39].mxu1  ;;  %v4930_v16 = vpop.f32.mrb[31].mxu0 }
0x1a06   : > { %v4854_v7 = vadd.f32 %v4853_v27, %v4772_v34  ;;  %v4931_v46 = vadd.f32 %v4930_v16, %v4780_v40 }
0x1a07   : > { %v10721_v43 = vmul.f32 -1.702, %v4852_v2  ;;  %v10723_v47 = vmul.f32 -1.702, %v4929_v42 }
0x1a08   : > { %v10722_v51 = vmul.f32 -1.702, %v4854_v7  ;;  %v10724_v58 = vmul.f32 -1.702, %v4931_v46 }
0x1a09   : > { %v4955_v59 = vmul.f32 1.442695, %v10721_v43  ;;  %v4959_v60 = vmul.f32 1.442695, %v10723_v47 }
0x1a0a   : > { %v4957_v61 = vmul.f32 1.442695, %v10722_v51  ;;  %v4961_v10 = vmul.f32 1.442695, %v10724_v58  ;;  %v10794_v58 = vld [vmem:[%s17871_s9 + $0x1] ss:$0 sm:$0xff] }
0x1a0b   : > { %14322 = vpow2.f32 %v4955_v59 }
0x1a0c   : > { %14324 = vpow2.f32 %v4959_v60 }
0x1a0d   : > { %14326 = vpow2.f32 %v4957_v61 }
0x1a0e   : > { %14328 = vpow2.f32 %v4961_v10 }
0x1a15   : > { %v14323_v63 = vpop.eup %14322 }
0x1a16   : > { %v14325_v55 = vpop.eup %14324  ;;  %v4971_v15 = vadd.f32 1.0, %v14323_v63 }
0x1a17   : > { %v14327_v57 = vpop.eup %14326  ;;  %v4973_v1 = vadd.f32 1.0, %v14325_v55 }
0x1a18   : > { %v14329_v52 = vpop.eup %14328  ;;  %14330 = vrcp.f32 %v4971_v15  ;;  %v4972_v12 = vadd.f32 1.0, %v14327_v57 }
0x1a19   : > { %14332 = vrcp.f32 %v4973_v1  ;;  %v4974_v4 = vadd.f32 1.0, %v14329_v52  ;;  %v5331_v1 = vld [vmem:[#allocation24] sm:$0xff]  ;;  %v5332_v52 = vld [vmem:[#allocation24 + $0x8] sm:$0xff] }
0x1a1a   : > { %14334 = vrcp.f32 %v4972_v12  ;;  %v5243_v12 = vld [vmem:[#allocation23] sm:$0xff] }
0x1a1b   : > { %14336 = vrcp.f32 %v4974_v4  ;;  %v16567_v4 = vpack.c.bf16 %v5332_v52, %v5331_v1  ;;  %v5330_v1 = vld [vmem:[%s15484_s13] sm:$0xff] }
0x1a22   : > { %v14331_v6 = vpop.eup %14330 }
0x1a23   : > { %v14333_v8 = vpop.eup %14332  ;;  %v4995_v13 = vmul.f32 %v14331_v6, %v4852_v2  ;;  %v5244_v6 = vld [vmem:[#allocation23 + $0x8] sm:$0xff] }
0x1a24   : > { %v14335_v9 = vpop.eup %14334  ;;  %v4997_v20 = vmul.f32 %v14333_v8, %v4929_v42  ;;  %v5333_v8 = vld [vmem:[#allocation24 + $0x10] sm:$0xff] }
0x1a25   : > { %v14337_v11 = vpop.eup %14336  ;;  %v4996_v36 = vmul.f32 %v14335_v9, %v4854_v7  ;;  %v5334_v9 = vld [vmem:[#allocation24 + $0x18] sm:$0xff] }
0x1a26   : > { %v4998_v14 = vmul.f32 %v14337_v11, %v4931_v46  ;;  %v13164_v11 = vpack.c.bf16 %v5244_v6, %v5243_v12 }
0x1a27   : > { %5140 = vmatprep.mubr.f32.mxu1 %v4996_v36  ;;  %v5245_v36 = vld [vmem:[#allocation23 + $0x10] sm:$0xff] }
0x1a28   : > { %5214 = vmatprep.mubr.f32.mxu0 %v4998_v14  ;;  %5141 = vmatmul.mubr.f32.vlgmr.msra.gmra.mrb[42].mxu1 %v4995_v13  ;;  %v5246_v13 = vld [vmem:[#allocation23 + $0x18] sm:$0xff]  ;;  %v16570_v14 = vpack.c.bf16 %v5334_v9, %v5333_v8  ;;  %v5225_v9 = vld [vmem:[%s17874_s1] sm:$0x1] }
0x1a29   : > { %5215 = vmatmul.mubr.f32.vlgmr.msra.gmra.mrb[34].mxu0 %v4997_v20  ;;  %13165 = vmatpush3.bf16.msra.mxu1 %v13164_v11  ;;  %v5335_v20 = vld [vmem:[#allocation24 + $0x20] sm:$0xff] }
0x1a2a   : > { %13189 = vmatpush3.bf16.msra.mxu0 %v16567_v4  ;;  %13166 = vmatprep.subr.bf16.mxu1 %v15269_v0 }
0x1a2b   : > { %13190 = vmatprep.subr.bf16.mxu0 %v15269_v0 }
0x1a2e   : > { %13192 = vmatpush3.bf16.msra.mxu0 %v16570_v14 }
0x1a2f   : > { %13193 = vmatprep.subr.bf16.mxu0 %v15269_v0 }
0x1a9c   : > { %v4857_v26 = vpop.f32.mrb[40].mxu1  ;;  %v4934_v29 = vpop.f32.mrb[32].mxu0 }
0x1a9d   : > { %v4858_v21 = vadd.f32 %v4857_v26, %v4768_v17  ;;  %v4935_v54 = vadd.f32 %v4934_v29, %v4776_v45  ;;  %v4859_v25 = vpop.f32.mrb[41].mxu1  ;;  %v4936_v22 = vpop.f32.mrb[33].mxu0  ;;  %v5336_v26 = vld [vmem:[#allocation24 + $0x28] sm:$0xff]  ;;  %v5247_v29 = vld [vmem:[#allocation23 + $0x20] sm:$0xff] }
0x1a9e   : > { %v4860_v23 = vadd.f32 %v4859_v25, %v4772_v34  ;;  %v4937_v19 = vadd.f32 %v4936_v22, %v4780_v40  ;;  %v5337_v22 = vld [vmem:[#allocation24 + $0x30] sm:$0xff] }
0x1a9f   : > { %v10725_v24 = vmul.f32 -1.702, %v4858_v21  ;;  %v10727_v49 = vmul.f32 -1.702, %v4935_v54 }
0x1aa0   : > { %v10726_v39 = vmul.f32 -1.702, %v4860_v23  ;;  %v10728_v18 = vmul.f32 -1.702, %v4937_v19 }
0x1aa1   : > { %v4963_v5 = vmul.f32 1.442695, %v10725_v24  ;;  %v4967_v56 = vmul.f32 1.442695, %v10727_v49 }
0x1aa2   : > { %v4965_v30 = vmul.f32 1.442695, %v10726_v39  ;;  %v4969_v33 = vmul.f32 1.442695, %v10728_v18 }
0x1aa3   : > { %14338 = vpow2.f32 %v4963_v5 }
0x1aa4   : > { %14340 = vpow2.f32 %v4967_v56 }
0x1aa5   : > { %14342 = vpow2.f32 %v4965_v30 }
0x1aa6   : > { %14344 = vpow2.f32 %v4969_v33 }
0x1aad   : > { %v14339_v37 = vpop.eup %14338 }
0x1aae   : > { %v14341_v44 = vpop.eup %14340  ;;  %v4975_v28 = vadd.f32 1.0, %v14339_v37 }
0x1aaf   : > { %v14343_v17 = vpop.eup %14342  ;;  %v4977_v45 = vadd.f32 1.0, %v14341_v44  ;;  %v5249_v44 = vld [vmem:[#allocation23 + $0x30] sm:$0xff] }
0x1ab0   : > { %v14345_v35 = vpop.eup %14344  ;;  %14346 = vrcp.f32 %v4975_v28  ;;  %v4976_v34 = vadd.f32 1.0, %v14343_v17  ;;  %v5250_v28 = vld [vmem:[#allocation23 + $0x38] sm:$0xff]  ;;  %v5339_v17 = vld [vmem:[#allocation24 + $0x40] sm:$0xff] }
0x1ab1   : > { %14348 = vrcp.f32 %v4977_v45  ;;  %v4978_v40 = vadd.f32 1.0, %v14345_v35  ;;  %v13173_v45 = vpack.c.bf16 %v5250_v28, %v5249_v44  ;;  %v5340_v35 = vld [vmem:[#allocation24 + $0x48] sm:$0xff]  ;;  %v5585_v28 = vld [vmem:[#allocation26] sm:$0xff] }
0x1ab2   : > { %14350 = vrcp.f32 %v4976_v34  ;;  %v13200_v34 = vpack.c.bf16 %v5340_v35, %v5339_v17  ;;  %v5586_v17 = vld [vmem:[#allocation26 + $0x8] sm:$0xff] }
0x1ab3   : > { %14352 = vrcp.f32 %v4978_v40  ;;  %v5251_v40 = vld [vmem:[#allocation23 + $0x40] sm:$0xff]  ;;  %v16642_v35 = vpack.c.bf16 %v5586_v17, %v5585_v28 }
0x1aba   : > { %v14347_v38 = vpop.eup %14346 }
0x1abb   : > { %v14349_v2 = vpop.eup %14348  ;;  %v4999_v7 = vmul.f32 %v14347_v38, %v4858_v21  ;;  %v5248_v21 = vld [vmem:[#allocation23 + $0x28] sm:$0xff] }
0x1abc   : > { %v14351_v42 = vpop.eup %14350  ;;  %v5001_v43 = vmul.f32 %v14349_v2, %v4935_v54  ;;  %v16575_v54 = vpack.c.bf16 %v5336_v26, %v5335_v20  ;;  %v13170_v25 = vpack.c.bf16 %v5248_v21, %v5247_v29  ;;  %v5252_v38 = vld [vmem:[#allocation23 + $0x48] sm:$0xff]  ;;  %v5341_v2 = vld [vmem:[#allocation24 + $0x50] sm:$0xff] }
0x1abd   : > { %v14353_v27 = vpop.eup %14352  ;;  %v5000_v16 = vmul.f32 %v14351_v42, %v4860_v23  ;;  %v5338_v23 = vld [vmem:[#allocation24 + $0x38] sm:$0xff]  ;;  %v13176_v42 = vpack.c.bf16 %v5252_v38, %v5251_v40  ;;  %v5259_v21 = vld [vmem:[%s17877_s5] sm:$0x1]  ;;  %s17878_s5 = sld [smem:[#allocation73_spill]] }
0x1abe   : > { %v5002_v46 = vmul.f32 %v14353_v27, %v4937_v19  ;;  %13195 = vmatpush3.bf16.msra.mxu0 %v16575_v54  ;;  %v16580_v19 = vpack.c.bf16 %v5338_v23, %v5337_v22  ;;  %v5342_v27 = vld [vmem:[#allocation24 + $0x58] sm:$0xff]  ;;  %v16636_v23 = vand.u32 127, %v1795_v48  ;;  %v5691_v48 = vld [vmem:[#allocation29] sm:$0xff]  ;;  %v5587_v40 = vld [vmem:[#allocation26 + $0x10] sm:$0xff] }
0x1abf   : > { %5145 = vmatprep.mubr.f32.mxu1 %v5000_v16  ;;  %13196 = vmatprep.subr.bf16.mxu0 %v15269_v0  ;;  %v13203_v16 = vpack.c.bf16 %v5342_v27, %v5341_v2  ;;  %v5588_v38 = vld [vmem:[#allocation26 + $0x18] sm:$0xff]  ;;  %v5590_v27 = vld [vmem:[#allocation26 + $0x28] sm:$0xff] }
0x1ac0   : > { %5219 = vmatprep.mubr.f32.mxu0 %v5002_v46  ;;  %5146 = vmatmul.mubr.f32.gmra.mrb[44].mxu1 %v4999_v7  ;;  %v5253_v7 = vld [vmem:[#allocation23 + $0x50] sm:$0xff]  ;;  %v5254_v46 = vld [vmem:[#allocation23 + $0x58] sm:$0xff]  ;;  %vm5497_vm7 = vcmp.lt.s32.totalorder %v16636_v23, 3  ;;  %v16646_v2 = vpack.c.bf16 %v5588_v38, %v5587_v40  ;;  %vm5833_vm10 = vcmp.lt.s32.totalorder %v16636_v23, 5  ;;  %vm6069_vm11 = vcmp.ge.s32.totalorder %v16636_v23, 19 }
0x1ac1   : > { %5220 = vmatmul.mubr.f32.gmra.mrb[36].mxu0 %v5001_v43  ;;  %v5343_v43 = vld [vmem:[#allocation24 + $0x60] sm:$0xff]  ;;  %11997 = vmatprep.mubr.msk.f32.mxu1 %vm15274_vm6, %v15270_v41 }
0x1ac2   : > { %13198 = vmatpush3.bf16.msra.mxu0 %v16580_v19  ;;  %12032 = vmatprep.mubr.msk.f32.mxu0 %vm15274_vm6, %v15270_v41 }
0x1ac3   : > { %13199 = vmatprep.subr.bf16.mxu0 %v15269_v0  ;;  %v5672_v28 = vld [vmem:[%s17878_s5] sm:$0x1]  ;;  %s17880_s5 = sld [smem:[#allocation47_spill]] }
0x1ac6   : > { %13201 = vmatpush3.bf16.msra.mxu0 %v13200_v34 }
0x1ac7   : > { %13202 = vmatprep.subr.bf16.mxu0 %v15269_v0 }
0x1aca   : > { %13204 = vmatpush3.bf16.msra.mxu0 %v13203_v16 }
0x1acb   : > { %13205 = vmatprep.subr.bf16.mxu0 %v15269_v0 }
0x1afb   : > { %v11223_v47 = vpop.f32.mrb[42].mxu1 }
0x1afc   : > { %v11261_v51 = vpop.f32.mrb[34].mxu0  ;;  %v11224_v59 = vpop.f32.mrb[43].mxu1 }
0x1afd   : > { %v11225_v60 = vadd.f32 %v11224_v59, %v11223_v47  ;;  %v11262_v61 = vpop.f32.mrb[35].mxu0  ;;  %v13179_v47 = vpack.c.bf16 %v5254_v46, %v5253_v7  ;;  %v5255_v59 = vld [vmem:[#allocation23 + $0x60] sm:$0xff]  ;;  %v5591_v7 = vld [vmem:[#allocation26 + $0x30] sm:$0xff]  ;;  %v5592_v46 = vld [vmem:[#allocation26 + $0x38] sm:$0xff] }
0x1afe   : > { %v11263_v10 = vadd.f32 %v11262_v61, %v11261_v51  ;;  %v5344_v51 = vld [vmem:[#allocation24 + $0x68] sm:$0xff]  ;;  %v5345_v61 = vld [vmem:[#allocation24 + $0x70] sm:$0xff] }
0x1aff   : > { %v5143_v63 = vadd.f32 %v11225_v60, %v10794_v58  ;;  %v13206_v58 = vpack.c.bf16 %v5344_v51, %v5343_v43  ;;  %v5256_v60 = vld [vmem:[#allocation23 + $0x68] sm:$0xff]  ;;  %v16656_v43 = vpack.c.bf16 %v5592_v46, %v5591_v7 }
0x1b00   : > { %v5594_v51 = vld [vmem:[#allocation26 + $0x48] sm:$0xff] }
0x1b01   : > { %v5217_v55 = vadd.f32 %v11263_v10, %v5143_v63  ;;  %13207 = vmatpush3.bf16.msra.mxu0 %v13206_v58  ;;  %v13182_v10 = vpack.c.bf16 %v5256_v60, %v5255_v59  ;;  %v5346_v63 = vld [vmem:[#allocation24 + $0x78] sm:$0xff]  ;;  %v5595_v59 = vld [vmem:[#allocation26 + $0x50] sm:$0xff] }
0x1b02   : > { %13208 = vmatprep.subr.bf16.mxu0 %v15269_v0  ;;  %v5596_v60 = vld [vmem:[#allocation26 + $0x58] sm:$0xff] }
0x1b03   : > { %v5224_v15 = vadd.f32 %v5217_v55, %v16398_v32  ;;  %v13167_v32 = vpack.c.bf16 %v5246_v13, %v5245_v36  ;;  %v13209_v55 = vpack.c.bf16 %v5346_v63, %v5345_v61  ;;  %v5226_v36 = vld [vmem:[%s17875_s2] sm:$0x1]  ;;  %v16664_v61 = vpack.c.bf16 %v5596_v60, %v5595_v59  ;;  %v5598_v63 = vld [vmem:[#allocation26 + $0x68] sm:$0xff] }
0x1b05   : > { %v5228_v57 = vsel %vm5227_vm5, %v5224_v15, 0.0  ;;  %13168 = vmatpush3.bf16.msra.mxu1 %v13167_v32  ;;  %13210 = vmatpush3.bf16.msra.mxu0 %v13209_v55  ;;  %v16624_v32 = vld [vmem:[%s17876_s3] ss:$0 sm:$0xff]  ;;  %s17879_s3 = sld [smem:[#allocation74_spill]] }
0x1b06   : > { %5229 = vadd.xlane.f32.xlu0 %v5228_v57  ;;  %13169 = vmatprep.subr.bf16.mxu1 %v15269_v0  ;;  %v5258_v57 = vld [vmem:[#allocation23 + $0x78] sm:$0xff] }
0x1b07   : > { %13235 = vmatprep.subr.bf16.mxu0 %v15269_v0 }
0x1b08   : > { %12033 = vmatmul.mubr.f32.vlgmr.msra.gmra.mrb[38].mxu0 %v5330_v1 }
0x1b09   : > { %13171 = vmatpush3.bf16.msra.mxu1 %v13170_v25  ;;  %13237 = vmatpush3.bf16.msra.mxu0 %v16567_v4 }
0x1b0a   : > { %13172 = vmatprep.subr.bf16.mxu1 %v15269_v0  ;;  %13238 = vmatprep.subr.bf16.mxu0 %v15269_v0 }
0x1b0b   : > { %12112 = vmatprep.mubr.msk.f32.mxu0 %vm15274_vm6, %v15270_v41 }
0x1b0d   : > { %13174 = vmatpush3.bf16.msra.mxu1 %v13173_v45  ;;  %13240 = vmatpush3.bf16.msra.mxu0 %v16570_v14 }
0x1b0e   : > { %13175 = vmatprep.subr.bf16.mxu1 %v15269_v0  ;;  %13241 = vmatprep.subr.bf16.mxu0 %v15269_v0 }
0x1b11   : > { %13177 = vmatpush3.bf16.msra.mxu1 %v13176_v42  ;;  %13243 = vmatpush3.bf16.msra.mxu0 %v16575_v54  ;;  %v5589_v42 = vld [vmem:[#allocation26 + $0x20] sm:$0xff] }
0x1b12   : > { %13178 = vmatprep.subr.bf16.mxu1 %v15269_v0  ;;  %13244 = vmatprep.subr.bf16.mxu0 %v15269_v0 }
0x1b15   : > { %13180 = vmatpush3.bf16.msra.mxu1 %v13179_v47  ;;  %13246 = vmatpush3.bf16.msra.mxu0 %v16580_v19  ;;  %v5593_v47 = vld [vmem:[#allocation26 + $0x40] sm:$0xff] }
0x1b16   : > { %13181 = vmatprep.subr.bf16.mxu1 %v15269_v0  ;;  %13247 = vmatprep.subr.bf16.mxu0 %v15269_v0 }
0x1b19   : > { %13183 = vmatpush3.bf16.msra.mxu1 %v13182_v10  ;;  %13249 = vmatpush3.bf16.msra.mxu0 %v13200_v34  ;;  %v5597_v10 = vld [vmem:[#allocation26 + $0x60] sm:$0xff] }
0x1b1a   : > { %13184 = vmatprep.subr.bf16.mxu1 %v15269_v0  ;;  %13250 = vmatprep.subr.bf16.mxu0 %v15269_v0 }
0x1b1d   : > { %13252 = vmatpush3.bf16.msra.mxu0 %v13203_v16  ;;  %v16652_v16 = vpack.c.bf16 %v5590_v27, %v5589_v42 }
0x1b1e   : > { %13253 = vmatprep.subr.bf16.mxu0 %v15269_v0 }
0x1b21   : > { %13255 = vmatpush3.bf16.msra.mxu0 %v13206_v58  ;;  %v16660_v58 = vpack.c.bf16 %v5594_v51, %v5593_v47 }
0x1b22   : > { %13256 = vmatprep.subr.bf16.mxu0 %v15269_v0 }
0x1b25   : > { %13258 = vmatpush3.bf16.msra.mxu0 %v13209_v55  ;;  %v16668_v55 = vpack.c.bf16 %v5598_v63, %v5597_v10  ;;  %v6014_v10 = vld [vmem:[#allocation2 + $0x8] sm:$0xff]  ;;  %v6006_v63 = vld [vmem:[%s17880_s5] sm:$0x1]  ;;  %s17882_s5 = sld [smem:[#allocation67_spill]] }
0x1b26   : > { %6007 = vst [vmem:[#allocation2] sm:$0x1] %v6006_v63  ;;  %v6126_v63 = vld [vmem:[#allocation11 + $0x10] sm:$0xff] }
0x1b28   : > { %12113 = vmatmul.mubr.f32.vlgmr.msra.gmra.mrb[40].mxu0 %v5691_v48 }
0x1b29   : > { %6253 = vmatprep.mubr.f32.mxu0 %v15270_v41 }
0x1b93   : > { %v5230_v24 = vpop.xlane.xlu0 %5229  ;;  %v11226_v49 = vpop.f32.mrb[44].mxu1 }
0x1b94   : > { %v11264_v39 = vpop.f32.mrb[36].mxu0  ;;  %v5231_v18 = vmul.f32 0.0078125, %v5230_v24  ;;  %v11227_v5 = vpop.f32.mrb[45].mxu1 }
0x1b95   : > { %v11265_v56 = vpop.f32.mrb[37].mxu0 }
0x1b96   : > { %v16586_v30 = vsub.f32 %v5224_v15, %v5231_v18  ;;  %v5257_v15 = vld [vmem:[#allocation23 + $0x70] sm:$0xff] }
0x1b97   : > { %v13185_v52 = vpack.c.bf16 %v5258_v57, %v5257_v15  ;;  %v5599_v15 = vld [vmem:[#allocation26 + $0x70] sm:$0xff]  ;;  %v5600_v57 = vld [vmem:[#allocation26 + $0x78] sm:$0xff] }
0x1b98   : > { %v5233_v33 = vmul.f32 %v16586_v30, %v16586_v30  ;;  %v16672_v1 = vpack.c.bf16 %v5600_v57, %v5599_v15 }
0x1b99   : > { %13186 = vmatpush3.bf16.msra.mxu1 %v13185_v52 }
0x1b9a   : > { %v5234_v37 = vsel %vm5227_vm5, %v5233_v33, 0.0  ;;  %12035 = vmatprep.subr.mxu1 %v15270_v41 }
0x1b9b   : > { %5235 = vadd.xlane.f32.xlu1 %v5234_v37 }
0x1bdb   : > { %v5420_v20 = vpop.f32.mrb[38].mxu0 }
0x1bdc   : > { %v5421_v26 = vadd.f32 %v16624_v32, %v5420_v20  ;;  %v12034_v29 = vpop.f32.mrb[39].mxu0 }
0x1bfb   : > { %v5758_v52 = vpop.f32.mrb[40].mxu0 }
0x1c28   : > { %v5236_v12 = vpop.xlane.xlu1 %5235 }
0x1c29   : > { %v5237_v4 = vmul.f32 0.0078125, %v5236_v12  ;;  %v12114_v12 = vpop.f32.mrb[41].mxu0 }
0x1c2b   : > { %v5238_v6 = vadd.f32 1e-05, %v5237_v4  ;;  %v5759_v4 = vadd.f32 %v16624_v32, %v5758_v52 }
0x1c2d   : > { %14354 = vrsqrt.f32 %v5238_v6 }
0x1c37   : > { %v14355_v8 = vpop.eup %14354 }
0x1c38   : > { %v5240_v11 = vmul.f32 %v14355_v8, %v16586_v30 }
0x1c3a   : > { %v5241_v13 = vmul.f32 %v5240_v11, %v5225_v9 }
0x1c3c   : > { %v5242_v14 = vadd.f32 %v5241_v13, %v5226_v36  ;;  %v5601_v13 = vld [vmem:[#allocation27] sm:$0x1] }
0x1c3e   : > { %11998 = vmatmul.mubr.f32.vlgmr.msra.gmra.mrb[46].mxu1 %v5242_v14 }
0x1c3f   : > { %12037 = vmatprep.mubr.msk.f32.mxu1 %vm15274_vm6, %v15270_v41  ;;  %12036 = vmatpush3.xpose.msra.mxu1 %v5421_v26 }
0x1c40   : > { %12040 = vmatprep.subr.mxu1 %v15270_v41 }
0x1d11   : > { %v5326_v54 = vpop.f32.mrb[46].mxu1 }
0x1d12   : > { %v16629_v25 = vadd.f32 %v5326_v54, %v5259_v21  ;;  %v11999_v22 = vpop.f32.mrb[47].mxu1 }
0x1d14   : > { %12038 = vmatmul.mubr.f32.vlgmr.msra.gmra.mrb[48].mxu1 %v16629_v25 }
0x1d15   : > { %12041 = vmatpush3.msra.mxu1 %v5421_v26  ;;  %12042 = vmatprep.mubr.msk.f32.mxu1 %vm15274_vm6, %v15270_v41 }
0x1d16   : > { %13211 = vmatprep.subr.bf16.mxu1 %v15269_v0 }
0x1de7   : > { %v5490_v19 = vpop.f32.mrb[48].mxu1 }
0x1de8   : > { %v5494_v24 = vmul.f32 0.5, %v5490_v19  ;;  %v12039_v49 = vpop.f32.mrb[49].mxu1 }
0x1dea   : > { %v5498_v39 = vsel %vm5497_vm7, %v5494_v24, -1e+30 }
0x1deb   : > { %v5500_v18 = vsel %vm5499_vm8, %v5498_v39, -inf }
0x1dec   : > { %5501 = vmax.xlane.f32.xlu0 %v5500_v18 }
0x1e79   : > { %v5502_v5 = vpop.xlane.xlu0 %5501 }
0x1e7a   : > { %v5503_v56 = vsub.f32 %v5498_v39, %v5502_v5 }
0x1e7c   : > { %v5504_v30 = vmul.f32 1.442695, %v5503_v56 }
0x1e7e   : > { %14356 = vpow2.f32 %v5504_v30 }
0x1e88   : > { %v14357_v33 = vpop.eup %14356 }
0x1e89   : > { %v5506_v37 = vsel %vm5499_vm8, %v14357_v33, 0.0 }
0x1e8a   : > { %5507 = vadd.xlane.f32.xlu1 %v5506_v37 }
0x1f17   : > { %v5508_v44 = vpop.xlane.xlu1 %5507 }
0x1f18   : > { %14358 = vrcp.f32 %v5508_v44 }
0x1f22   : > { %v14359_v45 = vpop.eup %14358 }
0x1f23   : > { %v5510_v34 = vmul.f32 %v14359_v45, %v14357_v33 }
0x1f25   : > { %12043 = vmatmul.mubr.msk.f32.vlgmr.msra.gmra.mrb[50].mxu1 %vm5511_vm9, %v5510_v34  ;;  %v5673_v34 = vld [vmem:[%s17879_s3] sm:$0x1]  ;;  %s17881_s3 = sld [smem:[#allocation66_spill]] }
0x1f26   : > { %13213 = vmatpush3.bf16.msra.mxu1 %v16642_v35  ;;  %12077 = vmatprep.mubr.msk.f32.mxu1 %vm15274_vm6, %v15270_v41 }
0x1f27   : > { %13214 = vmatprep.subr.bf16.mxu1 %v15269_v0 }
0x1f2a   : > { %13216 = vmatpush3.bf16.msra.mxu1 %v16646_v2 }
0x1f2b   : > { %13217 = vmatprep.subr.bf16.mxu1 %v15269_v0 }
0x1f2e   : > { %13219 = vmatpush3.bf16.msra.mxu1 %v16652_v16 }
0x1f2f   : > { %13220 = vmatprep.subr.bf16.mxu1 %v15269_v0 }
0x1f32   : > { %13222 = vmatpush3.bf16.msra.mxu1 %v16656_v43 }
0x1f33   : > { %13223 = vmatprep.subr.bf16.mxu1 %v15269_v0 }
0x1f36   : > { %13225 = vmatpush3.bf16.msra.mxu1 %v16660_v58 }
0x1f37   : > { %13226 = vmatprep.subr.bf16.mxu1 %v15269_v0 }
0x1f3a   : > { %13228 = vmatpush3.bf16.msra.mxu1 %v16664_v61 }
0x1f3b   : > { %13229 = vmatprep.subr.bf16.mxu1 %v15269_v0 }
0x1f3e   : > { %13231 = vmatpush3.bf16.msra.mxu1 %v16668_v55 }
0x1f3f   : > { %13232 = vmatprep.subr.bf16.mxu1 %v15269_v0 }
0x1f42   : > { %13234 = vmatpush3.bf16.msra.mxu1 %v16672_v1 }
0x1f43   : > { %12115 = vmatprep.subr.mxu1 %v15270_v41 }
0x1ff8   : > { %v5581_v6 = vpop.f32.mrb[50].mxu1 }
0x1ff9   : > { %v12044_v8 = vpop.f32.mrb[51].mxu1  ;;  %12078 = vmatmul.mubr.f32.vlgmr.msra.gmra.mrb[52].mxu1 %v5581_v6 }
0x1ffa   : > { %12116 = vmatpush3.xpose.msra.mxu1 %v5759_v4  ;;  %12117 = vmatprep.mubr.msk.f32.mxu1 %vm15274_vm6, %v15270_v41 }
0x1ffb   : > { %12120 = vmatprep.subr.mxu1 %v15270_v41 }
0x1ffd   : > { %12118 = vmatmul.mubr.f32.vlgmr.msra.gmra.mrb[54].mxu1 %v16629_v25 }
0x1ffe   : > { %12121 = vmatpush3.msra.mxu1 %v5759_v4  ;;  %12122 = vmatprep.mubr.msk.f32.mxu1 %vm15274_vm6, %v15270_v41 }
0x1fff   : > { %13259 = vmatprep.subr.bf16.mxu1 %v15269_v0 }
0x20cc   : > { %v5668_v9 = vpop.f32.mrb[52].mxu1 }
0x20cd   : > { %v12079_v11 = vpop.f32.mrb[53].mxu1  ;;  %v5669_v26 = vadd.f32 %v5668_v9, %v5601_v13 }
0x20cf   : > { %v5674_v21 = vsel %vm5227_vm5, %v5669_v26, 0.0 }
0x20d0   : > { %v5828_v36 = vpop.f32.mrb[54].mxu1 }
0x20d1   : > { %v5832_v14 = vmul.f32 0.5, %v5828_v36  ;;  %v12119_v32 = vpop.f32.mrb[55].mxu1 }
0x20d3   : > { %v5834_v20 = vsel %vm5833_vm10, %v5832_v14, -1e+30  ;;  %v6015_v14 = vld [vmem:[#allocation2 + $0x10] sm:$0xff] }
0x20d4   : > { %v5835_v29 = vsel %vm5499_vm8, %v5834_v20, -inf }
0x20d5   : > { %5836 = vmax.xlane.f32.xlu0 %v5835_v29 }
0x20d9   : > { %5675 = vadd.xlane.f32.xlu0 %v5674_v21 }
0x2162   : > { %v5837_v54 = vpop.xlane.xlu0 %5836 }
0x2163   : > { %v5838_v25 = vsub.f32 %v5834_v20, %v5837_v54 }
0x2165   : > { %v5839_v22 = vmul.f32 1.442695, %v5838_v25 }
0x2166   : > { %v5676_v19 = vpop.xlane.xlu0 %5675 }
0x2167   : > { %14360 = vpow2.f32 %v5839_v22  ;;  %v5677_v24 = vmul.f32 0.0078125, %v5676_v19 }
0x2169   : > { %v5678_v49 = vsub.f32 %v5669_v26, %v5677_v24 }
0x216b   : > { %v5679_v39 = vmul.f32 %v5678_v49, %v5678_v49 }
0x216d   : > { %v5680_v18 = vsel %vm5227_vm5, %v5679_v39, 0.0 }
0x216e   : > { %5681 = vadd.xlane.f32.xlu0 %v5680_v18 }
0x2171   : > { %v14361_v5 = vpop.eup %14360 }
0x2172   : > { %v5841_v56 = vsel %vm5499_vm8, %v14361_v5, 0.0 }
0x2173   : > { %5842 = vadd.xlane.f32.xlu1 %v5841_v56 }
0x21fb   : > { %v5682_v30 = vpop.xlane.xlu0 %5681 }
0x21fc   : > { %v5683_v33 = vmul.f32 0.0078125, %v5682_v30  ;;  %v10799_v30 = vld [vmem:[%s17849_s4] ss:$0 sm:$0xff]  ;;  %s10975_s4 = sshll.u32 %s15522_s28, 4  ;;  %s15102_s28 = scalar_lea.vmem %s15101_s7, 32 }
0x21fe   : > { %v5684_v37 = vadd.f32 1e-05, %v5683_v33 }
0x2200   : > { %14362 = vrsqrt.f32 %v5684_v37  ;;  %v5843_v48 = vpop.xlane.xlu1 %5842 }
0x2201   : > { %14364 = vrcp.f32 %v5843_v48 }
0x220a   : > { %v14363_v44 = vpop.eup %14362 }
0x220b   : > { %v14365_v17 = vpop.eup %14364  ;;  %v5686_v45 = vmul.f32 %v14363_v44, %v5678_v49 }
0x220c   : > { %v5845_v40 = vmul.f32 %v14365_v17, %v14361_v5  ;;  %v10798_v5 = vld [vmem:[%s17847_s15] ss:$0 sm:$0xff] }
0x220d   : > { %v5687_v38 = vmul.f32 %v5686_v45, %v5672_v28 }
0x220e   : > { %12123 = vmatmul.mubr.msk.f32.vlgmr.msra.gmra.mrb[56].mxu1 %vm5511_vm9, %v5845_v40 }
0x220f   : > { %v5688_v42 = vadd.f32 %v5687_v38, %v5673_v34  ;;  %13261 = vmatpush3.bf16.msra.mxu1 %v16642_v35  ;;  %12157 = vmatprep.mubr.msk.f32.mxu1 %vm15274_vm6, %v15270_v41 }
0x2210   : > { %13262 = vmatprep.subr.bf16.mxu1 %v15269_v0 }
0x2211   : > { %v5689_v27 = vadd.f32 %v5688_v42, %v5581_v6 }
0x2213   : > { %v5690_v7 = vmul.f32 0.25, %v5689_v27  ;;  %13264 = vmatpush3.bf16.msra.mxu1 %v16646_v2 }
0x2214   : > { %13265 = vmatprep.subr.bf16.mxu1 %v15269_v0 }
0x2215   : > { %6008 = vst [vmem:[#allocation2 + $0x1] sm:$0x1] %v5690_v7 }
0x2217   : > { %13267 = vmatpush3.bf16.msra.mxu1 %v16652_v16 }
0x2218   : > { %13268 = vmatprep.subr.bf16.mxu1 %v15269_v0 }
0x221b   : > { %13270 = vmatpush3.bf16.msra.mxu1 %v16656_v43 }
0x221c   : > { %13271 = vmatprep.subr.bf16.mxu1 %v15269_v0 }
0x221f   : > { %13273 = vmatpush3.bf16.msra.mxu1 %v16660_v58 }
0x2220   : > { %13274 = vmatprep.subr.bf16.mxu1 %v15269_v0 }
0x2223   : > { %13276 = vmatpush3.bf16.msra.mxu1 %v16664_v61 }
0x2224   : > { %13277 = vmatprep.subr.bf16.mxu1 %v15269_v0 }
0x2227   : > { %13279 = vmatpush3.bf16.msra.mxu1 %v16668_v55 }
0x2228   : > { %13280 = vmatprep.subr.bf16.mxu1 %v15269_v0 }
0x222b   : > { %13282 = vmatpush3.bf16.msra.mxu1 %v16672_v1 }
0x222c   : > { %13315 = vmatprep.subr.bf16.mxu1 %v15269_v0 }
0x22e1   : > { %v5915_v35 = vpop.f32.mrb[56].mxu1 }
0x22e2   : > { %v12124_v2 = vpop.f32.mrb[57].mxu1  ;;  %12158 = vmatmul.mubr.f32.vlgmr.msra.gmra.mrb[58].mxu1 %v5915_v35 }
0x22e3   : > { %12192 = vmatprep.mubr.msk.f32.mxu1 %vm15274_vm6, %v15270_v41 }
0x23b5   : > { %v5985_v16 = vpop.f32.mrb[58].mxu1 }
0x23b6   : > { %v5986_v46 = vadd.f32 %v5985_v16, %v5601_v13  ;;  %v12159_v43 = vpop.f32.mrb[59].mxu1 }
0x23b8   : > { %v5989_v47 = vsel %vm5227_vm5, %v5986_v46, 0.0 }
0x23b9   : > { %5990 = vadd.xlane.f32.xlu1 %v5989_v47 }
0x2446   : > { %v5991_v51 = vpop.xlane.xlu1 %5990 }
0x2447   : > { %v5992_v58 = vmul.f32 0.0078125, %v5991_v51 }
0x2449   : > { %v5993_v59 = vsub.f32 %v5986_v46, %v5992_v58  ;;  %v6125_v58 = vld [vmem:[#allocation11 + $0x8] sm:$0xff] }
0x244b   : > { %v5994_v60 = vmul.f32 %v5993_v59, %v5993_v59 }
0x244d   : > { %v5995_v61 = vsel %vm5227_vm5, %v5994_v60, 0.0  ;;  %v6124_v60 = vld [vmem:[#allocation11] sm:$0xff] }
0x244e   : > { %5996 = vadd.xlane.f32.xlu1 %v5995_v61 }
0x2452   : > { %6020 = vadd.xlane.f32.xlu1 %v6014_v10 }
0x24db   : > { %v5997_v55 = vpop.xlane.xlu1 %5996 }
0x24dc   : > { %v5998_v15 = vmul.f32 0.0078125, %v5997_v55  ;;  %v6129_v55 = vld [vmem:[#allocation11 + $0x28] sm:$0xff] }
0x24de   : > { %v5999_v57 = vadd.f32 1e-05, %v5998_v15 }
0x24df   : > { %v6021_v9 = vpop.xlane.xlu1 %6020 }
0x24e0   : > { %14366 = vrsqrt.f32 %v5999_v57  ;;  %v6025_v11 = vmul.f32 0.0078125, %v6021_v9  ;;  %v13316_v57 = vpack.c.bf16 %v6129_v55, %v6126_v63  ;;  %v6135_v9 = vld [vmem:[#allocation11 + $0x58] sm:$0xff]  ;;  %v6157_v63 = vld [vmem:[#allocation11 + $0x108] sm:$0xff]  ;;  %v6156_v55 = vld [vmem:[#allocation11 + $0x100] sm:$0xff] }
0x24e2   : > { %v6028_v13 = vsub.f32 %v6014_v10, %v6025_v11  ;;  %v6127_v10 = vld [vmem:[#allocation11 + $0x18] sm:$0xff]  ;;  %13317 = vmatpush3.bf16.msra.mxu1 %v13316_v57 }
0x24e3   : > { %v13285_v15 = vpack.c.bf16 %v6127_v10, %v6124_v60  ;;  %13318 = vmatprep.subr.bf16.mxu1 %v15269_v0  ;;  %v6158_v60 = vld [vmem:[#allocation11 + $0x110] sm:$0xff]  ;;  %v6159_v57 = vld [vmem:[#allocation11 + $0x118] sm:$0xff] }
0x24e4   : > { %v6031_v32 = vmul.f32 %v6028_v13, %v6028_v13  ;;  %v6154_v10 = vld [vmem:[#allocation11 + $0xf0] sm:$0xff] }
0x24ea   : > { %v14367_v1 = vpop.eup %14366 }
0x24eb   : > { %v6001_v52 = vmul.f32 %v14367_v1, %v5993_v59  ;;  %v6128_v59 = vld [vmem:[#allocation11 + $0x20] sm:$0xff]  ;;  %v6131_v1 = vld [vmem:[#allocation11 + $0x38] sm:$0xff] }
0x24ec   : > { %v13283_v61 = vpack.c.bf16 %v6128_v59, %v6125_v58  ;;  %v6155_v59 = vld [vmem:[#allocation11 + $0xf8] sm:$0xff] }
0x24ed   : > { %v6002_v12 = vmul.f32 %v6001_v52, %v5672_v28  ;;  %v6134_v52 = vld [vmem:[#allocation11 + $0x50] sm:$0xff] }
0x24ee   : > { %13284 = vmatprep.subr.bf16.mxu0 %v13283_v61  ;;  %v13303_v61 = vpack.c.bf16 %v6158_v60, %v6155_v59 }
0x24ef   : > { %v6003_v4 = vadd.f32 %v6002_v12, %v5673_v34  ;;  %v6130_v12 = vld [vmem:[#allocation11 + $0x30] sm:$0xff]  ;;  %13286 = vmatpush1.bf16.msra.mxu0 %v13285_v15  ;;  %v13305_v15 = vpack.c.bf16 %v6157_v63, %v6154_v10 }
0x24f1   : > { %v6004_v6 = vadd.f32 %v6003_v4, %v5915_v35  ;;  %v13287_v4 = vpack.c.bf16 %v6134_v52, %v6131_v1  ;;  %v6161_v1 = vld [vmem:[#allocation11 + $0x128] sm:$0xff]  ;;  %v6164_v52 = vld [vmem:[#allocation11 + $0x140] sm:$0xff] }
0x24f3   : > { %v6005_v8 = vmul.f32 0.25, %v6004_v6  ;;  %v6133_v6 = vld [vmem:[#allocation11 + $0x48] sm:$0xff]  ;;  %13288 = vmatprep.subr.bf16.mxu0 %v13287_v4  ;;  %v13307_v4 = vpack.c.bf16 %v6164_v52, %v6161_v1 }
0x24f4   : > { %v13289_v11 = vpack.c.bf16 %v6133_v6, %v6130_v12  ;;  %v13331_v12 = vpack.c.bf16 %v6159_v57, %v6156_v55  ;;  %v6160_v6 = vld [vmem:[#allocation11 + $0x120] sm:$0xff] }
0x24f5   : > { %6009 = vst [vmem:[#allocation2 + $0x2] sm:$0x1] %v6005_v8  ;;  %v6132_v8 = vld [vmem:[#allocation11 + $0x40] sm:$0xff] }
0x24f6   : > { %13290 = vmatpush1.bf16.msra.mxu0 %v13289_v11 }
0x24fc   : > { %v6013_v36 = vld [vmem:[#allocation2] sm:$0xff] }
0x24fd   : > { %6018 = vadd.xlane.f32.xlu0 %v6013_v36 }
0x2501   : > { %6022 = vadd.xlane.f32.xlu0 %v6015_v14 }
0x2505   : > { %6035 = vadd.xlane.f32.xlu0 %v6031_v32  ;;  %v6136_v32 = vld [vmem:[#allocation11 + $0x60] sm:$0xff] }
0x258a   : > { %v6019_v20 = vpop.xlane.xlu0 %6018 }
0x258b   : > { %v6024_v26 = vmul.f32 0.0078125, %v6019_v20 }
0x258d   : > { %v6027_v29 = vsub.f32 %v6013_v36, %v6024_v26  ;;  %v13319_v36 = vpack.c.bf16 %v6135_v9, %v6132_v8  ;;  %v6139_v26 = vld [vmem:[#allocation11 + $0x78] sm:$0xff]  ;;  %v6162_v9 = vld [vmem:[#allocation11 + $0x130] sm:$0xff] }
0x258e   : > { %v6023_v21 = vpop.xlane.xlu0 %6022  ;;  %v6163_v8 = vld [vmem:[#allocation11 + $0x138] sm:$0xff] }
0x258f   : > { %v6026_v54 = vmul.f32 0.0078125, %v6023_v21  ;;  %v6030_v25 = vmul.f32 %v6027_v29, %v6027_v29  ;;  %v6141_v21 = vld [vmem:[#allocation11 + $0x88] sm:$0xff]  ;;  %13320 = vmatpush3.bf16.msra.mxu1 %v13319_v36  ;;  %v13309_v11 = vpack.c.bf16 %v6163_v8, %v6160_v6 }
0x2590   : > { %13321 = vmatprep.subr.bf16.mxu1 %v15269_v0  ;;  %v6165_v36 = vld [vmem:[#allocation11 + $0x148] sm:$0xff] }
0x2591   : > { %v6029_v22 = vsub.f32 %v6015_v14, %v6026_v54  ;;  %6033 = vadd.xlane.f32.xlu1 %v6030_v25  ;;  %v6140_v14 = vld [vmem:[#allocation11 + $0x80] sm:$0xff]  ;;  %v13293_v54 = vpack.c.bf16 %v6139_v26, %v6136_v32  ;;  %v13334_v32 = vpack.c.bf16 %v6165_v36, %v6162_v9  ;;  %v6166_v26 = vld [vmem:[#allocation11 + $0x150] sm:$0xff] }
0x2592   : > { %v6036_v19 = vpop.xlane.xlu0 %6035 }
0x2593   : > { %v6040_v24 = vmul.f32 0.0078125, %v6036_v19  ;;  %v6032_v49 = vmul.f32 %v6029_v22, %v6029_v22 }
0x2595   : > { %v6043_v39 = vadd.f32 1e-05, %v6040_v24  ;;  %6037 = vadd.xlane.f32.xlu1 %v6032_v49 }
0x2597   : > { %14368 = vrsqrt.f32 %v6043_v39 }
0x25a1   : > { %v14369_v18 = vpop.eup %14368 }
0x25a2   : > { %v6049_v56 = vmul.f32 %v14369_v18, %v6028_v13  ;;  %v6137_v13 = vld [vmem:[#allocation11 + $0x68] sm:$0xff] }
0x25a3   : > { %v13291_v20 = vpack.c.bf16 %v6140_v14, %v6137_v13  ;;  %v6167_v13 = vld [vmem:[#allocation11 + $0x158] sm:$0xff]  ;;  %v6170_v14 = vld [vmem:[#allocation11 + $0x170] sm:$0xff] }
0x25a4   : > { %v6058_v33 = vmul.f32 %v10798_v5, %v6049_v56 }
0x25a5   : > { %13292 = vmatprep.subr.bf16.mxu0 %v13291_v20  ;;  %v13311_v20 = vpack.c.bf16 %v6170_v14, %v6167_v13 }
0x25a6   : > { %v16718_v37 = vadd.f32 %v10799_v30, %v6058_v33  ;;  %13294 = vmatpush1.bf16.msra.mxu0 %v13293_v54  ;;  %v6146_v33 = vld [vmem:[#allocation11 + $0xb0] sm:$0xff]  ;;  %v6171_v54 = vld [vmem:[#allocation11 + $0x178] sm:$0xff] }
0x25a8   : > { %6075 = vadd.xlane.f32.xlu1 %v16718_v37 }
0x261e   : > { %v6034_v48 = vpop.xlane.xlu1 %6033 }
0x261f   : > { %v6039_v44 = vmul.f32 0.0078125, %v6034_v48 }
0x2621   : > { %v6042_v28 = vadd.f32 1e-05, %v6039_v44  ;;  %v6142_v44 = vld [vmem:[#allocation11 + $0x90] sm:$0xff] }
0x2622   : > { %v6038_v17 = vpop.xlane.xlu1 %6037 }
0x2623   : > { %14370 = vrsqrt.f32 %v6042_v28  ;;  %v6041_v45 = vmul.f32 0.0078125, %v6038_v17  ;;  %v6145_v28 = vld [vmem:[#allocation11 + $0xa8] sm:$0xff]  ;;  %v6144_v17 = vld [vmem:[#allocation11 + $0xa0] sm:$0xff] }
0x2625   : > { %v6044_v34 = vadd.f32 1e-05, %v6041_v45  ;;  %v13297_v45 = vpack.c.bf16 %v6145_v28, %v6142_v44 }
0x2627   : > { %14372 = vrsqrt.f32 %v6044_v34  ;;  %v6147_v34 = vld [vmem:[#allocation11 + $0xb8] sm:$0xff] }
0x262d   : > { %v14371_v40 = vpop.eup %14370 }
0x262e   : > { %v6048_v38 = vmul.f32 %v14371_v40, %v6027_v29  ;;  %v6138_v29 = vld [vmem:[#allocation11 + $0x70] sm:$0xff]  ;;  %v13325_v40 = vpack.c.bf16 %v6147_v34, %v6144_v17 }
0x262f   : > { %v13322_v25 = vpack.c.bf16 %v6141_v21, %v6138_v29  ;;  %v6169_v29 = vld [vmem:[#allocation11 + $0x168] sm:$0xff]  ;;  %v6168_v21 = vld [vmem:[#allocation11 + $0x160] sm:$0xff] }
0x2630   : > { %v6057_v42 = vmul.f32 %v10798_v5, %v6048_v38  ;;  %v6149_v38 = vld [vmem:[#allocation11 + $0xc8] sm:$0xff] }
0x2631   : > { %v14373_v27 = vpop.eup %14372  ;;  %13323 = vmatpush3.bf16.msra.mxu1 %v13322_v25  ;;  %v13313_v25 = vpack.c.bf16 %v6169_v29, %v6166_v26 }
0x2632   : > { %v16721_v7 = vadd.f32 %v10799_v30, %v6057_v42  ;;  %v6050_v35 = vmul.f32 %v14373_v27, %v6029_v22  ;;  %13324 = vmatprep.subr.bf16.mxu1 %v15269_v0  ;;  %v6152_v42 = vld [vmem:[#allocation11 + $0xe0] sm:$0xff] }
0x2633   : > { %v13299_v27 = vpack.c.bf16 %v6152_v42, %v6149_v38 }
0x2634   : > { %6073 = vadd.xlane.f32.xlu0 %v16721_v7  ;;  %v6059_v2 = vmul.f32 %v10798_v5, %v6050_v35  ;;  %v6148_v35 = vld [vmem:[#allocation11 + $0xc0] sm:$0xff] }
0x2635   : > { %v6076_v16 = vpop.xlane.xlu1 %6075  ;;  %13326 = vmatpush3.bf16.msra.mxu1 %v13325_v40  ;;  %v10800_v40 = vld [vmem:[#allocation8] ss:$0 sm:$0xff] }
0x2636   : > { %v6080_v46 = vmul.f32 0.0078125, %v6076_v16  ;;  %v16724_v43 = vadd.f32 %v10799_v30, %v6059_v2  ;;  %v6143_v30 = vld [vmem:[#allocation11 + $0x98] sm:$0xff]  ;;  %v6150_v16 = vld [vmem:[#allocation11 + $0xd0] sm:$0xff]  ;;  %13327 = vmatprep.subr.bf16.mxu1 %v15269_v0 }
0x2637   : > { %v13295_v48 = vpack.c.bf16 %v6146_v33, %v6143_v30  ;;  %v6151_v2 = vld [vmem:[#allocation11 + $0xd8] sm:$0xff] }
0x2638   : > { %6077 = vadd.xlane.f32.xlu0 %v16724_v43  ;;  %v16728_v47 = vsub.f32 %v16718_v37, %v6080_v46  ;;  %v13301_v46 = vpack.c.bf16 %v6151_v2, %v6148_v35 }
0x2639   : > { %13296 = vmatprep.subr.bf16.mxu0 %v13295_v48 }
0x263a   : > { %v6086_v51 = vmul.f32 %v16728_v47, %v16728_v47  ;;  %13298 = vmatpush1.bf16.msra.mxu0 %v13297_v45 }
0x263b   : > { %13300 = vmatprep.subr.bf16.mxu0 %v13299_v27  ;;  %v10801_v27 = vld [vmem:[#allocation9] ss:$0 sm:$0xff] }
0x263c   : > { %6090 = vadd.xlane.f32.xlu0 %v6086_v51  ;;  %v6153_v51 = vld [vmem:[#allocation11 + $0xe8] sm:$0xff] }
0x263d   : > { %v13328_v58 = vpack.c.bf16 %v6153_v51, %v6150_v16 }
0x263e   : > { %13302 = vmatpush1.bf16.msra.mxu0 %v13301_v46 }
0x263f   : > { %13329 = vmatpush3.bf16.msra.mxu1 %v13328_v58  ;;  %13304 = vmatprep.subr.bf16.mxu0 %v13303_v61 }
0x2640   : > { %13330 = vmatprep.subr.bf16.mxu1 %v15269_v0 }
0x2642   : > { %13306 = vmatpush1.bf16.msra.mxu0 %v13305_v15 }
0x2643   : > { %13332 = vmatpush3.bf16.msra.mxu1 %v13331_v12  ;;  %13308 = vmatprep.subr.bf16.mxu0 %v13307_v4 }
0x2644   : > { %13333 = vmatprep.subr.bf16.mxu1 %v15269_v0 }
0x2646   : > { %13310 = vmatpush1.bf16.msra.mxu0 %v13309_v11 }
0x2647   : > { %13335 = vmatpush3.bf16.msra.mxu1 %v13334_v32  ;;  %13312 = vmatprep.subr.bf16.mxu0 %v13311_v20 }
0x2648   : > { %13336 = vmatprep.subr.bf16.mxu1 %v15269_v0 }
0x264a   : > { %13314 = vmatpush1.bf16.msra.mxu0 %v13313_v25 }
0x264b   : > { %13339 = vmatprep.subr.bf16.mxu0 %v15269_v0 }
0x26c1   : > { %v6074_v22 = vpop.xlane.xlu0 %6073 }
0x26c2   : > { %v6079_v19 = vmul.f32 0.0078125, %v6074_v22  ;;  %v13337_v22 = vpack.c.bf16 %v6171_v54, %v6168_v21 }
0x26c4   : > { %v16736_v24 = vsub.f32 %v16721_v7, %v6079_v19  ;;  %13338 = vmatpush3.bf16.msra.mxu1 %v13337_v22 }
0x26c5   : > { %v6078_v49 = vpop.xlane.xlu0 %6077  ;;  %13346 = vmatprep.subr.bf16.mxu1 %v15269_v0 }
0x26c6   : > { %v6081_v39 = vmul.f32 0.0078125, %v6078_v49  ;;  %v6085_v18 = vmul.f32 %v16736_v24, %v16736_v24 }
0x26c8   : > { %v16741_v5 = vsub.f32 %v16724_v43, %v6081_v39  ;;  %6088 = vadd.xlane.f32.xlu1 %v6085_v18 }
0x26c9   : > { %v6091_v19 = vpop.xlane.xlu0 %6090 }
0x26ca   : > { %v6087_v56 = vmul.f32 %v16741_v5, %v16741_v5  ;;  %v6095_v49 = vmul.f32 0.0078125, %v6091_v19 }
0x26cc   : > { %6092 = vadd.xlane.f32.xlu1 %v6087_v56  ;;  %v6098_v39 = vadd.f32 1e-05, %v6095_v49 }
0x26ce   : > { %14374 = vrsqrt.f32 %v6098_v39 }
0x26d8   : > { %v14375_v28 = vpop.eup %14374 }
0x26d9   : > { %v6104_v34 = vmul.f32 %v14375_v28, %v16728_v47 }
0x26db   : > { %v6113_v2 = vmul.f32 %v10800_v40, %v6104_v34 }
0x26dd   : > { %v6122_v46 = vadd.f32 %v10801_v27, %v6113_v2 }
0x2755   : > { %v6089_v18 = vpop.xlane.xlu1 %6088 }
0x2756   : > { %v6094_v56 = vmul.f32 0.0078125, %v6089_v18 }
0x2758   : > { %v6097_v30 = vadd.f32 1e-05, %v6094_v56 }
0x2759   : > { %v6093_v33 = vpop.xlane.xlu1 %6092 }
0x275a   : > { %14376 = vrsqrt.f32 %v6097_v30  ;;  %v6096_v48 = vmul.f32 0.0078125, %v6093_v33 }
0x275c   : > { %v6099_v44 = vadd.f32 1e-05, %v6096_v48 }
0x275e   : > { %14378 = vrsqrt.f32 %v6099_v44 }
0x2764   : > { %v14377_v17 = vpop.eup %14376 }
0x2765   : > { %v6103_v45 = vmul.f32 %v14377_v17, %v16736_v24  ;;  %v6172_v24 = vld [vmem:[#allocation12] sm:$0x7] }
0x2766   : > { %v6185_v59 = vrot.slane %v6172_v24, %v15968_v3  ;;  %v6181_v10 = vrot.slane %v6172_v24, %v15932_v53  ;;  %v6177_v12 = vrot.slane %v6172_v24, %v15927_v50  ;;  %v16853_v24 = vsel %vm6069_vm11, -1e+30, %v15270_v41 }
0x2767   : > { %v6112_v38 = vmul.f32 %v10800_v40, %v6103_v45 }
0x2768   : > { %v14379_v42 = vpop.eup %14378 }
0x2769   : > { %v6121_v35 = vadd.f32 %v10801_v27, %v6112_v38  ;;  %v6105_v16 = vmul.f32 %v14379_v42, %v16741_v5 }
0x276b   : > { %6254 = vmatmul.mubr.f32.vlgmr.msra.gmra.mrb[42].mxu0 %v6121_v35  ;;  %12193 = vmatmul.mubr.f32.vlgmr.msra.gmra.mrb[60].mxu1 %v6121_v35  ;;  %v6114_v51 = vmul.f32 %v10800_v40, %v6105_v16 }
0x276c   : > { %6259 = vmatprep.mubr.f32.mxu0 %v15270_v41  ;;  %12195 = vmatprep.mubr.msk.f32.mxu1 %vm15274_vm6, %v15270_v41 }
0x276d   : > { %v6123_v47 = vadd.f32 %v10801_v27, %v6114_v51 }
0x276f   : > { %6260 = vmatmul.mubr.f32.gmra.mrb[44].mxu0 %v6122_v46  ;;  %12196 = vmatmul.mubr.f32.gmra.mrb[62].mxu1 %v6122_v46 }
0x2770   : > { %6265 = vmatprep.mubr.f32.mxu0 %v15270_v41  ;;  %12198 = vmatprep.mubr.msk.f32.mxu1 %vm15274_vm6, %v15270_v41 }
0x2773   : > { %6266 = vmatmul.mubr.f32.gmra.mrb[46].mxu0 %v6123_v47  ;;  %12199 = vmatmul.mubr.f32.gmra.mrb[64].mxu1 %v6123_v47 }
0x2774   : > { %12207 = vmatprep.mubr.msk.f32.mxu0 %vm15274_vm6, %v15270_v41  ;;  %12237 = vmatprep.mubr.msk.f32.mxu1 %vm15274_vm6, %v15270_v41 }
0x283e   : > { %v6255_v5 = vpop.f32.mrb[42].mxu0  ;;  %v6338_v58 = vpop.f32.mrb[60].mxu1 }
0x283f   : > { %v6257_v60 = vpop.f32.mrb[43].mxu0  ;;  %v12194_v61 = vpop.f32.mrb[61].mxu1  ;;  %v6339_v15 = vadd.f32 %v6338_v58, %v6185_v59  ;;  %v6256_v29 = vadd.f32 %v6255_v5, %v6177_v12 }
0x2840   : > { %v6258_v4 = vadd.f32 %v6257_v60, %v6181_v10 }
0x2842   : > { %v6261_v63 = vpop.f32.mrb[44].mxu0  ;;  %v6343_v55 = vpop.f32.mrb[62].mxu1 }
0x2843   : > { %v6344_v57 = vadd.f32 %v6343_v55, %v6185_v59  ;;  %v6263_v1 = vpop.f32.mrb[45].mxu0  ;;  %v12197_v52 = vpop.f32.mrb[63].mxu1  ;;  %v6262_v54 = vadd.f32 %v6261_v63, %v6177_v12 }
0x2844   : > { %v6264_v6 = vadd.f32 %v6263_v1, %v6181_v10 }
0x2845   : > { %v13344_v8 = vpack.c.bf16 %v6344_v57, %v6339_v15  ;;  %v16767_v9 = vpack.i.bf16 %v6344_v57, %v6339_v15 }
0x2846   : > { %v13340_v11 = vpack.c.bf16 %v6264_v6, %v6258_v4  ;;  %v6267_v36 = vpop.f32.mrb[46].mxu0  ;;  %v6348_v13 = vpop.f32.mrb[64].mxu1  ;;  %v14146_v14 = vpack.i.bf16 %v6264_v6, %v6258_v4 }
0x2847   : > { %v6269_v32 = vpop.f32.mrb[47].mxu0  ;;  %v12200_v20 = vpop.f32.mrb[65].mxu1  ;;  %v6268_v21 = vadd.f32 %v6267_v36, %v6177_v12  ;;  %v16785_v25 = vadd.f32 %v6348_v13, %v6185_v59 }
0x2848   : > { %v6270_v26 = vadd.f32 %v6269_v32, %v6181_v10  ;;  %14147 = vrot.lane.b32.xlu0 %v14146_v14, %s17858_s22  ;;  %13342 = vmatpush3.bf16.xpose.msk.msra.mxu0 %vm15943_vm2, %v13340_v11 }
0x2849   : > { %12205 = vmatprep.subr.mxu0 %v15270_v41 }
0x284a   : > { %6589 = vrot.lane.b32.xlu1 %v6270_v26, %s17858_s22 }
0x284c   : > { %6579 = vrot.lane.b32.xlu0 %v6256_v29, %s17858_s22 }
0x284e   : > { %14152 = vrot.lane.b32.xlu1 %v14146_v14, %s17872_s0 }
0x2850   : > { %12206 = vmatpush3.xpose.msk.msra.mxu0 %vm1962_vm1, %v6270_v26  ;;  %6583 = vrot.lane.b32.xlu0 %v6268_v21, %s17858_s22 }
0x2851   : > { %13343 = vmatprep.subr.bf16.mxu0 %v15269_v0 }
0x2852   : > { %6581 = vrot.lane.b32.xlu1 %v6262_v54, %s17858_s22 }
0x2853   : > { %12208 = vmatmul.mubr.msk.f32.vlgmr.msra.gmra.mrb[48].mxu0 %vm1962_vm1, %v6256_v29 }
0x2854   : > { %14157 = vrot.lane.b32.xlu0 %v14146_v14, %s17873_s26  ;;  %13345 = vmatpush3.bf16.msra.mxu0 %v13344_v8 }
0x2855   : > { %12210 = vmatprep.mubr.msk.f32.mxu0 %vm15274_vm6, %v15270_v41  ;;  %12220 = vmatprep.subr.mxu0 %v15270_v41 }
0x2856   : > { %6833 = vrot.lane.b32.xlu1 %v6270_v26, %s17872_s0 }
0x2857   : > { %12211 = vmatmul.mubr.msk.f32.gmra.mrb[50].mxu0 %vm1962_vm1, %v6262_v54 }
0x2858   : > { %6825 = vrot.lane.b32.xlu0 %v6262_v54, %s17872_s0  ;;  %12221 = vmatpush3.msra.mxu0 %v16785_v25 }
0x2859   : > { %12213 = vmatprep.mubr.msk.f32.mxu0 %vm15274_vm6, %v15270_v41  ;;  %13350 = vmatprep.subr.bf16.mxu0 %v15269_v0 }
0x285a   : > { %6823 = vrot.lane.b32.xlu1 %v6256_v29, %s17872_s0 }
0x285b   : > { %12214 = vmatmul.mubr.msk.f32.gmra.mrb[52].mxu0 %vm1962_vm1, %v6268_v21 }
0x285c   : > { %7074 = vrot.lane.b32.xlu0 %v6270_v26, %s17873_s26  ;;  %12222 = vmatprep.mubr.msk.f32.mxu0 %vm15274_vm6, %v15270_v41 }
0x285e   : > { %6827 = vrot.lane.b32.xlu1 %v6268_v21, %s17872_s0 }
0x2860   : > { %7066 = vrot.lane.b32.xlu0 %v6262_v54, %s17873_s26 }
0x2862   : > { %7064 = vrot.lane.b32.xlu1 %v6256_v29, %s17873_s26 }
0x2864   : > { %14162 = vrot.lane.b32.xlu0 %v16767_v9, %s17858_s22 }
0x2866   : > { %7068 = vrot.lane.b32.xlu1 %v6268_v21, %s17873_s26 }
0x286a   : > { %6714 = vrot.lane.b32.xlu1 %v16785_v25, %s17858_s22 }
0x286e   : > { %14167 = vrot.lane.b32.xlu1 %v16767_v9, %s17872_s0 }
0x28ba   : > { %v14148_v22 = vpop.permute.xlu0 %14147 }
0x28bb   : > { %v14150_v19 = vunpack.i.h.bf16 %v14148_v22  ;;  %v14149_v49 = vunpack.i.l.bf16 %v14148_v22 }
0x28bc   : > { %v6590_v39 = vpop.permute.xlu1 %6589 }
0x28bd   : > { %v13347_v18 = vpack.c.bf16 %v14150_v19, %v14149_v49 }
0x28be   : > { %v6580_v56 = vpop.permute.xlu0 %6579 }
0x28bf   : > { %13349 = vmatpush3.bf16.xpose.msk.msra.mxu1 %vm15943_vm2, %v13347_v18 }
0x28c0   : > { %12235 = vmatprep.subr.mxu1 %v15270_v41  ;;  %v14153_v30 = vpop.permute.xlu1 %14152 }
0x28c1   : > { %v14155_v33 = vunpack.i.h.bf16 %v14153_v30  ;;  %v14154_v48 = vunpack.i.l.bf16 %v14153_v30 }
0x28c2   : > { %v6584_v44 = vpop.permute.xlu0 %6583 }
0x28c3   : > { %v13354_v28 = vpack.c.bf16 %v14155_v33, %v14154_v48 }
0x28c4   : > { %v6582_v17 = vpop.permute.xlu1 %6581 }
0x28c6   : > { %v14158_v45 = vpop.permute.xlu0 %14157 }
0x28c7   : > { %12236 = vmatpush3.xpose.msk.msra.mxu1 %vm1962_vm1, %v6590_v39  ;;  %v14160_v40 = vunpack.i.h.bf16 %v14158_v45  ;;  %v14159_v38 = vunpack.i.l.bf16 %v14158_v45 }
0x28c8   : > { %13353 = vmatprep.subr.bf16.mxu1 %v15269_v0  ;;  %v6834_v34 = vpop.permute.xlu1 %6833 }
0x28c9   : > { %v13361_v42 = vpack.c.bf16 %v14160_v40, %v14159_v38 }
0x28ca   : > { %12238 = vmatmul.mubr.msk.f32.vlgmr.msra.gmra.mrb[66].mxu1 %vm1962_vm1, %v6580_v56  ;;  %v6826_v35 = vpop.permute.xlu0 %6825 }
0x28cb   : > { %13356 = vmatpush3.bf16.xpose.msk.msra.mxu1 %vm15943_vm2, %v13354_v28  ;;  %12240 = vmatprep.mubr.msk.f32.mxu1 %vm15274_vm6, %v15270_v41 }
0x28cc   : > { %12265 = vmatprep.subr.mxu1 %v15270_v41  ;;  %v6824_v27 = vpop.permute.xlu1 %6823 }
0x28ce   : > { %12241 = vmatmul.mubr.msk.f32.gmra.mrb[68].mxu1 %vm1962_vm1, %v6582_v17  ;;  %v7075_v16 = vpop.permute.xlu0 %7074 }
0x28cf   : > { %12243 = vmatprep.mubr.msk.f32.mxu1 %vm15274_vm6, %v15270_v41 }
0x28d0   : > { %v6828_v2 = vpop.permute.xlu1 %6827 }
0x28d2   : > { %12244 = vmatmul.mubr.msk.f32.gmra.mrb[70].mxu1 %vm1962_vm1, %v6584_v44  ;;  %v7067_v51 = vpop.permute.xlu0 %7066 }
0x28d3   : > { %12266 = vmatpush3.xpose.msk.msra.mxu1 %vm1962_vm1, %v6834_v34  ;;  %12267 = vmatprep.mubr.msk.f32.mxu1 %vm15274_vm6, %v15270_v41 }
0x28d4   : > { %13360 = vmatprep.subr.bf16.mxu1 %v15269_v0  ;;  %v7065_v46 = vpop.permute.xlu1 %7064 }
0x28d6   : > { %12268 = vmatmul.mubr.msk.f32.vlgmr.msra.gmra.mrb[72].mxu1 %vm1962_vm1, %v6824_v27 }
0x28d7   : > { %13363 = vmatpush3.bf16.xpose.msk.msra.mxu1 %vm15943_vm2, %v13361_v42  ;;  %12270 = vmatprep.mubr.msk.f32.mxu1 %vm15274_vm6, %v15270_v41 }
0x28d8   : > { %12295 = vmatprep.subr.mxu1 %v15270_v41  ;;  %v7069_v47 = vpop.permute.xlu1 %7068 }
0x28da   : > { %12271 = vmatmul.mubr.msk.f32.gmra.mrb[74].mxu1 %vm1962_vm1, %v6826_v35  ;;  %v14163_v35 = vpop.permute.xlu0 %14162 }
0x28db   : > { %12273 = vmatprep.mubr.msk.f32.mxu1 %vm15274_vm6, %v15270_v41 }
0x28dc   : > { %v6715_v34 = vpop.permute.xlu1 %6714 }
0x28de   : > { %12274 = vmatmul.mubr.msk.f32.gmra.mrb[76].mxu1 %vm1962_vm1, %v6828_v2 }
0x28df   : > { %12296 = vmatpush3.xpose.msk.msra.mxu1 %vm1962_vm1, %v7075_v16  ;;  %12297 = vmatprep.mubr.msk.f32.mxu1 %vm15274_vm6, %v15270_v41 }
0x28e0   : > { %13367 = vmatprep.subr.bf16.mxu1 %v15269_v0 }
0x28e2   : > { %12298 = vmatmul.mubr.msk.f32.vlgmr.msra.gmra.mrb[78].mxu1 %vm1962_vm1, %v7065_v46 }
0x28e3   : > { %12300 = vmatprep.mubr.msk.f32.mxu1 %vm15274_vm6, %v15270_v41 }
0x28e6   : > { %12301 = vmatmul.mubr.msk.f32.gmra.mrb[80].mxu1 %vm1962_vm1, %v7067_v51 }
0x28e7   : > { %12303 = vmatprep.mubr.msk.f32.mxu1 %vm15274_vm6, %v15270_v41 }
0x28ea   : > { %12304 = vmatmul.mubr.msk.f32.gmra.mrb[82].mxu1 %vm1962_vm1, %v7069_v47  ;;  %v16900_v47 = vpop.permute.xlu1 %14167 }
0x28eb   : > { %12353 = vmatprep.mubr.msk.f32.mxu1 %vm15274_vm6, %v15270_v41 }
0x2926   : > { %v6436_v5 = vpop.f32.mrb[48].mxu0 }
0x2927   : > { %v6450_v58 = vmul.f32 0.17677669, %v6436_v5  ;;  %v12209_v59 = vpop.f32.mrb[49].mxu0 }
0x2929   : > { %v16856_v60 = vadd.f32 %v6450_v58, %v16853_v24 }
0x292a   : > { %v6441_v61 = vpop.f32.mrb[50].mxu0 }
0x292b   : > { %v6451_v10 = vmul.f32 0.17677669, %v6441_v61  ;;  %v12212_v63 = vpop.f32.mrb[51].mxu0  ;;  %v6457_v55 = vsel %vm6456_vm12, %v16856_v60, -inf }
0x292c   : > { %6458 = vmax.xlane.f32.xlu0 %v6457_v55 }
0x292d   : > { %v16861_v15 = vadd.f32 %v6451_v10, %v16853_v24 }
0x292e   : > { %v6446_v23 = vpop.f32.mrb[52].mxu0 }
0x292f   : > { %v6452_v57 = vmul.f32 0.17677669, %v6446_v23  ;;  %v12215_v1 = vpop.f32.mrb[53].mxu0  ;;  %v6460_v52 = vsel %vm6456_vm12, %v16861_v15, -inf }
0x2930   : > { %6461 = vmax.xlane.f32.xlu1 %v6460_v52 }
0x2931   : > { %v16866_v12 = vadd.f32 %v6452_v57, %v16853_v24 }
0x2933   : > { %v6463_v4 = vsel %vm6456_vm12, %v16866_v12, -inf }
0x2934   : > { %6464 = vmax.xlane.f32.xlu0 %v6463_v4 }
0x299d   : > { %v6669_v6 = vpop.f32.mrb[66].mxu1 }
0x299e   : > { %v6683_v8 = vmul.f32 0.17677669, %v6669_v6  ;;  %v12239_v11 = vpop.f32.mrb[67].mxu1 }
0x29a0   : > { %v16871_v36 = vadd.f32 %v6683_v8, %v16853_v24 }
0x29a1   : > { %v6674_v13 = vpop.f32.mrb[68].mxu1 }
0x29a2   : > { %v6684_v14 = vmul.f32 0.17677669, %v6674_v13  ;;  %v12242_v32 = vpop.f32.mrb[69].mxu1  ;;  %v6689_v20 = vsel %vm6456_vm12, %v16871_v36, -inf }
0x29a3   : > { %6690 = vmax.xlane.f32.xlu0 %v6689_v20  ;;  %v14164_v32 = vunpack.i.l.bf16 %v14163_v35 }
0x29a4   : > { %v16876_v26 = vadd.f32 %v6684_v14, %v16853_v24  ;;  %v14165_v14 = vunpack.i.h.bf16 %v14163_v35 }
0x29a5   : > { %v6679_v29 = vpop.f32.mrb[70].mxu1 }
0x29a6   : > { %v6685_v21 = vmul.f32 0.17677669, %v6679_v29  ;;  %v12245_v54 = vpop.f32.mrb[71].mxu1  ;;  %v6692_v22 = vsel %vm6456_vm12, %v16876_v26, -inf }
0x29a7   : > { %6693 = vmax.xlane.f32.xlu1 %v6692_v22 }
0x29a8   : > { %v16881_v19 = vadd.f32 %v6685_v21, %v16853_v24 }
0x29a9   : > { %v6913_v49 = vpop.f32.mrb[72].mxu1 }
0x29aa   : > { %v6927_v39 = vmul.f32 0.17677669, %v6913_v49  ;;  %v12269_v18 = vpop.f32.mrb[73].mxu1  ;;  %v6695_v56 = vsel %vm6456_vm12, %v16881_v19, -inf }
0x29ab   : > { %6696 = vmax.xlane.f32.xlu0 %v6695_v56 }
0x29ac   : > { %v16886_v30 = vadd.f32 %v6927_v39, %v16853_v24 }
0x29ad   : > { %v6918_v33 = vpop.f32.mrb[74].mxu1 }
0x29ae   : > { %v6928_v48 = vmul.f32 0.17677669, %v6918_v33  ;;  %v12272_v44 = vpop.f32.mrb[75].mxu1  ;;  %v6933_v28 = vsel %vm6456_vm12, %v16886_v30, -inf }
0x29af   : > { %6934 = vmax.xlane.f32.xlu1 %v6933_v28 }
0x29b0   : > { %v16891_v17 = vadd.f32 %v6928_v48, %v16853_v24 }
0x29b1   : > { %v6923_v45 = vpop.f32.mrb[76].mxu1 }
0x29b2   : > { %v6929_v40 = vmul.f32 0.17677669, %v6923_v45  ;;  %v12275_v38 = vpop.f32.mrb[77].mxu1  ;;  %v6936_v42 = vsel %vm6456_vm12, %v16891_v17, -inf  ;;  %v14170_v45 = vunpack.i.h.bf16 %v16900_v47 }
0x29b3   : > { %6937 = vmax.xlane.f32.xlu0 %v6936_v42 }
0x29b4   : > { %v16896_v27 = vadd.f32 %v6929_v40, %v16853_v24 }
0x29b5   : > { %v7154_v2 = vpop.f32.mrb[78].mxu1 }
0x29b6   : > { %v7168_v16 = vmul.f32 0.17677669, %v7154_v2  ;;  %v12299_v46 = vpop.f32.mrb[79].mxu1  ;;  %v6939_v51 = vsel %vm6456_vm12, %v16896_v27, -inf }
0x29b7   : > { %6940 = vmax.xlane.f32.xlu1 %v6939_v51 }
0x29b8   : > { %v16903_v5 = vadd.f32 %v7168_v16, %v16853_v24 }
0x29b9   : > { %v6459_v58 = vpop.xlane.xlu0 %6458  ;;  %v7159_v59 = vpop.f32.mrb[80].mxu1 }
0x29ba   : > { %v6466_v61 = vsub.f32 %v16856_v60, %v6459_v58  ;;  %v12302_v10 = vpop.f32.mrb[81].mxu1  ;;  %v7174_v63 = vsel %vm6456_vm12, %v16903_v5, -inf  ;;  %v7169_v54 = vmul.f32 0.17677669, %v7159_v59 }
0x29bb   : > { %7175 = vmax.xlane.f32.xlu1 %v7174_v63 }
0x29bc   : > { %v6469_v55 = vmul.f32 1.442695, %v6466_v61  ;;  %v16940_v22 = vadd.f32 %v7169_v54, %v16853_v24 }
0x29bd   : > { %v6462_v23 = vpop.xlane.xlu1 %6461  ;;  %v7164_v57 = vpop.f32.mrb[82].mxu1 }
0x29be   : > { %14380 = vpow2.f32 %v6469_v55  ;;  %v6467_v1 = vsub.f32 %v16861_v15, %v6462_v23  ;;  %v7170_v52 = vmul.f32 0.17677669, %v7164_v57  ;;  %v12305_v4 = vpop.f32.mrb[83].mxu1  ;;  %v13351_v15 = vpack.c.bf16 %v14165_v14, %v14164_v32 }
0x29bf   : > { %v7177_v49 = vsel %vm6456_vm12, %v16940_v22, -inf }
0x29c0   : > { %v6471_v6 = vmul.f32 1.442695, %v6467_v1  ;;  %v16910_v8 = vadd.f32 %v7170_v52, %v16853_v24 }
0x29c1   : > { %v6465_v11 = vpop.xlane.xlu0 %6464 }
0x29c2   : > { %14382 = vpow2.f32 %v6471_v6  ;;  %v6468_v60 = vsub.f32 %v16866_v12, %v6465_v11  ;;  %v7180_v13 = vsel %vm6456_vm12, %v16910_v8, -inf }
0x29c3   : > { %7181 = vmax.xlane.f32.xlu1 %v7180_v13 }
0x29c4   : > { %v6473_v20 = vmul.f32 1.442695, %v6468_v60 }
0x29c6   : > { %14384 = vpow2.f32 %v6473_v20 }
0x29c8   : > { %v16915_v29 = vpop.eup %14380 }
0x29c9   : > { %12223 = vmatmul.mubr.msk.f32.vlgmr.msra.gmra.mrb[54].mxu0 %vm6456_vm12, %v16915_v29  ;;  %6955 = vrot.lane.b32.xlu0 %v16785_v25, %s17872_s0 }
0x29ca   : > { %13352 = vmatpush3.bf16.msra.mxu0 %v13351_v15  ;;  %12225 = vmatprep.mubr.msk.f32.mxu0 %vm15274_vm6, %v15270_v41 }
0x29cb   : > { %12250 = vmatprep.subr.mxu0 %v15270_v41 }
0x29cc   : > { %v16924_v12 = vpop.eup %14382 }
0x29cd   : > { %12226 = vmatmul.mubr.msk.f32.gmra.mrb[56].mxu0 %vm6456_vm12, %v16924_v12  ;;  %v6567_v54 = vsel %vm6456_vm12, %v16924_v12, 0.0 }
0x29ce   : > { %12251 = vmatpush3.msra.mxu0 %v6715_v34  ;;  %12228 = vmatprep.mubr.msk.f32.mxu0 %vm15274_vm6, %v15270_v41  ;;  %v14169_v34 = vunpack.i.l.bf16 %v16900_v47 }
0x29cf   : > { %13357 = vmatprep.subr.bf16.mxu0 %v15269_v0 }
0x29d0   : > { %v16931_v21 = vpop.eup %14384  ;;  %v13358_v42 = vpack.c.bf16 %v14170_v45, %v14169_v34 }
0x29d1   : > { %12229 = vmatmul.mubr.msk.f32.gmra.mrb[58].mxu0 %vm6456_vm12, %v16931_v21 }
0x29d2   : > { %12252 = vmatprep.mubr.msk.f32.mxu0 %vm15274_vm6, %v15270_v41 }
0x29d4   : > { %14172 = vrot.lane.b32.xlu1 %v16767_v9, %s17873_s26 }
0x29e8   : > { %7178 = vmax.xlane.f32.xlu0 %v7177_v49 }
0x29fe   : > { %7196 = vrot.lane.b32.xlu0 %v16785_v25, %s17873_s26 }
0x2a30   : > { %v6691_v39 = vpop.xlane.xlu0 %6690 }
0x2a31   : > { %v6698_v18 = vsub.f32 %v16871_v36, %v6691_v39 }
0x2a33   : > { %v6701_v56 = vmul.f32 1.442695, %v6698_v18 }
0x2a34   : > { %v6694_v33 = vpop.xlane.xlu1 %6693 }
0x2a35   : > { %14386 = vpow2.f32 %v6701_v56  ;;  %v6699_v48 = vsub.f32 %v16876_v26, %v6694_v33 }
0x2a37   : > { %v6703_v9 = vmul.f32 1.442695, %v6699_v48 }
0x2a38   : > { %v6697_v44 = vpop.xlane.xlu0 %6696 }
0x2a39   : > { %14388 = vpow2.f32 %v6703_v9  ;;  %v6700_v28 = vsub.f32 %v16881_v19, %v6697_v44  ;;  %v6570_v9 = vsel %vm6456_vm12, %v16931_v21, 0.0 }
0x2a3b   : > { %v6705_v40 = vmul.f32 1.442695, %v6700_v28 }
0x2a3c   : > { %v6935_v38 = vpop.xlane.xlu1 %6934 }
0x2a3d   : > { %14390 = vpow2.f32 %v6705_v40  ;;  %v6942_v25 = vsub.f32 %v16886_v30, %v6935_v38 }
0x2a3f   : > { %v14387_v36 = vpop.eup %14386  ;;  %v6945_v35 = vmul.f32 1.442695, %v6942_v25 }
0x2a40   : > { %12253 = vmatmul.mubr.msk.f32.vlgmr.msra.gmra.mrb[60].mxu0 %vm6456_vm12, %v14387_v36  ;;  %v6938_v26 = vpop.xlane.xlu0 %6937  ;;  %v6808_v2 = vsel %vm6456_vm12, %v14387_v36, 0.0 }
0x2a41   : > { %14392 = vpow2.f32 %v6945_v35  ;;  %13359 = vmatpush3.bf16.msra.mxu0 %v13358_v42  ;;  %v6943_v19 = vsub.f32 %v16891_v17, %v6938_v26  ;;  %6809 = vadd.xlane.f32.xlu0 %v6808_v2 }
0x2a42   : > { %12255 = vmatprep.mubr.msk.f32.mxu0 %vm15274_vm6, %v15270_v41  ;;  %12280 = vmatprep.subr.mxu0 %v15270_v41 }
0x2a43   : > { %v14389_v16 = vpop.eup %14388  ;;  %v6947_v30 = vmul.f32 1.442695, %v6943_v19 }
0x2a44   : > { %12256 = vmatmul.mubr.msk.f32.gmra.mrb[62].mxu0 %vm6456_vm12, %v14389_v16  ;;  %v6956_v46 = vpop.permute.xlu0 %6955  ;;  %v6941_v51 = vpop.xlane.xlu1 %6940  ;;  %v6811_v47 = vsel %vm6456_vm12, %v14389_v16, 0.0 }
0x2a45   : > { %14394 = vpow2.f32 %v6947_v30  ;;  %v6944_v58 = vsub.f32 %v16896_v27, %v6941_v51  ;;  %12281 = vmatpush3.msra.mxu0 %v6956_v46  ;;  %6812 = vadd.xlane.f32.xlu0 %v6811_v47 }
0x2a46   : > { %12258 = vmatprep.mubr.msk.f32.mxu0 %vm15274_vm6, %v15270_v41  ;;  %13364 = vmatprep.subr.bf16.mxu0 %v15269_v0 }
0x2a47   : > { %v14391_v17 = vpop.eup %14390  ;;  %v6949_v59 = vmul.f32 1.442695, %v6944_v58 }
0x2a48   : > { %12259 = vmatmul.mubr.msk.f32.gmra.mrb[64].mxu0 %vm6456_vm12, %v14391_v17  ;;  %v7176_v61 = vpop.xlane.xlu1 %7175  ;;  %v6814_v11 = vsel %vm6456_vm12, %v14391_v17, 0.0  ;;  %v7350_v17 = vld [vmem:[#allocation14] sm:$0xff] }
0x2a49   : > { %14396 = vpow2.f32 %v6949_v59  ;;  %v7183_v10 = vsub.f32 %v16903_v5, %v7176_v61  ;;  %12282 = vmatprep.mubr.msk.f32.mxu0 %vm15274_vm6, %v15270_v41  ;;  %v7351_v59 = vld [vmem:[#allocation14 + $0x8] sm:$0xff]  ;;  %v7352_v61 = vld [vmem:[#allocation14 + $0x10] sm:$0xff] }
0x2a4b   : > { %v14393_v63 = vpop.eup %14392  ;;  %v7186_v27 = vmul.f32 1.442695, %v7183_v10  ;;  %v13368_v10 = vpack.c.bf16 %v7351_v59, %v7350_v17 }
0x2a4c   : > { %12283 = vmatmul.mubr.msk.f32.vlgmr.msra.gmra.mrb[66].mxu0 %vm6456_vm12, %v14393_v63  ;;  %v7049_v55 = vsel %vm6456_vm12, %v14393_v63, 0.0  ;;  %v7353_v63 = vld [vmem:[#allocation14 + $0x18] sm:$0xff] }
0x2a4d   : > { %14398 = vpow2.f32 %v7186_v27  ;;  %7050 = vadd.xlane.f32.xlu1 %v7049_v55  ;;  %12285 = vmatprep.mubr.msk.f32.mxu0 %vm15274_vm6, %v15270_v41 }
0x2a4e   : > { %13369 = vmatpush3.bf16.msra.mxu1 %v13368_v10 }
0x2a4f   : > { %v14395_v23 = vpop.eup %14394  ;;  %13370 = vmatprep.subr.bf16.mxu1 %v15269_v0 }
0x2a50   : > { %12286 = vmatmul.mubr.msk.f32.gmra.mrb[68].mxu0 %vm6456_vm12, %v14395_v23  ;;  %v7182_v57 = vpop.xlane.xlu1 %7181  ;;  %v7052_v5 = vsel %vm6456_vm12, %v14395_v23, 0.0 }
0x2a51   : > { %v7185_v1 = vsub.f32 %v16910_v8, %v7182_v57  ;;  %7053 = vadd.xlane.f32.xlu1 %v7052_v5  ;;  %12288 = vmatprep.mubr.msk.f32.mxu0 %vm15274_vm6, %v15270_v41  ;;  %v13371_v5 = vpack.c.bf16 %v7353_v63, %v7352_v61 }
0x2a53   : > { %v14397_v52 = vpop.eup %14396  ;;  %v7190_v4 = vmul.f32 1.442695, %v7185_v1  ;;  %v7354_v1 = vld [vmem:[#allocation14 + $0x20] sm:$0xff]  ;;  %13372 = vmatpush3.bf16.msra.mxu1 %v13371_v5 }
0x2a54   : > { %12289 = vmatmul.mubr.msk.f32.gmra.mrb[70].mxu0 %vm6456_vm12, %v14397_v52  ;;  %v14173_v6 = vpop.permute.xlu1 %14172  ;;  %v7055_v12 = vsel %vm6456_vm12, %v14397_v52, 0.0  ;;  %v7355_v52 = vld [vmem:[#allocation14 + $0x28] sm:$0xff]  ;;  %13373 = vmatprep.subr.bf16.mxu1 %v15269_v0 }
0x2a55   : > { %14400 = vpow2.f32 %v7190_v4  ;;  %v14175_v60 = vunpack.i.h.bf16 %v14173_v6  ;;  %v14174_v13 = vunpack.i.l.bf16 %v14173_v6  ;;  %6815 = vadd.xlane.f32.xlu1 %v6814_v11  ;;  %12312 = vmatprep.mubr.msk.f32.mxu0 %vm15274_vm6, %v15270_v41 }
0x2a57   : > { %v14399_v14 = vpop.eup %14398  ;;  %v13365_v8 = vpack.c.bf16 %v14175_v60, %v14174_v13  ;;  %v13374_v13 = vpack.c.bf16 %v7355_v52, %v7354_v1 }
0x2a58   : > { %v7290_v32 = vsel %vm6456_vm12, %v14399_v14, 0.0 }
0x2a59   : > { %7291 = vadd.xlane.f32.xlu0 %v7290_v32  ;;  %13366 = vmatpush3.bf16.msra.mxu0 %v13365_v8  ;;  %v7357_v8 = vld [vmem:[#allocation14 + $0x38] sm:$0xff] }
0x2a5a   : > { %12310 = vmatprep.subr.mxu0 %v15270_v41  ;;  %13375 = vmatpush3.bf16.msra.mxu1 %v13374_v13 }
0x2a5b   : > { %13376 = vmatprep.subr.bf16.mxu1 %v15269_v0 }
0x2a5f   : > { %v14401_v20 = vpop.eup %14400 }
0x2a60   : > { %v7296_v15 = vsel %vm6456_vm12, %v14401_v20, 0.0 }
0x2a61   : > { %7297 = vadd.xlane.f32.xlu1 %v7296_v15 }
0x2a65   : > { %6568 = vadd.xlane.f32.xlu1 %v6567_v54 }
0x2a75   : > { %v7179_v49 = vpop.xlane.xlu0 %7178 }
0x2a76   : > { %v7184_v39 = vsub.f32 %v16940_v22, %v7179_v49  ;;  %v6564_v22 = vsel %vm6456_vm12, %v16915_v29, 0.0 }
0x2a78   : > { %v7188_v18 = vmul.f32 1.442695, %v7184_v39  ;;  %v7358_v39 = vld [vmem:[#allocation14 + $0x40] sm:$0xff] }
0x2a79   : > { %v7197_v56 = vpop.permute.xlu0 %7196 }
0x2a7a   : > { %14402 = vpow2.f32 %v7188_v18  ;;  %12311 = vmatpush3.msra.mxu0 %v7197_v56  ;;  %v7359_v18 = vld [vmem:[#allocation14 + $0x48] sm:$0xff] }
0x2a7b   : > { %12313 = vmatmul.mubr.msk.f32.vlgmr.msra.gmra.mrb[72].mxu0 %vm6456_vm12, %v14399_v14  ;;  %v7356_v14 = vld [vmem:[#allocation14 + $0x30] sm:$0xff]  ;;  %v13380_v56 = vpack.c.bf16 %v7359_v18, %v7358_v39 }
0x2a7c   : > { %12315 = vmatprep.mubr.msk.f32.mxu0 %vm15274_vm6, %v15270_v41  ;;  %v13377_v49 = vpack.c.bf16 %v7357_v8, %v7356_v14 }
0x2a7e   : > { %13378 = vmatpush3.bf16.msra.mxu1 %v13377_v49 }
0x2a7f   : > { %13379 = vmatprep.subr.bf16.mxu1 %v15269_v0 }
0x2a82   : > { %13381 = vmatpush3.bf16.msra.mxu1 %v13380_v56 }
0x2a83   : > { %13382 = vmatprep.subr.bf16.mxu1 %v15269_v0 }
0x2a84   : > { %v14403_v33 = vpop.eup %14402 }
0x2a85   : > { %12316 = vmatmul.mubr.msk.f32.gmra.mrb[74].mxu0 %vm6456_vm12, %v14403_v33  ;;  %v7293_v48 = vsel %vm6456_vm12, %v14403_v33, 0.0  ;;  %v7360_v33 = vld [vmem:[#allocation14 + $0x50] sm:$0xff] }
0x2a86   : > { %7294 = vadd.xlane.f32.xlu0 %v7293_v48  ;;  %12318 = vmatprep.mubr.msk.f32.mxu0 %vm15274_vm6, %v15270_v41  ;;  %v7361_v48 = vld [vmem:[#allocation14 + $0x58] sm:$0xff] }
0x2a89   : > { %12319 = vmatmul.mubr.msk.f32.gmra.mrb[76].mxu0 %vm6456_vm12, %v14401_v20 }
0x2a8a   : > { %7056 = vadd.xlane.f32.xlu0 %v7055_v12  ;;  %7659 = vmatprep.mubr.f32.mxu0 %v15270_v41  ;;  %v13383_v12 = vpack.c.bf16 %v7361_v48, %v7360_v33 }
0x2a8c   : > { %13384 = vmatpush3.bf16.msra.mxu1 %v13383_v12  ;;  %v10838_v12 = vld [vmem:[#allocation15] ss:$0 sm:$0xff] }
0x2a8d   : > { %13385 = vmatprep.subr.bf16.mxu1 %v15269_v0 }
0x2a8e   : > { %6565 = vadd.xlane.f32.xlu0 %v6564_v22  ;;  %v7362_v22 = vld [vmem:[#allocation14 + $0x60] sm:$0xff] }
0x2a92   : > { %6571 = vadd.xlane.f32.xlu0 %v6570_v9  ;;  %v7363_v9 = vld [vmem:[#allocation14 + $0x68] sm:$0xff] }
0x2a9c   : > { %v17001_v44 = vpop.f32.mrb[54].mxu0 }
0x2a9d   : > { %v12224_v28 = vpop.f32.mrb[55].mxu0 }
0x2a9e   : > { %v13386_v28 = vpack.c.bf16 %v7363_v9, %v7362_v22 }
0x2aa0   : > { %v17003_v45 = vpop.f32.mrb[56].mxu0  ;;  %13387 = vmatpush3.bf16.msra.mxu1 %v13386_v28 }
0x2aa1   : > { %v12227_v34 = vpop.f32.mrb[57].mxu0  ;;  %13388 = vmatprep.subr.bf16.mxu1 %v15269_v0 }
0x2aa2   : > { %v7364_v34 = vld [vmem:[#allocation14 + $0x70] sm:$0xff] }
0x2aa4   : > { %v17005_v40 = vpop.f32.mrb[58].mxu0 }
0x2aa5   : > { %v12230_v38 = vpop.f32.mrb[59].mxu0 }
0x2aa6   : > { %v7365_v38 = vld [vmem:[#allocation14 + $0x78] sm:$0xff] }
0x2ace   : > { %v6810_v25 = vpop.xlane.xlu0 %6809 }
0x2acf   : > { %14404 = vrcp.f32 %v6810_v25  ;;  %v13389_v25 = vpack.c.bf16 %v7365_v38, %v7364_v34 }
0x2ad1   : > { %13390 = vmatpush3.bf16.msra.mxu1 %v13389_v25 }
0x2ad2   : > { %v6813_v36 = vpop.xlane.xlu0 %6812 }
0x2ad3   : > { %14406 = vrcp.f32 %v6813_v36 }
0x2ad9   : > { %v14405_v29 = vpop.eup %14404 }
0x2ada   : > { %v7051_v42 = vpop.xlane.xlu1 %7050 }
0x2adb   : > { %14408 = vrcp.f32 %v7051_v42 }
0x2add   : > { %v14407_v19 = vpop.eup %14406 }
0x2ade   : > { %v7054_v26 = vpop.xlane.xlu1 %7053 }
0x2adf   : > { %14410 = vrcp.f32 %v7054_v26 }
0x2ae2   : > { %v6816_v51 = vpop.xlane.xlu1 %6815 }
0x2ae3   : > { %14412 = vrcp.f32 %v6816_v51 }
0x2ae5   : > { %v14409_v27 = vpop.eup %14408 }
0x2ae6   : > { %v7292_v36 = vpop.xlane.xlu0 %7291 }
0x2ae7   : > { %14414 = vrcp.f32 %v7292_v36 }
0x2ae9   : > { %v14411_v4 = vpop.eup %14410 }
0x2aed   : > { %v14413_v32 = vpop.eup %14412 }
0x2b13   : > { %v6794_v35 = vpop.f32.mrb[60].mxu0  ;;  %v7295_v42 = vpop.xlane.xlu0 %7294 }
0x2b14   : > { %v6818_v2 = vmul.f32 %v14405_v29, %v6794_v35  ;;  %v12254_v21 = vpop.f32.mrb[61].mxu0  ;;  %v14415_v29 = vpop.eup %14414  ;;  %14416 = vrcp.f32 %v7295_v42 }
0x2b15   : > { %v7298_v35 = vpop.xlane.xlu1 %7297 }
0x2b16   : > { %7308 = vrot.lane.b32.xlu1 %v6818_v2, %s17873_s26  ;;  %14418 = vrcp.f32 %v7298_v35 }
0x2b17   : > { %v6799_v16 = vpop.f32.mrb[62].mxu0  ;;  %v7057_v2 = vpop.xlane.xlu0 %7056 }
0x2b18   : > { %v6820_v30 = vmul.f32 %v14407_v19, %v6799_v16  ;;  %v12257_v46 = vpop.f32.mrb[63].mxu0  ;;  %14420 = vrcp.f32 %v7057_v2  ;;  %v7514_v2 = vld [vmem:[%s17881_s3 + $0x28] sm:$0xff] }
0x2b1a   : > { %7310 = vrot.lane.b32.xlu1 %v6820_v30, %s17873_s26 }
0x2b1b   : > { %v6804_v47 = vpop.f32.mrb[64].mxu0  ;;  %v6566_v63 = vpop.xlane.xlu0 %6565 }
0x2b1c   : > { %v12260_v58 = vpop.f32.mrb[65].mxu0  ;;  %v6822_v15 = vmul.f32 %v14413_v32, %v6804_v47  ;;  %14422 = vrcp.f32 %v6566_v63 }
0x2b1e   : > { %v14417_v16 = vpop.eup %14416 }
0x2b1f   : > { %v7035_v55 = vpop.f32.mrb[66].mxu0 }
0x2b20   : > { %v7059_v23 = vmul.f32 %v14409_v27, %v7035_v55  ;;  %v12284_v57 = vpop.f32.mrb[67].mxu0  ;;  %v14419_v47 = vpop.eup %14418 }
0x2b21   : > { %v6569_v27 = vpop.xlane.xlu1 %6568 }
0x2b22   : > { %7320 = vrot.lane.b32.xlu0 %v7059_v23, %s17872_s0  ;;  %v14421_v58 = vpop.eup %14420  ;;  %v6572_v23 = vpop.xlane.xlu0 %6571  ;;  %14424 = vrcp.f32 %v6569_v27 }
0x2b23   : > { %v7040_v6 = vpop.f32.mrb[68].mxu0  ;;  %14426 = vrcp.f32 %v6572_v23  ;;  %v7521_v23 = vld [vmem:[%s17881_s3 + $0x60] sm:$0xff] }
0x2b24   : > { %v7061_v11 = vmul.f32 %v14411_v4, %v7040_v6  ;;  %v12287_v60 = vpop.f32.mrb[69].mxu0 }
0x2b26   : > { %7322 = vrot.lane.b32.xlu0 %v7061_v11, %s17872_s0  ;;  %v14423_v57 = vpop.eup %14422 }
0x2b27   : > { %v7045_v20 = vpop.f32.mrb[70].mxu0  ;;  %v6574_v1 = vmul.f32 %v14423_v57, %v17001_v44  ;;  %v7519_v57 = vld [vmem:[%s17881_s3 + $0x50] sm:$0xff] }
0x2b28   : > { %v12290_v54 = vpop.f32.mrb[71].mxu0  ;;  %v7063_v59 = vmul.f32 %v14421_v58, %v7045_v20  ;;  %v7518_v58 = vld [vmem:[%s17881_s3 + $0x48] sm:$0xff] }
0x2b2a   : > { %7312 = vrot.lane.b32.xlu0 %v6822_v15, %s17873_s26 }
0x2b2c   : > { %v14425_v13 = vpop.eup %14424 }
0x2b2d   : > { %v6576_v8 = vmul.f32 %v14425_v13, %v17003_v45  ;;  %v14427_v32 = vpop.eup %14426  ;;  %v7532_v13 = vld [vmem:[%s17881_s3 + $0xb8] sm:$0xff] }
0x2b2e   : > { %v6578_v39 = vmul.f32 %v14427_v32, %v17005_v40  ;;  %v7529_v32 = vld [vmem:[%s17881_s3 + $0xa0] sm:$0xff] }
0x2b4e   : > { %v7276_v26 = vpop.f32.mrb[72].mxu0 }
0x2b4f   : > { %v7300_v21 = vmul.f32 %v14415_v29, %v7276_v26  ;;  %v12314_v19 = vpop.f32.mrb[73].mxu0  ;;  %v7510_v26 = vld [vmem:[%s17881_s3 + $0x8] sm:$0xff] }
0x2b50   : > { %v7516_v19 = vld [vmem:[%s17881_s3 + $0x38] sm:$0xff] }
0x2b51   : > { %7332 = vrot.lane.b32.xlu1 %v7300_v21, %s17858_s22  ;;  %v13391_v21 = vpack.c.bf16 %v7514_v2, %v7510_v26  ;;  %v7533_v26 = vld [vmem:[%s17881_s3 + $0xc0] sm:$0xff] }
0x2b52   : > { %v7537_v2 = vld [vmem:[%s17881_s3 + $0xe0] sm:$0xff] }
0x2b53   : > { %13392 = vmatprep.subr.bf16.mxu0 %v13391_v21  ;;  %v13405_v21 = vpack.c.bf16 %v7537_v2, %v7533_v26 }
0x2b58   : > { %v7281_v30 = vpop.f32.mrb[74].mxu0 }
0x2b59   : > { %v7302_v46 = vmul.f32 %v14417_v16, %v7281_v30  ;;  %v12317_v51 = vpop.f32.mrb[75].mxu0  ;;  %v7509_v16 = vld [vmem:[%s17881_s3] sm:$0xff] }
0x2b5a   : > { %v7513_v30 = vld [vmem:[%s17881_s3 + $0x20] sm:$0xff] }
0x2b5b   : > { %7334 = vrot.lane.b32.xlu1 %v7302_v46, %s17858_s22  ;;  %v13393_v51 = vpack.c.bf16 %v7513_v30, %v7509_v16  ;;  %v7539_v16 = vld [vmem:[%s17881_s3 + $0xf0] sm:$0xff] }
0x2b5c   : > { %v7286_v17 = vpop.f32.mrb[76].mxu0 }
0x2b5d   : > { %v7304_v61 = vmul.f32 %v14419_v47, %v7286_v17  ;;  %v12320_v10 = vpop.f32.mrb[77].mxu0  ;;  %v7511_v47 = vld [vmem:[%s17881_s3 + $0x10] sm:$0xff]  ;;  %13394 = vmatpush1.bf16.msra.mxu0 %v13393_v51  ;;  %v7546_v51 = vld [vmem:[%s17881_s3 + $0x128] sm:$0xff] }
0x2b5e   : > { %v7524_v10 = vld [vmem:[%s17881_s3 + $0x78] sm:$0xff] }
0x2b5f   : > { %7324 = vrot.lane.b32.xlu1 %v7063_v59, %s17872_s0  ;;  %7336 = vrot.lane.b32.xlu0 %v7304_v61, %s17858_s22  ;;  %v7522_v59 = vld [vmem:[%s17881_s3 + $0x68] sm:$0xff]  ;;  %v7520_v61 = vld [vmem:[%s17881_s3 + $0x58] sm:$0xff] }
0x2b60   : > { %v13395_v63 = vpack.c.bf16 %v7522_v59, %v7518_v58  ;;  %v13427_v27 = vpack.c.bf16 %v7524_v10, %v7520_v61  ;;  %v7548_v58 = vld [vmem:[%s17881_s3 + $0x138] sm:$0xff]  ;;  %v7545_v59 = vld [vmem:[%s17881_s3 + $0x120] sm:$0xff] }
0x2b62   : > { %13396 = vmatprep.subr.bf16.mxu0 %v13395_v63  ;;  %v7543_v63 = vld [vmem:[%s17881_s3 + $0x110] sm:$0xff] }
0x2b88   : > { %v7309_v55 = vpop.permute.xlu1 %7308 }
0x2b89   : > { %v7341_v4 = vsel %vm1962_vm1, %v6574_v1, %v7309_v55  ;;  %v7517_v55 = vld [vmem:[%s17881_s3 + $0x40] sm:$0xff]  ;;  %v7523_v1 = vld [vmem:[%s17881_s3 + $0x70] sm:$0xff] }
0x2b8c   : > { %v7311_v5 = vpop.permute.xlu1 %7310 }
0x2b8d   : > { %v7342_v44 = vsel %vm1962_vm1, %v6576_v8, %v7311_v5  ;;  %v13397_v5 = vpack.c.bf16 %v7521_v23, %v7517_v55  ;;  %v7550_v23 = vld [vmem:[%s17881_s3 + $0x148] sm:$0xff] }
0x2b8f   : > { %13398 = vmatpush1.bf16.msra.mxu0 %v13397_v5  ;;  %v7552_v5 = vld [vmem:[%s17881_s3 + $0x158] sm:$0xff] }
0x2b94   : > { %v7321_v52 = vpop.permute.xlu0 %7320 }
0x2b95   : > { %v7344_v6 = vsel %vm1578_vm0, %v7341_v4, %v7321_v52  ;;  %v7526_v52 = vld [vmem:[%s17881_s3 + $0x88] sm:$0xff] }
0x2b96   : > { %v7530_v4 = vld [vmem:[%s17881_s3 + $0xa8] sm:$0xff] }
0x2b98   : > { %v7323_v14 = vpop.permute.xlu0 %7322 }
0x2b99   : > { %v7345_v20 = vsel %vm1578_vm0, %v7342_v44, %v7323_v14  ;;  %v7525_v14 = vld [vmem:[%s17881_s3 + $0x80] sm:$0xff]  ;;  %v7527_v44 = vld [vmem:[%s17881_s3 + $0x90] sm:$0xff] }
0x2b9c   : > { %v7313_v15 = vpop.permute.xlu0 %7312 }
0x2b9d   : > { %v7343_v18 = vsel %vm1962_vm1, %v6578_v39, %v7313_v15  ;;  %v13401_v15 = vpack.c.bf16 %v7529_v32, %v7525_v14  ;;  %v7555_v14 = vld [vmem:[%s17881_s3 + $0x170] sm:$0xff]  ;;  %v7558_v32 = vld [vmem:[%s17881_s3 + $0x188] sm:$0xff] }
0x2bc3   : > { %v7333_v11 = vpop.permute.xlu1 %7332 }
0x2bc4   : > { %v7347_v60 = vsel %vm2792_vm4, %v7344_v6, %v7333_v11  ;;  %v13429_v6 = vpack.c.bf16 %v7523_v1, %v7519_v57  ;;  %v13399_v11 = vpack.c.bf16 %v7530_v4, %v7526_v52  ;;  %v7554_v57 = vld [vmem:[%s17881_s3 + $0x168] sm:$0xff]  ;;  %v7556_v52 = vld [vmem:[%s17881_s3 + $0x178] sm:$0xff]  ;;  %v7549_v4 = vld [vmem:[%s17881_s3 + $0x140] sm:$0xff] }
0x2bc5   : > { %12354 = vmatmul.mubr.f32.vlgmr.msra.gmra.mrb[84].mxu1 %v7347_v60  ;;  %v7528_v60 = vld [vmem:[%s17881_s3 + $0x98] sm:$0xff]  ;;  %v13411_v1 = vpack.c.bf16 %v7554_v57, %v7550_v23 }
0x2bc6   : > { %12356 = vmatprep.mubr.msk.f32.mxu1 %vm15274_vm6, %v15270_v41  ;;  %v13431_v8 = vpack.c.bf16 %v7532_v13, %v7528_v60  ;;  %13400 = vmatprep.subr.bf16.mxu0 %v13399_v11  ;;  %v13443_v11 = vpack.c.bf16 %v7556_v52, %v7552_v5  ;;  %v7551_v13 = vld [vmem:[%s17881_s3 + $0x150] sm:$0xff] }
0x2bc7   : > { %13402 = vmatpush1.bf16.msra.mxu0 %v13401_v15 }
0x2bcd   : > { %v7335_v54 = vpop.permute.xlu1 %7334 }
0x2bce   : > { %v7348_v49 = vsel %vm2792_vm4, %v7345_v20, %v7335_v54  ;;  %v7531_v20 = vld [vmem:[%s17881_s3 + $0xb0] sm:$0xff] }
0x2bcf   : > { %12357 = vmatmul.mubr.f32.gmra.mrb[86].mxu1 %v7348_v49  ;;  %v13433_v54 = vpack.c.bf16 %v7531_v20, %v7527_v44  ;;  %v7562_v44 = vld [vmem:[%s17881_s3 + $0x1a8] sm:$0xff]  ;;  %v7560_v20 = vld [vmem:[%s17881_s3 + $0x198] sm:$0xff] }
0x2bd0   : > { %12359 = vmatprep.mubr.msk.f32.mxu1 %vm15274_vm6, %v15270_v41  ;;  %v13415_v15 = vpack.c.bf16 %v7562_v44, %v7558_v32  ;;  %v7857_v32 = vld [vmem:[#allocation20] sm:$0xff]  ;;  %v7858_v44 = vld [vmem:[#allocation20 + $0x8] sm:$0xff] }
0x2bd1   : > { %v7325_v56 = vpop.permute.xlu1 %7324  ;;  %v7337_v33 = vpop.permute.xlu0 %7336 }
0x2bd2   : > { %v7346_v45 = vsel %vm1578_vm0, %v7343_v18, %v7325_v56 }
0x2bd3   : > { %v7349_v48 = vsel %vm2792_vm4, %v7346_v45, %v7337_v33 }
0x2bd4   : > { %12360 = vmatmul.mubr.f32.gmra.mrb[88].mxu1 %v7349_v48 }
0x2bd5   : > { %7742 = vmatprep.mubr.f32.mxu1 %v15270_v41 }
0x2c98   : > { %v7439_v22 = vpop.f32.mrb[84].mxu1 }
0x2c99   : > { %v7440_v40 = vadd.f32 %v10838_v12, %v7439_v22  ;;  %v12355_v9 = vpop.f32.mrb[85].mxu1 }
0x2c9b   : > { %v17041_v28 = vadd.f32 %v7440_v40, %v16721_v7 }
0x2c9d   : > { %7458 = vadd.xlane.f32.xlu1 %v17041_v28 }
0x2ca2   : > { %v7444_v34 = vpop.f32.mrb[86].mxu1 }
0x2ca3   : > { %v7445_v38 = vadd.f32 %v10838_v12, %v7444_v34  ;;  %v12358_v25 = vpop.f32.mrb[87].mxu1 }
0x2ca4   : > { %v7538_v25 = vld [vmem:[%s17881_s3 + $0xe8] sm:$0xff] }
0x2ca5   : > { %v17045_v36 = vadd.f32 %v7445_v38, %v16718_v37  ;;  %v7512_v37 = vld [vmem:[%s17881_s3 + $0x18] sm:$0xff]  ;;  %v7534_v38 = vld [vmem:[%s17881_s3 + $0xc8] sm:$0xff] }
0x2ca6   : > { %v13423_v46 = vpack.c.bf16 %v7516_v19, %v7512_v37  ;;  %v7535_v19 = vld [vmem:[%s17881_s3 + $0xd0] sm:$0xff] }
0x2ca7   : > { %7460 = vadd.xlane.f32.xlu0 %v17045_v36  ;;  %v7449_v42 = vpop.f32.mrb[88].mxu1  ;;  %v13437_v30 = vpack.c.bf16 %v7539_v16, %v7535_v19 }
0x2ca8   : > { %v7450_v29 = vadd.f32 %v10838_v12, %v7449_v42  ;;  %v12361_v7 = vpop.f32.mrb[89].mxu1  ;;  %13424 = vmatprep.subr.bf16.mxu1 %v13423_v46  ;;  %v7536_v42 = vld [vmem:[%s17881_s3 + $0xd8] sm:$0xff]  ;;  %v7542_v46 = vld [vmem:[%s17881_s3 + $0x108] sm:$0xff] }
0x2ca9   : > { %v7540_v7 = vld [vmem:[%s17881_s3 + $0xf8] sm:$0xff] }
0x2caa   : > { %v17049_v35 = vadd.f32 %v7450_v29, %v16724_v43  ;;  %v7515_v43 = vld [vmem:[%s17881_s3 + $0x30] sm:$0xff]  ;;  %v13403_v29 = vpack.c.bf16 %v7538_v25, %v7534_v38  ;;  %v13435_v37 = vpack.c.bf16 %v7540_v7, %v7536_v42  ;;  %v7568_v38 = vld [vmem:[%s17881_s3 + $0x1d8] sm:$0xff]  ;;  %v7569_v7 = vld [vmem:[%s17881_s3 + $0x1e0] sm:$0xff] }
0x2cab   : > { %v13425_v17 = vpack.c.bf16 %v7515_v43, %v7511_v47  ;;  %v7544_v47 = vld [vmem:[%s17881_s3 + $0x118] sm:$0xff]  ;;  %v13407_v43 = vpack.c.bf16 %v7546_v51, %v7542_v46 }
0x2cac   : > { %7462 = vadd.xlane.f32.xlu0 %v17049_v35  ;;  %13404 = vmatprep.subr.bf16.mxu0 %v13403_v29  ;;  %v13439_v61 = vpack.c.bf16 %v7548_v58, %v7544_v47  ;;  %v7572_v42 = vld [vmem:[%s17881_s3 + $0x1f8] sm:$0xff]  ;;  %v7565_v29 = vld [vmem:[%s17881_s3 + $0x1c0] sm:$0xff] }
0x2cad   : > { %13426 = vmatpush1.bf16.msra.mxu1 %v13425_v17  ;;  %13406 = vmatpush1.bf16.msra.mxu0 %v13405_v21  ;;  %v7541_v17 = vld [vmem:[%s17881_s3 + $0x100] sm:$0xff]  ;;  %v13451_v26 = vpack.c.bf16 %v7572_v42, %v7568_v38  ;;  %v13421_v2 = vpack.c.bf16 %v7569_v7, %v7565_v29  ;;  %v7571_v21 = vld [vmem:[%s17881_s3 + $0x1f0] sm:$0xff]  ;;  %v7877_v7 = vld [vmem:[#allocation20 + $0xa0] sm:$0xff] }
0x2cae   : > { %13428 = vmatprep.subr.bf16.mxu1 %v13427_v27  ;;  %v13409_v10 = vpack.c.bf16 %v7545_v59, %v7541_v17  ;;  %v7547_v27 = vld [vmem:[%s17881_s3 + $0x130] sm:$0xff]  ;;  %13408 = vmatprep.subr.bf16.mxu0 %v13407_v43  ;;  %v10839_v59 = vld [vmem:[#allocation17] ss:$0 sm:$0xff] }
0x2caf   : > { %v13441_v55 = vpack.c.bf16 %v7547_v27, %v7543_v63  ;;  %v10840_v63 = vld [vmem:[#allocation18] ss:$0 sm:$0xff] }
0x2cb0   : > { %v7892_v42 = vld [vmem:[#allocation20 + $0x118] sm:$0xff] }
0x2cb1   : > { %13430 = vmatpush1.bf16.msra.mxu1 %v13429_v6  ;;  %13410 = vmatpush1.bf16.msra.mxu0 %v13409_v10  ;;  %v7553_v6 = vld [vmem:[%s17881_s3 + $0x160] sm:$0xff] }
0x2cb2   : > { %13432 = vmatprep.subr.bf16.mxu1 %v13431_v8  ;;  %v13413_v60 = vpack.c.bf16 %v7553_v6, %v7549_v4  ;;  %13412 = vmatprep.subr.bf16.mxu0 %v13411_v1  ;;  %v13445_v8 = vpack.c.bf16 %v7555_v14, %v7551_v13  ;;  %v7874_v13 = vld [vmem:[#allocation20 + $0x88] sm:$0xff]  ;;  %v7905_v14 = vld [vmem:[#allocation20 + $0x180] sm:$0xff] }
0x2cb5   : > { %13434 = vmatpush1.bf16.msra.mxu1 %v13433_v54  ;;  %13414 = vmatpush1.bf16.msra.mxu0 %v13413_v60  ;;  %v7564_v54 = vld [vmem:[%s17881_s3 + $0x1b8] sm:$0xff]  ;;  %v7873_v60 = vld [vmem:[#allocation20 + $0x80] sm:$0xff] }
0x2cb6   : > { %13436 = vmatprep.subr.bf16.mxu1 %v13435_v37  ;;  %13416 = vmatprep.subr.bf16.mxu0 %v13415_v15  ;;  %v7567_v37 = vld [vmem:[%s17881_s3 + $0x1d0] sm:$0xff]  ;;  %v13457_v15 = vpack.c.bf16 %v7858_v44, %v7857_v32 }
0x2cb7   : > { %v13453_v19 = vpack.c.bf16 %v7571_v21, %v7567_v37  ;;  %v7910_v21 = vld [vmem:[#allocation20 + $0x1a8] sm:$0xff] }
0x2cb8   : > { %v7898_v32 = vld [vmem:[#allocation20 + $0x148] sm:$0xff] }
0x2cb9   : > { %13438 = vmatpush1.bf16.msra.mxu1 %v13437_v30 }
0x2cba   : > { %13440 = vmatprep.subr.bf16.mxu1 %v13439_v61 }
0x2cbd   : > { %13442 = vmatpush1.bf16.msra.mxu1 %v13441_v55 }
0x2cbe   : > { %13444 = vmatprep.subr.bf16.mxu1 %v13443_v11 }
0x2cc1   : > { %13446 = vmatpush1.bf16.msra.mxu1 %v13445_v8  ;;  %v13455_v8 = vpack.c.bf16 %v7874_v13, %v7873_v60  ;;  %v7865_v60 = vld [vmem:[#allocation20 + $0x40] sm:$0xff]  ;;  %v7866_v13 = vld [vmem:[#allocation20 + $0x48] sm:$0xff] }
0x2d2a   : > { %v7459_v49 = vpop.xlane.xlu1 %7458 }
0x2d2b   : > { %v7464_v39 = vmul.f32 0.0078125, %v7459_v49  ;;  %v7557_v49 = vld [vmem:[%s17881_s3 + $0x180] sm:$0xff] }
0x2d2d   : > { %v17077_v18 = vsub.f32 %v17041_v28, %v7464_v39  ;;  %v7561_v39 = vld [vmem:[%s17881_s3 + $0x1a0] sm:$0xff] }
0x2d2f   : > { %v7470_v56 = vmul.f32 %v17077_v18, %v17077_v18 }
0x2d31   : > { %7473 = vadd.xlane.f32.xlu1 %v7470_v56  ;;  %v13447_v56 = vpack.c.bf16 %v7564_v54, %v7560_v20  ;;  %v7890_v54 = vld [vmem:[#allocation20 + $0x108] sm:$0xff] }
0x2d33   : > { %13448 = vmatprep.subr.bf16.mxu1 %v13447_v56  ;;  %v7876_v56 = vld [vmem:[#allocation20 + $0x98] sm:$0xff] }
0x2d34   : > { %v7461_v33 = vpop.xlane.xlu0 %7460 }
0x2d35   : > { %v7465_v45 = vmul.f32 0.0078125, %v7461_v33  ;;  %v13417_v33 = vpack.c.bf16 %v7561_v39, %v7557_v49  ;;  %v7875_v39 = vld [vmem:[#allocation20 + $0x90] sm:$0xff] }
0x2d37   : > { %v17082_v48 = vsub.f32 %v17045_v36, %v7465_v45  ;;  %v7559_v45 = vld [vmem:[%s17881_s3 + $0x190] sm:$0xff]  ;;  %13418 = vmatpush1.bf16.msra.mxu0 %v13417_v33  ;;  %v7907_v33 = vld [vmem:[#allocation20 + $0x190] sm:$0xff] }
0x2d39   : > { %v7463_v12 = vpop.xlane.xlu0 %7462  ;;  %v7471_v22 = vmul.f32 %v17082_v48, %v17082_v48 }
0x2d3a   : > { %v7466_v40 = vmul.f32 0.0078125, %v7463_v12  ;;  %v7563_v12 = vld [vmem:[%s17881_s3 + $0x1b0] sm:$0xff] }
0x2d3b   : > { %7475 = vadd.xlane.f32.xlu0 %v7471_v22  ;;  %v13449_v22 = vpack.c.bf16 %v7563_v12, %v7559_v45  ;;  %v13459_v45 = vpack.c.bf16 %v7876_v56, %v7875_v39  ;;  %v7908_v12 = vld [vmem:[#allocation20 + $0x198] sm:$0xff]  ;;  %v7867_v39 = vld [vmem:[#allocation20 + $0x50] sm:$0xff] }
0x2d3c   : > { %v17087_v9 = vsub.f32 %v17049_v35, %v7466_v40  ;;  %v7566_v40 = vld [vmem:[%s17881_s3 + $0x1c8] sm:$0xff]  ;;  %v7868_v56 = vld [vmem:[#allocation20 + $0x58] sm:$0xff] }
0x2d3d   : > { %13450 = vmatpush1.bf16.msra.mxu1 %v13449_v22  ;;  %v7859_v22 = vld [vmem:[#allocation20 + $0x10] sm:$0xff] }
0x2d3e   : > { %v7472_v34 = vmul.f32 %v17087_v9, %v17087_v9  ;;  %13452 = vmatprep.subr.bf16.mxu1 %v13451_v26  ;;  %v7878_v26 = vld [vmem:[#allocation20 + $0xa8] sm:$0xff] }
0x2d3f   : > { %v13463_v37 = vpack.c.bf16 %v7878_v26, %v7877_v7  ;;  %v7869_v7 = vld [vmem:[#allocation20 + $0x60] sm:$0xff]  ;;  %v7870_v26 = vld [vmem:[#allocation20 + $0x68] sm:$0xff] }
0x2d40   : > { %7477 = vadd.xlane.f32.xlu1 %v7472_v34  ;;  %v7570_v34 = vld [vmem:[%s17881_s3 + $0x1e8] sm:$0xff] }
0x2d41   : > { %v13419_v25 = vpack.c.bf16 %v7570_v34, %v7566_v40  ;;  %13454 = vmatpush1.bf16.msra.mxu1 %v13453_v19  ;;  %v7860_v40 = vld [vmem:[#allocation20 + $0x18] sm:$0xff]  ;;  %v13491_v34 = vpack.c.bf16 %v7908_v12, %v7907_v33  ;;  %v7861_v19 = vld [vmem:[#allocation20 + $0x20] sm:$0xff]  ;;  %v7899_v12 = vld [vmem:[#allocation20 + $0x150] sm:$0xff] }
0x2d42   : > { %v13461_v38 = vpack.c.bf16 %v7860_v40, %v7859_v22  ;;  %v7900_v22 = vld [vmem:[#allocation20 + $0x158] sm:$0xff] }
0x2d43   : > { %13420 = vmatprep.subr.bf16.mxu0 %v13419_v25  ;;  %v7891_v25 = vld [vmem:[#allocation20 + $0x110] sm:$0xff]  ;;  %v13509_v40 = vpack.c.bf16 %v7900_v22, %v7899_v12 }
0x2d44   : > { %13422 = vmatpush1.bf16.msra.mxu0 %v13421_v2  ;;  %v13493_v29 = vpack.c.bf16 %v7892_v42, %v7891_v25  ;;  %v7909_v2 = vld [vmem:[#allocation20 + $0x1a0] sm:$0xff] }
0x2d45   : > { %13456 = vmatprep.subr.bf16.mxu0 %v13455_v8  ;;  %v13473_v8 = vpack.c.bf16 %v7866_v13, %v7865_v60  ;;  %v7917_v25 = vld [vmem:[#allocation20 + $0x1e0] sm:$0xff] }
0x2dbe   : > { %v7474_v16 = vpop.xlane.xlu1 %7473 }
0x2dbf   : > { %v7479_v30 = vmul.f32 0.0078125, %v7474_v16  ;;  %v7862_v16 = vld [vmem:[#allocation20 + $0x28] sm:$0xff] }
0x2dc1   : > { %v7482_v46 = vadd.f32 1e-05, %v7479_v30  ;;  %v13495_v30 = vpack.c.bf16 %v7910_v21, %v7909_v2  ;;  %v7901_v21 = vld [vmem:[#allocation20 + $0x160] sm:$0xff] }
0x2dc3   : > { %14428 = vrsqrt.f32 %v7482_v46  ;;  %v13465_v46 = vpack.c.bf16 %v7862_v16, %v7861_v19  ;;  %v7902_v19 = vld [vmem:[#allocation20 + $0x168] sm:$0xff] }
0x2dc4   : > { %v13513_v16 = vpack.c.bf16 %v7902_v19, %v7901_v21 }
0x2dc8   : > { %v7476_v51 = vpop.xlane.xlu0 %7475 }
0x2dc9   : > { %v7480_v47 = vmul.f32 0.0078125, %v7476_v51  ;;  %v7893_v51 = vld [vmem:[#allocation20 + $0x120] sm:$0xff] }
0x2dcb   : > { %v7483_v43 = vadd.f32 1e-05, %v7480_v47  ;;  %v7894_v47 = vld [vmem:[#allocation20 + $0x128] sm:$0xff] }
0x2dcd   : > { %v14429_v58 = vpop.eup %14428  ;;  %14430 = vrsqrt.f32 %v7483_v43  ;;  %v7478_v17 = vpop.xlane.xlu1 %7477  ;;  %v13497_v43 = vpack.c.bf16 %v7894_v47, %v7893_v51  ;;  %v7919_v51 = vld [vmem:[#allocation20 + $0x1f0] sm:$0xff] }
0x2dce   : > { %v7488_v61 = vmul.f32 %v14429_v58, %v17077_v18  ;;  %v7481_v10 = vmul.f32 0.0078125, %v7478_v17  ;;  %v7879_v58 = vld [vmem:[#allocation20 + $0xb0] sm:$0xff]  ;;  %v7880_v17 = vld [vmem:[#allocation20 + $0xb8] sm:$0xff] }
0x2dd0   : > { %v7484_v27 = vadd.f32 1e-05, %v7481_v10  ;;  %v7497_v55 = vmul.f32 %v10839_v59, %v7488_v61  ;;  %v13467_v61 = vpack.c.bf16 %v7880_v17, %v7879_v58  ;;  %v7912_v10 = vld [vmem:[#allocation20 + $0x1b8] sm:$0xff]  ;;  %v7871_v58 = vld [vmem:[#allocation20 + $0x70] sm:$0xff] }
0x2dd1   : > { %v7872_v17 = vld [vmem:[#allocation20 + $0x78] sm:$0xff] }
0x2dd2   : > { %14432 = vrsqrt.f32 %v7484_v27  ;;  %v7506_v23 = vadd.f32 %v10840_v63, %v7497_v55  ;;  %v7864_v27 = vld [vmem:[#allocation20 + $0x38] sm:$0xff] }
0x2dd4   : > { %7660 = vmatmul.mubr.f32.vlgmr.msra.gmra.mrb[78].mxu0 %v7506_v23  ;;  %7743 = vmatmul.mubr.f32.vlgmr.msra.gmra.mrb[90].mxu1 %v7506_v23 }
0x2dd5   : > { %7665 = vmatprep.mubr.f32.mxu0 %v15270_v41  ;;  %7748 = vmatprep.mubr.f32.mxu1 %v15270_v41 }
0x2dd6   : > { %13458 = vmatpush3.bf16.msra.mxu0 %v13457_v15  ;;  %v7884_v15 = vld [vmem:[#allocation20 + $0xd8] sm:$0xff] }
0x2dd7   : > { %v14431_v57 = vpop.eup %14430  ;;  %13460 = vmatprep.subr.bf16.mxu0 %v13459_v45  ;;  %v13477_v45 = vpack.c.bf16 %v7868_v56, %v7867_v39 }
0x2dd8   : > { %v7489_v5 = vmul.f32 %v14431_v57, %v17082_v48  ;;  %v7906_v48 = vld [vmem:[#allocation20 + $0x188] sm:$0xff]  ;;  %v7895_v57 = vld [vmem:[#allocation20 + $0x130] sm:$0xff] }
0x2dd9   : > { %v13487_v20 = vpack.c.bf16 %v7906_v48, %v7905_v14  ;;  %v7897_v48 = vld [vmem:[#allocation20 + $0x140] sm:$0xff] }
0x2dda   : > { %v7498_v1 = vmul.f32 %v10839_v59, %v7489_v5  ;;  %13462 = vmatpush3.bf16.msra.mxu0 %v13461_v38  ;;  %v7896_v5 = vld [vmem:[#allocation20 + $0x138] sm:$0xff]  ;;  %v13505_v44 = vpack.c.bf16 %v7898_v32, %v7897_v48  ;;  %v7886_v38 = vld [vmem:[#allocation20 + $0xe8] sm:$0xff] }
0x2ddb   : > { %13488 = vmatprep.subr.bf16.mxu1 %v13487_v20  ;;  %13464 = vmatprep.subr.bf16.mxu0 %v13463_v37  ;;  %v7883_v20 = vld [vmem:[#allocation20 + $0xd0] sm:$0xff]  ;;  %v13481_v37 = vpack.c.bf16 %v7870_v26, %v7869_v7 }
0x2ddc   : > { %v14433_v52 = vpop.eup %14432  ;;  %v7507_v4 = vadd.f32 %v10840_v63, %v7498_v1  ;;  %v13501_v1 = vpack.c.bf16 %v7896_v5, %v7895_v57 }
0x2ddd   : > { %v7490_v18 = vmul.f32 %v14433_v52, %v17087_v9  ;;  %v7889_v9 = vld [vmem:[#allocation20 + $0x100] sm:$0xff] }
0x2dde   : > { %7666 = vmatmul.mubr.f32.gmra.mrb[80].mxu0 %v7507_v4  ;;  %7749 = vmatmul.mubr.f32.gmra.mrb[92].mxu1 %v7507_v4  ;;  %v13489_v49 = vpack.c.bf16 %v7890_v54, %v7889_v9  ;;  %v7881_v52 = vld [vmem:[#allocation20 + $0xc0] sm:$0xff]  ;;  %v7882_v4 = vld [vmem:[#allocation20 + $0xc8] sm:$0xff]  ;;  %v7915_v9 = vld [vmem:[#allocation20 + $0x1d0] sm:$0xff]  ;;  %v13475_v54 = vpack.c.bf16 %v7884_v15, %v7883_v20 }
0x2ddf   : > { %7671 = vmatprep.mubr.f32.mxu0 %v15270_v41  ;;  %7754 = vmatprep.mubr.f32.mxu1 %v15270_v41  ;;  %v7499_v6 = vmul.f32 %v10839_v59, %v7490_v18  ;;  %v7911_v59 = vld [vmem:[#allocation20 + $0x1b0] sm:$0xff]  ;;  %v7913_v18 = vld [vmem:[#allocation20 + $0x1c0] sm:$0xff] }
0x2de0   : > { %13490 = vmatpush3.bf16.msra.mxu1 %v13489_v49  ;;  %13466 = vmatpush3.bf16.msra.mxu0 %v13465_v46  ;;  %v13499_v55 = vpack.c.bf16 %v7912_v10, %v7911_v59  ;;  %v7916_v49 = vld [vmem:[#allocation20 + $0x1d8] sm:$0xff]  ;;  %v7903_v10 = vld [vmem:[#allocation20 + $0x170] sm:$0xff] }
0x2de1   : > { %v7508_v11 = vadd.f32 %v10840_v63, %v7499_v6  ;;  %13492 = vmatprep.subr.bf16.mxu1 %v13491_v34  ;;  %v7863_v63 = vld [vmem:[#allocation20 + $0x30] sm:$0xff]  ;;  %13468 = vmatprep.subr.bf16.mxu0 %v13467_v61  ;;  %v13471_v6 = vpack.c.bf16 %v7882_v4, %v7881_v52  ;;  %v13507_v33 = vpack.c.bf16 %v7916_v49, %v7915_v9  ;;  %v7885_v34 = vld [vmem:[#allocation20 + $0xe0] sm:$0xff]  ;;  %v7888_v46 = vld [vmem:[#allocation20 + $0xf8] sm:$0xff] }
0x2de2   : > { %v13469_v23 = vpack.c.bf16 %v7864_v27, %v7863_v63  ;;  %v13479_v42 = vpack.c.bf16 %v7886_v38, %v7885_v34  ;;  %v13485_v61 = vpack.c.bf16 %v7872_v17, %v7871_v58  ;;  %v7904_v63 = vld [vmem:[#allocation20 + $0x178] sm:$0xff] }
0x2de3   : > { %7672 = vmatmul.mubr.f32.gmra.mrb[82].mxu0 %v7508_v11  ;;  %7755 = vmatmul.mubr.f32.gmra.mrb[94].mxu1 %v7508_v11  ;;  %v7914_v11 = vld [vmem:[#allocation20 + $0x1c8] sm:$0xff]  ;;  %v13517_v27 = vpack.c.bf16 %v7904_v63, %v7903_v10 }
0x2de4   : > { %13494 = vmatpush3.bf16.msra.mxu1 %v13493_v29  ;;  %13470 = vmatpush3.bf16.msra.mxu0 %v13469_v23  ;;  %v13503_v14 = vpack.c.bf16 %v7914_v11, %v7913_v18  ;;  %v7918_v29 = vld [vmem:[#allocation20 + $0x1e8] sm:$0xff] }
0x2de5   : > { %13496 = vmatprep.subr.bf16.mxu1 %v13495_v30  ;;  %13472 = vmatprep.subr.bf16.mxu0 %v13471_v6  ;;  %v13511_v2 = vpack.c.bf16 %v7918_v29, %v7917_v25  ;;  %v7887_v30 = vld [vmem:[#allocation20 + $0xf0] sm:$0xff] }
0x2de6   : > { %v13483_v47 = vpack.c.bf16 %v7888_v46, %v7887_v30 }
0x2de8   : > { %13498 = vmatpush3.bf16.msra.mxu1 %v13497_v43  ;;  %13474 = vmatpush3.bf16.msra.mxu0 %v13473_v8  ;;  %v7920_v43 = vld [vmem:[#allocation20 + $0x1f8] sm:$0xff] }
0x2de9   : > { %13500 = vmatprep.subr.bf16.mxu1 %v13499_v55  ;;  %13476 = vmatprep.subr.bf16.mxu0 %v13475_v54  ;;  %v13515_v59 = vpack.c.bf16 %v7920_v43, %v7919_v51  ;;  %v7573_v55 = vld [vmem:[%s17882_s5] sm:$0xf] }
0x2dea   : > { %v7578_v23 = vrot.slane %v7573_v55, %v15927_v50  ;;  %v7586_v57 = vrot.slane %v7573_v55, %v15968_v3  ;;  %v7582_v5 = vrot.slane %v7573_v55, %v15932_v53 }
0x2dec   : > { %13502 = vmatpush3.bf16.msra.mxu1 %v13501_v1  ;;  %13478 = vmatpush3.bf16.msra.mxu0 %v13477_v45  ;;  %v7590_v1 = vrot.slane %v7573_v55, %v16223_v31 }
0x2ded   : > { %13504 = vmatprep.subr.bf16.mxu1 %v13503_v14  ;;  %13480 = vmatprep.subr.bf16.mxu0 %v13479_v42 }
0x2df0   : > { %13506 = vmatpush3.bf16.msra.mxu1 %v13505_v44  ;;  %13482 = vmatpush3.bf16.msra.mxu0 %v13481_v37 }
0x2df1   : > { %13508 = vmatprep.subr.bf16.mxu1 %v13507_v33  ;;  %13484 = vmatprep.subr.bf16.mxu0 %v13483_v47 }
0x2df4   : > { %13510 = vmatpush3.bf16.msra.mxu1 %v13509_v40  ;;  %13486 = vmatpush3.bf16.msra.mxu0 %v13485_v61 }
0x2df5   : > { %13512 = vmatprep.subr.bf16.mxu1 %v13511_v2 }
0x2df8   : > { %13514 = vmatpush3.bf16.msra.mxu1 %v13513_v16 }
0x2df9   : > { %13516 = vmatprep.subr.bf16.mxu1 %v13515_v59 }
0x2dfc   : > { %13518 = vmatpush3.bf16.msra.mxu1 %v13517_v27 }
0x2dfd   : > { %13551 = vmatprep.subr.bf16.mxu1 %v15269_v0 }
0x2ea7   : > { %v7661_v52 = vpop.f32.mrb[78].mxu0  ;;  %v7744_v4 = vpop.f32.mrb[90].mxu1 }
0x2ea8   : > { %v17144_v18 = vadd.f32 %v7661_v52, %v7578_v23  ;;  %v17146_v6 = vadd.f32 %v7744_v4, %v7586_v57  ;;  %v7663_v11 = vpop.f32.mrb[79].mxu0  ;;  %v7746_v60 = vpop.f32.mrb[91].mxu1 }
0x2ea9   : > { %v17148_v13 = vadd.f32 %v7663_v11, %v7582_v5  ;;  %v17150_v14 = vadd.f32 %v7746_v60, %v7590_v1 }
0x2eaa   : > { %v10841_v8 = vmul.f32 -1.702, %v17144_v18  ;;  %v10843_v48 = vmul.f32 -1.702, %v17146_v6 }
0x2eab   : > { %v10842_v32 = vmul.f32 -1.702, %v17148_v13  ;;  %v10844_v44 = vmul.f32 -1.702, %v17150_v14 }
0x2eac   : > { %v7785_v20 = vmul.f32 1.442695, %v10841_v8  ;;  %v7789_v15 = vmul.f32 1.442695, %v10843_v48 }
0x2ead   : > { %v7787_v9 = vmul.f32 1.442695, %v10842_v32  ;;  %v7791_v54 = vmul.f32 1.442695, %v10844_v44 }
0x2eae   : > { %14434 = vpow2.f32 %v7785_v20 }
0x2eaf   : > { %14436 = vpow2.f32 %v7789_v15 }
0x2eb0   : > { %14438 = vpow2.f32 %v7787_v9 }
0x2eb1   : > { %14440 = vpow2.f32 %v7791_v54  ;;  %v7667_v49 = vpop.f32.mrb[80].mxu0  ;;  %v7750_v39 = vpop.f32.mrb[92].mxu1 }
0x2eb2   : > { %v17156_v56 = vadd.f32 %v7667_v49, %v7578_v23  ;;  %v17158_v33 = vadd.f32 %v7750_v39, %v7586_v57  ;;  %v7669_v45 = vpop.f32.mrb[81].mxu0  ;;  %v7752_v12 = vpop.f32.mrb[93].mxu1 }
0x2eb3   : > { %v17160_v22 = vadd.f32 %v7669_v45, %v7582_v5  ;;  %v17162_v40 = vadd.f32 %v7752_v12, %v7590_v1 }
0x2eb4   : > { %v10845_v34 = vmul.f32 -1.702, %v17156_v56  ;;  %v10847_v38 = vmul.f32 -1.702, %v17158_v33 }
0x2eb5   : > { %v10846_v25 = vmul.f32 -1.702, %v17160_v22  ;;  %v10848_v37 = vmul.f32 -1.702, %v17162_v40 }
0x2eb6   : > { %v7793_v42 = vmul.f32 1.442695, %v10845_v34  ;;  %v7797_v29 = vmul.f32 1.442695, %v10847_v38  ;;  %v7673_v7 = vpop.f32.mrb[82].mxu0  ;;  %v7756_v26 = vpop.f32.mrb[94].mxu1 }
0x2eb7   : > { %v7795_v2 = vmul.f32 1.442695, %v10846_v25  ;;  %v17168_v21 = vadd.f32 %v7673_v7, %v7578_v23  ;;  %v17170_v19 = vadd.f32 %v7756_v26, %v7586_v57  ;;  %v7675_v16 = vpop.f32.mrb[83].mxu0  ;;  %v7758_v30 = vpop.f32.mrb[95].mxu1  ;;  %v7799_v23 = vmul.f32 1.442695, %v10848_v37 }
0x2eb8   : > { %v14435_v46 = vpop.eup %14434  ;;  %14442 = vpow2.f32 %v7793_v42  ;;  %v17172_v51 = vadd.f32 %v7675_v16, %v7582_v5  ;;  %v17174_v47 = vadd.f32 %v7758_v30, %v7590_v1 }
0x2eb9   : > { %v14437_v43 = vpop.eup %14436  ;;  %v7809_v58 = vadd.f32 1.0, %v14435_v46  ;;  %14444 = vpow2.f32 %v7797_v29  ;;  %v10849_v17 = vmul.f32 -1.702, %v17168_v21  ;;  %v10851_v59 = vmul.f32 -1.702, %v17170_v19 }
0x2eba   : > { %v14439_v61 = vpop.eup %14438  ;;  %v7811_v10 = vadd.f32 1.0, %v14437_v43  ;;  %14446 = vpow2.f32 %v7795_v2  ;;  %v10850_v63 = vmul.f32 -1.702, %v17172_v51  ;;  %v10852_v57 = vmul.f32 -1.702, %v17174_v47 }
0x2ebb   : > { %v14441_v27 = vpop.eup %14440  ;;  %14448 = vrcp.f32 %v7809_v58  ;;  %v7810_v55 = vadd.f32 1.0, %v14439_v61  ;;  %v7801_v1 = vmul.f32 1.442695, %v10849_v17  ;;  %v7805_v52 = vmul.f32 1.442695, %v10851_v59 }
0x2ebc   : > { %14450 = vrcp.f32 %v7811_v10  ;;  %v7812_v5 = vadd.f32 1.0, %v14441_v27  ;;  %v7803_v4 = vmul.f32 1.442695, %v10850_v63  ;;  %v7807_v11 = vmul.f32 1.442695, %v10852_v57 }
0x2ebd   : > { %14452 = vrcp.f32 %v7810_v55 }
0x2ebe   : > { %14454 = vrcp.f32 %v7812_v5 }
0x2ebf   : > { %14456 = vpow2.f32 %v7799_v23  ;;  %v10853_v23 = vld [vmem:[#allocation21] ss:$0 sm:$0xff] }
0x2ec0   : > { %14458 = vpow2.f32 %v7801_v1 }
0x2ec1   : > { %14460 = vpow2.f32 %v7805_v52 }
0x2ec2   : > { %v14443_v60 = vpop.eup %14442  ;;  %14462 = vpow2.f32 %v7803_v4 }
0x2ec3   : > { %v14445_v8 = vpop.eup %14444  ;;  %v7813_v48 = vadd.f32 1.0, %v14443_v60  ;;  %14464 = vpow2.f32 %v7807_v11 }
0x2ec4   : > { %v14447_v32 = vpop.eup %14446  ;;  %v7815_v54 = vadd.f32 1.0, %v14445_v8 }
0x2ec5   : > { %v14449_v44 = vpop.eup %14448  ;;  %v7814_v20 = vadd.f32 1.0, %v14447_v32  ;;  %14466 = vrcp.f32 %v7813_v48 }
0x2ec6   : > { %v14451_v15 = vpop.eup %14450  ;;  %v7845_v12 = vmul.f32 %v14449_v44, %v17144_v18 }
0x2ec7   : > { %v14453_v9 = vpop.eup %14452  ;;  %14468 = vrcp.f32 %v7814_v20  ;;  %v7847_v25 = vmul.f32 %v14451_v15, %v17146_v6 }
0x2ec8   : > { %v14455_v49 = vpop.eup %14454  ;;  %v7846_v39 = vmul.f32 %v14453_v9, %v17148_v13  ;;  %14470 = vrcp.f32 %v7815_v54 }
0x2ec9   : > { %v14457_v45 = vpop.eup %14456  ;;  %v7848_v34 = vmul.f32 %v14455_v49, %v17150_v14 }
0x2eca   : > { %v14459_v38 = vpop.eup %14458  ;;  %v7816_v42 = vadd.f32 1.0, %v14457_v45  ;;  %7992 = vmatprep.mubr.f32.mxu0 %v7846_v39 }
0x2ecb   : > { %v14461_v29 = vpop.eup %14460  ;;  %v7817_v7 = vadd.f32 1.0, %v14459_v38  ;;  %8072 = vmatprep.mubr.f32.mxu1 %v7848_v34  ;;  %7993 = vmatmul.mubr.f32.vlgmr.msra.gmra.mrb[84].mxu0 %v7845_v12  ;;  %v8148_v38 = vld [vmem:[#allocation11 + $0x188] sm:$0xff] }
0x2ecc   : > { %v14463_v26 = vpop.eup %14462  ;;  %14472 = vrcp.f32 %v7816_v42  ;;  %v7819_v2 = vadd.f32 1.0, %v14461_v29  ;;  %8073 = vmatmul.mubr.f32.vlgmr.msra.gmra.mrb[96].mxu1 %v7847_v25  ;;  %v8151_v25 = vld [vmem:[#allocation11 + $0x1a0] sm:$0xff] }
0x2ecd   : > { %v14465_v13 = vpop.eup %14464  ;;  %14474 = vrcp.f32 %v7817_v7  ;;  %v7818_v37 = vadd.f32 1.0, %v14463_v26  ;;  %v8147_v42 = vld [vmem:[#allocation11 + $0x180] sm:$0xff]  ;;  %v13519_v29 = vpack.c.bf16 %v8151_v25, %v8148_v38  ;;  %v8150_v7 = vld [vmem:[#allocation11 + $0x198] sm:$0xff]  ;;  %v8149_v26 = vld [vmem:[#allocation11 + $0x190] sm:$0xff] }
0x2ece   : > { %14476 = vrcp.f32 %v7819_v2  ;;  %v7820_v18 = vadd.f32 1.0, %v14465_v13  ;;  %v8152_v2 = vld [vmem:[#allocation11 + $0x1a8] sm:$0xff]  ;;  %v13521_v13 = vpack.c.bf16 %v8150_v7, %v8147_v42  ;;  %v8173_v38 = vld [vmem:[#allocation11 + $0x250] sm:$0xff]  ;;  %v8178_v7 = vld [vmem:[#allocation11 + $0x278] sm:$0xff] }
0x2ecf   : > { %14478 = vrcp.f32 %v7818_v37  ;;  %v14467_v14 = vpop.eup %14466  ;;  %v13552_v37 = vpack.c.bf16 %v8152_v2, %v8149_v26  ;;  %13520 = vmatprep.subr.bf16.mxu0 %v13519_v29  ;;  %v8176_v42 = vld [vmem:[#allocation11 + $0x268] sm:$0xff]  ;;  %v8181_v26 = vld [vmem:[#allocation11 + $0x290] sm:$0xff] }
0x2ed0   : > { %14480 = vrcp.f32 %v7820_v18  ;;  %v7849_v30 = vmul.f32 %v14467_v14, %v17156_v56  ;;  %v8157_v18 = vld [vmem:[#allocation11 + $0x1d0] sm:$0xff]  ;;  %13522 = vmatpush1.bf16.msra.mxu0 %v13521_v13  ;;  %v13564_v29 = vpack.c.bf16 %v8176_v42, %v8173_v38  ;;  %v13539_v2 = vpack.c.bf16 %v8181_v26, %v8178_v7  ;;  %v8196_v26 = vld [vmem:[#allocation12 + $0x3] sm:$0x7] }
0x2ed1   : > { %v14469_v6 = vpop.eup %14468  ;;  %v8153_v14 = vld [vmem:[#allocation11 + $0x1b0] sm:$0xff]  ;;  %13553 = vmatpush3.bf16.msra.mxu1 %v13552_v37  ;;  %v8180_v37 = vld [vmem:[#allocation11 + $0x288] sm:$0xff] }
0x2ed2   : > { %v7850_v16 = vmul.f32 %v14469_v6, %v17160_v22  ;;  %v14471_v46 = vpop.eup %14470  ;;  %13554 = vmatprep.subr.bf16.mxu1 %v15269_v0  ;;  %v8177_v13 = vld [vmem:[#allocation11 + $0x270] sm:$0xff] }
0x2ed3   : > { %v7851_v61 = vmul.f32 %v14471_v46, %v17158_v33 }
0x2ed4   : > { %7997 = vmatprep.mubr.f32.mxu0 %v7850_v16  ;;  %v8156_v16 = vld [vmem:[#allocation11 + $0x1c8] sm:$0xff] }
0x2ed5   : > { %7998 = vmatmul.mubr.f32.gmra.mrb[86].mxu0 %v7849_v30  ;;  %v8155_v30 = vld [vmem:[#allocation11 + $0x1c0] sm:$0xff]  ;;  %v13525_v46 = vpack.c.bf16 %v8156_v16, %v8153_v14  ;;  %v8182_v14 = vld [vmem:[#allocation11 + $0x298] sm:$0xff]  ;;  %v8184_v16 = vld [vmem:[#allocation11 + $0x2a8] sm:$0xff] }
0x2ed6   : > { %v14473_v43 = vpop.eup %14472 }
0x2ed7   : > { %v14475_v58 = vpop.eup %14474  ;;  %v7852_v17 = vmul.f32 %v14473_v43, %v17162_v40 }
0x2ed8   : > { %v14477_v59 = vpop.eup %14476  ;;  %v7853_v22 = vmul.f32 %v14475_v58, %v17168_v21  ;;  %v8160_v58 = vld [vmem:[#allocation11 + $0x1e8] sm:$0xff] }
0x2ed9   : > { %v14479_v10 = vpop.eup %14478  ;;  %8077 = vmatprep.mubr.f32.mxu1 %v7852_v17  ;;  %v7855_v55 = vmul.f32 %v14477_v59, %v17170_v19  ;;  %v8163_v17 = vld [vmem:[#allocation11 + $0x200] sm:$0xff] }
0x2eda   : > { %v14481_v63 = vpop.eup %14480  ;;  %v7854_v27 = vmul.f32 %v14479_v10, %v17172_v51  ;;  %8078 = vmatmul.mubr.f32.gmra.mrb[98].mxu1 %v7851_v61  ;;  %v8159_v59 = vld [vmem:[#allocation11 + $0x1e0] sm:$0xff]  ;;  %v13527_v61 = vpack.c.bf16 %v8163_v17, %v8160_v58  ;;  %v8162_v10 = vld [vmem:[#allocation11 + $0x1f8] sm:$0xff]  ;;  %v8185_v58 = vld [vmem:[#allocation11 + $0x2b0] sm:$0xff] }
0x2edb   : > { %v7856_v56 = vmul.f32 %v14481_v63, %v17174_v47  ;;  %v8161_v63 = vld [vmem:[#allocation11 + $0x1f0] sm:$0xff] }
0x2edc   : > { %8002 = vmatprep.mubr.f32.mxu0 %v7854_v27  ;;  %v8164_v27 = vld [vmem:[#allocation11 + $0x208] sm:$0xff] }
0x2edd   : > { %8082 = vmatprep.mubr.f32.mxu1 %v7856_v56  ;;  %8003 = vmatmul.mubr.f32.gmra.mrb[88].mxu0 %v7853_v22  ;;  %v13529_v22 = vpack.c.bf16 %v8162_v10, %v8159_v59  ;;  %v13558_v56 = vpack.c.bf16 %v8164_v27, %v8161_v63  ;;  %v8188_v59 = vld [vmem:[#allocation11 + $0x2c8] sm:$0xff]  ;;  %v8190_v10 = vld [vmem:[#allocation11 + $0x2d8] sm:$0xff]  ;;  %v8193_v63 = vld [vmem:[#allocation11 + $0x2f0] sm:$0xff] }
0x2ede   : > { %8083 = vmatmul.mubr.f32.gmra.mrb[100].mxu1 %v7855_v55  ;;  %8277 = vmatprep.mubr.f32.mxu0 %v15270_v41  ;;  %v13547_v27 = vpack.c.bf16 %v8193_v63, %v8190_v10 }
0x2edf   : > { %12394 = vmatprep.mubr.msk.f32.mxu1 %vm15274_vm6, %v15270_v41 }
0x2f9e   : > { %v11478_v33 = vpop.f32.mrb[84].mxu0 }
0x2f9f   : > { %v11519_v40 = vpop.f32.mrb[96].mxu1  ;;  %v11479_v51 = vpop.f32.mrb[85].mxu0 }
0x2fa0   : > { %v11480_v57 = vadd.f32 %v11479_v51, %v11478_v33  ;;  %v11520_v5 = vpop.f32.mrb[97].mxu1 }
0x2fa1   : > { %v11521_v21 = vadd.f32 %v11520_v5, %v11519_v40 }
0x2fa2   : > { %v7995_v1 = vadd.f32 %v11480_v57, %v10853_v23 }
0x2fa4   : > { %v8075_v47 = vadd.f32 %v11521_v21, %v7995_v1 }
0x2fa6   : > { %v17196_v19 = vadd.f32 %v8075_v47, %v17041_v28 }
0x2fa8   : > { %v11481_v52 = vpop.f32.mrb[86].mxu0  ;;  %8095 = vadd.xlane.f32.xlu0 %v17196_v19 }
0x2fa9   : > { %v11482_v4 = vpop.f32.mrb[87].mxu0 }
0x2faa   : > { %v11483_v11 = vadd.f32 %v11482_v4, %v11481_v52 }
0x2fac   : > { %v8000_v8 = vadd.f32 %v11483_v11, %v10853_v23  ;;  %v8166_v11 = vld [vmem:[#allocation11 + $0x218] sm:$0xff] }
0x2fad   : > { %v11522_v60 = vpop.f32.mrb[98].mxu1 }
0x2fae   : > { %v11523_v48 = vpop.f32.mrb[99].mxu1 }
0x2faf   : > { %v11524_v32 = vadd.f32 %v11523_v48, %v11522_v60  ;;  %v8169_v60 = vld [vmem:[#allocation11 + $0x230] sm:$0xff] }
0x2fb0   : > { %v11484_v44 = vpop.f32.mrb[88].mxu0  ;;  %v8165_v48 = vld [vmem:[#allocation11 + $0x210] sm:$0xff] }
0x2fb1   : > { %v8080_v20 = vadd.f32 %v11524_v32, %v8000_v8  ;;  %v11525_v15 = vpop.f32.mrb[100].mxu1  ;;  %v11485_v9 = vpop.f32.mrb[89].mxu0  ;;  %v13531_v8 = vpack.c.bf16 %v8169_v60, %v8166_v11  ;;  %v8168_v32 = vld [vmem:[#allocation11 + $0x228] sm:$0xff]  ;;  %v10854_v60 = vld [vmem:[#allocation8 + $0x1] ss:$0 sm:$0xff] }
0x2fb2   : > { %v11486_v54 = vadd.f32 %v11485_v9, %v11484_v44  ;;  %v11526_v49 = vpop.f32.mrb[101].mxu1  ;;  %v8167_v44 = vld [vmem:[#allocation11 + $0x220] sm:$0xff] }
0x2fb3   : > { %v11527_v39 = vadd.f32 %v11526_v49, %v11525_v15  ;;  %v17200_v45 = vadd.f32 %v8080_v20, %v17045_v36  ;;  %v8154_v36 = vld [vmem:[#allocation11 + $0x1b8] sm:$0xff]  ;;  %v13533_v20 = vpack.c.bf16 %v8168_v32, %v8165_v48  ;;  %v8175_v49 = vld [vmem:[#allocation11 + $0x260] sm:$0xff] }
0x2fb4   : > { %v8005_v28 = vadd.f32 %v11486_v54, %v10853_v23  ;;  %v13523_v6 = vpack.c.bf16 %v8157_v18, %v8154_v36  ;;  %v8170_v15 = vld [vmem:[#allocation11 + $0x238] sm:$0xff]  ;;  %v8172_v54 = vld [vmem:[#allocation11 + $0x248] sm:$0xff]  ;;  %v8179_v36 = vld [vmem:[#allocation11 + $0x280] sm:$0xff]  ;;  %v13541_v18 = vpack.c.bf16 %v8180_v37, %v8177_v13  ;;  %v8205_v13 = vrot.slane %v8196_v26, %v15932_v53 }
0x2fb5   : > { %8097 = vadd.xlane.f32.xlu1 %v17200_v45  ;;  %v13561_v9 = vpack.c.bf16 %v8170_v15, %v8167_v44  ;;  %v10855_v32 = vld [vmem:[#allocation9 + $0x1] ss:$0 sm:$0xff] }
0x2fb6   : > { %v8085_v12 = vadd.f32 %v11527_v39, %v8005_v28  ;;  %13524 = vmatprep.subr.bf16.mxu0 %v13523_v6  ;;  %v13535_v39 = vpack.c.bf16 %v8175_v49, %v8172_v54  ;;  %v8171_v28 = vld [vmem:[#allocation11 + $0x240] sm:$0xff]  ;;  %v13567_v6 = vpack.c.bf16 %v8182_v14, %v8179_v36 }
0x2fb7   : > { %13526 = vmatpush1.bf16.msra.mxu0 %v13525_v46  ;;  %v8183_v46 = vld [vmem:[#allocation11 + $0x2a0] sm:$0xff] }
0x2fb8   : > { %v17204_v34 = vadd.f32 %v8085_v12, %v17049_v35  ;;  %v8158_v35 = vld [vmem:[#allocation11 + $0x1d8] sm:$0xff]  ;;  %13528 = vmatprep.subr.bf16.mxu0 %v13527_v61  ;;  %v13570_v61 = vpack.c.bf16 %v8188_v59, %v8185_v58 }
0x2fb9   : > { %v13555_v43 = vpack.c.bf16 %v8158_v35, %v8155_v30  ;;  %v8174_v12 = vld [vmem:[#allocation11 + $0x258] sm:$0xff]  ;;  %v8187_v30 = vld [vmem:[#allocation11 + $0x2c0] sm:$0xff] }
0x2fba   : > { %8099 = vadd.xlane.f32.xlu0 %v17204_v34  ;;  %v13537_v25 = vpack.c.bf16 %v8174_v12, %v8171_v28  ;;  %v13543_v35 = vpack.c.bf16 %v8187_v30, %v8184_v16 }
0x2fbb   : > { %13556 = vmatpush3.bf16.msra.mxu1 %v13555_v43  ;;  %13530 = vmatpush1.bf16.msra.mxu0 %v13529_v22  ;;  %v8186_v43 = vld [vmem:[#allocation11 + $0x2b8] sm:$0xff]  ;;  %v8189_v22 = vld [vmem:[#allocation11 + $0x2d0] sm:$0xff] }
0x2fbc   : > { %13557 = vmatprep.subr.bf16.mxu1 %v15269_v0  ;;  %13532 = vmatprep.subr.bf16.mxu0 %v13531_v8  ;;  %v13545_v17 = vpack.c.bf16 %v8186_v43, %v8183_v46 }
0x2fbf   : > { %13559 = vmatpush3.bf16.msra.mxu1 %v13558_v56  ;;  %13534 = vmatpush1.bf16.msra.mxu0 %v13533_v20  ;;  %v8192_v56 = vld [vmem:[#allocation11 + $0x2e8] sm:$0xff] }
0x2fc0   : > { %13560 = vmatprep.subr.bf16.mxu1 %v15269_v0  ;;  %13536 = vmatprep.subr.bf16.mxu0 %v13535_v39 }
0x2fc3   : > { %13562 = vmatpush3.bf16.msra.mxu1 %v13561_v9  ;;  %13538 = vmatpush1.bf16.msra.mxu0 %v13537_v25 }
0x2fc4   : > { %13563 = vmatprep.subr.bf16.mxu1 %v15269_v0  ;;  %13540 = vmatprep.subr.bf16.mxu0 %v13539_v2  ;;  %v8209_v2 = vrot.slane %v8196_v26, %v15968_v3 }
0x2fc7   : > { %13565 = vmatpush3.bf16.msra.mxu1 %v13564_v29  ;;  %13542 = vmatpush1.bf16.msra.mxu0 %v13541_v18 }
0x2fc8   : > { %13566 = vmatprep.subr.bf16.mxu1 %v15269_v0  ;;  %13544 = vmatprep.subr.bf16.mxu0 %v13543_v35 }
0x2fcb   : > { %13568 = vmatpush3.bf16.msra.mxu1 %v13567_v6  ;;  %13546 = vmatpush1.bf16.msra.mxu0 %v13545_v17 }
0x2fcc   : > { %13569 = vmatprep.subr.bf16.mxu1 %v15269_v0  ;;  %13548 = vmatprep.subr.bf16.mxu0 %v13547_v27  ;;  %v8201_v27 = vrot.slane %v8196_v26, %v15927_v50 }
0x2fcf   : > { %13571 = vmatpush3.bf16.msra.mxu1 %v13570_v61 }
0x2fd0   : > { %13572 = vmatprep.subr.bf16.mxu1 %v15269_v0 }
0x3035   : > { %v8096_v55 = vpop.xlane.xlu0 %8095 }
0x3036   : > { %v8101_v33 = vmul.f32 0.0078125, %v8096_v55  ;;  %v8191_v55 = vld [vmem:[#allocation11 + $0x2e0] sm:$0xff] }
0x3038   : > { %v17211_v40 = vsub.f32 %v17196_v19, %v8101_v33  ;;  %v13549_v33 = vpack.c.bf16 %v8192_v56, %v8189_v22 }
0x303a   : > { %v8107_v23 = vmul.f32 %v17211_v40, %v17211_v40  ;;  %13550 = vmatpush1.bf16.msra.mxu0 %v13549_v33 }
0x303b   : > { %13575 = vmatprep.subr.bf16.mxu0 %v15269_v0 }
0x303c   : > { %8110 = vadd.xlane.f32.xlu1 %v8107_v23  ;;  %v8194_v23 = vld [vmem:[#allocation11 + $0x2f8] sm:$0xff] }
0x3042   : > { %v8098_v51 = vpop.xlane.xlu1 %8097 }
0x3043   : > { %v8102_v57 = vmul.f32 0.0078125, %v8098_v51  ;;  %v13573_v51 = vpack.c.bf16 %v8194_v23, %v8191_v55 }
0x3045   : > { %v17216_v5 = vsub.f32 %v17200_v45, %v8102_v57  ;;  %13574 = vmatpush3.bf16.msra.mxu1 %v13573_v51 }
0x3046   : > { %13586 = vmatprep.subr.bf16.mxu1 %v15269_v0 }
0x3047   : > { %v8100_v21 = vpop.xlane.xlu0 %8099  ;;  %v8108_v1 = vmul.f32 %v17216_v5, %v17216_v5 }
0x3048   : > { %v8103_v47 = vmul.f32 0.0078125, %v8100_v21 }
0x3049   : > { %8112 = vadd.xlane.f32.xlu0 %v8108_v1 }
0x304a   : > { %v17221_v52 = vsub.f32 %v17204_v34, %v8103_v47 }
0x304c   : > { %v8109_v4 = vmul.f32 %v17221_v52, %v17221_v52 }
0x304e   : > { %8114 = vadd.xlane.f32.xlu1 %v8109_v4 }
0x30c9   : > { %v8111_v57 = vpop.xlane.xlu1 %8110 }
0x30ca   : > { %v8116_v21 = vmul.f32 0.0078125, %v8111_v57 }
0x30cc   : > { %v8119_v1 = vadd.f32 1e-05, %v8116_v21 }
0x30ce   : > { %14482 = vrsqrt.f32 %v8119_v1 }
0x30d6   : > { %v8113_v47 = vpop.xlane.xlu0 %8112 }
0x30d7   : > { %v8117_v4 = vmul.f32 0.0078125, %v8113_v47 }
0x30d8   : > { %v14483_v11 = vpop.eup %14482 }
0x30d9   : > { %v8125_v8 = vmul.f32 %v14483_v11, %v17211_v40  ;;  %v8120_v48 = vadd.f32 1e-05, %v8117_v4 }
0x30db   : > { %14484 = vrsqrt.f32 %v8120_v48  ;;  %v8115_v44 = vpop.xlane.xlu1 %8114  ;;  %v8134_v20 = vmul.f32 %v10854_v60, %v8125_v8 }
0x30dc   : > { %v8118_v15 = vmul.f32 0.0078125, %v8115_v44 }
0x30dd   : > { %v8143_v9 = vadd.f32 %v10855_v32, %v8134_v20 }
0x30de   : > { %v8121_v54 = vadd.f32 1e-05, %v8118_v15 }
0x30df   : > { %8278 = vmatmul.mubr.f32.vlgmr.msra.gmra.mrb[90].mxu0 %v8143_v9  ;;  %12395 = vmatmul.mubr.f32.vlgmr.msra.gmra.mrb[102].mxu1 %v8143_v9 }
0x30e0   : > { %14486 = vrsqrt.f32 %v8121_v54  ;;  %8283 = vmatprep.mubr.f32.mxu0 %v15270_v41  ;;  %12397 = vmatprep.mubr.msk.f32.mxu1 %vm15274_vm6, %v15270_v41 }
0x30e5   : > { %v14485_v49 = vpop.eup %14484 }
0x30e6   : > { %v8126_v39 = vmul.f32 %v14485_v49, %v17216_v5 }
0x30e8   : > { %v8135_v40 = vmul.f32 %v10854_v60, %v8126_v39 }
0x30ea   : > { %v14487_v28 = vpop.eup %14486  ;;  %v8144_v12 = vadd.f32 %v10855_v32, %v8135_v40 }
0x30eb   : > { %v8127_v38 = vmul.f32 %v14487_v28, %v17221_v52 }
0x30ec   : > { %8284 = vmatmul.mubr.f32.gmra.mrb[92].mxu0 %v8144_v12  ;;  %12398 = vmatmul.mubr.f32.gmra.mrb[104].mxu1 %v8144_v12 }
0x30ed   : > { %8289 = vmatprep.mubr.f32.mxu0 %v15270_v41  ;;  %12400 = vmatprep.mubr.msk.f32.mxu1 %vm15274_vm6, %v15270_v41  ;;  %v8136_v25 = vmul.f32 %v10854_v60, %v8127_v38 }
0x30ef   : > { %v8145_v42 = vadd.f32 %v10855_v32, %v8136_v25 }
0x30f1   : > { %8290 = vmatmul.mubr.f32.gmra.mrb[94].mxu0 %v8145_v42  ;;  %12401 = vmatmul.mubr.f32.gmra.mrb[106].mxu1 %v8145_v42 }
0x30f2   : > { %12409 = vmatprep.mubr.msk.f32.mxu0 %vm15274_vm6, %v15270_v41  ;;  %12454 = vmatprep.mubr.msk.f32.mxu1 %vm15274_vm6, %v15270_v41 }
0x31b2   : > { %v8279_v5 = vpop.f32.mrb[90].mxu0  ;;  %v8362_v29 = vpop.f32.mrb[102].mxu1 }
0x31b3   : > { %v8281_v52 = vpop.f32.mrb[91].mxu0  ;;  %v12396_v7 = vpop.f32.mrb[103].mxu1  ;;  %v8363_v18 = vadd.f32 %v8362_v29, %v8209_v2  ;;  %v8280_v56 = vadd.f32 %v8279_v5, %v8201_v27 }
0x31b4   : > { %v8282_v30 = vadd.f32 %v8281_v52, %v8205_v13 }
0x31bf   : > { %v8285_v37 = vpop.f32.mrb[92].mxu0  ;;  %v8367_v36 = vpop.f32.mrb[104].mxu1 }
0x31c0   : > { %v8368_v14 = vadd.f32 %v8367_v36, %v8209_v2  ;;  %v8287_v6 = vpop.f32.mrb[93].mxu0  ;;  %v12399_v16 = vpop.f32.mrb[105].mxu1  ;;  %v8286_v55 = vadd.f32 %v8285_v37, %v8201_v27 }
0x31c1   : > { %v8288_v35 = vadd.f32 %v8287_v6, %v8205_v13 }
0x31c2   : > { %v13580_v46 = vpack.c.bf16 %v8368_v14, %v8363_v18  ;;  %v17246_v43 = vpack.i.bf16 %v8368_v14, %v8363_v18 }
0x31c3   : > { %v13576_v58 = vpack.c.bf16 %v8288_v35, %v8282_v30  ;;  %v14176_v17 = vpack.i.bf16 %v8288_v35, %v8282_v30 }
0x31c4   : > { %v8291_v59 = vpop.f32.mrb[94].mxu0  ;;  %v8372_v61 = vpop.f32.mrb[106].mxu1 }
0x31c5   : > { %v8293_v10 = vpop.f32.mrb[95].mxu0  ;;  %v12402_v63 = vpop.f32.mrb[107].mxu1  ;;  %14177 = vrot.lane.b32.xlu1 %v14176_v17, %s17858_s22  ;;  %13578 = vmatpush3.bf16.xpose.msk.msra.mxu0 %vm15943_vm2, %v13576_v58  ;;  %v17259_v33 = vadd.f32 %v8372_v61, %v8209_v2  ;;  %v8292_v23 = vadd.f32 %v8291_v59, %v8201_v27 }
0x31c6   : > { %12407 = vmatprep.subr.mxu0 %v15270_v41  ;;  %v8294_v22 = vadd.f32 %v8293_v10, %v8205_v13 }
0x31cd   : > { %12408 = vmatpush3.xpose.msk.msra.mxu0 %vm1962_vm1, %v8294_v22 }
0x31ce   : > { %13579 = vmatprep.subr.bf16.mxu0 %v15269_v0 }
0x31d0   : > { %12410 = vmatmul.mubr.msk.f32.vlgmr.msra.gmra.mrb[96].mxu0 %vm1962_vm1, %v8280_v56 }
0x31d1   : > { %13581 = vmatpush3.bf16.msra.mxu0 %v13580_v46  ;;  %12412 = vmatprep.mubr.msk.f32.mxu0 %vm15274_vm6, %v15270_v41 }
0x31d2   : > { %12422 = vmatprep.subr.mxu0 %v15270_v41 }
0x31d4   : > { %12413 = vmatmul.mubr.msk.f32.gmra.mrb[98].mxu0 %vm1962_vm1, %v8286_v55 }
0x31d5   : > { %12423 = vmatpush3.msra.mxu0 %v17259_v33  ;;  %12415 = vmatprep.mubr.msk.f32.mxu0 %vm15274_vm6, %v15270_v41 }
0x31d6   : > { %13582 = vmatprep.subr.bf16.mxu0 %v15269_v0 }
0x31d8   : > { %12416 = vmatmul.mubr.msk.f32.gmra.mrb[100].mxu0 %vm1962_vm1, %v8292_v23 }
0x31d9   : > { %12424 = vmatprep.mubr.msk.f32.mxu0 %vm15274_vm6, %v15270_v41 }
0x3237   : > { %v14178_v54 = vpop.permute.xlu1 %14177 }
0x3238   : > { %v14180_v29 = vunpack.i.h.bf16 %v14178_v54  ;;  %v14179_v52 = vunpack.i.l.bf16 %v14178_v54 }
0x323a   : > { %v13583_v37 = vpack.c.bf16 %v14180_v29, %v14179_v52 }
0x32a3   : > { %v8460_v51 = vpop.f32.mrb[96].mxu0 }
0x32a4   : > { %v8474_v57 = vmul.f32 0.17677669, %v8460_v51  ;;  %v12411_v21 = vpop.f32.mrb[97].mxu0 }
0x32a6   : > { %v8477_v1 = vadd.f32 %v8474_v57, %v16853_v24 }
0x32a7   : > { %v8465_v47 = vpop.f32.mrb[98].mxu0 }
0x32a8   : > { %v8475_v4 = vmul.f32 0.17677669, %v8465_v47  ;;  %v12414_v11 = vpop.f32.mrb[99].mxu0  ;;  %v8480_v60 = vsel %vm6456_vm12, %v8477_v1, -inf }
0x32a9   : > { %8481 = vmax.xlane.f32.xlu0 %v8480_v60 }
0x32aa   : > { %v8478_v8 = vadd.f32 %v8475_v4, %v16853_v24 }
0x32ab   : > { %v8470_v48 = vpop.f32.mrb[100].mxu0 }
0x32ac   : > { %v8476_v32 = vmul.f32 0.17677669, %v8470_v48  ;;  %v12417_v44 = vpop.f32.mrb[101].mxu0  ;;  %v8483_v20 = vsel %vm6456_vm12, %v8478_v8, -inf }
0x32ad   : > { %8484 = vmax.xlane.f32.xlu1 %v8483_v20 }
0x32ae   : > { %v8479_v15 = vadd.f32 %v8476_v32, %v16853_v24 }
0x32b0   : > { %v8486_v9 = vsel %vm6456_vm12, %v8479_v15, -inf }
0x32b1   : > { %8487 = vmax.xlane.f32.xlu0 %v8486_v9 }
0x32be   : > { %14182 = vrot.lane.b32.xlu1 %v14176_v17, %s17872_s0 }
0x32c2   : > { %8602 = vrot.lane.b32.xlu1 %v8280_v56, %s17858_s22 }
0x32c6   : > { %8606 = vrot.lane.b32.xlu1 %v8292_v23, %s17858_s22 }
0x32c7   : > { %8612 = vrot.lane.b32.xlu0 %v8294_v22, %s17858_s22 }
0x32ca   : > { %14187 = vrot.lane.b32.xlu1 %v14176_v17, %s17873_s26 }
0x32cb   : > { %8604 = vrot.lane.b32.xlu0 %v8286_v55, %s17858_s22 }
0x32ce   : > { %8848 = vrot.lane.b32.xlu1 %v8286_v55, %s17872_s0 }
0x32cf   : > { %8856 = vrot.lane.b32.xlu0 %v8294_v22, %s17872_s0 }
0x32d2   : > { %9097 = vrot.lane.b32.xlu1 %v8294_v22, %s17873_s26 }
0x32d3   : > { %8846 = vrot.lane.b32.xlu0 %v8280_v56, %s17872_s0 }
0x32d6   : > { %9089 = vrot.lane.b32.xlu1 %v8286_v55, %s17873_s26 }
0x32d7   : > { %8850 = vrot.lane.b32.xlu0 %v8292_v23, %s17872_s0 }
0x32da   : > { %8737 = vrot.lane.b32.xlu1 %v17259_v33, %s17858_s22 }
0x32db   : > { %9087 = vrot.lane.b32.xlu0 %v8280_v56, %s17873_s26 }
0x32df   : > { %9091 = vrot.lane.b32.xlu0 %v8292_v23, %s17873_s26 }
0x32e3   : > { %14192 = vrot.lane.b32.xlu0 %v17246_v43, %s17858_s22 }
0x3336   : > { %v8482_v49 = vpop.xlane.xlu0 %8481 }
0x3337   : > { %v8489_v39 = vsub.f32 %v8477_v1, %v8482_v49 }
0x3339   : > { %v8492_v40 = vmul.f32 1.442695, %v8489_v39 }
0x333a   : > { %v8485_v28 = vpop.xlane.xlu1 %8484 }
0x333b   : > { %14488 = vpow2.f32 %v8492_v40  ;;  %v8490_v12 = vsub.f32 %v8478_v8, %v8485_v28 }
0x333d   : > { %v8494_v38 = vmul.f32 1.442695, %v8490_v12 }
0x333e   : > { %v14183_v25 = vpop.permute.xlu1 %14182  ;;  %v8488_v42 = vpop.xlane.xlu0 %8487 }
0x333f   : > { %14490 = vpow2.f32 %v8494_v38  ;;  %v8491_v5 = vsub.f32 %v8479_v15, %v8488_v42  ;;  %v14185_v30 = vunpack.i.h.bf16 %v14183_v25  ;;  %v14184_v35 = vunpack.i.l.bf16 %v14183_v25 }
0x3341   : > { %v8496_v7 = vmul.f32 1.442695, %v8491_v5  ;;  %v13590_v17 = vpack.c.bf16 %v14185_v30, %v14184_v35 }
0x3342   : > { %v8603_v26 = vpop.permute.xlu1 %8602  ;;  %v8613_v2 = vpop.permute.xlu0 %8612 }
0x3343   : > { %14492 = vpow2.f32 %v8496_v7 }
0x3345   : > { %v17293_v13 = vpop.eup %14488 }
0x3346   : > { %12425 = vmatmul.mubr.msk.f32.vlgmr.msra.gmra.mrb[102].mxu0 %vm6456_vm12, %v17293_v13  ;;  %v8605_v36 = vpop.permute.xlu0 %8604  ;;  %v8607_v18 = vpop.permute.xlu1 %8606 }
0x3347   : > { %13585 = vmatpush3.bf16.xpose.msk.msra.mxu0 %vm15943_vm2, %v13583_v37  ;;  %12427 = vmatprep.mubr.msk.f32.mxu0 %vm15274_vm6, %v15270_v41 }
0x3348   : > { %12437 = vmatprep.subr.mxu0 %v15270_v41 }
0x3349   : > { %v17302_v14 = vpop.eup %14490 }
0x334a   : > { %12428 = vmatmul.mubr.msk.f32.gmra.mrb[104].mxu0 %vm6456_vm12, %v17302_v14  ;;  %v8857_v6 = vpop.permute.xlu0 %8856  ;;  %v14188_v46 = vpop.permute.xlu1 %14187 }
0x334b   : > { %12430 = vmatprep.mubr.msk.f32.mxu0 %vm15274_vm6, %v15270_v41  ;;  %v14190_v63 = vunpack.i.h.bf16 %v14188_v46  ;;  %v14189_v27 = vunpack.i.l.bf16 %v14188_v46 }
0x334d   : > { %v17308_v16 = vpop.eup %14492  ;;  %v13597_v55 = vpack.c.bf16 %v14190_v63, %v14189_v27 }
0x334e   : > { %12431 = vmatmul.mubr.msk.f32.gmra.mrb[106].mxu0 %vm6456_vm12, %v17308_v16  ;;  %v8847_v58 = vpop.permute.xlu0 %8846  ;;  %v8849_v61 = vpop.permute.xlu1 %8848 }
0x334f   : > { %12438 = vmatpush3.xpose.msk.msra.mxu0 %vm1962_vm1, %v8613_v2  ;;  %12439 = vmatprep.mubr.msk.f32.mxu0 %vm15274_vm6, %v15270_v41 }
0x3350   : > { %13589 = vmatprep.subr.bf16.mxu0 %v15269_v0 }
0x3352   : > { %12440 = vmatmul.mubr.msk.f32.vlgmr.msra.gmra.mrb[108].mxu0 %vm1962_vm1, %v8603_v26  ;;  %v8851_v59 = vpop.permute.xlu0 %8850  ;;  %v9098_v22 = vpop.permute.xlu1 %9097 }
0x3353   : > { %13592 = vmatpush3.bf16.xpose.msk.msra.mxu0 %vm15943_vm2, %v13590_v17  ;;  %12442 = vmatprep.mubr.msk.f32.mxu0 %vm15274_vm6, %v15270_v41 }
0x3354   : > { %12467 = vmatprep.subr.mxu0 %v15270_v41 }
0x3356   : > { %12443 = vmatmul.mubr.msk.f32.gmra.mrb[110].mxu0 %vm1962_vm1, %v8605_v36  ;;  %v9088_v10 = vpop.permute.xlu0 %9087  ;;  %v9090_v21 = vpop.permute.xlu1 %9089 }
0x3357   : > { %12445 = vmatprep.mubr.msk.f32.mxu0 %vm15274_vm6, %v15270_v41 }
0x335a   : > { %12446 = vmatmul.mubr.msk.f32.gmra.mrb[112].mxu0 %vm1962_vm1, %v8607_v18  ;;  %v9092_v56 = vpop.permute.xlu0 %9091  ;;  %v8738_v47 = vpop.permute.xlu1 %8737 }
0x335b   : > { %12468 = vmatpush3.xpose.msk.msra.mxu0 %vm1962_vm1, %v8857_v6  ;;  %12469 = vmatprep.mubr.msk.f32.mxu0 %vm15274_vm6, %v15270_v41 }
0x335c   : > { %13596 = vmatprep.subr.bf16.mxu0 %v15269_v0 }
0x335e   : > { %12470 = vmatmul.mubr.msk.f32.vlgmr.msra.gmra.mrb[114].mxu0 %vm1962_vm1, %v8847_v58  ;;  %v14193_v23 = vpop.permute.xlu0 %14192 }
0x335f   : > { %13599 = vmatpush3.bf16.xpose.msk.msra.mxu0 %vm15943_vm2, %v13597_v55  ;;  %v14195_v51 = vunpack.i.h.bf16 %v14193_v23  ;;  %v14194_v57 = vunpack.i.l.bf16 %v14193_v23  ;;  %12472 = vmatprep.mubr.msk.f32.mxu0 %vm15274_vm6, %v15270_v41 }
0x3360   : > { %12497 = vmatprep.subr.mxu0 %v15270_v41 }
0x3361   : > { %v13587_v1 = vpack.c.bf16 %v14195_v51, %v14194_v57 }
0x3362   : > { %12473 = vmatmul.mubr.msk.f32.gmra.mrb[116].mxu0 %vm1962_vm1, %v8849_v61 }
0x3363   : > { %13588 = vmatpush3.bf16.msra.mxu1 %v13587_v1  ;;  %12475 = vmatprep.mubr.msk.f32.mxu0 %vm15274_vm6, %v15270_v41 }
0x3364   : > { %12452 = vmatprep.subr.mxu1 %v15270_v41 }
0x3366   : > { %12476 = vmatmul.mubr.msk.f32.gmra.mrb[118].mxu0 %vm1962_vm1, %v8851_v59 }
0x3367   : > { %12498 = vmatpush3.xpose.msk.msra.mxu0 %vm1962_vm1, %v9098_v22  ;;  %12453 = vmatpush3.msra.mxu1 %v8738_v47 }
0x3368   : > { %12499 = vmatprep.mubr.msk.f32.mxu0 %vm15274_vm6, %v15270_v41  ;;  %13593 = vmatprep.subr.bf16.mxu1 %v15269_v0 }
0x3369   : > { %13603 = vmatprep.subr.bf16.mxu0 %v15269_v0 }
0x336a   : > { %12500 = vmatmul.mubr.msk.f32.vlgmr.msra.gmra.mrb[120].mxu0 %vm1962_vm1, %v9088_v10 }
0x336b   : > { %12502 = vmatprep.mubr.msk.f32.mxu0 %vm15274_vm6, %v15270_v41 }
0x336e   : > { %12503 = vmatmul.mubr.msk.f32.gmra.mrb[122].mxu0 %vm1962_vm1, %v9090_v21 }
0x336f   : > { %12505 = vmatprep.mubr.msk.f32.mxu0 %vm15274_vm6, %v15270_v41 }
0x3372   : > { %12506 = vmatmul.mubr.msk.f32.gmra.mrb[124].mxu0 %vm1962_vm1, %v9092_v56 }
0x3373   : > { %12555 = vmatprep.mubr.msk.f32.mxu0 %vm15274_vm6, %v15270_v41 }
0x3419   : > { %v17355_v62 = vpop.f32.mrb[102].mxu0 }
0x341a   : > { %v12426_v4 = vpop.f32.mrb[103].mxu0 }
0x341d   : > { %v17357_v11 = vpop.f32.mrb[104].mxu0 }
0x341e   : > { %v12429_v60 = vpop.f32.mrb[105].mxu0 }
0x3421   : > { %v17359_v8 = vpop.f32.mrb[106].mxu0 }
0x3422   : > { %v12432_v48 = vpop.f32.mrb[107].mxu0 }
0x3425   : > { %v8692_v32 = vpop.f32.mrb[108].mxu0 }
0x3426   : > { %v8706_v44 = vmul.f32 0.17677669, %v8692_v32  ;;  %v12441_v20 = vpop.f32.mrb[109].mxu0 }
0x3428   : > { %v8709_v15 = vadd.f32 %v8706_v44, %v16853_v24 }
0x3429   : > { %v8697_v9 = vpop.f32.mrb[110].mxu0 }
0x342a   : > { %v8707_v54 = vmul.f32 0.17677669, %v8697_v9  ;;  %v12444_v49 = vpop.f32.mrb[111].mxu0  ;;  %v8712_v39 = vsel %vm6456_vm12, %v8709_v15, -inf }
0x342b   : > { %8713 = vmax.xlane.f32.xlu1 %v8712_v39 }
0x342c   : > { %v8710_v40 = vadd.f32 %v8707_v54, %v16853_v24 }
0x342d   : > { %v8702_v28 = vpop.f32.mrb[112].mxu0 }
0x342e   : > { %v8708_v12 = vmul.f32 0.17677669, %v8702_v28  ;;  %v12447_v38 = vpop.f32.mrb[113].mxu0  ;;  %v8715_v25 = vsel %vm6456_vm12, %v8710_v40, -inf }
0x342f   : > { %8716 = vmax.xlane.f32.xlu0 %v8715_v25 }
0x3430   : > { %v8711_v42 = vadd.f32 %v8708_v12, %v16853_v24 }
0x3431   : > { %v8936_v5 = vpop.f32.mrb[114].mxu0 }
0x3432   : > { %v12471_v29 = vpop.f32.mrb[115].mxu0  ;;  %v8718_v52 = vsel %vm6456_vm12, %v8711_v42, -inf  ;;  %v8950_v58 = vmul.f32 0.17677669, %v8936_v5 }
0x3433   : > { %8719 = vmax.xlane.f32.xlu0 %v8718_v52 }
0x3434   : > { %v8953_v17 = vadd.f32 %v8950_v58, %v16853_v24 }
0x3435   : > { %v8941_v7 = vpop.f32.mrb[116].mxu0 }
0x3436   : > { %v12474_v26 = vpop.f32.mrb[117].mxu0  ;;  %v8951_v61 = vmul.f32 0.17677669, %v8941_v7  ;;  %v8956_v27 = vsel %vm6456_vm12, %v8953_v17, -inf }
0x3438   : > { %v8954_v22 = vadd.f32 %v8951_v61, %v16853_v24 }
0x3439   : > { %v8946_v2 = vpop.f32.mrb[118].mxu0 }
0x343a   : > { %v12477_v37 = vpop.f32.mrb[119].mxu0  ;;  %v8952_v59 = vmul.f32 0.17677669, %v8946_v2  ;;  %v8959_v23 = vsel %vm6456_vm12, %v8954_v22, -inf }
0x343c   : > { %8978 = vrot.lane.b32.xlu1 %v17259_v33, %s17872_s0  ;;  %v8955_v10 = vadd.f32 %v8952_v59, %v16853_v24 }
0x343d   : > { %v9177_v36 = vpop.f32.mrb[120].mxu0 }
0x343e   : > { %v12501_v18 = vpop.f32.mrb[121].mxu0  ;;  %v9191_v63 = vmul.f32 0.17677669, %v9177_v36  ;;  %v8962_v55 = vsel %vm6456_vm12, %v8955_v10, -inf }
0x3440   : > { %v9194_v56 = vadd.f32 %v9191_v63, %v16853_v24 }
0x3441   : > { %v17369_v6 = vpop.f32.mrb[122].mxu0 }
0x3442   : > { %v12504_v30 = vpop.f32.mrb[123].mxu0  ;;  %v9197_v51 = vsel %vm6456_vm12, %v9194_v56, -inf  ;;  %v9192_v63 = vmul.f32 0.17677669, %v17369_v6 }
0x3445   : > { %v17371_v35 = vpop.f32.mrb[124].mxu0 }
0x3446   : > { %v12507_v46 = vpop.f32.mrb[125].mxu0  ;;  %v9193_v37 = vmul.f32 0.17677669, %v17371_v35 }
0x3448   : > { %v9196_v59 = vadd.f32 %v9193_v37, %v16853_v24 }
0x3449   : > { %14197 = vrot.lane.b32.xlu0 %v17246_v43, %s17872_s0 }
0x3460   : > { %8957 = vmax.xlane.f32.xlu1 %v8956_v27 }
0x3464   : > { %8963 = vmax.xlane.f32.xlu1 %v8962_v55 }
0x3468   : > { %8960 = vmax.xlane.f32.xlu0 %v8959_v23  ;;  %9198 = vmax.xlane.f32.xlu1 %v9197_v51 }
0x3479   : > { %9219 = vrot.lane.b32.xlu1 %v17259_v33, %s17873_s26 }
0x347e   : > { %14202 = vrot.lane.b32.xlu0 %v17246_v43, %s17873_s26 }
0x34b8   : > { %v8714_v57 = vpop.xlane.xlu1 %8713 }
0x34b9   : > { %v8721_v21 = vsub.f32 %v8709_v15, %v8714_v57 }
0x34bb   : > { %v8724_v1 = vmul.f32 1.442695, %v8721_v21  ;;  %v9374_v21 = vld [vmem:[#allocation14 + $0x80] sm:$0xff] }
0x34bc   : > { %v8717_v47 = vpop.xlane.xlu0 %8716  ;;  %v8979_v39 = vpop.permute.xlu1 %8978 }
0x34bd   : > { %14494 = vpow2.f32 %v8724_v1  ;;  %v8722_v4 = vsub.f32 %v8710_v40, %v8717_v47  ;;  %v9375_v1 = vld [vmem:[#allocation14 + $0x88] sm:$0xff]  ;;  %v9376_v47 = vld [vmem:[#allocation14 + $0x90] sm:$0xff] }
0x34bf   : > { %v8726_v60 = vmul.f32 1.442695, %v8722_v4 }
0x34c0   : > { %v8720_v48 = vpop.xlane.xlu0 %8719 }
0x34c1   : > { %14496 = vpow2.f32 %v8726_v60  ;;  %v8723_v32 = vsub.f32 %v8711_v42, %v8720_v48  ;;  %v13604_v60 = vpack.c.bf16 %v9375_v1, %v9374_v21  ;;  %v9377_v48 = vld [vmem:[#allocation14 + $0x98] sm:$0xff] }
0x34c3   : > { %v8728_v44 = vmul.f32 1.442695, %v8723_v32  ;;  %13605 = vmatpush3.bf16.msra.mxu0 %v13604_v60 }
0x34c4   : > { %v14198_v20 = vpop.permute.xlu0 %14197  ;;  %13606 = vmatprep.subr.bf16.mxu0 %v15269_v0 }
0x34c5   : > { %14498 = vpow2.f32 %v8728_v44  ;;  %v14200_v9 = vunpack.i.h.bf16 %v14198_v20  ;;  %v14199_v54 = vunpack.i.l.bf16 %v14198_v20  ;;  %v13607_v44 = vpack.c.bf16 %v9377_v48, %v9376_v47  ;;  %v9379_v20 = vld [vmem:[#allocation14 + $0xa8] sm:$0xff] }
0x34c7   : > { %v14495_v49 = vpop.eup %14494  ;;  %v13594_v33 = vpack.c.bf16 %v14200_v9, %v14199_v54  ;;  %13608 = vmatpush3.bf16.msra.mxu0 %v13607_v44 }
0x34c8   : > { %12455 = vmatmul.mubr.msk.f32.vlgmr.msra.gmra.mrb[108].mxu1 %vm6456_vm12, %v14495_v49  ;;  %v8831_v43 = vsel %vm6456_vm12, %v14495_v49, 0.0  ;;  %13609 = vmatprep.subr.bf16.mxu0 %v15269_v0 }
0x34c9   : > { %13595 = vmatpush3.bf16.msra.mxu1 %v13594_v33  ;;  %8832 = vadd.xlane.f32.xlu0 %v8831_v43 }
0x34ca   : > { %12457 = vmatprep.mubr.msk.f32.mxu1 %vm15274_vm6, %v15270_v41  ;;  %12482 = vmatprep.subr.mxu1 %v15270_v41 }
0x34cb   : > { %v17392_v15 = vpop.eup %14496 }
0x34cc   : > { %12458 = vmatmul.mubr.msk.f32.gmra.mrb[110].mxu1 %vm6456_vm12, %v17392_v15 }
0x34cd   : > { %12483 = vmatpush3.msra.mxu1 %v8979_v39  ;;  %12460 = vmatprep.mubr.msk.f32.mxu1 %vm15274_vm6, %v15270_v41 }
0x34ce   : > { %13600 = vmatprep.subr.bf16.mxu1 %v15269_v0 }
0x34cf   : > { %v17399_v40 = vpop.eup %14498 }
0x34d0   : > { %12461 = vmatmul.mubr.msk.f32.gmra.mrb[112].mxu1 %vm6456_vm12, %v17399_v40 }
0x34d1   : > { %12484 = vmatprep.mubr.msk.f32.mxu1 %vm15274_vm6, %v15270_v41 }
0x34ed   : > { %v8958_v28 = vpop.xlane.xlu1 %8957 }
0x34ee   : > { %v8965_v12 = vsub.f32 %v8953_v17, %v8958_v28 }
0x34f0   : > { %v8968_v38 = vmul.f32 1.442695, %v8965_v12  ;;  %v9380_v12 = vld [vmem:[#allocation14 + $0xb0] sm:$0xff] }
0x34f1   : > { %v8964_v25 = vpop.xlane.xlu1 %8963 }
0x34f2   : > { %14500 = vpow2.f32 %v8968_v38  ;;  %v8967_v29 = vsub.f32 %v8955_v10, %v8964_v25  ;;  %v9203_v10 = vsel %vm6456_vm12, %v9196_v59, -inf  ;;  %v9381_v38 = vld [vmem:[#allocation14 + $0xb8] sm:$0xff] }
0x34f4   : > { %v8972_v18 = vmul.f32 1.442695, %v8967_v29  ;;  %v13613_v29 = vpack.c.bf16 %v9381_v38, %v9380_v12 }
0x34f5   : > { %v8961_v42 = vpop.xlane.xlu0 %8960  ;;  %v9199_v5 = vpop.xlane.xlu1 %9198 }
0x34f6   : > { %v8966_v52 = vsub.f32 %v8954_v22, %v8961_v42  ;;  %v9206_v7 = vsub.f32 %v9194_v56, %v9199_v5  ;;  %v9195_v56 = vadd.f32 %v9192_v63, %v16853_v24  ;;  %v8587_v24 = vsel %vm6456_vm12, %v17293_v13, 0.0  ;;  %v9378_v13 = vld [vmem:[#allocation14 + $0xa0] sm:$0xff]  ;;  %v9388_v63 = vld [vmem:[#allocation14 + $0xf0] sm:$0xff] }
0x34f7   : > { %v13610_v33 = vpack.c.bf16 %v9379_v20, %v9378_v13 }
0x34f8   : > { %v8970_v26 = vmul.f32 1.442695, %v8966_v52  ;;  %v9209_v2 = vmul.f32 1.442695, %v9206_v7  ;;  %v9200_v6 = vsel %vm6456_vm12, %v9195_v56, -inf }
0x34f9   : > { %v14203_v36 = vpop.permute.xlu0 %14202  ;;  %v9220_v35 = vpop.permute.xlu1 %9219  ;;  %13611 = vmatpush3.bf16.msra.mxu0 %v13610_v33  ;;  %v8593_v33 = vsel %vm6456_vm12, %v17308_v16, 0.0 }
0x34fa   : > { %14502 = vpow2.f32 %v8970_v26  ;;  %v14205_v30 = vunpack.i.h.bf16 %v14203_v36  ;;  %v14204_v46 = vunpack.i.l.bf16 %v14203_v36  ;;  %13612 = vmatprep.subr.bf16.mxu0 %v15269_v0 }
0x34fb   : > { %14504 = vpow2.f32 %v9209_v2 }
0x34fc   : > { %v14501_v58 = vpop.eup %14500  ;;  %v13601_v17 = vpack.c.bf16 %v14205_v30, %v14204_v46  ;;  %14506 = vpow2.f32 %v8972_v18  ;;  %v9382_v18 = vld [vmem:[#allocation14 + $0xc0] sm:$0xff]  ;;  %v9383_v30 = vld [vmem:[#allocation14 + $0xc8] sm:$0xff]  ;;  %v9384_v46 = vld [vmem:[#allocation14 + $0xd0] sm:$0xff] }
0x34fd   : > { %12485 = vmatmul.mubr.msk.f32.vlgmr.msra.gmra.mrb[114].mxu1 %vm6456_vm12, %v14501_v58  ;;  %v9072_v61 = vsel %vm6456_vm12, %v14501_v58, 0.0  ;;  %13614 = vmatpush3.bf16.msra.mxu0 %v13613_v29  ;;  %v13616_v58 = vpack.c.bf16 %v9383_v30, %v9382_v18 }
0x34fe   : > { %13602 = vmatpush3.bf16.msra.mxu1 %v13601_v17  ;;  %9073 = vadd.xlane.f32.xlu1 %v9072_v61  ;;  %v9385_v17 = vld [vmem:[#allocation14 + $0xd8] sm:$0xff]  ;;  %v9386_v61 = vld [vmem:[#allocation14 + $0xe0] sm:$0xff] }
0x34ff   : > { %12512 = vmatprep.subr.mxu1 %v15270_v41  ;;  %12487 = vmatprep.mubr.msk.f32.mxu1 %vm15274_vm6, %v15270_v41 }
0x3500   : > { %13615 = vmatprep.subr.bf16.mxu0 %v15269_v0 }
0x3501   : > { %13617 = vmatpush3.bf16.msra.mxu0 %v13616_v58 }
0x3502   : > { %12513 = vmatpush3.msra.mxu1 %v9220_v35  ;;  %9204 = vmax.xlane.f32.xlu1 %v9203_v10  ;;  %v9387_v35 = vld [vmem:[#allocation14 + $0xe8] sm:$0xff] }
0x3503   : > { %13618 = vmatprep.subr.bf16.mxu0 %v15269_v0  ;;  %v13622_v10 = vpack.c.bf16 %v9387_v35, %v9386_v61 }
0x3504   : > { %v17414_v27 = vpop.eup %14502 }
0x3505   : > { %v14505_v22 = vpop.eup %14504  ;;  %12488 = vmatmul.mubr.msk.f32.gmra.mrb[116].mxu1 %vm6456_vm12, %v17414_v27  ;;  %v9075_v13 = vsel %vm6456_vm12, %v17414_v27, 0.0 }
0x3506   : > { %v9313_v55 = vsel %vm6456_vm12, %v14505_v22, 0.0  ;;  %12490 = vmatprep.mubr.msk.f32.mxu1 %vm15274_vm6, %v15270_v41  ;;  %v17422_v23 = vpop.eup %14506 }
0x3507   : > { %9314 = vadd.xlane.f32.xlu0 %v9313_v55 }
0x3509   : > { %12491 = vmatmul.mubr.msk.f32.gmra.mrb[118].mxu1 %vm6456_vm12, %v17422_v23 }
0x350a   : > { %12514 = vmatprep.mubr.msk.f32.mxu1 %vm15274_vm6, %v15270_v41 }
0x350b   : > { %9201 = vmax.xlane.f32.xlu0 %v9200_v6 }
0x350d   : > { %12515 = vmatmul.mubr.msk.f32.vlgmr.msra.gmra.mrb[120].mxu1 %vm6456_vm12, %v14505_v22  ;;  %v9389_v22 = vld [vmem:[#allocation14 + $0xf8] sm:$0xff] }
0x350e   : > { %12517 = vmatprep.mubr.msk.f32.mxu1 %vm15274_vm6, %v15270_v41 }
0x350f   : > { %8588 = vadd.xlane.f32.xlu0 %v8587_v24 }
0x3556   : > { %v8833_v51 = vpop.xlane.xlu0 %8832 }
0x3557   : > { %14508 = vrcp.f32 %v8833_v51  ;;  %v13625_v51 = vpack.c.bf16 %v9389_v22, %v9388_v63 }
0x3561   : > { %v14509_v43 = vpop.eup %14508 }
0x358b   : > { %v9074_v57 = vpop.xlane.xlu1 %9073 }
0x358f   : > { %v9205_v32 = vpop.xlane.xlu1 %9204 }
0x3590   : > { %v9208_v54 = vsub.f32 %v9196_v59, %v9205_v32  ;;  %v13619_v59 = vpack.c.bf16 %v9385_v17, %v9384_v46 }
0x3592   : > { %v9213_v5 = vmul.f32 1.442695, %v9208_v54  ;;  %13620 = vmatpush3.bf16.msra.mxu0 %v13619_v59  ;;  %v8834_v54 = vsel %vm6456_vm12, %v17392_v15, 0.0 }
0x3593   : > { %13621 = vmatprep.subr.bf16.mxu0 %v15269_v0 }
0x3594   : > { %v17434_v4 = vpop.xlane.xlu0 %9314 }
0x3596   : > { %13623 = vmatpush3.bf16.msra.mxu0 %v13622_v10 }
0x3597   : > { %13624 = vmatprep.subr.bf16.mxu0 %v15269_v0 }
0x3598   : > { %v9202_v9 = vpop.xlane.xlu0 %9201 }
0x3599   : > { %v9207_v49 = vsub.f32 %v9195_v56, %v9202_v9  ;;  %v8590_v9 = vsel %vm6456_vm12, %v17302_v14, 0.0 }
0x359a   : > { %13626 = vmatpush3.bf16.msra.mxu0 %v13625_v51 }
0x359b   : > { %v9211_v39 = vmul.f32 1.442695, %v9207_v49  ;;  %v8817_v28 = vpop.f32.mrb[108].mxu1  ;;  %v8837_v49 = vsel %vm6456_vm12, %v17399_v40, 0.0 }
0x359c   : > { %v8841_v25 = vmul.f32 %v14509_v43, %v8817_v28  ;;  %v12456_v42 = vpop.f32.mrb[109].mxu1 }
0x359d   : > { %14510 = vpow2.f32 %v9211_v39 }
0x359e   : > { %9331 = vrot.lane.b32.xlu1 %v8841_v25, %s17873_s26  ;;  %14512 = vpow2.f32 %v9213_v5 }
0x359f   : > { %v17439_v52 = vpop.f32.mrb[110].mxu1  ;;  %14514 = vrcp.f32 %v9074_v57 }
0x35a0   : > { %v12459_v7 = vpop.f32.mrb[111].mxu1  ;;  %14516 = vrcp.f32 %v17434_v4  ;;  %v9078_v4 = vsel %vm6456_vm12, %v17422_v23, 0.0  ;;  %v8589_v23 = vpop.xlane.xlu0 %8588 }
0x35a1   : > { %14518 = vrcp.f32 %v8589_v23  ;;  %v10900_v23 = vld [vmem:[%s17881_s3 + $0x228] sm:$0xff] }
0x35a3   : > { %v17442_v26 = vpop.f32.mrb[112].mxu1 }
0x35a4   : > { %v12462_v2 = vpop.f32.mrb[113].mxu1 }
0x35a7   : > { %v14511_v37 = vpop.eup %14510 }
0x35a8   : > { %12518 = vmatmul.mubr.msk.f32.gmra.mrb[122].mxu1 %vm6456_vm12, %v14511_v37  ;;  %v14513_v36 = vpop.eup %14512  ;;  %v9316_v20 = vsel %vm6456_vm12, %v14511_v37, 0.0 }
0x35a9   : > { %12520 = vmatprep.mubr.msk.f32.mxu1 %vm15274_vm6, %v15270_v41  ;;  %v14515_v56 = vpop.eup %14514  ;;  %v9319_v27 = vsel %vm6456_vm12, %v14513_v36, 0.0 }
0x35aa   : > { %v14517_v60 = vpop.eup %14516 }
0x35ab   : > { %v14519_v43 = vpop.eup %14518 }
0x35ac   : > { %12521 = vmatmul.mubr.msk.f32.gmra.mrb[124].mxu1 %vm6456_vm12, %v14513_v36  ;;  %v8597_v39 = vmul.f32 %v14519_v43, %v17355_v62  ;;  %v10898_v43 = vld [vmem:[%s17881_s3 + $0x218] sm:$0xff] }
0x35ad   : > { %9688 = vmatprep.mubr.f32.mxu1 %v15270_v41 }
0x35d0   : > { %v9058_v55 = vpop.f32.mrb[114].mxu1 }
0x35d1   : > { %v9082_v6 = vmul.f32 %v14515_v56, %v9058_v55  ;;  %v12486_v24 = vpop.f32.mrb[115].mxu1 }
0x35d3   : > { %9343 = vrot.lane.b32.xlu0 %v9082_v6, %s17872_s0 }
0x35d8   : > { %v9063_v57 = vpop.f32.mrb[116].mxu1 }
0x35d9   : > { %v12489_v21 = vpop.f32.mrb[117].mxu1 }
0x35dc   : > { %v9068_v1 = vpop.f32.mrb[118].mxu1 }
0x35dd   : > { %v12492_v47 = vpop.f32.mrb[119].mxu1 }
0x35e0   : > { %v9299_v48 = vpop.f32.mrb[120].mxu1 }
0x35e1   : > { %v9323_v32 = vmul.f32 %v14517_v60, %v9299_v48  ;;  %v12516_v44 = vpop.f32.mrb[121].mxu1 }
0x35e3   : > { %9355 = vrot.lane.b32.xlu1 %v9323_v32, %s17858_s22 }
0x35f2   : > { %9076 = vadd.xlane.f32.xlu0 %v9075_v13 }
0x35f6   : > { %9317 = vadd.xlane.f32.xlu0 %v9316_v20 }
0x35fa   : > { %9079 = vadd.xlane.f32.xlu0 %v9078_v4  ;;  %v17495_v4 = vld [vmem:[#allocation15 + $0x1] ss:$0 sm:$0xff] }
0x35fe   : > { %8591 = vadd.xlane.f32.xlu0 %v8590_v9 }
0x3607   : > { %8835 = vadd.xlane.f32.xlu1 %v8834_v54 }
0x360b   : > { %8838 = vadd.xlane.f32.xlu1 %v8837_v49 }
0x360f   : > { %9320 = vadd.xlane.f32.xlu1 %v9319_v27 }
0x3610   : > { %v9332_v14 = vpop.permute.xlu1 %9331 }
0x3611   : > { %v9364_v15 = vsel %vm1962_vm1, %v8597_v39, %v9332_v14  ;;  %v10902_v39 = vld [vmem:[%s17881_s3 + $0x238] sm:$0xff] }
0x3613   : > { %8594 = vadd.xlane.f32.xlu1 %v8593_v33  ;;  %v10896_v33 = vld [vmem:[%s17881_s3 + $0x208] sm:$0xff] }
0x3614   : > { %v13627_v14 = vpack.c.bf16 %v10900_v23, %v10896_v33  ;;  %v10930_v33 = vld [vmem:[%s17881_s3 + $0x318] sm:$0xff] }
0x3616   : > { %13628 = vmatprep.subr.bf16.mxu1 %v13627_v14  ;;  %v10927_v14 = vld [vmem:[%s17881_s3 + $0x300] sm:$0xff] }
0x3645   : > { %v9344_v28 = vpop.permute.xlu0 %9343 }
0x3646   : > { %v9367_v12 = vsel %vm1578_vm0, %v9364_v15, %v9344_v28  ;;  %v10895_v28 = vld [vmem:[%s17881_s3 + $0x200] sm:$0xff] }
0x3647   : > { %v10899_v15 = vld [vmem:[%s17881_s3 + $0x220] sm:$0xff] }
0x3655   : > { %v9356_v40 = vpop.permute.xlu1 %9355 }
0x3656   : > { %v9370_v38 = vsel %vm2792_vm4, %v9367_v12, %v9356_v40  ;;  %v13659_v12 = vpack.c.bf16 %v10902_v39, %v10898_v43  ;;  %v13629_v40 = vpack.c.bf16 %v10899_v15, %v10895_v28  ;;  %v10934_v43 = vld [vmem:[%s17881_s3 + $0x338] sm:$0xff]  ;;  %v10931_v39 = vld [vmem:[%s17881_s3 + $0x320] sm:$0xff] }
0x3657   : > { %12556 = vmatmul.mubr.f32.vlgmr.msra.gmra.mrb[126].mxu0 %v9370_v38  ;;  %v10897_v38 = vld [vmem:[%s17881_s3 + $0x210] sm:$0xff]  ;;  %v13675_v28 = vpack.c.bf16 %v10934_v43, %v10930_v33  ;;  %v13645_v15 = vpack.c.bf16 %v10931_v39, %v10927_v14 }
0x3658   : > { %12558 = vmatprep.mubr.msk.f32.mxu0 %vm15274_vm6, %v15270_v41  ;;  %13660 = vmatprep.subr.bf16.mxu0 %v13659_v12  ;;  %v10929_v12 = vld [vmem:[%s17881_s3 + $0x310] sm:$0xff] }
0x3659   : > { %13630 = vmatpush1.bf16.msra.mxu1 %v13629_v40  ;;  %v10933_v40 = vld [vmem:[%s17881_s3 + $0x330] sm:$0xff] }
0x367b   : > { %v9304_v16 = vpop.f32.mrb[122].mxu1 }
0x367c   : > { %v12519_v25 = vpop.f32.mrb[123].mxu1 }
0x367f   : > { %v9309_v42 = vpop.f32.mrb[124].mxu1  ;;  %v9077_v5 = vpop.xlane.xlu0 %9076 }
0x3680   : > { %14520 = vrcp.f32 %v9077_v5  ;;  %v12522_v29 = vpop.f32.mrb[125].mxu1  ;;  %v10906_v5 = vld [vmem:[%s17881_s3 + $0x258] sm:$0xff] }
0x3681   : > { %v10910_v29 = vld [vmem:[%s17881_s3 + $0x278] sm:$0xff] }
0x3683   : > { %v9318_v7 = vpop.xlane.xlu0 %9317 }
0x3684   : > { %14522 = vrcp.f32 %v9318_v7 }
0x3687   : > { %v9080_v62 = vpop.xlane.xlu0 %9079 }
0x3688   : > { %14524 = vrcp.f32 %v9080_v62  ;;  %v13663_v62 = vpack.c.bf16 %v10910_v29, %v10906_v5  ;;  %v10942_v5 = vld [vmem:[%s17881_s3 + $0x378] sm:$0xff]  ;;  %v10935_v29 = vld [vmem:[%s17881_s3 + $0x340] sm:$0xff] }
0x368a   : > { %v14521_v2 = vpop.eup %14520 }
0x368b   : > { %v9084_v37 = vmul.f32 %v14521_v2, %v9063_v57  ;;  %v8592_v55 = vpop.xlane.xlu0 %8591  ;;  %v10903_v2 = vld [vmem:[%s17881_s3 + $0x240] sm:$0xff] }
0x368d   : > { %9345 = vrot.lane.b32.xlu1 %v9084_v37, %s17872_s0  ;;  %v10907_v37 = vld [vmem:[%s17881_s3 + $0x260] sm:$0xff] }
0x368e   : > { %v14523_v36 = vpop.eup %14522 }
0x368f   : > { %v9325_v18 = vmul.f32 %v14523_v36, %v9304_v16  ;;  %v10904_v16 = vld [vmem:[%s17881_s3 + $0x248] sm:$0xff]  ;;  %v10905_v36 = vld [vmem:[%s17881_s3 + $0x250] sm:$0xff] }
0x3691   : > { %9357 = vrot.lane.b32.xlu1 %v9325_v18, %s17858_s22  ;;  %v13633_v18 = vpack.c.bf16 %v10907_v37, %v10903_v2  ;;  %v10937_v37 = vld [vmem:[%s17881_s3 + $0x350] sm:$0xff] }
0x3692   : > { %v14525_v30 = vpop.eup %14524 }
0x3693   : > { %v9086_v46 = vmul.f32 %v14525_v30, %v9068_v1  ;;  %v10909_v30 = vld [vmem:[%s17881_s3 + $0x270] sm:$0xff] }
0x3694   : > { %v8836_v58 = vpop.xlane.xlu1 %8835 }
0x3695   : > { %14526 = vrcp.f32 %v8836_v58  ;;  %9347 = vrot.lane.b32.xlu1 %v9086_v46, %s17872_s0  ;;  %v10912_v46 = vld [vmem:[%s17881_s3 + $0x288] sm:$0xff]  ;;  %s1543_s0 = sand.u32 1, %s15190_s23  }
0x3696   : > { %v10916_v58 = vld [vmem:[%s17881_s3 + $0x2a8] sm:$0xff] }
0x3698   : > { %v8839_v17 = vpop.xlane.xlu1 %8838 }
0x3699   : > { %14528 = vrcp.f32 %v8839_v17  ;;  %v13665_v17 = vpack.c.bf16 %v10909_v30, %v10905_v36  ;;  %v10941_v36 = vld [vmem:[%s17881_s3 + $0x370] sm:$0xff]  ;;  %v10944_v30 = vld [vmem:[%s17881_s3 + $0x388] sm:$0xff] }
0x369c   : > { %v9321_v59 = vpop.xlane.xlu1 %9320 }
0x369d   : > { %14530 = vrcp.f32 %v9321_v59  ;;  %v13635_v59 = vpack.c.bf16 %v10916_v58, %v10912_v46  ;;  %v10948_v46 = vld [vmem:[%s17881_s3 + $0x3a8] sm:$0xff]  ;;  %v10946_v58 = vld [vmem:[%s17881_s3 + $0x398] sm:$0xff] }
0x369e   : > { %14532 = vrcp.f32 %v8592_v55  ;;  %v10917_v55 = vld [vmem:[%s17881_s3 + $0x2b0] sm:$0xff] }
0x369f   : > { %v14527_v61 = vpop.eup %14526 }
0x36a0   : > { %v8843_v35 = vmul.f32 %v14527_v61, %v17439_v52  ;;  %v8595_v6 = vpop.xlane.xlu1 %8594  ;;  %v10914_v61 = vld [vmem:[%s17881_s3 + $0x298] sm:$0xff] }
0x36a1   : > { %14534 = vrcp.f32 %v8595_v6 }
0x36a2   : > { %9333 = vrot.lane.b32.xlu0 %v8843_v35, %s17873_s26  ;;  %v10918_v35 = vld [vmem:[%s17881_s3 + $0x2b8] sm:$0xff] }
0x36a3   : > { %v14529_v10 = vpop.eup %14528 }
0x36a4   : > { %v8845_v63 = vmul.f32 %v14529_v10, %v17442_v26  ;;  %v10911_v10 = vld [vmem:[%s17881_s3 + $0x280] sm:$0xff] }
0x36a6   : > { %9335 = vrot.lane.b32.xlu0 %v8845_v63, %s17873_s26  ;;  %v13667_v63 = vpack.c.bf16 %v10918_v35, %v10914_v61  ;;  %v10943_v61 = vld [vmem:[%s17881_s3 + $0x380] sm:$0xff]  ;;  %s1544_s26 = scalar_lea.vmem [#allocation32], %s1543_s0 }
0x36a7   : > { %v14531_v22 = vpop.eup %14530  ;;  %v10947_v35 = vld [vmem:[%s17881_s3 + $0x3a0] sm:$0xff] }
0x36a8   : > { %v9327_v56 = vmul.f32 %v14531_v22, %v9309_v42  ;;  %v14533_v51 = vpop.eup %14532  ;;  %v10908_v42 = vld [vmem:[%s17881_s3 + $0x268] sm:$0xff]  ;;  %v10915_v22 = vld [vmem:[%s17881_s3 + $0x2a0] sm:$0xff] }
0x36a9   : > { %v8599_v57 = vmul.f32 %v14533_v51, %v17357_v11  ;;  %v13631_v7 = vpack.c.bf16 %v10908_v42, %v10904_v16  ;;  %v13637_v6 = vpack.c.bf16 %v10915_v22, %v10911_v10  ;;  %v10940_v16 = vld [vmem:[%s17881_s3 + $0x368] sm:$0xff]  ;;  %v10945_v22 = vld [vmem:[%s17881_s3 + $0x390] sm:$0xff] }
0x36aa   : > { %9359 = vrot.lane.b32.xlu0 %v9327_v56, %s17858_s22  ;;  %v10913_v56 = vld [vmem:[%s17881_s3 + $0x290] sm:$0xff]  ;;  %s17883_s22 = sld [smem:[#allocation81_spill]] }
0x36ab   : > { %v14535_v52 = vpop.eup %14534  ;;  %13632 = vmatprep.subr.bf16.mxu1 %v13631_v7  ;;  %v10939_v7 = vld [vmem:[%s17881_s3 + $0x360] sm:$0xff] }
0x36ac   : > { %v8601_v60 = vmul.f32 %v14535_v52, %v17359_v8  ;;  %13634 = vmatpush1.bf16.msra.mxu1 %v13633_v18  ;;  %v13649_v2 = vpack.c.bf16 %v10939_v7, %v10935_v29  ;;  %v13681_v18 = vpack.c.bf16 %v10941_v36, %v10937_v37  ;;  %v9904_v29 = vld [vmem:[#allocation20 + $0x288] sm:$0xff]  ;;  %v9935_v7 = vld [vmem:[#allocation20 + $0x380] sm:$0xff] }
0x36ad   : > { %13636 = vmatprep.subr.bf16.mxu1 %v13635_v59  ;;  %v10950_v59 = vld [vmem:[%s17881_s3 + $0x3b8] sm:$0xff]  ;;  %v9887_v37 = vld [vmem:[#allocation20 + $0x200] sm:$0xff]  ;;  %v9888_v36 = vld [vmem:[#allocation20 + $0x208] sm:$0xff] }
0x36ae   : > { %v13683_v10 = vpack.c.bf16 %v10950_v59, %v10946_v58  ;;  %v9920_v58 = vld [vmem:[#allocation20 + $0x308] sm:$0xff]  ;;  %v9905_v59 = vld [vmem:[#allocation20 + $0x290] sm:$0xff] }
0x36b0   : > { %13638 = vmatpush1.bf16.msra.mxu1 %v13637_v6  ;;  %v10952_v6 = vld [vmem:[%s17881_s3 + $0x3c8] sm:$0xff]  ;;  %p17884_p3 = scmp.ne.s32.totalorder %s17883_s22, 0 }
0x36ff   : > { %v9346_v24 = vpop.permute.xlu1 %9345 }
0x3703   : > { %v9358_v1 = vpop.permute.xlu1 %9357 }
0x3707   : > { %v9348_v11 = vpop.permute.xlu1 %9347 }
0x3714   : > { %v9334_v21 = vpop.permute.xlu0 %9333 }
0x3715   : > { %v9365_v47 = vsel %vm1962_vm1, %v8599_v57, %v9334_v21 }
0x3716   : > { %v9368_v26 = vsel %vm1578_vm0, %v9365_v47, %v9346_v24  ;;  %v13669_v24 = vpack.c.bf16 %v10917_v55, %v10913_v56  ;;  %v10924_v47 = vld [vmem:[%s17881_s3 + $0x2e8] sm:$0xff]  ;;  %v10949_v56 = vld [vmem:[%s17881_s3 + $0x3b0] sm:$0xff] }
0x3717   : > { %v9371_v48 = vsel %vm2792_vm4, %v9368_v26, %v9358_v1  ;;  %v10920_v1 = vld [vmem:[%s17881_s3 + $0x2c8] sm:$0xff]  ;;  %v10922_v26 = vld [vmem:[%s17881_s3 + $0x2d8] sm:$0xff]  ;;  %v13685_v55 = vpack.c.bf16 %v10949_v56, %v10945_v22  ;;  %v9890_v56 = vld [vmem:[#allocation20 + $0x218] sm:$0xff] }
0x3718   : > { %v9336_v32 = vpop.permute.xlu0 %9335  ;;  %12559 = vmatmul.mubr.f32.gmra.mrb[128].mxu0 %v9371_v48  ;;  %v10926_v48 = vld [vmem:[%s17881_s3 + $0x2f8] sm:$0xff] }
0x3719   : > { %v9366_v44 = vsel %vm1962_vm1, %v8601_v60, %v9336_v32  ;;  %12561 = vmatprep.mubr.msk.f32.mxu0 %vm15274_vm6, %v15270_v41  ;;  %v13639_v60 = vpack.c.bf16 %v10924_v47, %v10920_v1  ;;  %v10919_v32 = vld [vmem:[%s17881_s3 + $0x2c0] sm:$0xff]  ;;  %v9889_v22 = vld [vmem:[#allocation20 + $0x210] sm:$0xff] }
0x371a   : > { %v9369_v20 = vsel %vm1578_vm0, %v9366_v44, %v9348_v11  ;;  %v10923_v44 = vld [vmem:[%s17881_s3 + $0x2e0] sm:$0xff]  ;;  %v13671_v11 = vpack.c.bf16 %v10926_v48, %v10922_v26  ;;  %v10953_v48 = vld [vmem:[%s17881_s3 + $0x3d0] sm:$0xff] }
0x371b   : > { %13640 = vmatprep.subr.bf16.mxu1 %v13639_v60  ;;  %v10951_v1 = vld [vmem:[%s17881_s3 + $0x3c0] sm:$0xff] }
0x371c   : > { %v9360_v13 = vpop.permute.xlu0 %9359  ;;  %v10955_v47 = vld [vmem:[%s17881_s3 + $0x3e0] sm:$0xff] }
0x371d   : > { %v9372_v8 = vsel %vm2792_vm4, %v9369_v20, %v9360_v13  ;;  %v13641_v13 = vpack.c.bf16 %v10923_v44, %v10919_v32  ;;  %v10921_v20 = vld [vmem:[%s17881_s3 + $0x2d0] sm:$0xff]  ;;  %v13657_v60 = vpack.c.bf16 %v10955_v47, %v10951_v1  ;;  %v9939_v47 = vld [vmem:[#allocation20 + $0x3a0] sm:$0xff] }
0x371e   : > { %12562 = vmatmul.mubr.f32.gmra.mrb[130].mxu0 %v9372_v8  ;;  %v10925_v8 = vld [vmem:[%s17881_s3 + $0x2f0] sm:$0xff] }
0x371f   : > { %9771 = vmatprep.mubr.f32.mxu0 %v15270_v41  ;;  %13642 = vmatpush1.bf16.msra.mxu1 %v13641_v13  ;;  %v10957_v32 = vld [vmem:[%s17881_s3 + $0x3f0] sm:$0xff] }
0x3720   : > { %v13689_v44 = vpack.c.bf16 %v10957_v32, %v10953_v48  ;;  %v9908_v1 = vld [vmem:[#allocation20 + $0x2a8] sm:$0xff]  ;;  %v9891_v48 = vld [vmem:[#allocation20 + $0x220] sm:$0xff] }
0x3721   : > { %v9892_v32 = vld [vmem:[#allocation20 + $0x228] sm:$0xff] }
0x372a   : > { %v9464_v9 = vpop.f32.mrb[126].mxu0 }
0x372b   : > { %v9465_v54 = vadd.f32 %v17495_v4, %v9464_v9  ;;  %v12557_v49 = vpop.f32.mrb[127].mxu0  ;;  %v13673_v9 = vpack.c.bf16 %v10925_v8, %v10921_v20 }
0x372c   : > { %v10932_v49 = vld [vmem:[%s17881_s3 + $0x328] sm:$0xff] }
0x372d   : > { %v17499_v27 = vadd.f32 %v9465_v54, %v17196_v19  ;;  %v10901_v19 = vld [vmem:[%s17881_s3 + $0x230] sm:$0xff]  ;;  %v10928_v54 = vld [vmem:[%s17881_s3 + $0x308] sm:$0xff] }
0x372e   : > { %v13661_v25 = vpack.c.bf16 %v10901_v19, %v10897_v38  ;;  %v13643_v23 = vpack.c.bf16 %v10932_v49, %v10928_v54  ;;  %v13677_v38 = vpack.c.bf16 %v10933_v40, %v10929_v12  ;;  %v10936_v19 = vld [vmem:[%s17881_s3 + $0x348] sm:$0xff]  ;;  %v17578_v12 = vld [vmem:[#allocation18 + $0x1] ss:$0 sm:$0xff] }
0x372f   : > { %9485 = vadd.xlane.f32.xlu1 %v17499_v27  ;;  %v13647_v42 = vpack.c.bf16 %v10940_v16, %v10936_v19 }
0x3730   : > { %13662 = vmatpush1.bf16.msra.mxu0 %v13661_v25  ;;  %13644 = vmatprep.subr.bf16.mxu1 %v13643_v23  ;;  %v10938_v25 = vld [vmem:[%s17881_s3 + $0x358] sm:$0xff] }
0x3731   : > { %13664 = vmatprep.subr.bf16.mxu0 %v13663_v62  ;;  %13646 = vmatpush1.bf16.msra.mxu1 %v13645_v15  ;;  %v13679_v62 = vpack.c.bf16 %v10942_v5, %v10938_v25  ;;  %v9903_v5 = vld [vmem:[#allocation20 + $0x280] sm:$0xff] }
0x3732   : > { %13648 = vmatprep.subr.bf16.mxu1 %v13647_v42 }
0x3734   : > { %13666 = vmatpush1.bf16.msra.mxu0 %v13665_v17  ;;  %v13651_v17 = vpack.c.bf16 %v10948_v46, %v10944_v30  ;;  %v13693_v30 = vpack.c.bf16 %v9888_v36, %v9887_v37  ;;  %v9919_v46 = vld [vmem:[#allocation20 + $0x300] sm:$0xff]  ;;  %v9928_v37 = vld [vmem:[#allocation20 + $0x348] sm:$0xff] }
0x3735   : > { %13668 = vmatprep.subr.bf16.mxu0 %v13667_v63  ;;  %13650 = vmatpush1.bf16.msra.mxu1 %v13649_v2  ;;  %v13653_v63 = vpack.c.bf16 %v10947_v35, %v10943_v61  ;;  %v9936_v2 = vld [vmem:[#allocation20 + $0x388] sm:$0xff]  ;;  %v9906_v61 = vld [vmem:[#allocation20 + $0x298] sm:$0xff]  ;;  %v9937_v35 = vld [vmem:[#allocation20 + $0x390] sm:$0xff] }
0x3736   : > { %13652 = vmatprep.subr.bf16.mxu1 %v13651_v17  ;;  %v13725_v17 = vpack.c.bf16 %v9920_v58, %v9919_v46  ;;  %v9945_v46 = vld [vmem:[#allocation20 + $0x3d0] sm:$0xff] }
0x3738   : > { %13670 = vmatpush1.bf16.msra.mxu0 %v13669_v24  ;;  %v10956_v24 = vld [vmem:[%s17881_s3 + $0x3e8] sm:$0xff] }
0x3739   : > { %13672 = vmatprep.subr.bf16.mxu0 %v13671_v11  ;;  %13654 = vmatpush1.bf16.msra.mxu1 %v13653_v63  ;;  %v9938_v63 = vld [vmem:[#allocation20 + $0x398] sm:$0xff] }
0x373c   : > { %13674 = vmatpush1.bf16.msra.mxu0 %v13673_v9 }
0x373d   : > { %13676 = vmatprep.subr.bf16.mxu0 %v13675_v28  ;;  %v17575_v28 = vld [vmem:[#allocation17 + $0x1] ss:$0 sm:$0xff] }
0x3740   : > { %13678 = vmatpush1.bf16.msra.mxu0 %v13677_v38 }
0x3741   : > { %13680 = vmatprep.subr.bf16.mxu0 %v13679_v62  ;;  %v13691_v62 = vpack.c.bf16 %v9904_v29, %v9903_v5  ;;  %v9895_v5 = vld [vmem:[#allocation20 + $0x240] sm:$0xff]  ;;  %v9896_v29 = vld [vmem:[#allocation20 + $0x248] sm:$0xff] }
0x3744   : > { %13682 = vmatpush1.bf16.msra.mxu0 %v13681_v18  ;;  %v13723_v18 = vpack.c.bf16 %v9936_v2, %v9935_v7  ;;  %v9927_v2 = vld [vmem:[#allocation20 + $0x340] sm:$0xff] }
0x3745   : > { %13684 = vmatprep.subr.bf16.mxu0 %v13683_v10  ;;  %v13695_v10 = vpack.c.bf16 %v9906_v61, %v9905_v59  ;;  %v13741_v36 = vpack.c.bf16 %v9928_v37, %v9927_v2  ;;  %v9897_v59 = vld [vmem:[#allocation20 + $0x250] sm:$0xff]  ;;  %v9898_v61 = vld [vmem:[#allocation20 + $0x258] sm:$0xff] }
0x3748   : > { %13686 = vmatpush1.bf16.msra.mxu0 %v13685_v55  ;;  %v13727_v55 = vpack.c.bf16 %v9938_v63, %v9937_v35  ;;  %v9929_v63 = vld [vmem:[#allocation20 + $0x350] sm:$0xff] }
0x37bc   : > { %v9486_v51 = vpop.xlane.xlu1 %9485 }
0x37bd   : > { %v9491_v57 = vmul.f32 0.0078125, %v9486_v51  ;;  %v10954_v51 = vld [vmem:[%s17881_s3 + $0x3d8] sm:$0xff] }
0x37bf   : > { %v17527_v52 = vsub.f32 %v17499_v27, %v9491_v57  ;;  %v13655_v57 = vpack.c.bf16 %v10956_v24, %v10952_v6  ;;  %v13697_v6 = vpack.c.bf16 %v9890_v56, %v9889_v22  ;;  %v9921_v24 = vld [vmem:[#allocation20 + $0x310] sm:$0xff]  ;;  %v9930_v22 = vld [vmem:[#allocation20 + $0x358] sm:$0xff] }
0x37c0   : > { %v13745_v56 = vpack.c.bf16 %v9930_v22, %v9929_v63 }
0x37c1   : > { %v9497_v21 = vmul.f32 %v17527_v52, %v17527_v52  ;;  %13656 = vmatprep.subr.bf16.mxu1 %v13655_v57 }
0x37c2   : > { %13658 = vmatpush1.bf16.msra.mxu1 %v13657_v60  ;;  %v9940_v60 = vld [vmem:[#allocation20 + $0x3a8] sm:$0xff] }
0x37c3   : > { %9500 = vadd.xlane.f32.xlu0 %v9497_v21  ;;  %v10958_v21 = vld [vmem:[%s17881_s3 + $0x3f8] sm:$0xff]  ;;  %13692 = vmatprep.subr.bf16.mxu1 %v13691_v62  ;;  %v13709_v62 = vpack.c.bf16 %v9896_v29, %v9895_v5  ;;  %s10249_s3 = sshll.u32 %s1544_s26, 4  ;;  %s17658_s3 = int_to_ptr.vmem [resolvable:$true] %s10249_s3 }
0x37c4   : > { %v13687_v26 = vpack.c.bf16 %v10958_v21, %v10954_v51  ;;  %v9922_v51 = vld [vmem:[#allocation20 + $0x318] sm:$0xff]  ;;  %v9907_v21 = vld [vmem:[#allocation20 + $0x2a0] sm:$0xff]  ;;  %p15103_p8 = scmp.lt.s32.totalorder %s17658_s3, %s15101_s7 }
0x37c5   : > { %v13729_v57 = vpack.c.bf16 %v9922_v51, %v9921_v24  ;;  %v9947_v24 = vld [vmem:[#allocation20 + $0x3e0] sm:$0xff] }
0x37c6   : > { %13688 = vmatprep.subr.bf16.mxu0 %v13687_v26  ;;  %v13699_v26 = vpack.c.bf16 %v9908_v1, %v9907_v21  ;;  %v9899_v21 = vld [vmem:[#allocation20 + $0x260] sm:$0xff]  ;;  %v9900_v1 = vld [vmem:[#allocation20 + $0x268] sm:$0xff] }
0x37c7   : > { %13690 = vmatpush1.bf16.msra.mxu0 %v13689_v44  ;;  %v13731_v44 = vpack.c.bf16 %v9940_v60, %v9939_v47  ;;  %v9931_v60 = vld [vmem:[#allocation20 + $0x360] sm:$0xff] }
0x37c8   : > { %13724 = vmatprep.subr.bf16.mxu0 %v13723_v18  ;;  %v9913_v18 = vld [vmem:[#allocation20 + $0x2d0] sm:$0xff] }
0x37eb   : > { %v9469_v11 = vpop.f32.mrb[128].mxu0 }
0x37ec   : > { %v9470_v13 = vadd.f32 %v17495_v4, %v9469_v11  ;;  %v12560_v20 = vpop.f32.mrb[129].mxu0  ;;  %v13701_v11 = vpack.c.bf16 %v9892_v32, %v9891_v48  ;;  %v9932_v48 = vld [vmem:[#allocation20 + $0x368] sm:$0xff] }
0x37ed   : > { %v9924_v20 = vld [vmem:[#allocation20 + $0x328] sm:$0xff]  ;;  %v13749_v32 = vpack.c.bf16 %v9932_v48, %v9931_v60 }
0x37ee   : > { %v9479_v8 = vadd.f32 %v9470_v13, %v17200_v45  ;;  %v9923_v13 = vld [vmem:[#allocation20 + $0x320] sm:$0xff] }
0x37f0   : > { %9487 = vadd.xlane.f32.xlu0 %v9479_v8 }
0x37f1   : > { %v9474_v9 = vpop.f32.mrb[130].mxu0 }
0x37f2   : > { %v9475_v54 = vadd.f32 %v17495_v4, %v9474_v9  ;;  %v12563_v49 = vpop.f32.mrb[131].mxu0  ;;  %v9909_v9 = vld [vmem:[#allocation20 + $0x2b0] sm:$0xff] }
0x37f3   : > { %v9941_v49 = vld [vmem:[#allocation20 + $0x3b0] sm:$0xff] }
0x37f4   : > { %v9480_v33 = vadd.f32 %v9475_v54, %v17204_v34  ;;  %v9910_v54 = vld [vmem:[#allocation20 + $0x2b8] sm:$0xff] }
0x37f6   : > { %9489 = vadd.xlane.f32.xlu1 %v9480_v33 }
0x3850   : > { %v9501_v23 = vpop.xlane.xlu0 %9500 }
0x3851   : > { %v9506_v43 = vmul.f32 0.0078125, %v9501_v23  ;;  %v9942_v23 = vld [vmem:[#allocation20 + $0x3b8] sm:$0xff] }
0x3853   : > { %v9509_v14 = vadd.f32 1e-05, %v9506_v43  ;;  %v9893_v43 = vld [vmem:[#allocation20 + $0x230] sm:$0xff] }
0x3855   : > { %14536 = vrsqrt.f32 %v9509_v14  ;;  %v9894_v14 = vld [vmem:[#allocation20 + $0x238] sm:$0xff] }
0x385f   : > { %v14537_v39 = vpop.eup %14536 }
0x3860   : > { %v9515_v15 = vmul.f32 %v14537_v39, %v17527_v52  ;;  %v13735_v39 = vpack.c.bf16 %v9942_v23, %v9941_v49  ;;  %v9933_v23 = vld [vmem:[#allocation20 + $0x370] sm:$0xff] }
0x3862   : > { %v9524_v45 = vmul.f32 %v17575_v28, %v9515_v15  ;;  %v13705_v15 = vpack.c.bf16 %v9894_v14, %v9893_v43  ;;  %v9934_v43 = vld [vmem:[#allocation20 + $0x378] sm:$0xff] }
0x3863   : > { %v13753_v14 = vpack.c.bf16 %v9934_v43, %v9933_v23 }
0x3864   : > { %v9533_v40 = vadd.f32 %v17578_v12, %v9524_v45  ;;  %v9925_v45 = vld [vmem:[#allocation20 + $0x330] sm:$0xff] }
0x3866   : > { %9689 = vmatmul.mubr.f32.vlgmr.msra.gmra.mrb[126].mxu1 %v9533_v40  ;;  %9772 = vmatmul.mubr.f32.vlgmr.msra.gmra.mrb[132].mxu0 %v9533_v40  ;;  %v9926_v40 = vld [vmem:[#allocation20 + $0x338] sm:$0xff] }
0x3867   : > { %9694 = vmatprep.mubr.f32.mxu1 %v15270_v41  ;;  %9777 = vmatprep.mubr.f32.mxu0 %v15270_v41 }
0x3868   : > { %13694 = vmatpush3.bf16.msra.mxu1 %v13693_v30  ;;  %13726 = vmatpush3.bf16.msra.mxu0 %v13725_v17  ;;  %v9914_v30 = vld [vmem:[#allocation20 + $0x2d8] sm:$0xff] }
0x3869   : > { %13696 = vmatprep.subr.bf16.mxu1 %v13695_v10  ;;  %13728 = vmatprep.subr.bf16.mxu0 %v13727_v55  ;;  %v13711_v58 = vpack.c.bf16 %v9914_v30, %v9913_v18  ;;  %v9946_v17 = vld [vmem:[#allocation20 + $0x3d8] sm:$0xff]  ;;  %v13713_v10 = vpack.c.bf16 %v9898_v61, %v9897_v59  ;;  %v9915_v55 = vld [vmem:[#allocation20 + $0x2e0] sm:$0xff] }
0x386a   : > { %v13743_v35 = vpack.c.bf16 %v9946_v17, %v9945_v46 }
0x386c   : > { %13698 = vmatpush3.bf16.msra.mxu1 %v13697_v6  ;;  %13730 = vmatpush3.bf16.msra.mxu0 %v13729_v57  ;;  %v9916_v6 = vld [vmem:[#allocation20 + $0x2e8] sm:$0xff] }
0x386d   : > { %13700 = vmatprep.subr.bf16.mxu1 %v13699_v26  ;;  %13732 = vmatprep.subr.bf16.mxu0 %v13731_v44  ;;  %v13715_v51 = vpack.c.bf16 %v9916_v6, %v9915_v55  ;;  %v9948_v57 = vld [vmem:[#allocation20 + $0x3e8] sm:$0xff]  ;;  %v13717_v26 = vpack.c.bf16 %v9900_v1, %v9899_v21  ;;  %v9917_v44 = vld [vmem:[#allocation20 + $0x2f0] sm:$0xff] }
0x386e   : > { %v13747_v47 = vpack.c.bf16 %v9948_v57, %v9947_v24 }
0x3870   : > { %13702 = vmatpush3.bf16.msra.mxu1 %v13701_v11  ;;  %v9918_v11 = vld [vmem:[#allocation20 + $0x2f8] sm:$0xff] }
0x387d   : > { %v9488_v34 = vpop.xlane.xlu0 %9487 }
0x387e   : > { %v9492_v4 = vmul.f32 0.0078125, %v9488_v34  ;;  %v13737_v34 = vpack.c.bf16 %v9926_v40, %v9925_v45 }
0x3880   : > { %v17584_v38 = vsub.f32 %v9479_v8, %v9492_v4  ;;  %v13733_v8 = vpack.c.bf16 %v9924_v20, %v9923_v13  ;;  %v9911_v4 = vld [vmem:[#allocation20 + $0x2c0] sm:$0xff]  ;;  %v9949_v13 = vld [vmem:[#allocation20 + $0x3f0] sm:$0xff]  ;;  %v13719_v20 = vpack.c.bf16 %v9918_v11, %v9917_v44 }
0x3882   : > { %v9498_v19 = vmul.f32 %v17584_v38, %v17584_v38  ;;  %13734 = vmatpush3.bf16.msra.mxu0 %v13733_v8  ;;  %v9950_v8 = vld [vmem:[#allocation20 + $0x3f8] sm:$0xff] }
0x3883   : > { %v9490_v52 = vpop.xlane.xlu1 %9489  ;;  %13736 = vmatprep.subr.bf16.mxu0 %v13735_v39  ;;  %v13751_v49 = vpack.c.bf16 %v9950_v8, %v9949_v13 }
0x3884   : > { %v9493_v16 = vmul.f32 0.0078125, %v9490_v52  ;;  %9502 = vadd.xlane.f32.xlu0 %v9498_v19  ;;  %v9912_v19 = vld [vmem:[#allocation20 + $0x2c8] sm:$0xff]  ;;  %v9943_v52 = vld [vmem:[#allocation20 + $0x3c0] sm:$0xff] }
0x3886   : > { %v17588_v25 = vsub.f32 %v9480_v33, %v9493_v16  ;;  %v13703_v33 = vpack.c.bf16 %v9910_v54, %v9909_v9  ;;  %13738 = vmatpush3.bf16.msra.mxu0 %v13737_v34  ;;  %v13707_v16 = vpack.c.bf16 %v9912_v19, %v9911_v4  ;;  %v9901_v9 = vld [vmem:[#allocation20 + $0x270] sm:$0xff]  ;;  %v9902_v54 = vld [vmem:[#allocation20 + $0x278] sm:$0xff] }
0x3888   : > { %v9499_v42 = vmul.f32 %v17588_v25, %v17588_v25  ;;  %13704 = vmatprep.subr.bf16.mxu1 %v13703_v33  ;;  %v13721_v33 = vpack.c.bf16 %v9902_v54, %v9901_v9 }
0x3889   : > { %13706 = vmatpush3.bf16.msra.mxu1 %v13705_v15 }
0x388a   : > { %9504 = vadd.xlane.f32.xlu1 %v9499_v42  ;;  %v9944_v42 = vld [vmem:[#allocation20 + $0x3c8] sm:$0xff]  ;;  %13708 = vmatprep.subr.bf16.mxu1 %v13707_v16 }
0x388b   : > { %v13739_v7 = vpack.c.bf16 %v9944_v42, %v9943_v52 }
0x388d   : > { %13740 = vmatprep.subr.bf16.mxu0 %v13739_v7  ;;  %13710 = vmatpush3.bf16.msra.mxu1 %v13709_v62 }
0x388e   : > { %13742 = vmatpush3.bf16.msra.mxu0 %v13741_v36  ;;  %13712 = vmatprep.subr.bf16.mxu1 %v13711_v58 }
0x388f   : > { %13744 = vmatprep.subr.bf16.mxu0 %v13743_v35 }
0x3891   : > { %13714 = vmatpush3.bf16.msra.mxu1 %v13713_v10 }
0x3892   : > { %13746 = vmatpush3.bf16.msra.mxu0 %v13745_v56  ;;  %13716 = vmatprep.subr.bf16.mxu1 %v13715_v51 }
0x3893   : > { %13748 = vmatprep.subr.bf16.mxu0 %v13747_v47 }
0x3895   : > { %13718 = vmatpush3.bf16.msra.mxu1 %v13717_v26 }
0x3896   : > { %13750 = vmatpush3.bf16.msra.mxu0 %v13749_v32  ;;  %13720 = vmatprep.subr.bf16.mxu1 %v13719_v20 }
0x3897   : > { %13752 = vmatprep.subr.bf16.mxu0 %v13751_v49 }
0x3899   : > { %13722 = vmatpush3.bf16.msra.mxu1 %v13721_v33 }
0x389a   : > { %13754 = vmatpush3.bf16.msra.mxu0 %v13753_v14  ;;  %13755 = vmatprep.subr.bf16.mxu1 %v15269_v0 }
0x3911   : > { %v9503_v39 = vpop.xlane.xlu0 %9502 }
0x3912   : > { %v9507_v15 = vmul.f32 0.0078125, %v9503_v39 }
0x3914   : > { %v9510_v45 = vadd.f32 1e-05, %v9507_v15 }
0x3916   : > { %14538 = vrsqrt.f32 %v9510_v45 }
0x3917   : > { %v9505_v40 = vpop.xlane.xlu1 %9504 }
0x3918   : > { %v9508_v34 = vmul.f32 0.0078125, %v9505_v40 }
0x391a   : > { %v9511_v4 = vadd.f32 1e-05, %v9508_v34 }
0x391c   : > { %14540 = vrsqrt.f32 %v9511_v4 }
0x3920   : > { %v14539_v19 = vpop.eup %14538 }
0x3921   : > { %v9516_v52 = vmul.f32 %v14539_v19, %v17584_v38  ;;  %v10959_v38 = vld [vmem:[%s17882_s5 + $0x4] sm:$0xf]  ;;  %s17661_s5 = scalar_lea.hbm %s15499_s21, %s10975_s4 }
0x3922   : > { %v17603_v2 = vrot.slane %v10959_v38, %v15927_v50  ;;  %v17606_v37 = vrot.slane %v10959_v38, %v15968_v3  ;;  %v17609_v36 = vrot.slane %v10959_v38, %v15932_v53 }
0x3923   : > { %v9525_v16 = vmul.f32 %v17575_v28, %v9516_v52 }
0x3925   : > { %v9534_v42 = vadd.f32 %v17578_v12, %v9525_v16 }
0x3926   : > { %v14541_v5 = vpop.eup %14540 }
0x3927   : > { %9695 = vmatmul.mubr.f32.gmra.mrb[128].mxu1 %v9534_v42  ;;  %9778 = vmatmul.mubr.f32.gmra.mrb[134].mxu0 %v9534_v42  ;;  %v9517_v29 = vmul.f32 %v14541_v5, %v17588_v25  ;;  %v17612_v25 = vrot.slane %v10959_v38, %v16223_v31 }
0x3928   : > { %9700 = vmatprep.mubr.f32.mxu1 %v15270_v41  ;;  %9783 = vmatprep.mubr.f32.mxu0 %v15270_v41 }
0x3929   : > { %v9526_v7 = vmul.f32 %v17575_v28, %v9517_v29 }
0x392b   : > { %v9535_v62 = vadd.f32 %v17578_v12, %v9526_v7 }
0x392d   : > { %9701 = vmatmul.mubr.f32.gmra.mrb[130].mxu1 %v9535_v62  ;;  %9784 = vmatmul.mubr.f32.gmra.mrb[136].mxu0 %v9535_v62 }
0x3939   : > { %v9690_v18 = vpop.f32.mrb[126].mxu1  ;;  %v9773_v30 = vpop.f32.mrb[132].mxu0 }
0x393a   : > { %v9691_v28 = vadd.f32 %v9690_v18, %v17603_v2  ;;  %v9774_v12 = vadd.f32 %v9773_v30, %v17606_v37  ;;  %v9692_v46 = vpop.f32.mrb[127].mxu1  ;;  %v9775_v58 = vpop.f32.mrb[133].mxu0 }
0x393b   : > { %v9693_v50 = vadd.f32 %v9692_v46, %v17609_v36  ;;  %v9776_v17 = vadd.f32 %v9775_v58, %v17612_v25 }
0x393c   : > { %v10960_v3 = vmul.f32 -1.702, %v9691_v28  ;;  %v10962_v59 = vmul.f32 -1.702, %v9774_v12 }
0x393d   : > { %v10961_v61 = vmul.f32 -1.702, %v9693_v50  ;;  %v10963_v53 = vmul.f32 -1.702, %v9776_v17 }
0x393e   : > { %v9814_v35 = vmul.f32 1.442695, %v10960_v3  ;;  %v9818_v10 = vmul.f32 1.442695, %v10962_v59 }
0x393f   : > { %v9816_v31 = vmul.f32 1.442695, %v10961_v61  ;;  %v9820_v63 = vmul.f32 1.442695, %v10963_v53 }
0x3940   : > { %14542 = vpow2.f32 %v9814_v35 }
0x3941   : > { %14544 = vpow2.f32 %v9818_v10 }
0x3942   : > { %14546 = vpow2.f32 %v9816_v31 }
0x3943   : > { %14548 = vpow2.f32 %v9820_v63 }
0x394a   : > { %v14543_v22 = vpop.eup %14542 }
0x394b   : > { %v14545_v56 = vpop.eup %14544  ;;  %v9838_v55 = vadd.f32 1.0, %v14543_v22 }
0x394c   : > { %v14547_v6 = vpop.eup %14546  ;;  %v9840_v24 = vadd.f32 1.0, %v14545_v56 }
0x394d   : > { %v14549_v51 = vpop.eup %14548  ;;  %14550 = vrcp.f32 %v9838_v55  ;;  %v9839_v57 = vadd.f32 1.0, %v14547_v6 }
0x394e   : > { %14552 = vrcp.f32 %v9840_v24  ;;  %v9841_v21 = vadd.f32 1.0, %v14549_v51 }
0x394f   : > { %14554 = vrcp.f32 %v9839_v57 }
0x3950   : > { %14556 = vrcp.f32 %v9841_v21 }
0x3957   : > { %v14551_v1 = vpop.eup %14550 }
0x3958   : > { %v14553_v47 = vpop.eup %14552  ;;  %v9874_v32 = vmul.f32 %v14551_v1, %v9691_v28 }
0x3959   : > { %v14555_v26 = vpop.eup %14554  ;;  %v9876_v11 = vmul.f32 %v14553_v47, %v9774_v12 }
0x395a   : > { %v14557_v60 = vpop.eup %14556  ;;  %v9875_v48 = vmul.f32 %v14555_v26, %v9693_v50 }
0x395b   : > { %v9877_v44 = vmul.f32 %v14557_v60, %v9776_v17 }
0x395c   : > { %10023 = vmatprep.mubr.f32.mxu1 %v9875_v48 }
0x395d   : > { %10101 = vmatprep.mubr.f32.mxu0 %v9877_v44  ;;  %10024 = vmatmul.mubr.f32.vlgmr.msra.gmra.mrb[132].mxu1 %v9874_v32 }
0x395e   : > { %10102 = vmatmul.mubr.f32.vlgmr.msra.gmra.mrb[138].mxu0 %v9876_v11 }
0x39fa   : > { %v9696_v13 = vpop.f32.mrb[128].mxu1  ;;  %v9779_v20 = vpop.f32.mrb[134].mxu0 }
0x39fb   : > { %v17619_v8 = vadd.f32 %v9696_v13, %v17603_v2  ;;  %v17622_v9 = vadd.f32 %v9779_v20, %v17606_v37  ;;  %v9698_v54 = vpop.f32.mrb[129].mxu1  ;;  %v9781_v49 = vpop.f32.mrb[135].mxu0 }
0x39fc   : > { %v9699_v33 = vadd.f32 %v9698_v54, %v17609_v36  ;;  %v17626_v23 = vadd.f32 %v9781_v49, %v17612_v25  ;;  %v10972_v49 = vld [vmem:[#allocation21 + $0x1] ss:$0 sm:$0xff] }
0x39fd   : > { %v10964_v43 = vmul.f32 -1.702, %v17619_v8  ;;  %v10966_v14 = vmul.f32 -1.702, %v17622_v9 }
0x39fe   : > { %v10965_v39 = vmul.f32 -1.702, %v9699_v33  ;;  %v10967_v15 = vmul.f32 -1.702, %v17626_v23 }
0x39ff   : > { %v9822_v45 = vmul.f32 1.442695, %v10964_v43  ;;  %v9826_v40 = vmul.f32 1.442695, %v10966_v14 }
0x3a00   : > { %v9824_v34 = vmul.f32 1.442695, %v10965_v39  ;;  %v9828_v4 = vmul.f32 1.442695, %v10967_v15  ;;  %v9702_v19 = vpop.f32.mrb[130].mxu1  ;;  %v9785_v52 = vpop.f32.mrb[136].mxu0 }
0x3a01   : > { %14558 = vpow2.f32 %v9822_v45  ;;  %v9703_v16 = vadd.f32 %v9702_v19, %v17603_v2  ;;  %v17633_v42 = vadd.f32 %v9785_v52, %v17606_v37  ;;  %v9704_v5 = vpop.f32.mrb[131].mxu1  ;;  %v9787_v29 = vpop.f32.mrb[137].mxu0  ;;  %v10148_v19 = vld [vmem:[#allocation30 + $0x10] sm:$0xff] }
0x3a02   : > { %14560 = vpow2.f32 %v9826_v40  ;;  %v9705_v7 = vadd.f32 %v9704_v5, %v17609_v36  ;;  %v9788_v62 = vadd.f32 %v9787_v29, %v17612_v25 }
0x3a03   : > { %14562 = vpow2.f32 %v9824_v34  ;;  %v10968_v38 = vmul.f32 -1.702, %v9703_v16  ;;  %v10970_v18 = vmul.f32 -1.702, %v17633_v42  ;;  %v10146_v34 = vld [vmem:[#allocation30] sm:$0xff] }
0x3a04   : > { %14564 = vpow2.f32 %v9828_v4  ;;  %v10969_v30 = vmul.f32 -1.702, %v9705_v7  ;;  %v10971_v28 = vmul.f32 -1.702, %v9788_v62  ;;  %v10147_v4 = vld [vmem:[#allocation30 + $0x8] sm:$0xff] }
0x3a05   : > { %v9830_v12 = vmul.f32 1.442695, %v10968_v38  ;;  %v9834_v46 = vmul.f32 1.442695, %v10970_v18  ;;  %v13756_v52 = vpack.c.bf16 %v10147_v4, %v10146_v34  ;;  %v10151_v38 = vld [vmem:[#allocation30 + $0x28] sm:$0xff] }
0x3a06   : > { %v9832_v2 = vmul.f32 1.442695, %v10969_v30  ;;  %v9836_v58 = vmul.f32 1.442695, %v10971_v28  ;;  %v10152_v30 = vld [vmem:[#allocation30 + $0x30] sm:$0xff]  ;;  %v10153_v28 = vld [vmem:[#allocation30 + $0x38] sm:$0xff] }
0x3a07   : > { %14566 = vpow2.f32 %v9830_v12  ;;  %13757 = vmatpush3.bf16.msra.mxu1 %v13756_v52  ;;  %v13765_v12 = vpack.c.bf16 %v10153_v28, %v10152_v30 }
0x3a08   : > { %14568 = vpow2.f32 %v9834_v46  ;;  %13758 = vmatprep.subr.bf16.mxu1 %v15269_v0  ;;  %v10154_v46 = vld [vmem:[#allocation30 + $0x40] sm:$0xff] }
0x3a09   : > { %14570 = vpow2.f32 %v9832_v2  ;;  %v10155_v2 = vld [vmem:[#allocation30 + $0x48] sm:$0xff] }
0x3a0a   : > { %14572 = vpow2.f32 %v9836_v58  ;;  %v13768_v58 = vpack.c.bf16 %v10155_v2, %v10154_v46 }
0x3a0b   : > { %v14559_v37 = vpop.eup %14558 }
0x3a0c   : > { %v14561_v50 = vpop.eup %14560  ;;  %v9842_v36 = vadd.f32 1.0, %v14559_v37  ;;  %v10156_v37 = vld [vmem:[#allocation30 + $0x50] sm:$0xff] }
0x3a0d   : > { %v14563_v17 = vpop.eup %14562  ;;  %v9844_v25 = vadd.f32 1.0, %v14561_v50  ;;  %v10157_v50 = vld [vmem:[#allocation30 + $0x58] sm:$0xff] }
0x3a0e   : > { %v14565_v3 = vpop.eup %14564  ;;  %14574 = vrcp.f32 %v9842_v36  ;;  %v9843_v59 = vadd.f32 1.0, %v14563_v17  ;;  %v13771_v36 = vpack.c.bf16 %v10157_v50, %v10156_v37  ;;  %v10158_v17 = vld [vmem:[#allocation30 + $0x60] sm:$0xff] }
0x3a0f   : > { %14576 = vrcp.f32 %v9844_v25  ;;  %v9845_v61 = vadd.f32 1.0, %v14565_v3  ;;  %v10159_v25 = vld [vmem:[#allocation30 + $0x68] sm:$0xff] }
0x3a10   : > { %14578 = vrcp.f32 %v9843_v59  ;;  %v13774_v3 = vpack.c.bf16 %v10159_v25, %v10158_v17  ;;  %v10160_v59 = vld [vmem:[#allocation30 + $0x70] sm:$0xff] }
0x3a11   : > { %v14567_v53 = vpop.eup %14566  ;;  %14580 = vrcp.f32 %v9845_v61  ;;  %v10161_v61 = vld [vmem:[#allocation30 + $0x78] sm:$0xff] }
0x3a12   : > { %v14569_v35 = vpop.eup %14568  ;;  %v9846_v10 = vadd.f32 1.0, %v14567_v53  ;;  %v13777_v53 = vpack.c.bf16 %v10161_v61, %v10160_v59 }
0x3a13   : > { %v14571_v31 = vpop.eup %14570  ;;  %v9848_v63 = vadd.f32 1.0, %v14569_v35 }
0x3a14   : > { %v14573_v22 = vpop.eup %14572  ;;  %14582 = vrcp.f32 %v9846_v10  ;;  %v9847_v56 = vadd.f32 1.0, %v14571_v31 }
0x3a15   : > { %14584 = vrcp.f32 %v9848_v63  ;;  %v9849_v55 = vadd.f32 1.0, %v14573_v22 }
0x3a16   : > { %14586 = vrcp.f32 %v9847_v56 }
0x3a17   : > { %14588 = vrcp.f32 %v9849_v55 }
0x3a18   : > { %v14575_v6 = vpop.eup %14574 }
0x3a19   : > { %v14577_v24 = vpop.eup %14576  ;;  %v9878_v1 = vmul.f32 %v14575_v6, %v17619_v8 }
0x3a1a   : > { %v14579_v51 = vpop.eup %14578  ;;  %v9880_v26 = vmul.f32 %v14577_v24, %v17622_v9 }
0x3a1b   : > { %v14581_v57 = vpop.eup %14580  ;;  %v9879_v21 = vmul.f32 %v14579_v51, %v9699_v33 }
0x3a1c   : > { %v9881_v47 = vmul.f32 %v14581_v57, %v17626_v23 }
0x3a1d   : > { %10028 = vmatprep.mubr.f32.mxu1 %v9879_v21  ;;  %v10973_v21 = vld [vmem:[%s17874_s1] ss:$0 sm:$0xff]  ;;  %s10237_s1 = scalar_lea.sflag [#allocation5], %s1543_s0 }
0x3a1e   : > { %v14583_v60 = vpop.eup %14582  ;;  %10106 = vmatprep.mubr.f32.mxu0 %v9881_v47  ;;  %10029 = vmatmul.mubr.f32.gmra.mrb[134].mxu1 %v9878_v1  ;;  %v10974_v47 = vld [vmem:[%s17875_s2] ss:$0 sm:$0xff]  ;;  %s15096_s2 = scalar_lea.vmem %s17658_s3, 16 }
0x3a1f   : > { %v14585_v48 = vpop.eup %14584  ;;  %10107 = vmatmul.mubr.f32.gmra.mrb[140].mxu0 %v9880_v26  ;;  %v9882_v13 = vmul.f32 %v14583_v60, %v9703_v16  ;;  %p15097_p2 = scmp.ne.s32.totalorder %s17658_s3, %s15096_s2  ;;  %p15104_p11 = scmp.lt.s32.totalorder %s15102_s28, %s15096_s2 }
0x3a20   : > { %v14587_v32 = vpop.eup %14586  ;;  %v9884_v54 = vmul.f32 %v14585_v48, %v17633_v42 }
0x3a21   : > { %v14589_v44 = vpop.eup %14588  ;;  %v9883_v11 = vmul.f32 %v14587_v32, %v9705_v7  ;;  %p15098_p4 = pnand %p15097_p2, %p17884_p3  ;;  %p15105_p6 = por %p15104_p11, %p15103_p8 }
0x3a22   : > { %v9885_v20 = vmul.f32 %v14589_v44, %v9788_v62  ;;  %v10150_v62 = vld [vmem:[#allocation30 + $0x20] sm:$0xff] }
0x3a23   : > { %10032 = vmatprep.mubr.f32.mxu1 %v9883_v11  ;;  %v13762_v18 = vpack.c.bf16 %v10151_v38, %v10150_v62  ;;  %p15099_p7 = pneg %p15098_p4 }
0x3a24   : > { %10110 = vmatprep.mubr.f32.mxu0 %v9885_v20  ;;  %10033 = vmatmul.mubr.f32.gmra.mrb[136].mxu1 %v9882_v13 }
0x3a25   : > { %10111 = vmatmul.mubr.f32.gmra.mrb[142].mxu0 %v9884_v54  ;;  %12596 = vmatprep.mubr.msk.f32.mxu1 %vm15274_vm6, %v15270_v41  ;;  %v10149_v41 = vld [vmem:[#allocation30 + $0x18] sm:$0xff]  ;;  %p15106_p0 = pnand %p15105_p6, %p15099_p7 }
0x3a26   : > { %v13759_v16 = vpack.c.bf16 %v10149_v41, %v10148_v19 }
0x3a28   : > { %13760 = vmatpush3.bf16.msra.mxu1 %v13759_v16 }
0x3a29   : > { %13761 = vmatprep.subr.bf16.mxu1 %v15269_v0 }
0x3a2c   : > { %13763 = vmatpush3.bf16.msra.mxu1 %v13762_v18 }
0x3a2d   : > { %13764 = vmatprep.subr.bf16.mxu1 %v15269_v0 }
0x3a30   : > { %v11646_v8 = vpop.f32.mrb[132].mxu1  ;;  %13766 = vmatpush3.bf16.msra.mxu1 %v13765_v12 }
0x3a31   : > { %v11687_v9 = vpop.f32.mrb[138].mxu0  ;;  %v11647_v33 = vpop.f32.mrb[133].mxu1  ;;  %13767 = vmatprep.subr.bf16.mxu1 %v15269_v0 }
0x3a32   : > { %v11648_v23 = vadd.f32 %v11647_v33, %v11646_v8  ;;  %v11688_v43 = vpop.f32.mrb[139].mxu0 }
0x3a33   : > { %v11689_v14 = vadd.f32 %v11688_v43, %v11687_v9 }
0x3a34   : > { %v10026_v39 = vadd.f32 %v11648_v23, %v10972_v49  ;;  %13769 = vmatpush3.bf16.msra.mxu1 %v13768_v58 }
0x3a35   : > { %13770 = vmatprep.subr.bf16.mxu1 %v15269_v0 }
0x3a36   : > { %v10104_v15 = vadd.f32 %v11689_v14, %v10026_v39 }
0x3a38   : > { %v10115_v45 = vadd.f32 %v10104_v15, %v17499_v27  ;;  %13772 = vmatpush3.bf16.msra.mxu1 %v13771_v36 }
0x3a39   : > { %13773 = vmatprep.subr.bf16.mxu1 %v15269_v0 }
0x3a3a   : > { %v10119_v40 = vsel %vm10118_vm13, %v10115_v45, 0.0 }
0x3a3b   : > { %10120 = vadd.xlane.f32.xlu0 %v10119_v40 }
0x3a3c   : > { %13775 = vmatpush3.bf16.msra.mxu1 %v13774_v3 }
0x3a3d   : > { %13776 = vmatprep.subr.bf16.mxu1 %v15269_v0 }
0x3a40   : > { %13778 = vmatpush3.bf16.msra.mxu1 %v13777_v53 }
0x3ac8   : > { %v10121_v42 = vpop.xlane.xlu0 %10120 }
0x3ac9   : > { %v10122_v5 = vmul.f32 0.0078125, %v10121_v42 }
0x3acb   : > { %v10123_v29 = vsub.f32 %v10115_v45, %v10122_v5 }
0x3acd   : > { %v10124_v7 = vmul.f32 %v10123_v29, %v10123_v29 }
0x3acf   : > { %v10125_v27 = vsel %vm10118_vm13, %v10124_v7, 0.0 }
0x3ad0   : > { %10126 = vadd.xlane.f32.xlu1 %v10125_v27 }
0x3af1   : > { %v11649_v35 = vpop.f32.mrb[134].mxu1 }
0x3af2   : > { %v11690_v10 = vpop.f32.mrb[140].mxu0  ;;  %v11650_v31 = vpop.f32.mrb[135].mxu1 }
0x3af3   : > { %v11691_v63 = vpop.f32.mrb[141].mxu0 }
0x3af7   : > { %v11652_v22 = vpop.f32.mrb[136].mxu1 }
0x3af8   : > { %v11693_v56 = vpop.f32.mrb[142].mxu0  ;;  %v11653_v55 = vpop.f32.mrb[137].mxu1 }
0x3af9   : > { %v11694_v6 = vpop.f32.mrb[143].mxu0 }
0x3b5d   : > { %v10127_v24 = vpop.xlane.xlu1 %10126 }
0x3b5e   : > { %v10128_v51 = vmul.f32 0.0078125, %v10127_v24 }
0x3b60   : > { %v10129_v57 = vadd.f32 1e-05, %v10128_v51 }
0x3b62   : > { %14590 = vrsqrt.f32 %v10129_v57 }
0x3b6c   : > { %v14591_v0 = vpop.eup %14590 }
0x3b6d   : > { %v10131_v1 = vmul.f32 %v14591_v0, %v10123_v29 }
0x3b6f   : > { %v10138_v26 = vmul.f32 %v10973_v21, %v10131_v1 }
0x3b71   : > { %v10145_v60 = vadd.f32 %v10974_v47, %v10138_v26 }
0x3b73   : > { %v10163_v48 = vrot.slane %v10145_v60, 1 }
0x3b75   : > { %12597 = vmatmul.mubr.f32.vlgmr.msra.gmra.mrb[138].mxu1 %v10163_v48 }
0x3c48   : > { %v10231_v32 = vpop.f32.mrb[138].mxu1 }
0x3c49   : > { %10235 = vst [vmem:[%s1544_s26] sm:$0x1] %v10231_v32  ;;  %v12598_v44 = vpop.f32.mrb[139].mxu1 }
0x3c4a   : > { %15109 = shalt.err (!%p15106_p0)
}
0x3c4b   : > { %s15110_s4 = scalar_lea.hbm %s17661_s5, 16  ;;  %s15114_s6 = scalar_lea.hbm %s15499_s21, 32 }
0x3c4c   : > { %p15111_p5 = scmp.ne.s32.totalorder %s17661_s5, %s15110_s4  ;;  %p15115_p13 = scmp.lt.u32.totalorder %s17661_s5, %s15499_s21 }
0x3c4d   : > { %p15116_p12 = scmp.lt.u32.totalorder %s15114_s6, %s15110_s4  ;;  %p15118_p2 = scmp.lt.u32.totalorder %s15110_s4, %s17661_s5 }
0x3c4e   : > { %p15112_p9 = pnand %p15111_p5, %p17884_p3 }
0x3c4f   : > { %p15117_p1 = por %p15116_p12, %p15115_p13 }
0x3c50   : > { %p15113_p10 = pneg %p15112_p9 }
0x3c51   : > { %p15119_p4 = por %p15118_p2, %p15117_p1 }
0x3c53   : > { %p15120_p7 = pnand %p15119_p4, %p15113_p10 }
0x3c55   : > { %15123 = shalt.err (!%p15120_p7)
}
0x3c56   : > { %13851 = dma.vmem_to_hbm [thread:$0]  (%p17884_p3), %s17658_s3, 16, %s17661_s5, %s10237_s1  }
0x3c57 PF: > { %s17885_s7 = sld [smem:[#allocation78_spill]]  ;;  %s17886_s2 = sld [smem:[#allocation76_spill]] }
0x3c58   : > { %s17887_s0 = sld [smem:[#allocation82_spill]] }
0x3c5d   : > { %p13948_p8 = scmp.ge.s32.totalorder %s17885_s7, 2  ;;  %s10261_s26 = sand.u32 1, %s17886_s2  }
0x3c5e   : > { %p17888_p11 = scmp.ne.s32.totalorder %s17887_s0, 0  ;;  %s10262_s28 = scalar_lea.sflag [#allocation5], %s10261_s26 }
0x3c60   : > { %p13909_p6 = pnand %p13948_p8, %p17888_p11 }
0x3c62   : > { %15181 = dma.done.wait (!%p13909_p6), %s10262_s28, 16  }
0x3c63   : > { %15183 = vsyncadd (!%p13909_p6), %s10262_s28, 4294967280  ;;  %s17889_s0 = sld [smem:[#allocation79_spill]]  ;;  %s17890_s4 = sld [smem:[#allocation77_spill]] }
0x3c64   : > { %s17891_s26 = sld [smem:[#allocation80_spill]]  ;;  %s17892_s22 = smov %s15190_s23 }
0x3c69   : > { %p107_p0 = scmp.ge.s32.totalorder %s17889_s0, 4   ;;  %s17893_s23 = smov %s17890_s4 }
0x3c6b   :  { %109 = sbr.rel (!%p107_p0) target bundleno = 93 (0x5d), region = 367 }
0x3c72   :  { %10266 = vsyncpa [#allocation4], 1 }
0x3c73   :  { %10268 = vsyncpa [#allocation4 + $0x1], 1 }
0x3c74   :  { %10269 = vsyncpa [#allocation7], 1 }
0x3c75   :  { %10270 = vsyncpa [#allocation10], 1 }
0x3c76   :  { %10271 = vsyncpa [#allocation13], 1 }
0x3c77   :  { %10272 = vsyncpa [#allocation16], 1 }
0x3c78   :  { %10273 = vsyncpa [#allocation19], 1 }
0x3c79   :  { %10274 = vsyncpa [#allocation22], 1 }
0x3c7a   :  { %10275 = vsyncpa [#allocation25], 1 }
0x3c7b   :  { %10276 = vsyncpa [#allocation28], 1 }
0x3c7c   :  { %10277 = vsyncpa [#allocation31], 1 }
0x3c7d   :  { %10278 = vsyncpa [#allocation5], 1 }
0x3c7e   :  { %10280 = vsyncpa [#allocation5 + $0x1], 1 }

</bundles_post_ra>
